<compile_context>
chip_gen: v7x
topology: tpu7x:2x2x1
jax: 0.10.0
libtpu: 0.0.40
codegen_flags: <defaults>
</compile_context>

<pallas_src>
from functools import partial

import jax
import jax.numpy as jnp
from jax.experimental import pallas as pl
from jax.experimental.pallas import tpu as pltpu

SOS_token = 1

_VMEM = pl.BlockSpec(memory_space=pltpu.MemorySpace.VMEM)


# ------------------------------ shared GRU step ------------------------------
def _gru_step(x, h, wih, whh, bih, bhh, H):
    """One PyTorch-semantics GRU cell step with packed (Din, 3H) gate weights."""
    gi = jnp.dot(x, wih, preferred_element_type=jnp.float32) + bih   # (1, 3H)
    gh = jnp.dot(h, whh, preferred_element_type=jnp.float32) + bhh   # (1, 3H)
    r = jax.nn.sigmoid(gi[:, 0:H] + gh[:, 0:H])
    z = jax.nn.sigmoid(gi[:, H:2 * H] + gh[:, H:2 * H])
    n = jnp.tanh(gi[:, 2 * H:3 * H] + r * gh[:, 2 * H:3 * H])
    return (1.0 - z) * n + z * h                                     # PyTorch GRU update


# -------------------------- fused bidirectional encoder ----------------------
def _encoder_kernel(emb_ref, wihf_ref, whhf_ref, bihf_ref, bhhf_ref,
                    wihb_ref, whhb_ref, bihb_ref, bhhb_ref,
                    out_ref, hf_ref, bwd_buf):
    T, H = out_ref.shape
    wihf = wihf_ref[...]; whhf = whhf_ref[...]
    bihf = bihf_ref[...]; bhhf = bhhf_ref[...]
    wihb = wihb_ref[...]; whhb = whhb_ref[...]
    bihb = bihb_ref[...]; bhhb = bhhb_ref[...]

    def body(t, carry):
        h_f, h_b = carry
        tb = T - 1 - t
        x_f = emb_ref[pl.ds(t, 1), :]                 # (1, H)
        x_b = emb_ref[pl.ds(tb, 1), :]                # (1, H)
        h_f = _gru_step(x_f, h_f, wihf, whhf, bihf, bhhf, H)
        h_b = _gru_step(x_b, h_b, wihb, whhb, bihb, bhhb, H)
        out_ref[pl.ds(t, 1), :] = h_f                 # forward outputs, row t
        bwd_buf[pl.ds(tb, 1), :] = h_b                # backward outputs, row T-1-t
        return (h_f, h_b)

    h0 = jnp.zeros((1, H), jnp.float32)
    h_f, _ = jax.lax.fori_loop(0, T, body, (h0, h0), unroll=True)
    out_ref[...] = out_ref[...] + bwd_buf[...]        # tutorial sums the two directions
    hf_ref[...] = h_f                                 # forward final hidden (decoder init)


def run_encoder(emb_seq, p):
    T, H = emb_seq.shape
    return pl.pallas_call(
        _encoder_kernel,
        out_shape=(jax.ShapeDtypeStruct((T, H), jnp.float32),
                   jax.ShapeDtypeStruct((1, H), jnp.float32)),
        in_specs=[_VMEM] * 9,
        out_specs=(_VMEM, _VMEM),
        scratch_shapes=[pltpu.VMEM((T, H), jnp.float32)],
    )(emb_seq,
      p['enc_wih_f'], p['enc_whh_f'], p['enc_bih_f'], p['enc_bhh_f'],
      p['enc_wih_b'], p['enc_whh_b'], p['enc_bih_b'], p['enc_bhh_b'])


# ----------------------- fused greedy-decode loop kernel ----------------------
def _decoder_kernel(emb_ref, enc_ref, h0_ref,
                    wih_ref, whh_ref, bih_ref, bhh_ref,
                    wc_ref, bc_ref, wo_ref, bo_ref,
                    tok_ref, score_ref):
    H = h0_ref.shape[1]
    V = wo_ref.shape[1]
    L = tok_ref.shape[1]

    emb_tab = emb_ref[...]                            # (V, H) embedding table, VMEM-resident
    enc = enc_ref[...]                                # (T, H) encoder outputs
    wih = wih_ref[...]; whh = whh_ref[...]
    bih = bih_ref[...]; bhh = bhh_ref[...]
    wc_rnn = wc_ref[0]; wc_ctx = wc_ref[1]; bc = bc_ref[...]
    wo = wo_ref[...]; bo = bo_ref[...]

    lane_l = jax.lax.broadcasted_iota(jnp.int32, (1, L), 1)
    lane_v = jax.lax.broadcasted_iota(jnp.int32, (1, V), 1)

    def body(step, carry):
        x, h, toks, scores = carry
        # decoder GRU cell
        h = _gru_step(x, h, wih, whh, bih, bhh, H)
        # Luong 'dot' attention: energies = h @ enc^T on the MXU -> softmax over T
        energies = jax.lax.dot_general(h, enc, (((1,), (1,)), ((), ())),
                                       preferred_element_type=jnp.float32)     # (1, T)
        e = jnp.exp(energies - jnp.max(energies, axis=1, keepdims=True))
        attn = e / jnp.sum(e, axis=1, keepdims=True)                            # (1, T)
        context = jnp.dot(attn, enc, preferred_element_type=jnp.float32)        # (1, H)
        # concat Linear(2H -> H) split into two H x H blocks, then tanh
        concat_out = jnp.tanh(
            jnp.dot(h, wc_rnn, preferred_element_type=jnp.float32)
            + jnp.dot(context, wc_ctx, preferred_element_type=jnp.float32) + bc)
        # output Linear(H -> V)
        logits = jnp.dot(concat_out, wo, preferred_element_type=jnp.float32) + bo  # (1, V)
        # greedy: argmax(softmax(logits)) == argmax(logits) (first-max tie-break like torch.max),
        # and the max probability is 1 / sum(exp(logits - max)).
        lmax = jnp.max(logits, axis=1, keepdims=True)                            # (1, 1)
        sum_ez = jnp.sum(jnp.exp(logits - lmax), axis=1, keepdims=True)          # (1, 1)
        score = pl.reciprocal(sum_ez, approx=True)                               # (1, 1)
        tok = jnp.min(jnp.where(logits >= lmax, lane_v, V),
                      axis=1, keepdims=True)                                     # (1, 1) int32
        toks = jnp.where(lane_l == step, tok, toks)
        scores = jnp.where(lane_l == step, score, scores)
        # next-step input embedding via one-hot @ table (feedback stays on-chip / MXU)
        onehot = (lane_v == tok).astype(jnp.float32)                             # (1, V)
        x_next = jnp.dot(onehot, emb_tab, preferred_element_type=jnp.float32)    # (1, H)
        return (x_next, h, toks, scores)

    x0 = emb_tab[SOS_token:SOS_token + 1, :]          # embedding of SOS
    h0 = h0_ref[...]
    toks0 = jnp.zeros((1, L), jnp.int32)
    scores0 = jnp.zeros((1, L), jnp.float32)
    _, _, toks, scores = jax.lax.fori_loop(0, L, body, (x0, h0, toks0, scores0),
                                           unroll=True)
    tok_ref[...] = toks                               # single lane-slab store
    score_ref[...] = scores


def run_greedy_decoder(enc_outputs, h0, p, max_length):
    toks, scores = pl.pallas_call(
        _decoder_kernel,
        out_shape=(jax.ShapeDtypeStruct((1, max_length), jnp.int32),
                   jax.ShapeDtypeStruct((1, max_length), jnp.float32)),
        in_specs=[_VMEM] * 11,
        out_specs=(_VMEM, _VMEM),
    )(p['embedding'], enc_outputs, h0,
      p['dec_wih'], p['dec_whh'], p['dec_bih'], p['dec_bhh'],
      p['wc_t'], p['bc'], p['wo_t'], p['bo'])
    return toks[0], scores[0]


# --------------------------------- model glue ---------------------------------
@partial(jax.jit, static_argnums=(2,))
def greedy_decode(input_seq, input_length, max_length, p):
    # input_seq: (T, 1) int32; input_length: (1,) int32
    del input_length  # TODO(synk): pack_padded_sequence is a no-op for a full-length batch-1 seq
    emb_seq = jnp.take(p['embedding'], input_seq[:, 0], axis=0)       # (T, H) static gather
    enc_outputs, h_f = run_encoder(emb_seq, p)
    # encoder_hidden[:decoder.n_layers] with n_layers=1 -> forward-direction final hidden
    return run_greedy_decoder(enc_outputs, h_f, p, max_length)


def init_params(key, vocab, hidden):
    ks = jax.random.split(key, 17)
    s = 1.0 / float(hidden) ** 0.5

    def u(k, shape):
        return jax.random.uniform(k, shape, jnp.float32, -s, s)

    return dict(
        embedding=jax.random.normal(ks[0], (vocab, hidden), jnp.float32),
        # encoder bidirectional GRU, gate weights packed (in, 3H) in r|z|n order
        enc_wih_f=u(ks[1], (hidden, 3 * hidden)), enc_whh_f=u(ks[2], (hidden, 3 * hidden)),
        enc_bih_f=u(ks[3], (1, 3 * hidden)),      enc_bhh_f=u(ks[4], (1, 3 * hidden)),
        enc_wih_b=u(ks[5], (hidden, 3 * hidden)), enc_whh_b=u(ks[6], (hidden, 3 * hidden)),
        enc_bih_b=u(ks[7], (1, 3 * hidden)),      enc_bhh_b=u(ks[8], (1, 3 * hidden)),
        # decoder GRU
        dec_wih=u(ks[9], (hidden, 3 * hidden)),   dec_whh=u(ks[10], (hidden, 3 * hidden)),
        dec_bih=u(ks[11], (1, 3 * hidden)),       dec_bhh=u(ks[12], (1, 3 * hidden)),
        # concat Linear(2H -> H) split & pre-transposed, out Linear(H -> V) pre-transposed
        wc_t=u(ks[13], (2, hidden, hidden)),      bc=u(ks[14], (1, hidden)),
        wo_t=u(ks[15], (hidden, vocab)),          bo=u(ks[16], (1, vocab)),
    )


if __name__ == "__main__":
    key = jax.random.PRNGKey(0)
    VOCAB, HIDDEN, SEQ, MAX_LENGTH = 48, 32, 8, 10
    pkey, dkey = jax.random.split(key)
    params = init_params(pkey, VOCAB, HIDDEN)
    input_seq = jax.random.randint(dkey, (SEQ, 1), 2, VOCAB, dtype=jnp.int32)  # (T, B=1)
    input_length = jnp.array([SEQ], dtype=jnp.int32)

    all_tokens, all_scores = greedy_decode(input_seq, input_length, MAX_LENGTH, params)
    jax.block_until_ready((all_tokens, all_scores))

    assert all_tokens.shape == (MAX_LENGTH,) and all_tokens.dtype == jnp.int32
    assert all_scores.shape == (MAX_LENGTH,) and all_scores.dtype == jnp.float32
    print("KERNEL_OK")
</pallas_src>

<mosaic_0001>
module attributes {stable_mosaic.version = 11 : i64} {
  func.func @_encoder_kernel(%arg0: memref<8x32xf32, #tpu.memory_space<vmem>>, %arg1: memref<32x96xf32, #tpu.memory_space<vmem>>, %arg2: memref<32x96xf32, #tpu.memory_space<vmem>>, %arg3: memref<1x96xf32, #tpu.memory_space<vmem>>, %arg4: memref<1x96xf32, #tpu.memory_space<vmem>>, %arg5: memref<32x96xf32, #tpu.memory_space<vmem>>, %arg6: memref<32x96xf32, #tpu.memory_space<vmem>>, %arg7: memref<1x96xf32, #tpu.memory_space<vmem>>, %arg8: memref<1x96xf32, #tpu.memory_space<vmem>>, %arg9: memref<8x32xf32, #tpu.memory_space<vmem>>, %arg10: memref<1x32xf32, #tpu.memory_space<vmem>>, %arg11: memref<8x32xf32, #tpu.memory_space<vmem>>) attributes {dimension_semantics = [], scalar_prefetch = 0 : i64, scratch_operands = 1 : i64, tpu.core_type = #tpu.core_type<tc>} {
    %c0 = arith.constant 0 : index
    %c0_0 = arith.constant 0 : index
    %0 = vector.load %arg1[%c0, %c0_0] : memref<32x96xf32, #tpu.memory_space<vmem>>, vector<32x96xf32>
    %c0_1 = arith.constant 0 : index
    %c0_2 = arith.constant 0 : index
    %1 = vector.load %arg2[%c0_1, %c0_2] : memref<32x96xf32, #tpu.memory_space<vmem>>, vector<32x96xf32>
    %c0_3 = arith.constant 0 : index
    %c0_4 = arith.constant 0 : index
    %2 = vector.load %arg3[%c0_3, %c0_4] : memref<1x96xf32, #tpu.memory_space<vmem>>, vector<1x96xf32>
    %c0_5 = arith.constant 0 : index
    %c0_6 = arith.constant 0 : index
    %3 = vector.load %arg4[%c0_5, %c0_6] : memref<1x96xf32, #tpu.memory_space<vmem>>, vector<1x96xf32>
    %c0_7 = arith.constant 0 : index
    %c0_8 = arith.constant 0 : index
    %4 = vector.load %arg5[%c0_7, %c0_8] : memref<32x96xf32, #tpu.memory_space<vmem>>, vector<32x96xf32>
    %c0_9 = arith.constant 0 : index
    %c0_10 = arith.constant 0 : index
    %5 = vector.load %arg6[%c0_9, %c0_10] : memref<32x96xf32, #tpu.memory_space<vmem>>, vector<32x96xf32>
    %c0_11 = arith.constant 0 : index
    %c0_12 = arith.constant 0 : index
    %6 = vector.load %arg7[%c0_11, %c0_12] : memref<1x96xf32, #tpu.memory_space<vmem>>, vector<1x96xf32>
    %c0_13 = arith.constant 0 : index
    %c0_14 = arith.constant 0 : index
    %7 = vector.load %arg8[%c0_13, %c0_14] : memref<1x96xf32, #tpu.memory_space<vmem>>, vector<1x96xf32>
    %cst = arith.constant 0.000000e+00 : f32
    %8 = vector.broadcast %cst : f32 to vector<1x32xf32>
    %c0_i32 = arith.constant 0 : i32
    %c7_i32 = arith.constant 7 : i32
    %9 = arith.subi %c7_i32, %c0_i32 : i32
    %10 = arith.index_cast %c0_i32 : i32 to index
    %c0_15 = arith.constant 0 : index
    %11 = vector.load %arg0[%10, %c0_15] : memref<8x32xf32, #tpu.memory_space<vmem>>, vector<1x32xf32>
    %12 = arith.index_cast %9 : i32 to index
    %c0_16 = arith.constant 0 : index
    %13 = vector.load %arg0[%12, %c0_16] : memref<8x32xf32, #tpu.memory_space<vmem>>, vector<1x32xf32>
    %cst_17 = arith.constant dense<0.000000e+00> : vector<1x96xf32>
    %14 = tpu.matmul %11, %0, %cst_17 {dimension_numbers = #tpu.dot_dimension_numbers<[1], [0], [0], [1], [0, 0, 1, 1], [], []>} : vector<1x32xf32>, vector<32x96xf32>, vector<1x96xf32> -> vector<1x96xf32>
    %15 = arith.addf %14, %2 : vector<1x96xf32>
    %cst_18 = arith.constant dense<0.000000e+00> : vector<1x96xf32>
    %16 = tpu.matmul %8, %1, %cst_18 {dimension_numbers = #tpu.dot_dimension_numbers<[1], [0], [0], [1], [0, 0, 1, 1], [], []>} : vector<1x32xf32>, vector<32x96xf32>, vector<1x96xf32> -> vector<1x96xf32>
    %17 = arith.addf %16, %3 : vector<1x96xf32>
    %18 = vector.extract_strided_slice %15 {offsets = [0, 0], sizes = [1, 32], strides = [1, 1]} : vector<1x96xf32> to vector<1x32xf32>
    %19 = vector.extract_strided_slice %17 {offsets = [0, 0], sizes = [1, 32], strides = [1, 1]} : vector<1x96xf32> to vector<1x32xf32>
    %20 = arith.addf %18, %19 : vector<1x32xf32>
    %21 = arith.negf %20 : vector<1x32xf32>
    %22 = math.exp %21 : vector<1x32xf32>
    %cst_19 = arith.constant 1.000000e+00 : f32
    %23 = vector.broadcast %cst_19 : f32 to vector<1x32xf32>
    %24 = arith.addf %23, %22 : vector<1x32xf32>
    %25 = arith.divf %23, %24 : vector<1x32xf32>
    %26 = vector.extract_strided_slice %15 {offsets = [0, 32], sizes = [1, 32], strides = [1, 1]} : vector<1x96xf32> to vector<1x32xf32>
    %27 = vector.extract_strided_slice %17 {offsets = [0, 32], sizes = [1, 32], strides = [1, 1]} : vector<1x96xf32> to vector<1x32xf32>
    %28 = arith.addf %26, %27 : vector<1x32xf32>
    %29 = arith.negf %28 : vector<1x32xf32>
    %30 = math.exp %29 : vector<1x32xf32>
    %cst_20 = arith.constant 1.000000e+00 : f32
    %31 = vector.broadcast %cst_20 : f32 to vector<1x32xf32>
    %32 = arith.addf %31, %30 : vector<1x32xf32>
    %33 = arith.divf %31, %32 : vector<1x32xf32>
    %34 = vector.extract_strided_slice %15 {offsets = [0, 64], sizes = [1, 32], strides = [1, 1]} : vector<1x96xf32> to vector<1x32xf32>
    %35 = vector.extract_strided_slice %17 {offsets = [0, 64], sizes = [1, 32], strides = [1, 1]} : vector<1x96xf32> to vector<1x32xf32>
    %36 = arith.mulf %25, %35 : vector<1x32xf32>
    %37 = arith.addf %34, %36 : vector<1x32xf32>
    %38 = math.tanh %37 : vector<1x32xf32>
    %cst_21 = arith.constant 1.000000e+00 : f32
    %39 = vector.broadcast %cst_21 : f32 to vector<1x32xf32>
    %40 = arith.subf %39, %33 : vector<1x32xf32>
    %41 = arith.mulf %40, %38 : vector<1x32xf32>
    %42 = arith.mulf %33, %8 : vector<1x32xf32>
    %43 = arith.addf %41, %42 : vector<1x32xf32>
    %cst_22 = arith.constant dense<0.000000e+00> : vector<1x96xf32>
    %44 = tpu.matmul %13, %4, %cst_22 {dimension_numbers = #tpu.dot_dimension_numbers<[1], [0], [0], [1], [0, 0, 1, 1], [], []>} : vector<1x32xf32>, vector<32x96xf32>, vector<1x96xf32> -> vector<1x96xf32>
    %45 = arith.addf %44, %6 : vector<1x96xf32>
    %cst_23 = arith.constant dense<0.000000e+00> : vector<1x96xf32>
    %46 = tpu.matmul %8, %5, %cst_23 {dimension_numbers = #tpu.dot_dimension_numbers<[1], [0], [0], [1], [0, 0, 1, 1], [], []>} : vector<1x32xf32>, vector<32x96xf32>, vector<1x96xf32> -> vector<1x96xf32>
    %47 = arith.addf %46, %7 : vector<1x96xf32>
    %48 = vector.extract_strided_slice %45 {offsets = [0, 0], sizes = [1, 32], strides = [1, 1]} : vector<1x96xf32> to vector<1x32xf32>
    %49 = vector.extract_strided_slice %47 {offsets = [0, 0], sizes = [1, 32], strides = [1, 1]} : vector<1x96xf32> to vector<1x32xf32>
    %50 = arith.addf %48, %49 : vector<1x32xf32>
    %51 = arith.negf %50 : vector<1x32xf32>
    %52 = math.exp %51 : vector<1x32xf32>
    %cst_24 = arith.constant 1.000000e+00 : f32
    %53 = vector.broadcast %cst_24 : f32 to vector<1x32xf32>
    %54 = arith.addf %53, %52 : vector<1x32xf32>
    %55 = arith.divf %53, %54 : vector<1x32xf32>
    %56 = vector.extract_strided_slice %45 {offsets = [0, 32], sizes = [1, 32], strides = [1, 1]} : vector<1x96xf32> to vector<1x32xf32>
    %57 = vector.extract_strided_slice %47 {offsets = [0, 32], sizes = [1, 32], strides = [1, 1]} : vector<1x96xf32> to vector<1x32xf32>
    %58 = arith.addf %56, %57 : vector<1x32xf32>
    %59 = arith.negf %58 : vector<1x32xf32>
    %60 = math.exp %59 : vector<1x32xf32>
    %cst_25 = arith.constant 1.000000e+00 : f32
    %61 = vector.broadcast %cst_25 : f32 to vector<1x32xf32>
    %62 = arith.addf %61, %60 : vector<1x32xf32>
    %63 = arith.divf %61, %62 : vector<1x32xf32>
    %64 = vector.extract_strided_slice %45 {offsets = [0, 64], sizes = [1, 32], strides = [1, 1]} : vector<1x96xf32> to vector<1x32xf32>
    %65 = vector.extract_strided_slice %47 {offsets = [0, 64], sizes = [1, 32], strides = [1, 1]} : vector<1x96xf32> to vector<1x32xf32>
    %66 = arith.mulf %55, %65 : vector<1x32xf32>
    %67 = arith.addf %64, %66 : vector<1x32xf32>
    %68 = math.tanh %67 : vector<1x32xf32>
    %cst_26 = arith.constant 1.000000e+00 : f32
    %69 = vector.broadcast %cst_26 : f32 to vector<1x32xf32>
    %70 = arith.subf %69, %63 : vector<1x32xf32>
    %71 = arith.mulf %70, %68 : vector<1x32xf32>
    %72 = arith.mulf %63, %8 : vector<1x32xf32>
    %73 = arith.addf %71, %72 : vector<1x32xf32>
    %74 = arith.index_cast %c0_i32 : i32 to index
    %c0_27 = arith.constant 0 : index
    %75 = vector.load %arg9[%74, %c0_27] : memref<8x32xf32, #tpu.memory_space<vmem>>, vector<1x32xf32>
    tpu.vector_store %arg9[%74, %c0_27], %43 {strides = array<i32>} : memref<8x32xf32, #tpu.memory_space<vmem>>, vector<1x32xf32>,
    %76 = arith.index_cast %9 : i32 to index
    %c0_28 = arith.constant 0 : index
    %77 = vector.load %arg11[%76, %c0_28] : memref<8x32xf32, #tpu.memory_space<vmem>>, vector<1x32xf32>
    tpu.vector_store %arg11[%76, %c0_28], %73 {strides = array<i32>} : memref<8x32xf32, #tpu.memory_space<vmem>>, vector<1x32xf32>,
    %c1_i32 = arith.constant 1 : i32
    %c7_i32_29 = arith.constant 7 : i32
    %78 = arith.subi %c7_i32_29, %c1_i32 : i32
    %79 = arith.index_cast %c1_i32 : i32 to index
    %c0_30 = arith.constant 0 : index
    %80 = vector.load %arg0[%79, %c0_30] : memref<8x32xf32, #tpu.memory_space<vmem>>, vector<1x32xf32>
    %81 = arith.index_cast %78 : i32 to index
    %c0_31 = arith.constant 0 : index
    %82 = vector.load %arg0[%81, %c0_31] : memref<8x32xf32, #tpu.memory_space<vmem>>, vector<1x32xf32>
    %cst_32 = arith.constant dense<0.000000e+00> : vector<1x96xf32>
    %83 = tpu.matmul %80, %0, %cst_32 {dimension_numbers = #tpu.dot_dimension_numbers<[1], [0], [0], [1], [0, 0, 1, 1], [], []>} : vector<1x32xf32>, vector<32x96xf32>, vector<1x96xf32> -> vector<1x96xf32>
    %84 = arith.addf %83, %2 : vector<1x96xf32>
    %cst_33 = arith.constant dense<0.000000e+00> : vector<1x96xf32>
    %85 = tpu.matmul %43, %1, %cst_33 {dimension_numbers = #tpu.dot_dimension_numbers<[1], [0], [0], [1], [0, 0, 1, 1], [], []>} : vector<1x32xf32>, vector<32x96xf32>, vector<1x96xf32> -> vector<1x96xf32>
    %86 = arith.addf %85, %3 : vector<1x96xf32>
    %87 = vector.extract_strided_slice %84 {offsets = [0, 0], sizes = [1, 32], strides = [1, 1]} : vector<1x96xf32> to vector<1x32xf32>
    %88 = vector.extract_strided_slice %86 {offsets = [0, 0], sizes = [1, 32], strides = [1, 1]} : vector<1x96xf32> to vector<1x32xf32>
    %89 = arith.addf %87, %88 : vector<1x32xf32>
    %90 = arith.negf %89 : vector<1x32xf32>
    %91 = math.exp %90 : vector<1x32xf32>
    %cst_34 = arith.constant 1.000000e+00 : f32
    %92 = vector.broadcast %cst_34 : f32 to vector<1x32xf32>
    %93 = arith.addf %92, %91 : vector<1x32xf32>
    %94 = arith.divf %92, %93 : vector<1x32xf32>
    %95 = vector.extract_strided_slice %84 {offsets = [0, 32], sizes = [1, 32], strides = [1, 1]} : vector<1x96xf32> to vector<1x32xf32>
    %96 = vector.extract_strided_slice %86 {offsets = [0, 32], sizes = [1, 32], strides = [1, 1]} : vector<1x96xf32> to vector<1x32xf32>
    %97 = arith.addf %95, %96 : vector<1x32xf32>
    %98 = arith.negf %97 : vector<1x32xf32>
    %99 = math.exp %98 : vector<1x32xf32>
    %cst_35 = arith.constant 1.000000e+00 : f32
    %100 = vector.broadcast %cst_35 : f32 to vector<1x32xf32>
    %101 = arith.addf %100, %99 : vector<1x32xf32>
    %102 = arith.divf %100, %101 : vector<1x32xf32>
    %103 = vector.extract_strided_slice %84 {offsets = [0, 64], sizes = [1, 32], strides = [1, 1]} : vector<1x96xf32> to vector<1x32xf32>
    %104 = vector.extract_strided_slice %86 {offsets = [0, 64], sizes = [1, 32], strides = [1, 1]} : vector<1x96xf32> to vector<1x32xf32>
    %105 = arith.mulf %94, %104 : vector<1x32xf32>
    %106 = arith.addf %103, %105 : vector<1x32xf32>
    %107 = math.tanh %106 : vector<1x32xf32>
    %cst_36 = arith.constant 1.000000e+00 : f32
    %108 = vector.broadcast %cst_36 : f32 to vector<1x32xf32>
    %109 = arith.subf %108, %102 : vector<1x32xf32>
    %110 = arith.mulf %109, %107 : vector<1x32xf32>
    %111 = arith.mulf %102, %43 : vector<1x32xf32>
    %112 = arith.addf %110, %111 : vector<1x32xf32>
    %cst_37 = arith.constant dense<0.000000e+00> : vector<1x96xf32>
    %113 = tpu.matmul %82, %4, %cst_37 {dimension_numbers = #tpu.dot_dimension_numbers<[1], [0], [0], [1], [0, 0, 1, 1], [], []>} : vector<1x32xf32>, vector<32x96xf32>, vector<1x96xf32> -> vector<1x96xf32>
    %114 = arith.addf %113, %6 : vector<1x96xf32>
    %cst_38 = arith.constant dense<0.000000e+00> : vector<1x96xf32>
    %115 = tpu.matmul %73, %5, %cst_38 {dimension_numbers = #tpu.dot_dimension_numbers<[1], [0], [0], [1], [0, 0, 1, 1], [], []>} : vector<1x32xf32>, vector<32x96xf32>, vector<1x96xf32> -> vector<1x96xf32>
    %116 = arith.addf %115, %7 : vector<1x96xf32>
    %117 = vector.extract_strided_slice %114 {offsets = [0, 0], sizes = [1, 32], strides = [1, 1]} : vector<1x96xf32> to vector<1x32xf32>
    %118 = vector.extract_strided_slice %116 {offsets = [0, 0], sizes = [1, 32], strides = [1, 1]} : vector<1x96xf32> to vector<1x32xf32>
    %119 = arith.addf %117, %118 : vector<1x32xf32>
    %120 = arith.negf %119 : vector<1x32xf32>
    %121 = math.exp %120 : vector<1x32xf32>
    %cst_39 = arith.constant 1.000000e+00 : f32
    %122 = vector.broadcast %cst_39 : f32 to vector<1x32xf32>
    %123 = arith.addf %122, %121 : vector<1x32xf32>
    %124 = arith.divf %122, %123 : vector<1x32xf32>
    %125 = vector.extract_strided_slice %114 {offsets = [0, 32], sizes = [1, 32], strides = [1, 1]} : vector<1x96xf32> to vector<1x32xf32>
    %126 = vector.extract_strided_slice %116 {offsets = [0, 32], sizes = [1, 32], strides = [1, 1]} : vector<1x96xf32> to vector<1x32xf32>
    %127 = arith.addf %125, %126 : vector<1x32xf32>
    %128 = arith.negf %127 : vector<1x32xf32>
    %129 = math.exp %128 : vector<1x32xf32>
    %cst_40 = arith.constant 1.000000e+00 : f32
    %130 = vector.broadcast %cst_40 : f32 to vector<1x32xf32>
    %131 = arith.addf %130, %129 : vector<1x32xf32>
    %132 = arith.divf %130, %131 : vector<1x32xf32>
    %133 = vector.extract_strided_slice %114 {offsets = [0, 64], sizes = [1, 32], strides = [1, 1]} : vector<1x96xf32> to vector<1x32xf32>
    %134 = vector.extract_strided_slice %116 {offsets = [0, 64], sizes = [1, 32], strides = [1, 1]} : vector<1x96xf32> to vector<1x32xf32>
    %135 = arith.mulf %124, %134 : vector<1x32xf32>
    %136 = arith.addf %133, %135 : vector<1x32xf32>
    %137 = math.tanh %136 : vector<1x32xf32>
    %cst_41 = arith.constant 1.000000e+00 : f32
    %138 = vector.broadcast %cst_41 : f32 to vector<1x32xf32>
    %139 = arith.subf %138, %132 : vector<1x32xf32>
    %140 = arith.mulf %139, %137 : vector<1x32xf32>
    %141 = arith.mulf %132, %73 : vector<1x32xf32>
    %142 = arith.addf %140, %141 : vector<1x32xf32>
    %143 = arith.index_cast %c1_i32 : i32 to index
    %c0_42 = arith.constant 0 : index
    %144 = vector.load %arg9[%143, %c0_42] : memref<8x32xf32, #tpu.memory_space<vmem>>, vector<1x32xf32>
    tpu.vector_store %arg9[%143, %c0_42], %112 {strides = array<i32>} : memref<8x32xf32, #tpu.memory_space<vmem>>, vector<1x32xf32>,
    %145 = arith.index_cast %78 : i32 to index
    %c0_43 = arith.constant 0 : index
    %146 = vector.load %arg11[%145, %c0_43] : memref<8x32xf32, #tpu.memory_space<vmem>>, vector<1x32xf32>
    tpu.vector_store %arg11[%145, %c0_43], %142 {strides = array<i32>} : memref<8x32xf32, #tpu.memory_space<vmem>>, vector<1x32xf32>,
    %c2_i32 = arith.constant 2 : i32
    %c7_i32_44 = arith.constant 7 : i32
    %147 = arith.subi %c7_i32_44, %c2_i32 : i32
    %148 = arith.index_cast %c2_i32 : i32 to index
    %c0_45 = arith.constant 0 : index
    %149 = vector.load %arg0[%148, %c0_45] : memref<8x32xf32, #tpu.memory_space<vmem>>, vector<1x32xf32>
    %150 = arith.index_cast %147 : i32 to index
    %c0_46 = arith.constant 0 : index
    %151 = vector.load %arg0[%150, %c0_46] : memref<8x32xf32, #tpu.memory_space<vmem>>, vector<1x32xf32>
    %cst_47 = arith.constant dense<0.000000e+00> : vector<1x96xf32>
    %152 = tpu.matmul %149, %0, %cst_47 {dimension_numbers = #tpu.dot_dimension_numbers<[1], [0], [0], [1], [0, 0, 1, 1], [], []>} : vector<1x32xf32>, vector<32x96xf32>, vector<1x96xf32> -> vector<1x96xf32>
    %153 = arith.addf %152, %2 : vector<1x96xf32>
    %cst_48 = arith.constant dense<0.000000e+00> : vector<1x96xf32>
    %154 = tpu.matmul %112, %1, %cst_48 {dimension_numbers = #tpu.dot_dimension_numbers<[1], [0], [0], [1], [0, 0, 1, 1], [], []>} : vector<1x32xf32>, vector<32x96xf32>, vector<1x96xf32> -> vector<1x96xf32>
    %155 = arith.addf %154, %3 : vector<1x96xf32>
    %156 = vector.extract_strided_slice %153 {offsets = [0, 0], sizes = [1, 32], strides = [1, 1]} : vector<1x96xf32> to vector<1x32xf32>
    %157 = vector.extract_strided_slice %155 {offsets = [0, 0], sizes = [1, 32], strides = [1, 1]} : vector<1x96xf32> to vector<1x32xf32>
    %158 = arith.addf %156, %157 : vector<1x32xf32>
    %159 = arith.negf %158 : vector<1x32xf32>
    %160 = math.exp %159 : vector<1x32xf32>
    %cst_49 = arith.constant 1.000000e+00 : f32
    %161 = vector.broadcast %cst_49 : f32 to vector<1x32xf32>
    %162 = arith.addf %161, %160 : vector<1x32xf32>
    %163 = arith.divf %161, %162 : vector<1x32xf32>
    %164 = vector.extract_strided_slice %153 {offsets = [0, 32], sizes = [1, 32], strides = [1, 1]} : vector<1x96xf32> to vector<1x32xf32>
    %165 = vector.extract_strided_slice %155 {offsets = [0, 32], sizes = [1, 32], strides = [1, 1]} : vector<1x96xf32> to vector<1x32xf32>
    %166 = arith.addf %164, %165 : vector<1x32xf32>
    %167 = arith.negf %166 : vector<1x32xf32>
    %168 = math.exp %167 : vector<1x32xf32>
    %cst_50 = arith.constant 1.000000e+00 : f32
    %169 = vector.broadcast %cst_50 : f32 to vector<1x32xf32>
    %170 = arith.addf %169, %168 : vector<1x32xf32>
    %171 = arith.divf %169, %170 : vector<1x32xf32>
    %172 = vector.extract_strided_slice %153 {offsets = [0, 64], sizes = [1, 32], strides = [1, 1]} : vector<1x96xf32> to vector<1x32xf32>
    %173 = vector.extract_strided_slice %155 {offsets = [0, 64], sizes = [1, 32], strides = [1, 1]} : vector<1x96xf32> to vector<1x32xf32>
    %174 = arith.mulf %163, %173 : vector<1x32xf32>
    %175 = arith.addf %172, %174 : vector<1x32xf32>
    %176 = math.tanh %175 : vector<1x32xf32>
    %cst_51 = arith.constant 1.000000e+00 : f32
    %177 = vector.broadcast %cst_51 : f32 to vector<1x32xf32>
    %178 = arith.subf %177, %171 : vector<1x32xf32>
    %179 = arith.mulf %178, %176 : vector<1x32xf32>
    %180 = arith.mulf %171, %112 : vector<1x32xf32>
    %181 = arith.addf %179, %180 : vector<1x32xf32>
    %cst_52 = arith.constant dense<0.000000e+00> : vector<1x96xf32>
    %182 = tpu.matmul %151, %4, %cst_52 {dimension_numbers = #tpu.dot_dimension_numbers<[1], [0], [0], [1], [0, 0, 1, 1], [], []>} : vector<1x32xf32>, vector<32x96xf32>, vector<1x96xf32> -> vector<1x96xf32>
    %183 = arith.addf %182, %6 : vector<1x96xf32>
    %cst_53 = arith.constant dense<0.000000e+00> : vector<1x96xf32>
    %184 = tpu.matmul %142, %5, %cst_53 {dimension_numbers = #tpu.dot_dimension_numbers<[1], [0], [0], [1], [0, 0, 1, 1], [], []>} : vector<1x32xf32>, vector<32x96xf32>, vector<1x96xf32> -> vector<1x96xf32>
    %185 = arith.addf %184, %7 : vector<1x96xf32>
    %186 = vector.extract_strided_slice %183 {offsets = [0, 0], sizes = [1, 32], strides = [1, 1]} : vector<1x96xf32> to vector<1x32xf32>
    %187 = vector.extract_strided_slice %185 {offsets = [0, 0], sizes = [1, 32], strides = [1, 1]} : vector<1x96xf32> to vector<1x32xf32>
    %188 = arith.addf %186, %187 : vector<1x32xf32>
    %189 = arith.negf %188 : vector<1x32xf32>
    %190 = math.exp %189 : vector<1x32xf32>
    %cst_54 = arith.constant 1.000000e+00 : f32
    %191 = vector.broadcast %cst_54 : f32 to vector<1x32xf32>
    %192 = arith.addf %191, %190 : vector<1x32xf32>
    %193 = arith.divf %191, %192 : vector<1x32xf32>
    %194 = vector.extract_strided_slice %183 {offsets = [0, 32], sizes = [1, 32], strides = [1, 1]} : vector<1x96xf32> to vector<1x32xf32>
    %195 = vector.extract_strided_slice %185 {offsets = [0, 32], sizes = [1, 32], strides = [1, 1]} : vector<1x96xf32> to vector<1x32xf32>
    %196 = arith.addf %194, %195 : vector<1x32xf32>
    %197 = arith.negf %196 : vector<1x32xf32>
    %198 = math.exp %197 : vector<1x32xf32>
    %cst_55 = arith.constant 1.000000e+00 : f32
    %199 = vector.broadcast %cst_55 : f32 to vector<1x32xf32>
    %200 = arith.addf %199, %198 : vector<1x32xf32>
    %201 = arith.divf %199, %200 : vector<1x32xf32>
    %202 = vector.extract_strided_slice %183 {offsets = [0, 64], sizes = [1, 32], strides = [1, 1]} : vector<1x96xf32> to vector<1x32xf32>
    %203 = vector.extract_strided_slice %185 {offsets = [0, 64], sizes = [1, 32], strides = [1, 1]} : vector<1x96xf32> to vector<1x32xf32>
    %204 = arith.mulf %193, %203 : vector<1x32xf32>
    %205 = arith.addf %202, %204 : vector<1x32xf32>
    %206 = math.tanh %205 : vector<1x32xf32>
    %cst_56 = arith.constant 1.000000e+00 : f32
    %207 = vector.broadcast %cst_56 : f32 to vector<1x32xf32>
    %208 = arith.subf %207, %201 : vector<1x32xf32>
    %209 = arith.mulf %208, %206 : vector<1x32xf32>
    %210 = arith.mulf %201, %142 : vector<1x32xf32>
    %211 = arith.addf %209, %210 : vector<1x32xf32>
    %212 = arith.index_cast %c2_i32 : i32 to index
    %c0_57 = arith.constant 0 : index
    %213 = vector.load %arg9[%212, %c0_57] : memref<8x32xf32, #tpu.memory_space<vmem>>, vector<1x32xf32>
    tpu.vector_store %arg9[%212, %c0_57], %181 {strides = array<i32>} : memref<8x32xf32, #tpu.memory_space<vmem>>, vector<1x32xf32>,
    %214 = arith.index_cast %147 : i32 to index
    %c0_58 = arith.constant 0 : index
    %215 = vector.load %arg11[%214, %c0_58] : memref<8x32xf32, #tpu.memory_space<vmem>>, vector<1x32xf32>
    tpu.vector_store %arg11[%214, %c0_58], %211 {strides = array<i32>} : memref<8x32xf32, #tpu.memory_space<vmem>>, vector<1x32xf32>,
    %c3_i32 = arith.constant 3 : i32
    %c7_i32_59 = arith.constant 7 : i32
    %216 = arith.subi %c7_i32_59, %c3_i32 : i32
    %217 = arith.index_cast %c3_i32 : i32 to index
    %c0_60 = arith.constant 0 : index
    %218 = vector.load %arg0[%217, %c0_60] : memref<8x32xf32, #tpu.memory_space<vmem>>, vector<1x32xf32>
    %219 = arith.index_cast %216 : i32 to index
    %c0_61 = arith.constant 0 : index
    %220 = vector.load %arg0[%219, %c0_61] : memref<8x32xf32, #tpu.memory_space<vmem>>, vector<1x32xf32>
    %cst_62 = arith.constant dense<0.000000e+00> : vector<1x96xf32>
    %221 = tpu.matmul %218, %0, %cst_62 {dimension_numbers = #tpu.dot_dimension_numbers<[1], [0], [0], [1], [0, 0, 1, 1], [], []>} : vector<1x32xf32>, vector<32x96xf32>, vector<1x96xf32> -> vector<1x96xf32>
    %222 = arith.addf %221, %2 : vector<1x96xf32>
    %cst_63 = arith.constant dense<0.000000e+00> : vector<1x96xf32>
    %223 = tpu.matmul %181, %1, %cst_63 {dimension_numbers = #tpu.dot_dimension_numbers<[1], [0], [0], [1], [0, 0, 1, 1], [], []>} : vector<1x32xf32>, vector<32x96xf32>, vector<1x96xf32> -> vector<1x96xf32>
    %224 = arith.addf %223, %3 : vector<1x96xf32>
    %225 = vector.extract_strided_slice %222 {offsets = [0, 0], sizes = [1, 32], strides = [1, 1]} : vector<1x96xf32> to vector<1x32xf32>
    %226 = vector.extract_strided_slice %224 {offsets = [0, 0], sizes = [1, 32], strides = [1, 1]} : vector<1x96xf32> to vector<1x32xf32>
    %227 = arith.addf %225, %226 : vector<1x32xf32>
    %228 = arith.negf %227 : vector<1x32xf32>
    %229 = math.exp %228 : vector<1x32xf32>
    %cst_64 = arith.constant 1.000000e+00 : f32
    %230 = vector.broadcast %cst_64 : f32 to vector<1x32xf32>
    %231 = arith.addf %230, %229 : vector<1x32xf32>
    %232 = arith.divf %230, %231 : vector<1x32xf32>
    %233 = vector.extract_strided_slice %222 {offsets = [0, 32], sizes = [1, 32], strides = [1, 1]} : vector<1x96xf32> to vector<1x32xf32>
    %234 = vector.extract_strided_slice %224 {offsets = [0, 32], sizes = [1, 32], strides = [1, 1]} : vector<1x96xf32> to vector<1x32xf32>
    %235 = arith.addf %233, %234 : vector<1x32xf32>
    %236 = arith.negf %235 : vector<1x32xf32>
    %237 = math.exp %236 : vector<1x32xf32>
    %cst_65 = arith.constant 1.000000e+00 : f32
    %238 = vector.broadcast %cst_65 : f32 to vector<1x32xf32>
    %239 = arith.addf %238, %237 : vector<1x32xf32>
    %240 = arith.divf %238, %239 : vector<1x32xf32>
    %241 = vector.extract_strided_slice %222 {offsets = [0, 64], sizes = [1, 32], strides = [1, 1]} : vector<1x96xf32> to vector<1x32xf32>
    %242 = vector.extract_strided_slice %224 {offsets = [0, 64], sizes = [1, 32], strides = [1, 1]} : vector<1x96xf32> to vector<1x32xf32>
    %243 = arith.mulf %232, %242 : vector<1x32xf32>
    %244 = arith.addf %241, %243 : vector<1x32xf32>
    %245 = math.tanh %244 : vector<1x32xf32>
    %cst_66 = arith.constant 1.000000e+00 : f32
    %246 = vector.broadcast %cst_66 : f32 to vector<1x32xf32>
    %247 = arith.subf %246, %240 : vector<1x32xf32>
    %248 = arith.mulf %247, %245 : vector<1x32xf32>
    %249 = arith.mulf %240, %181 : vector<1x32xf32>
    %250 = arith.addf %248, %249 : vector<1x32xf32>
    %cst_67 = arith.constant dense<0.000000e+00> : vector<1x96xf32>
    %251 = tpu.matmul %220, %4, %cst_67 {dimension_numbers = #tpu.dot_dimension_numbers<[1], [0], [0], [1], [0, 0, 1, 1], [], []>} : vector<1x32xf32>, vector<32x96xf32>, vector<1x96xf32> -> vector<1x96xf32>
    %252 = arith.addf %251, %6 : vector<1x96xf32>
    %cst_68 = arith.constant dense<0.000000e+00> : vector<1x96xf32>
    %253 = tpu.matmul %211, %5, %cst_68 {dimension_numbers = #tpu.dot_dimension_numbers<[1], [0], [0], [1], [0, 0, 1, 1], [], []>} : vector<1x32xf32>, vector<32x96xf32>, vector<1x96xf32> -> vector<1x96xf32>
    %254 = arith.addf %253, %7 : vector<1x96xf32>
    %255 = vector.extract_strided_slice %252 {offsets = [0, 0], sizes = [1, 32], strides = [1, 1]} : vector<1x96xf32> to vector<1x32xf32>
    %256 = vector.extract_strided_slice %254 {offsets = [0, 0], sizes = [1, 32], strides = [1, 1]} : vector<1x96xf32> to vector<1x32xf32>
    %257 = arith.addf %255, %256 : vector<1x32xf32>
    %258 = arith.negf %257 : vector<1x32xf32>
    %259 = math.exp %258 : vector<1x32xf32>
    %cst_69 = arith.constant 1.000000e+00 : f32
    %260 = vector.broadcast %cst_69 : f32 to vector<1x32xf32>
    %261 = arith.addf %260, %259 : vector<1x32xf32>
    %262 = arith.divf %260, %261 : vector<1x32xf32>
    %263 = vector.extract_strided_slice %252 {offsets = [0, 32], sizes = [1, 32], strides = [1, 1]} : vector<1x96xf32> to vector<1x32xf32>
    %264 = vector.extract_strided_slice %254 {offsets = [0, 32], sizes = [1, 32], strides = [1, 1]} : vector<1x96xf32> to vector<1x32xf32>
    %265 = arith.addf %263, %264 : vector<1x32xf32>
    %266 = arith.negf %265 : vector<1x32xf32>
    %267 = math.exp %266 : vector<1x32xf32>
    %cst_70 = arith.constant 1.000000e+00 : f32
    %268 = vector.broadcast %cst_70 : f32 to vector<1x32xf32>
    %269 = arith.addf %268, %267 : vector<1x32xf32>
    %270 = arith.divf %268, %269 : vector<1x32xf32>
    %271 = vector.extract_strided_slice %252 {offsets = [0, 64], sizes = [1, 32], strides = [1, 1]} : vector<1x96xf32> to vector<1x32xf32>
    %272 = vector.extract_strided_slice %254 {offsets = [0, 64], sizes = [1, 32], strides = [1, 1]} : vector<1x96xf32> to vector<1x32xf32>
    %273 = arith.mulf %262, %272 : vector<1x32xf32>
    %274 = arith.addf %271, %273 : vector<1x32xf32>
    %275 = math.tanh %274 : vector<1x32xf32>
    %cst_71 = arith.constant 1.000000e+00 : f32
    %276 = vector.broadcast %cst_71 : f32 to vector<1x32xf32>
    %277 = arith.subf %276, %270 : vector<1x32xf32>
    %278 = arith.mulf %277, %275 : vector<1x32xf32>
    %279 = arith.mulf %270, %211 : vector<1x32xf32>
    %280 = arith.addf %278, %279 : vector<1x32xf32>
    %281 = arith.index_cast %c3_i32 : i32 to index
    %c0_72 = arith.constant 0 : index
    %282 = vector.load %arg9[%281, %c0_72] : memref<8x32xf32, #tpu.memory_space<vmem>>, vector<1x32xf32>
    tpu.vector_store %arg9[%281, %c0_72], %250 {strides = array<i32>} : memref<8x32xf32, #tpu.memory_space<vmem>>, vector<1x32xf32>,
    %283 = arith.index_cast %216 : i32 to index
    %c0_73 = arith.constant 0 : index
    %284 = vector.load %arg11[%283, %c0_73] : memref<8x32xf32, #tpu.memory_space<vmem>>, vector<1x32xf32>
    tpu.vector_store %arg11[%283, %c0_73], %280 {strides = array<i32>} : memref<8x32xf32, #tpu.memory_space<vmem>>, vector<1x32xf32>,
    %c4_i32 = arith.constant 4 : i32
    %c7_i32_74 = arith.constant 7 : i32
    %285 = arith.subi %c7_i32_74, %c4_i32 : i32
    %286 = arith.index_cast %c4_i32 : i32 to index
    %c0_75 = arith.constant 0 : index
    %287 = vector.load %arg0[%286, %c0_75] : memref<8x32xf32, #tpu.memory_space<vmem>>, vector<1x32xf32>
    %288 = arith.index_cast %285 : i32 to index
    %c0_76 = arith.constant 0 : index
    %289 = vector.load %arg0[%288, %c0_76] : memref<8x32xf32, #tpu.memory_space<vmem>>, vector<1x32xf32>
    %cst_77 = arith.constant dense<0.000000e+00> : vector<1x96xf32>
    %290 = tpu.matmul %287, %0, %cst_77 {dimension_numbers = #tpu.dot_dimension_numbers<[1], [0], [0], [1], [0, 0, 1, 1], [], []>} : vector<1x32xf32>, vector<32x96xf32>, vector<1x96xf32> -> vector<1x96xf32>
    %291 = arith.addf %290, %2 : vector<1x96xf32>
    %cst_78 = arith.constant dense<0.000000e+00> : vector<1x96xf32>
    %292 = tpu.matmul %250, %1, %cst_78 {dimension_numbers = #tpu.dot_dimension_numbers<[1], [0], [0], [1], [0, 0, 1, 1], [], []>} : vector<1x32xf32>, vector<32x96xf32>, vector<1x96xf32> -> vector<1x96xf32>
    %293 = arith.addf %292, %3 : vector<1x96xf32>
    %294 = vector.extract_strided_slice %291 {offsets = [0, 0], sizes = [1, 32], strides = [1, 1]} : vector<1x96xf32> to vector<1x32xf32>
    %295 = vector.extract_strided_slice %293 {offsets = [0, 0], sizes = [1, 32], strides = [1, 1]} : vector<1x96xf32> to vector<1x32xf32>
    %296 = arith.addf %294, %295 : vector<1x32xf32>
    %297 = arith.negf %296 : vector<1x32xf32>
    %298 = math.exp %297 : vector<1x32xf32>
    %cst_79 = arith.constant 1.000000e+00 : f32
    %299 = vector.broadcast %cst_79 : f32 to vector<1x32xf32>
    %300 = arith.addf %299, %298 : vector<1x32xf32>
    %301 = arith.divf %299, %300 : vector<1x32xf32>
    %302 = vector.extract_strided_slice %291 {offsets = [0, 32], sizes = [1, 32], strides = [1, 1]} : vector<1x96xf32> to vector<1x32xf32>
    %303 = vector.extract_strided_slice %293 {offsets = [0, 32], sizes = [1, 32], strides = [1, 1]} : vector<1x96xf32> to vector<1x32xf32>
    %304 = arith.addf %302, %303 : vector<1x32xf32>
    %305 = arith.negf %304 : vector<1x32xf32>
    %306 = math.exp %305 : vector<1x32xf32>
    %cst_80 = arith.constant 1.000000e+00 : f32
    %307 = vector.broadcast %cst_80 : f32 to vector<1x32xf32>
    %308 = arith.addf %307, %306 : vector<1x32xf32>
    %309 = arith.divf %307, %308 : vector<1x32xf32>
    %310 = vector.extract_strided_slice %291 {offsets = [0, 64], sizes = [1, 32], strides = [1, 1]} : vector<1x96xf32> to vector<1x32xf32>
    %311 = vector.extract_strided_slice %293 {offsets = [0, 64], sizes = [1, 32], strides = [1, 1]} : vector<1x96xf32> to vector<1x32xf32>
    %312 = arith.mulf %301, %311 : vector<1x32xf32>
    %313 = arith.addf %310, %312 : vector<1x32xf32>
    %314 = math.tanh %313 : vector<1x32xf32>
    %cst_81 = arith.constant 1.000000e+00 : f32
    %315 = vector.broadcast %cst_81 : f32 to vector<1x32xf32>
    %316 = arith.subf %315, %309 : vector<1x32xf32>
    %317 = arith.mulf %316, %314 : vector<1x32xf32>
    %318 = arith.mulf %309, %250 : vector<1x32xf32>
    %319 = arith.addf %317, %318 : vector<1x32xf32>
    %cst_82 = arith.constant dense<0.000000e+00> : vector<1x96xf32>
    %320 = tpu.matmul %289, %4, %cst_82 {dimension_numbers = #tpu.dot_dimension_numbers<[1], [0], [0], [1], [0, 0, 1, 1], [], []>} : vector<1x32xf32>, vector<32x96xf32>, vector<1x96xf32> -> vector<1x96xf32>
    %321 = arith.addf %320, %6 : vector<1x96xf32>
    %cst_83 = arith.constant dense<0.000000e+00> : vector<1x96xf32>
    %322 = tpu.matmul %280, %5, %cst_83 {dimension_numbers = #tpu.dot_dimension_numbers<[1], [0], [0], [1], [0, 0, 1, 1], [], []>} : vector<1x32xf32>, vector<32x96xf32>, vector<1x96xf32> -> vector<1x96xf32>
    %323 = arith.addf %322, %7 : vector<1x96xf32>
    %324 = vector.extract_strided_slice %321 {offsets = [0, 0], sizes = [1, 32], strides = [1, 1]} : vector<1x96xf32> to vector<1x32xf32>
    %325 = vector.extract_strided_slice %323 {offsets = [0, 0], sizes = [1, 32], strides = [1, 1]} : vector<1x96xf32> to vector<1x32xf32>
    %326 = arith.addf %324, %325 : vector<1x32xf32>
    %327 = arith.negf %326 : vector<1x32xf32>
    %328 = math.exp %327 : vector<1x32xf32>
    %cst_84 = arith.constant 1.000000e+00 : f32
    %329 = vector.broadcast %cst_84 : f32 to vector<1x32xf32>
    %330 = arith.addf %329, %328 : vector<1x32xf32>
    %331 = arith.divf %329, %330 : vector<1x32xf32>
    %332 = vector.extract_strided_slice %321 {offsets = [0, 32], sizes = [1, 32], strides = [1, 1]} : vector<1x96xf32> to vector<1x32xf32>
    %333 = vector.extract_strided_slice %323 {offsets = [0, 32], sizes = [1, 32], strides = [1, 1]} : vector<1x96xf32> to vector<1x32xf32>
    %334 = arith.addf %332, %333 : vector<1x32xf32>
    %335 = arith.negf %334 : vector<1x32xf32>
    %336 = math.exp %335 : vector<1x32xf32>
    %cst_85 = arith.constant 1.000000e+00 : f32
    %337 = vector.broadcast %cst_85 : f32 to vector<1x32xf32>
    %338 = arith.addf %337, %336 : vector<1x32xf32>
    %339 = arith.divf %337, %338 : vector<1x32xf32>
    %340 = vector.extract_strided_slice %321 {offsets = [0, 64], sizes = [1, 32], strides = [1, 1]} : vector<1x96xf32> to vector<1x32xf32>
    %341 = vector.extract_strided_slice %323 {offsets = [0, 64], sizes = [1, 32], strides = [1, 1]} : vector<1x96xf32> to vector<1x32xf32>
    %342 = arith.mulf %331, %341 : vector<1x32xf32>
    %343 = arith.addf %340, %342 : vector<1x32xf32>
    %344 = math.tanh %343 : vector<1x32xf32>
    %cst_86 = arith.constant 1.000000e+00 : f32
    %345 = vector.broadcast %cst_86 : f32 to vector<1x32xf32>
    %346 = arith.subf %345, %339 : vector<1x32xf32>
    %347 = arith.mulf %346, %344 : vector<1x32xf32>
    %348 = arith.mulf %339, %280 : vector<1x32xf32>
    %349 = arith.addf %347, %348 : vector<1x32xf32>
    %350 = arith.index_cast %c4_i32 : i32 to index
    %c0_87 = arith.constant 0 : index
    %351 = vector.load %arg9[%350, %c0_87] : memref<8x32xf32, #tpu.memory_space<vmem>>, vector<1x32xf32>
    tpu.vector_store %arg9[%350, %c0_87], %319 {strides = array<i32>} : memref<8x32xf32, #tpu.memory_space<vmem>>, vector<1x32xf32>,
    %352 = arith.index_cast %285 : i32 to index
    %c0_88 = arith.constant 0 : index
    %353 = vector.load %arg11[%352, %c0_88] : memref<8x32xf32, #tpu.memory_space<vmem>>, vector<1x32xf32>
    tpu.vector_store %arg11[%352, %c0_88], %349 {strides = array<i32>} : memref<8x32xf32, #tpu.memory_space<vmem>>, vector<1x32xf32>,
    %c5_i32 = arith.constant 5 : i32
    %c7_i32_89 = arith.constant 7 : i32
    %354 = arith.subi %c7_i32_89, %c5_i32 : i32
    %355 = arith.index_cast %c5_i32 : i32 to index
    %c0_90 = arith.constant 0 : index
    %356 = vector.load %arg0[%355, %c0_90] : memref<8x32xf32, #tpu.memory_space<vmem>>, vector<1x32xf32>
    %357 = arith.index_cast %354 : i32 to index
    %c0_91 = arith.constant 0 : index
    %358 = vector.load %arg0[%357, %c0_91] : memref<8x32xf32, #tpu.memory_space<vmem>>, vector<1x32xf32>
    %cst_92 = arith.constant dense<0.000000e+00> : vector<1x96xf32>
    %359 = tpu.matmul %356, %0, %cst_92 {dimension_numbers = #tpu.dot_dimension_numbers<[1], [0], [0], [1], [0, 0, 1, 1], [], []>} : vector<1x32xf32>, vector<32x96xf32>, vector<1x96xf32> -> vector<1x96xf32>
    %360 = arith.addf %359, %2 : vector<1x96xf32>
    %cst_93 = arith.constant dense<0.000000e+00> : vector<1x96xf32>
    %361 = tpu.matmul %319, %1, %cst_93 {dimension_numbers = #tpu.dot_dimension_numbers<[1], [0], [0], [1], [0, 0, 1, 1], [], []>} : vector<1x32xf32>, vector<32x96xf32>, vector<1x96xf32> -> vector<1x96xf32>
    %362 = arith.addf %361, %3 : vector<1x96xf32>
    %363 = vector.extract_strided_slice %360 {offsets = [0, 0], sizes = [1, 32], strides = [1, 1]} : vector<1x96xf32> to vector<1x32xf32>
    %364 = vector.extract_strided_slice %362 {offsets = [0, 0], sizes = [1, 32], strides = [1, 1]} : vector<1x96xf32> to vector<1x32xf32>
    %365 = arith.addf %363, %364 : vector<1x32xf32>
    %366 = arith.negf %365 : vector<1x32xf32>
    %367 = math.exp %366 : vector<1x32xf32>
    %cst_94 = arith.constant 1.000000e+00 : f32
    %368 = vector.broadcast %cst_94 : f32 to vector<1x32xf32>
    %369 = arith.addf %368, %367 : vector<1x32xf32>
    %370 = arith.divf %368, %369 : vector<1x32xf32>
    %371 = vector.extract_strided_slice %360 {offsets = [0, 32], sizes = [1, 32], strides = [1, 1]} : vector<1x96xf32> to vector<1x32xf32>
    %372 = vector.extract_strided_slice %362 {offsets = [0, 32], sizes = [1, 32], strides = [1, 1]} : vector<1x96xf32> to vector<1x32xf32>
    %373 = arith.addf %371, %372 : vector<1x32xf32>
    %374 = arith.negf %373 : vector<1x32xf32>
    %375 = math.exp %374 : vector<1x32xf32>
    %cst_95 = arith.constant 1.000000e+00 : f32
    %376 = vector.broadcast %cst_95 : f32 to vector<1x32xf32>
    %377 = arith.addf %376, %375 : vector<1x32xf32>
    %378 = arith.divf %376, %377 : vector<1x32xf32>
    %379 = vector.extract_strided_slice %360 {offsets = [0, 64], sizes = [1, 32], strides = [1, 1]} : vector<1x96xf32> to vector<1x32xf32>
    %380 = vector.extract_strided_slice %362 {offsets = [0, 64], sizes = [1, 32], strides = [1, 1]} : vector<1x96xf32> to vector<1x32xf32>
    %381 = arith.mulf %370, %380 : vector<1x32xf32>
    %382 = arith.addf %379, %381 : vector<1x32xf32>
    %383 = math.tanh %382 : vector<1x32xf32>
    %cst_96 = arith.constant 1.000000e+00 : f32
    %384 = vector.broadcast %cst_96 : f32 to vector<1x32xf32>
    %385 = arith.subf %384, %378 : vector<1x32xf32>
    %386 = arith.mulf %385, %383 : vector<1x32xf32>
    %387 = arith.mulf %378, %319 : vector<1x32xf32>
    %388 = arith.addf %386, %387 : vector<1x32xf32>
    %cst_97 = arith.constant dense<0.000000e+00> : vector<1x96xf32>
    %389 = tpu.matmul %358, %4, %cst_97 {dimension_numbers = #tpu.dot_dimension_numbers<[1], [0], [0], [1], [0, 0, 1, 1], [], []>} : vector<1x32xf32>, vector<32x96xf32>, vector<1x96xf32> -> vector<1x96xf32>
    %390 = arith.addf %389, %6 : vector<1x96xf32>
    %cst_98 = arith.constant dense<0.000000e+00> : vector<1x96xf32>
    %391 = tpu.matmul %349, %5, %cst_98 {dimension_numbers = #tpu.dot_dimension_numbers<[1], [0], [0], [1], [0, 0, 1, 1], [], []>} : vector<1x32xf32>, vector<32x96xf32>, vector<1x96xf32> -> vector<1x96xf32>
    %392 = arith.addf %391, %7 : vector<1x96xf32>
    %393 = vector.extract_strided_slice %390 {offsets = [0, 0], sizes = [1, 32], strides = [1, 1]} : vector<1x96xf32> to vector<1x32xf32>
    %394 = vector.extract_strided_slice %392 {offsets = [0, 0], sizes = [1, 32], strides = [1, 1]} : vector<1x96xf32> to vector<1x32xf32>
    %395 = arith.addf %393, %394 : vector<1x32xf32>
    %396 = arith.negf %395 : vector<1x32xf32>
    %397 = math.exp %396 : vector<1x32xf32>
    %cst_99 = arith.constant 1.000000e+00 : f32
    %398 = vector.broadcast %cst_99 : f32 to vector<1x32xf32>
    %399 = arith.addf %398, %397 : vector<1x32xf32>
    %400 = arith.divf %398, %399 : vector<1x32xf32>
    %401 = vector.extract_strided_slice %390 {offsets = [0, 32], sizes = [1, 32], strides = [1, 1]} : vector<1x96xf32> to vector<1x32xf32>
    %402 = vector.extract_strided_slice %392 {offsets = [0, 32], sizes = [1, 32], strides = [1, 1]} : vector<1x96xf32> to vector<1x32xf32>
    %403 = arith.addf %401, %402 : vector<1x32xf32>
    %404 = arith.negf %403 : vector<1x32xf32>
    %405 = math.exp %404 : vector<1x32xf32>
    %cst_100 = arith.constant 1.000000e+00 : f32
    %406 = vector.broadcast %cst_100 : f32 to vector<1x32xf32>
    %407 = arith.addf %406, %405 : vector<1x32xf32>
    %408 = arith.divf %406, %407 : vector<1x32xf32>
    %409 = vector.extract_strided_slice %390 {offsets = [0, 64], sizes = [1, 32], strides = [1, 1]} : vector<1x96xf32> to vector<1x32xf32>
    %410 = vector.extract_strided_slice %392 {offsets = [0, 64], sizes = [1, 32], strides = [1, 1]} : vector<1x96xf32> to vector<1x32xf32>
    %411 = arith.mulf %400, %410 : vector<1x32xf32>
    %412 = arith.addf %409, %411 : vector<1x32xf32>
    %413 = math.tanh %412 : vector<1x32xf32>
    %cst_101 = arith.constant 1.000000e+00 : f32
    %414 = vector.broadcast %cst_101 : f32 to vector<1x32xf32>
    %415 = arith.subf %414, %408 : vector<1x32xf32>
    %416 = arith.mulf %415, %413 : vector<1x32xf32>
    %417 = arith.mulf %408, %349 : vector<1x32xf32>
    %418 = arith.addf %416, %417 : vector<1x32xf32>
    %419 = arith.index_cast %c5_i32 : i32 to index
    %c0_102 = arith.constant 0 : index
    %420 = vector.load %arg9[%419, %c0_102] : memref<8x32xf32, #tpu.memory_space<vmem>>, vector<1x32xf32>
    tpu.vector_store %arg9[%419, %c0_102], %388 {strides = array<i32>} : memref<8x32xf32, #tpu.memory_space<vmem>>, vector<1x32xf32>,
    %421 = arith.index_cast %354 : i32 to index
    %c0_103 = arith.constant 0 : index
    %422 = vector.load %arg11[%421, %c0_103] : memref<8x32xf32, #tpu.memory_space<vmem>>, vector<1x32xf32>
    tpu.vector_store %arg11[%421, %c0_103], %418 {strides = array<i32>} : memref<8x32xf32, #tpu.memory_space<vmem>>, vector<1x32xf32>,
    %c6_i32 = arith.constant 6 : i32
    %c7_i32_104 = arith.constant 7 : i32
    %423 = arith.subi %c7_i32_104, %c6_i32 : i32
    %424 = arith.index_cast %c6_i32 : i32 to index
    %c0_105 = arith.constant 0 : index
    %425 = vector.load %arg0[%424, %c0_105] : memref<8x32xf32, #tpu.memory_space<vmem>>, vector<1x32xf32>
    %426 = arith.index_cast %423 : i32 to index
    %c0_106 = arith.constant 0 : index
    %427 = vector.load %arg0[%426, %c0_106] : memref<8x32xf32, #tpu.memory_space<vmem>>, vector<1x32xf32>
    %cst_107 = arith.constant dense<0.000000e+00> : vector<1x96xf32>
    %428 = tpu.matmul %425, %0, %cst_107 {dimension_numbers = #tpu.dot_dimension_numbers<[1], [0], [0], [1], [0, 0, 1, 1], [], []>} : vector<1x32xf32>, vector<32x96xf32>, vector<1x96xf32> -> vector<1x96xf32>
    %429 = arith.addf %428, %2 : vector<1x96xf32>
    %cst_108 = arith.constant dense<0.000000e+00> : vector<1x96xf32>
    %430 = tpu.matmul %388, %1, %cst_108 {dimension_numbers = #tpu.dot_dimension_numbers<[1], [0], [0], [1], [0, 0, 1, 1], [], []>} : vector<1x32xf32>, vector<32x96xf32>, vector<1x96xf32> -> vector<1x96xf32>
    %431 = arith.addf %430, %3 : vector<1x96xf32>
    %432 = vector.extract_strided_slice %429 {offsets = [0, 0], sizes = [1, 32], strides = [1, 1]} : vector<1x96xf32> to vector<1x32xf32>
    %433 = vector.extract_strided_slice %431 {offsets = [0, 0], sizes = [1, 32], strides = [1, 1]} : vector<1x96xf32> to vector<1x32xf32>
    %434 = arith.addf %432, %433 : vector<1x32xf32>
    %435 = arith.negf %434 : vector<1x32xf32>
    %436 = math.exp %435 : vector<1x32xf32>
    %cst_109 = arith.constant 1.000000e+00 : f32
    %437 = vector.broadcast %cst_109 : f32 to vector<1x32xf32>
    %438 = arith.addf %437, %436 : vector<1x32xf32>
    %439 = arith.divf %437, %438 : vector<1x32xf32>
    %440 = vector.extract_strided_slice %429 {offsets = [0, 32], sizes = [1, 32], strides = [1, 1]} : vector<1x96xf32> to vector<1x32xf32>
    %441 = vector.extract_strided_slice %431 {offsets = [0, 32], sizes = [1, 32], strides = [1, 1]} : vector<1x96xf32> to vector<1x32xf32>
    %442 = arith.addf %440, %441 : vector<1x32xf32>
    %443 = arith.negf %442 : vector<1x32xf32>
    %444 = math.exp %443 : vector<1x32xf32>
    %cst_110 = arith.constant 1.000000e+00 : f32
    %445 = vector.broadcast %cst_110 : f32 to vector<1x32xf32>
    %446 = arith.addf %445, %444 : vector<1x32xf32>
    %447 = arith.divf %445, %446 : vector<1x32xf32>
    %448 = vector.extract_strided_slice %429 {offsets = [0, 64], sizes = [1, 32], strides = [1, 1]} : vector<1x96xf32> to vector<1x32xf32>
    %449 = vector.extract_strided_slice %431 {offsets = [0, 64], sizes = [1, 32], strides = [1, 1]} : vector<1x96xf32> to vector<1x32xf32>
    %450 = arith.mulf %439, %449 : vector<1x32xf32>
    %451 = arith.addf %448, %450 : vector<1x32xf32>
    %452 = math.tanh %451 : vector<1x32xf32>
    %cst_111 = arith.constant 1.000000e+00 : f32
    %453 = vector.broadcast %cst_111 : f32 to vector<1x32xf32>
    %454 = arith.subf %453, %447 : vector<1x32xf32>
    %455 = arith.mulf %454, %452 : vector<1x32xf32>
    %456 = arith.mulf %447, %388 : vector<1x32xf32>
    %457 = arith.addf %455, %456 : vector<1x32xf32>
    %cst_112 = arith.constant dense<0.000000e+00> : vector<1x96xf32>
    %458 = tpu.matmul %427, %4, %cst_112 {dimension_numbers = #tpu.dot_dimension_numbers<[1], [0], [0], [1], [0, 0, 1, 1], [], []>} : vector<1x32xf32>, vector<32x96xf32>, vector<1x96xf32> -> vector<1x96xf32>
    %459 = arith.addf %458, %6 : vector<1x96xf32>
    %cst_113 = arith.constant dense<0.000000e+00> : vector<1x96xf32>
    %460 = tpu.matmul %418, %5, %cst_113 {dimension_numbers = #tpu.dot_dimension_numbers<[1], [0], [0], [1], [0, 0, 1, 1], [], []>} : vector<1x32xf32>, vector<32x96xf32>, vector<1x96xf32> -> vector<1x96xf32>
    %461 = arith.addf %460, %7 : vector<1x96xf32>
    %462 = vector.extract_strided_slice %459 {offsets = [0, 0], sizes = [1, 32], strides = [1, 1]} : vector<1x96xf32> to vector<1x32xf32>
    %463 = vector.extract_strided_slice %461 {offsets = [0, 0], sizes = [1, 32], strides = [1, 1]} : vector<1x96xf32> to vector<1x32xf32>
    %464 = arith.addf %462, %463 : vector<1x32xf32>
    %465 = arith.negf %464 : vector<1x32xf32>
    %466 = math.exp %465 : vector<1x32xf32>
    %cst_114 = arith.constant 1.000000e+00 : f32
    %467 = vector.broadcast %cst_114 : f32 to vector<1x32xf32>
    %468 = arith.addf %467, %466 : vector<1x32xf32>
    %469 = arith.divf %467, %468 : vector<1x32xf32>
    %470 = vector.extract_strided_slice %459 {offsets = [0, 32], sizes = [1, 32], strides = [1, 1]} : vector<1x96xf32> to vector<1x32xf32>
    %471 = vector.extract_strided_slice %461 {offsets = [0, 32], sizes = [1, 32], strides = [1, 1]} : vector<1x96xf32> to vector<1x32xf32>
    %472 = arith.addf %470, %471 : vector<1x32xf32>
    %473 = arith.negf %472 : vector<1x32xf32>
    %474 = math.exp %473 : vector<1x32xf32>
    %cst_115 = arith.constant 1.000000e+00 : f32
    %475 = vector.broadcast %cst_115 : f32 to vector<1x32xf32>
    %476 = arith.addf %475, %474 : vector<1x32xf32>
    %477 = arith.divf %475, %476 : vector<1x32xf32>
    %478 = vector.extract_strided_slice %459 {offsets = [0, 64], sizes = [1, 32], strides = [1, 1]} : vector<1x96xf32> to vector<1x32xf32>
    %479 = vector.extract_strided_slice %461 {offsets = [0, 64], sizes = [1, 32], strides = [1, 1]} : vector<1x96xf32> to vector<1x32xf32>
    %480 = arith.mulf %469, %479 : vector<1x32xf32>
    %481 = arith.addf %478, %480 : vector<1x32xf32>
    %482 = math.tanh %481 : vector<1x32xf32>
    %cst_116 = arith.constant 1.000000e+00 : f32
    %483 = vector.broadcast %cst_116 : f32 to vector<1x32xf32>
    %484 = arith.subf %483, %477 : vector<1x32xf32>
    %485 = arith.mulf %484, %482 : vector<1x32xf32>
    %486 = arith.mulf %477, %418 : vector<1x32xf32>
    %487 = arith.addf %485, %486 : vector<1x32xf32>
    %488 = arith.index_cast %c6_i32 : i32 to index
    %c0_117 = arith.constant 0 : index
    %489 = vector.load %arg9[%488, %c0_117] : memref<8x32xf32, #tpu.memory_space<vmem>>, vector<1x32xf32>
    tpu.vector_store %arg9[%488, %c0_117], %457 {strides = array<i32>} : memref<8x32xf32, #tpu.memory_space<vmem>>, vector<1x32xf32>,
    %490 = arith.index_cast %423 : i32 to index
    %c0_118 = arith.constant 0 : index
    %491 = vector.load %arg11[%490, %c0_118] : memref<8x32xf32, #tpu.memory_space<vmem>>, vector<1x32xf32>
    tpu.vector_store %arg11[%490, %c0_118], %487 {strides = array<i32>} : memref<8x32xf32, #tpu.memory_space<vmem>>, vector<1x32xf32>,
    %c7_i32_119 = arith.constant 7 : i32
    %c7_i32_120 = arith.constant 7 : i32
    %492 = arith.subi %c7_i32_120, %c7_i32_119 : i32
    %493 = arith.index_cast %c7_i32_119 : i32 to index
    %c0_121 = arith.constant 0 : index
    %494 = vector.load %arg0[%493, %c0_121] : memref<8x32xf32, #tpu.memory_space<vmem>>, vector<1x32xf32>
    %495 = arith.index_cast %492 : i32 to index
    %c0_122 = arith.constant 0 : index
    %496 = vector.load %arg0[%495, %c0_122] : memref<8x32xf32, #tpu.memory_space<vmem>>, vector<1x32xf32>
    %cst_123 = arith.constant dense<0.000000e+00> : vector<1x96xf32>
    %497 = tpu.matmul %494, %0, %cst_123 {dimension_numbers = #tpu.dot_dimension_numbers<[1], [0], [0], [1], [0, 0, 1, 1], [], []>} : vector<1x32xf32>, vector<32x96xf32>, vector<1x96xf32> -> vector<1x96xf32>
    %498 = arith.addf %497, %2 : vector<1x96xf32>
    %cst_124 = arith.constant dense<0.000000e+00> : vector<1x96xf32>
    %499 = tpu.matmul %457, %1, %cst_124 {dimension_numbers = #tpu.dot_dimension_numbers<[1], [0], [0], [1], [0, 0, 1, 1], [], []>} : vector<1x32xf32>, vector<32x96xf32>, vector<1x96xf32> -> vector<1x96xf32>
    %500 = arith.addf %499, %3 : vector<1x96xf32>
    %501 = vector.extract_strided_slice %498 {offsets = [0, 0], sizes = [1, 32], strides = [1, 1]} : vector<1x96xf32> to vector<1x32xf32>
    %502 = vector.extract_strided_slice %500 {offsets = [0, 0], sizes = [1, 32], strides = [1, 1]} : vector<1x96xf32> to vector<1x32xf32>
    %503 = arith.addf %501, %502 : vector<1x32xf32>
    %504 = arith.negf %503 : vector<1x32xf32>
    %505 = math.exp %504 : vector<1x32xf32>
    %cst_125 = arith.constant 1.000000e+00 : f32
    %506 = vector.broadcast %cst_125 : f32 to vector<1x32xf32>
    %507 = arith.addf %506, %505 : vector<1x32xf32>
    %508 = arith.divf %506, %507 : vector<1x32xf32>
    %509 = vector.extract_strided_slice %498 {offsets = [0, 32], sizes = [1, 32], strides = [1, 1]} : vector<1x96xf32> to vector<1x32xf32>
    %510 = vector.extract_strided_slice %500 {offsets = [0, 32], sizes = [1, 32], strides = [1, 1]} : vector<1x96xf32> to vector<1x32xf32>
    %511 = arith.addf %509, %510 : vector<1x32xf32>
    %512 = arith.negf %511 : vector<1x32xf32>
    %513 = math.exp %512 : vector<1x32xf32>
    %cst_126 = arith.constant 1.000000e+00 : f32
    %514 = vector.broadcast %cst_126 : f32 to vector<1x32xf32>
    %515 = arith.addf %514, %513 : vector<1x32xf32>
    %516 = arith.divf %514, %515 : vector<1x32xf32>
    %517 = vector.extract_strided_slice %498 {offsets = [0, 64], sizes = [1, 32], strides = [1, 1]} : vector<1x96xf32> to vector<1x32xf32>
    %518 = vector.extract_strided_slice %500 {offsets = [0, 64], sizes = [1, 32], strides = [1, 1]} : vector<1x96xf32> to vector<1x32xf32>
    %519 = arith.mulf %508, %518 : vector<1x32xf32>
    %520 = arith.addf %517, %519 : vector<1x32xf32>
    %521 = math.tanh %520 : vector<1x32xf32>
    %cst_127 = arith.constant 1.000000e+00 : f32
    %522 = vector.broadcast %cst_127 : f32 to vector<1x32xf32>
    %523 = arith.subf %522, %516 : vector<1x32xf32>
    %524 = arith.mulf %523, %521 : vector<1x32xf32>
    %525 = arith.mulf %516, %457 : vector<1x32xf32>
    %526 = arith.addf %524, %525 : vector<1x32xf32>
    %cst_128 = arith.constant dense<0.000000e+00> : vector<1x96xf32>
    %527 = tpu.matmul %496, %4, %cst_128 {dimension_numbers = #tpu.dot_dimension_numbers<[1], [0], [0], [1], [0, 0, 1, 1], [], []>} : vector<1x32xf32>, vector<32x96xf32>, vector<1x96xf32> -> vector<1x96xf32>
    %528 = arith.addf %527, %6 : vector<1x96xf32>
    %cst_129 = arith.constant dense<0.000000e+00> : vector<1x96xf32>
    %529 = tpu.matmul %487, %5, %cst_129 {dimension_numbers = #tpu.dot_dimension_numbers<[1], [0], [0], [1], [0, 0, 1, 1], [], []>} : vector<1x32xf32>, vector<32x96xf32>, vector<1x96xf32> -> vector<1x96xf32>
    %530 = arith.addf %529, %7 : vector<1x96xf32>
    %531 = vector.extract_strided_slice %528 {offsets = [0, 0], sizes = [1, 32], strides = [1, 1]} : vector<1x96xf32> to vector<1x32xf32>
    %532 = vector.extract_strided_slice %530 {offsets = [0, 0], sizes = [1, 32], strides = [1, 1]} : vector<1x96xf32> to vector<1x32xf32>
    %533 = arith.addf %531, %532 : vector<1x32xf32>
    %534 = arith.negf %533 : vector<1x32xf32>
    %535 = math.exp %534 : vector<1x32xf32>
    %cst_130 = arith.constant 1.000000e+00 : f32
    %536 = vector.broadcast %cst_130 : f32 to vector<1x32xf32>
    %537 = arith.addf %536, %535 : vector<1x32xf32>
    %538 = arith.divf %536, %537 : vector<1x32xf32>
    %539 = vector.extract_strided_slice %528 {offsets = [0, 32], sizes = [1, 32], strides = [1, 1]} : vector<1x96xf32> to vector<1x32xf32>
    %540 = vector.extract_strided_slice %530 {offsets = [0, 32], sizes = [1, 32], strides = [1, 1]} : vector<1x96xf32> to vector<1x32xf32>
    %541 = arith.addf %539, %540 : vector<1x32xf32>
    %542 = arith.negf %541 : vector<1x32xf32>
    %543 = math.exp %542 : vector<1x32xf32>
    %cst_131 = arith.constant 1.000000e+00 : f32
    %544 = vector.broadcast %cst_131 : f32 to vector<1x32xf32>
    %545 = arith.addf %544, %543 : vector<1x32xf32>
    %546 = arith.divf %544, %545 : vector<1x32xf32>
    %547 = vector.extract_strided_slice %528 {offsets = [0, 64], sizes = [1, 32], strides = [1, 1]} : vector<1x96xf32> to vector<1x32xf32>
    %548 = vector.extract_strided_slice %530 {offsets = [0, 64], sizes = [1, 32], strides = [1, 1]} : vector<1x96xf32> to vector<1x32xf32>
    %549 = arith.mulf %538, %548 : vector<1x32xf32>
    %550 = arith.addf %547, %549 : vector<1x32xf32>
    %551 = math.tanh %550 : vector<1x32xf32>
    %cst_132 = arith.constant 1.000000e+00 : f32
    %552 = vector.broadcast %cst_132 : f32 to vector<1x32xf32>
    %553 = arith.subf %552, %546 : vector<1x32xf32>
    %554 = arith.mulf %553, %551 : vector<1x32xf32>
    %555 = arith.mulf %546, %487 : vector<1x32xf32>
    %556 = arith.addf %554, %555 : vector<1x32xf32>
    %557 = arith.index_cast %c7_i32_119 : i32 to index
    %c0_133 = arith.constant 0 : index
    %558 = vector.load %arg9[%557, %c0_133] : memref<8x32xf32, #tpu.memory_space<vmem>>, vector<1x32xf32>
    tpu.vector_store %arg9[%557, %c0_133], %526 {strides = array<i32>} : memref<8x32xf32, #tpu.memory_space<vmem>>, vector<1x32xf32>,
    %559 = arith.index_cast %492 : i32 to index
    %c0_134 = arith.constant 0 : index
    %560 = vector.load %arg11[%559, %c0_134] : memref<8x32xf32, #tpu.memory_space<vmem>>, vector<1x32xf32>
    tpu.vector_store %arg11[%559, %c0_134], %556 {strides = array<i32>} : memref<8x32xf32, #tpu.memory_space<vmem>>, vector<1x32xf32>,
    %c8_i32 = arith.constant 8 : i32
    %c0_135 = arith.constant 0 : index
    %c0_136 = arith.constant 0 : index
    %561 = vector.load %arg9[%c0_135, %c0_136] : memref<8x32xf32, #tpu.memory_space<vmem>>, vector<8x32xf32>
    %c0_137 = arith.constant 0 : index
    %c0_138 = arith.constant 0 : index
    %562 = vector.load %arg11[%c0_137, %c0_138] : memref<8x32xf32, #tpu.memory_space<vmem>>, vector<8x32xf32>
    %563 = arith.addf %561, %562 : vector<8x32xf32>
    %c0_139 = arith.constant 0 : index
    %c0_140 = arith.constant 0 : index
    %564 = vector.load %arg9[%c0_139, %c0_140] : memref<8x32xf32, #tpu.memory_space<vmem>>, vector<8x32xf32>
    tpu.vector_store %arg9[%c0_139, %c0_140], %563 {strides = array<i32>} : memref<8x32xf32, #tpu.memory_space<vmem>>, vector<8x32xf32>,
    %c0_141 = arith.constant 0 : index
    %c0_142 = arith.constant 0 : index
    %565 = vector.load %arg10[%c0_141, %c0_142] : memref<1x32xf32, #tpu.memory_space<vmem>>, vector<1x32xf32>
    tpu.vector_store %arg10[%c0_141, %c0_142], %526 {strides = array<i32>} : memref<1x32xf32, #tpu.memory_space<vmem>>, vector<1x32xf32>,
    return
  }
}

module attributes {stable_mosaic.version = 11 : i64} {
  func.func @_decoder_kernel(%arg0: memref<48x32xf32, #tpu.memory_space<vmem>>, %arg1: memref<8x32xf32, #tpu.memory_space<vmem>>, %arg2: memref<1x32xf32, #tpu.memory_space<vmem>>, %arg3: memref<32x96xf32, #tpu.memory_space<vmem>>, %arg4: memref<32x96xf32, #tpu.memory_space<vmem>>, %arg5: memref<1x96xf32, #tpu.memory_space<vmem>>, %arg6: memref<1x96xf32, #tpu.memory_space<vmem>>, %arg7: memref<2x32x32xf32, #tpu.memory_space<vmem>>, %arg8: memref<1x32xf32, #tpu.memory_space<vmem>>, %arg9: memref<32x48xf32, #tpu.memory_space<vmem>>, %arg10: memref<1x48xf32, #tpu.memory_space<vmem>>, %arg11: memref<1x10xi32, #tpu.memory_space<vmem>>, %arg12: memref<1x10xf32, #tpu.memory_space<vmem>>) attributes {dimension_semantics = [], scalar_prefetch = 0 : i64, scratch_operands = 0 : i64, tpu.core_type = #tpu.core_type<tc>} {
    %c0 = arith.constant 0 : index
    %c0_0 = arith.constant 0 : index
    %0 = vector.load %arg0[%c0, %c0_0] : memref<48x32xf32, #tpu.memory_space<vmem>>, vector<48x32xf32>
    %c0_1 = arith.constant 0 : index
    %c0_2 = arith.constant 0 : index
    %1 = vector.load %arg1[%c0_1, %c0_2] : memref<8x32xf32, #tpu.memory_space<vmem>>, vector<8x32xf32>
    %c0_3 = arith.constant 0 : index
    %c0_4 = arith.constant 0 : index
    %2 = vector.load %arg3[%c0_3, %c0_4] : memref<32x96xf32, #tpu.memory_space<vmem>>, vector<32x96xf32>
    %c0_5 = arith.constant 0 : index
    %c0_6 = arith.constant 0 : index
    %3 = vector.load %arg4[%c0_5, %c0_6] : memref<32x96xf32, #tpu.memory_space<vmem>>, vector<32x96xf32>
    %c0_7 = arith.constant 0 : index
    %c0_8 = arith.constant 0 : index
    %4 = vector.load %arg5[%c0_7, %c0_8] : memref<1x96xf32, #tpu.memory_space<vmem>>, vector<1x96xf32>
    %c0_9 = arith.constant 0 : index
    %c0_10 = arith.constant 0 : index
    %5 = vector.load %arg6[%c0_9, %c0_10] : memref<1x96xf32, #tpu.memory_space<vmem>>, vector<1x96xf32>
    %c0_11 = arith.constant 0 : index
    %c0_12 = arith.constant 0 : index
    %c0_13 = arith.constant 0 : index
    %6 = vector.load %arg7[%c0_11, %c0_12, %c0_13] : memref<2x32x32xf32, #tpu.memory_space<vmem>>, vector<1x32x32xf32>
    %7 = vector.shape_cast %6 : vector<1x32x32xf32> to vector<32x32xf32>
    %c1 = arith.constant 1 : index
    %c0_14 = arith.constant 0 : index
    %c0_15 = arith.constant 0 : index
    %8 = vector.load %arg7[%c1, %c0_14, %c0_15] : memref<2x32x32xf32, #tpu.memory_space<vmem>>, vector<1x32x32xf32>
    %9 = vector.shape_cast %8 : vector<1x32x32xf32> to vector<32x32xf32>
    %c0_16 = arith.constant 0 : index
    %c0_17 = arith.constant 0 : index
    %10 = vector.load %arg8[%c0_16, %c0_17] : memref<1x32xf32, #tpu.memory_space<vmem>>, vector<1x32xf32>
    %c0_18 = arith.constant 0 : index
    %c0_19 = arith.constant 0 : index
    %11 = vector.load %arg9[%c0_18, %c0_19] : memref<32x48xf32, #tpu.memory_space<vmem>>, vector<32x48xf32>
    %c0_20 = arith.constant 0 : index
    %c0_21 = arith.constant 0 : index
    %12 = vector.load %arg10[%c0_20, %c0_21] : memref<1x48xf32, #tpu.memory_space<vmem>>, vector<1x48xf32>
    %13 = tpu.iota {dimensions = array<i32: 1>} : vector<1x10xi32>
    %14 = tpu.iota {dimensions = array<i32: 1>} : vector<1x48xi32>
    %15 = vector.extract_strided_slice %0 {offsets = [1, 0], sizes = [1, 32], strides = [1, 1]} : vector<48x32xf32> to vector<1x32xf32>
    %c0_22 = arith.constant 0 : index
    %c0_23 = arith.constant 0 : index
    %16 = vector.load %arg2[%c0_22, %c0_23] : memref<1x32xf32, #tpu.memory_space<vmem>>, vector<1x32xf32>
    %c0_i32 = arith.constant 0 : i32
    %17 = vector.broadcast %c0_i32 : i32 to vector<1x10xi32>
    %cst = arith.constant 0.000000e+00 : f32
    %18 = vector.broadcast %cst : f32 to vector<1x10xf32>
    %c0_i32_24 = arith.constant 0 : i32
    %cst_25 = arith.constant dense<0.000000e+00> : vector<1x96xf32>
    %19 = tpu.matmul %15, %2, %cst_25 {dimension_numbers = #tpu.dot_dimension_numbers<[1], [0], [0], [1], [0, 0, 1, 1], [], []>} : vector<1x32xf32>, vector<32x96xf32>, vector<1x96xf32> -> vector<1x96xf32>
    %20 = arith.addf %19, %4 : vector<1x96xf32>
    %cst_26 = arith.constant dense<0.000000e+00> : vector<1x96xf32>
    %21 = tpu.matmul %16, %3, %cst_26 {dimension_numbers = #tpu.dot_dimension_numbers<[1], [0], [0], [1], [0, 0, 1, 1], [], []>} : vector<1x32xf32>, vector<32x96xf32>, vector<1x96xf32> -> vector<1x96xf32>
    %22 = arith.addf %21, %5 : vector<1x96xf32>
    %23 = vector.extract_strided_slice %20 {offsets = [0, 0], sizes = [1, 32], strides = [1, 1]} : vector<1x96xf32> to vector<1x32xf32>
    %24 = vector.extract_strided_slice %22 {offsets = [0, 0], sizes = [1, 32], strides = [1, 1]} : vector<1x96xf32> to vector<1x32xf32>
    %25 = arith.addf %23, %24 : vector<1x32xf32>
    %26 = arith.negf %25 : vector<1x32xf32>
    %27 = math.exp %26 : vector<1x32xf32>
    %cst_27 = arith.constant 1.000000e+00 : f32
    %28 = vector.broadcast %cst_27 : f32 to vector<1x32xf32>
    %29 = arith.addf %28, %27 : vector<1x32xf32>
    %30 = arith.divf %28, %29 : vector<1x32xf32>
    %31 = vector.extract_strided_slice %20 {offsets = [0, 32], sizes = [1, 32], strides = [1, 1]} : vector<1x96xf32> to vector<1x32xf32>
    %32 = vector.extract_strided_slice %22 {offsets = [0, 32], sizes = [1, 32], strides = [1, 1]} : vector<1x96xf32> to vector<1x32xf32>
    %33 = arith.addf %31, %32 : vector<1x32xf32>
    %34 = arith.negf %33 : vector<1x32xf32>
    %35 = math.exp %34 : vector<1x32xf32>
    %cst_28 = arith.constant 1.000000e+00 : f32
    %36 = vector.broadcast %cst_28 : f32 to vector<1x32xf32>
    %37 = arith.addf %36, %35 : vector<1x32xf32>
    %38 = arith.divf %36, %37 : vector<1x32xf32>
    %39 = vector.extract_strided_slice %20 {offsets = [0, 64], sizes = [1, 32], strides = [1, 1]} : vector<1x96xf32> to vector<1x32xf32>
    %40 = vector.extract_strided_slice %22 {offsets = [0, 64], sizes = [1, 32], strides = [1, 1]} : vector<1x96xf32> to vector<1x32xf32>
    %41 = arith.mulf %30, %40 : vector<1x32xf32>
    %42 = arith.addf %39, %41 : vector<1x32xf32>
    %43 = math.tanh %42 : vector<1x32xf32>
    %cst_29 = arith.constant 1.000000e+00 : f32
    %44 = vector.broadcast %cst_29 : f32 to vector<1x32xf32>
    %45 = arith.subf %44, %38 : vector<1x32xf32>
    %46 = arith.mulf %45, %43 : vector<1x32xf32>
    %47 = arith.mulf %38, %16 : vector<1x32xf32>
    %48 = arith.addf %46, %47 : vector<1x32xf32>
    %cst_30 = arith.constant dense<0.000000e+00> : vector<1x8xf32>
    %49 = tpu.matmul %48, %1, %cst_30 {dimension_numbers = #tpu.dot_dimension_numbers<[1], [1], [0], [0], [0, 0, 1, 0], [], []>} : vector<1x32xf32>, vector<8x32xf32>, vector<1x8xf32> -> vector<1x8xf32>
    %cst_31 = arith.constant dense<0xFF800000> : vector<1xf32>
    %50 = vector.multi_reduction <maximumf>, %49, %cst_31 [1] : vector<1x8xf32> to vector<1xf32>
    %51 = vector.shape_cast %50 : vector<1xf32> to vector<1x1xf32>
    %52 = vector.broadcast %51 : vector<1x1xf32> to vector<1x8xf32>
    %53 = arith.subf %49, %52 : vector<1x8xf32>
    %54 = math.exp %53 : vector<1x8xf32>
    %cst_32 = arith.constant dense<0.000000e+00> : vector<1xf32>
    %55 = vector.multi_reduction <add>, %54, %cst_32 [1] : vector<1x8xf32> to vector<1xf32>
    %56 = vector.shape_cast %55 : vector<1xf32> to vector<1x1xf32>
    %57 = vector.broadcast %56 : vector<1x1xf32> to vector<1x8xf32>
    %58 = arith.divf %54, %57 : vector<1x8xf32>
    %cst_33 = arith.constant dense<0.000000e+00> : vector<1x32xf32>
    %59 = tpu.matmul %58, %1, %cst_33 {dimension_numbers = #tpu.dot_dimension_numbers<[1], [0], [0], [1], [0, 0, 1, 1], [], []>} : vector<1x8xf32>, vector<8x32xf32>, vector<1x32xf32> -> vector<1x32xf32>
    %cst_34 = arith.constant dense<0.000000e+00> : vector<1x32xf32>
    %60 = tpu.matmul %48, %7, %cst_34 {dimension_numbers = #tpu.dot_dimension_numbers<[1], [0], [0], [1], [0, 0, 1, 1], [], []>} : vector<1x32xf32>, vector<32x32xf32>, vector<1x32xf32> -> vector<1x32xf32>
    %cst_35 = arith.constant dense<0.000000e+00> : vector<1x32xf32>
    %61 = tpu.matmul %59, %9, %cst_35 {dimension_numbers = #tpu.dot_dimension_numbers<[1], [0], [0], [1], [0, 0, 1, 1], [], []>} : vector<1x32xf32>, vector<32x32xf32>, vector<1x32xf32> -> vector<1x32xf32>
    %62 = arith.addf %60, %61 : vector<1x32xf32>
    %63 = arith.addf %62, %10 : vector<1x32xf32>
    %64 = math.tanh %63 : vector<1x32xf32>
    %cst_36 = arith.constant dense<0.000000e+00> : vector<1x48xf32>
    %65 = tpu.matmul %64, %11, %cst_36 {dimension_numbers = #tpu.dot_dimension_numbers<[1], [0], [0], [1], [0, 0, 1, 1], [], []>} : vector<1x32xf32>, vector<32x48xf32>, vector<1x48xf32> -> vector<1x48xf32>
    %66 = arith.addf %65, %12 : vector<1x48xf32>
    %cst_37 = arith.constant dense<0xFF800000> : vector<1xf32>
    %67 = vector.multi_reduction <maximumf>, %66, %cst_37 [1] : vector<1x48xf32> to vector<1xf32>
    %68 = vector.shape_cast %67 : vector<1xf32> to vector<1x1xf32>
    %69 = vector.broadcast %68 : vector<1x1xf32> to vector<1x48xf32>
    %70 = arith.subf %66, %69 : vector<1x48xf32>
    %71 = math.exp %70 : vector<1x48xf32>
    %cst_38 = arith.constant dense<0.000000e+00> : vector<1xf32>
    %72 = vector.multi_reduction <add>, %71, %cst_38 [1] : vector<1x48xf32> to vector<1xf32>
    %73 = vector.shape_cast %72 : vector<1xf32> to vector<1x1xf32>
    %74 = tpu.reciprocal %73 {approx = true} : vector<1x1xf32> -> vector<1x1xf32>
    %75 = vector.broadcast %68 : vector<1x1xf32> to vector<1x48xf32>
    %76 = arith.cmpf oge, %66, %75 : vector<1x48xf32>
    %c48_i32 = arith.constant 48 : i32
    %77 = vector.broadcast %c48_i32 : i32 to vector<1x48xi32>
    %78 = arith.select %76, %14, %77 : vector<1x48xi1>, vector<1x48xi32>
    %cst_39 = arith.constant dense<2147483647> : vector<1xi32>
    %79 = vector.multi_reduction <minsi>, %78, %cst_39 [1] : vector<1x48xi32> to vector<1xi32>
    %80 = vector.shape_cast %79 : vector<1xi32> to vector<1x1xi32>
    %81 = vector.broadcast %c0_i32_24 : i32 to vector<1x10xi32>
    %82 = arith.cmpi eq, %13, %81 : vector<1x10xi32>
    %83 = vector.shape_cast %80 : vector<1x1xi32> to vector<1x1xi32>
    %84 = vector.broadcast %83 : vector<1x1xi32> to vector<1x10xi32>
    %85 = arith.select %82, %84, %17 : vector<1x10xi1>, vector<1x10xi32>
    %86 = vector.broadcast %c0_i32_24 : i32 to vector<1x10xi32>
    %87 = arith.cmpi eq, %13, %86 : vector<1x10xi32>
    %88 = vector.shape_cast %74 : vector<1x1xf32> to vector<1x1xf32>
    %89 = vector.broadcast %88 : vector<1x1xf32> to vector<1x10xf32>
    %90 = arith.select %87, %89, %18 : vector<1x10xi1>, vector<1x10xf32>
    %91 = vector.broadcast %80 : vector<1x1xi32> to vector<1x48xi32>
    %92 = arith.cmpi eq, %14, %91 : vector<1x48xi32>
    %93 = arith.extui %92 : vector<1x48xi1> to vector<1x48xi32>
    %94 = arith.sitofp %93 : vector<1x48xi32> to vector<1x48xf32>
    %cst_40 = arith.constant dense<0.000000e+00> : vector<1x32xf32>
    %95 = tpu.matmul %94, %0, %cst_40 {dimension_numbers = #tpu.dot_dimension_numbers<[1], [0], [0], [1], [0, 0, 1, 1], [], []>} : vector<1x48xf32>, vector<48x32xf32>, vector<1x32xf32> -> vector<1x32xf32>
    %c1_i32 = arith.constant 1 : i32
    %cst_41 = arith.constant dense<0.000000e+00> : vector<1x96xf32>
    %96 = tpu.matmul %95, %2, %cst_41 {dimension_numbers = #tpu.dot_dimension_numbers<[1], [0], [0], [1], [0, 0, 1, 1], [], []>} : vector<1x32xf32>, vector<32x96xf32>, vector<1x96xf32> -> vector<1x96xf32>
    %97 = arith.addf %96, %4 : vector<1x96xf32>
    %cst_42 = arith.constant dense<0.000000e+00> : vector<1x96xf32>
    %98 = tpu.matmul %48, %3, %cst_42 {dimension_numbers = #tpu.dot_dimension_numbers<[1], [0], [0], [1], [0, 0, 1, 1], [], []>} : vector<1x32xf32>, vector<32x96xf32>, vector<1x96xf32> -> vector<1x96xf32>
    %99 = arith.addf %98, %5 : vector<1x96xf32>
    %100 = vector.extract_strided_slice %97 {offsets = [0, 0], sizes = [1, 32], strides = [1, 1]} : vector<1x96xf32> to vector<1x32xf32>
    %101 = vector.extract_strided_slice %99 {offsets = [0, 0], sizes = [1, 32], strides = [1, 1]} : vector<1x96xf32> to vector<1x32xf32>
    %102 = arith.addf %100, %101 : vector<1x32xf32>
    %103 = arith.negf %102 : vector<1x32xf32>
    %104 = math.exp %103 : vector<1x32xf32>
    %cst_43 = arith.constant 1.000000e+00 : f32
    %105 = vector.broadcast %cst_43 : f32 to vector<1x32xf32>
    %106 = arith.addf %105, %104 : vector<1x32xf32>
    %107 = arith.divf %105, %106 : vector<1x32xf32>
    %108 = vector.extract_strided_slice %97 {offsets = [0, 32], sizes = [1, 32], strides = [1, 1]} : vector<1x96xf32> to vector<1x32xf32>
    %109 = vector.extract_strided_slice %99 {offsets = [0, 32], sizes = [1, 32], strides = [1, 1]} : vector<1x96xf32> to vector<1x32xf32>
    %110 = arith.addf %108, %109 : vector<1x32xf32>
    %111 = arith.negf %110 : vector<1x32xf32>
    %112 = math.exp %111 : vector<1x32xf32>
    %cst_44 = arith.constant 1.000000e+00 : f32
    %113 = vector.broadcast %cst_44 : f32 to vector<1x32xf32>
    %114 = arith.addf %113, %112 : vector<1x32xf32>
    %115 = arith.divf %113, %114 : vector<1x32xf32>
    %116 = vector.extract_strided_slice %97 {offsets = [0, 64], sizes = [1, 32], strides = [1, 1]} : vector<1x96xf32> to vector<1x32xf32>
    %117 = vector.extract_strided_slice %99 {offsets = [0, 64], sizes = [1, 32], strides = [1, 1]} : vector<1x96xf32> to vector<1x32xf32>
    %118 = arith.mulf %107, %117 : vector<1x32xf32>
    %119 = arith.addf %116, %118 : vector<1x32xf32>
    %120 = math.tanh %119 : vector<1x32xf32>
    %cst_45 = arith.constant 1.000000e+00 : f32
    %121 = vector.broadcast %cst_45 : f32 to vector<1x32xf32>
    %122 = arith.subf %121, %115 : vector<1x32xf32>
    %123 = arith.mulf %122, %120 : vector<1x32xf32>
    %124 = arith.mulf %115, %48 : vector<1x32xf32>
    %125 = arith.addf %123, %124 : vector<1x32xf32>
    %cst_46 = arith.constant dense<0.000000e+00> : vector<1x8xf32>
    %126 = tpu.matmul %125, %1, %cst_46 {dimension_numbers = #tpu.dot_dimension_numbers<[1], [1], [0], [0], [0, 0, 1, 0], [], []>} : vector<1x32xf32>, vector<8x32xf32>, vector<1x8xf32> -> vector<1x8xf32>
    %cst_47 = arith.constant dense<0xFF800000> : vector<1xf32>
    %127 = vector.multi_reduction <maximumf>, %126, %cst_47 [1] : vector<1x8xf32> to vector<1xf32>
    %128 = vector.shape_cast %127 : vector<1xf32> to vector<1x1xf32>
    %129 = vector.broadcast %128 : vector<1x1xf32> to vector<1x8xf32>
    %130 = arith.subf %126, %129 : vector<1x8xf32>
    %131 = math.exp %130 : vector<1x8xf32>
    %cst_48 = arith.constant dense<0.000000e+00> : vector<1xf32>
    %132 = vector.multi_reduction <add>, %131, %cst_48 [1] : vector<1x8xf32> to vector<1xf32>
    %133 = vector.shape_cast %132 : vector<1xf32> to vector<1x1xf32>
    %134 = vector.broadcast %133 : vector<1x1xf32> to vector<1x8xf32>
    %135 = arith.divf %131, %134 : vector<1x8xf32>
    %cst_49 = arith.constant dense<0.000000e+00> : vector<1x32xf32>
    %136 = tpu.matmul %135, %1, %cst_49 {dimension_numbers = #tpu.dot_dimension_numbers<[1], [0], [0], [1], [0, 0, 1, 1], [], []>} : vector<1x8xf32>, vector<8x32xf32>, vector<1x32xf32> -> vector<1x32xf32>
    %cst_50 = arith.constant dense<0.000000e+00> : vector<1x32xf32>
    %137 = tpu.matmul %125, %7, %cst_50 {dimension_numbers = #tpu.dot_dimension_numbers<[1], [0], [0], [1], [0, 0, 1, 1], [], []>} : vector<1x32xf32>, vector<32x32xf32>, vector<1x32xf32> -> vector<1x32xf32>
    %cst_51 = arith.constant dense<0.000000e+00> : vector<1x32xf32>
    %138 = tpu.matmul %136, %9, %cst_51 {dimension_numbers = #tpu.dot_dimension_numbers<[1], [0], [0], [1], [0, 0, 1, 1], [], []>} : vector<1x32xf32>, vector<32x32xf32>, vector<1x32xf32> -> vector<1x32xf32>
    %139 = arith.addf %137, %138 : vector<1x32xf32>
    %140 = arith.addf %139, %10 : vector<1x32xf32>
    %141 = math.tanh %140 : vector<1x32xf32>
    %cst_52 = arith.constant dense<0.000000e+00> : vector<1x48xf32>
    %142 = tpu.matmul %141, %11, %cst_52 {dimension_numbers = #tpu.dot_dimension_numbers<[1], [0], [0], [1], [0, 0, 1, 1], [], []>} : vector<1x32xf32>, vector<32x48xf32>, vector<1x48xf32> -> vector<1x48xf32>
    %143 = arith.addf %142, %12 : vector<1x48xf32>
    %cst_53 = arith.constant dense<0xFF800000> : vector<1xf32>
    %144 = vector.multi_reduction <maximumf>, %143, %cst_53 [1] : vector<1x48xf32> to vector<1xf32>
    %145 = vector.shape_cast %144 : vector<1xf32> to vector<1x1xf32>
    %146 = vector.broadcast %145 : vector<1x1xf32> to vector<1x48xf32>
    %147 = arith.subf %143, %146 : vector<1x48xf32>
    %148 = math.exp %147 : vector<1x48xf32>
    %cst_54 = arith.constant dense<0.000000e+00> : vector<1xf32>
    %149 = vector.multi_reduction <add>, %148, %cst_54 [1] : vector<1x48xf32> to vector<1xf32>
    %150 = vector.shape_cast %149 : vector<1xf32> to vector<1x1xf32>
    %151 = tpu.reciprocal %150 {approx = true} : vector<1x1xf32> -> vector<1x1xf32>
    %152 = vector.broadcast %145 : vector<1x1xf32> to vector<1x48xf32>
    %153 = arith.cmpf oge, %143, %152 : vector<1x48xf32>
    %c48_i32_55 = arith.constant 48 : i32
    %154 = vector.broadcast %c48_i32_55 : i32 to vector<1x48xi32>
    %155 = arith.select %153, %14, %154 : vector<1x48xi1>, vector<1x48xi32>
    %cst_56 = arith.constant dense<2147483647> : vector<1xi32>
    %156 = vector.multi_reduction <minsi>, %155, %cst_56 [1] : vector<1x48xi32> to vector<1xi32>
    %157 = vector.shape_cast %156 : vector<1xi32> to vector<1x1xi32>
    %158 = vector.broadcast %c1_i32 : i32 to vector<1x10xi32>
    %159 = arith.cmpi eq, %13, %158 : vector<1x10xi32>
    %160 = vector.shape_cast %157 : vector<1x1xi32> to vector<1x1xi32>
    %161 = vector.broadcast %160 : vector<1x1xi32> to vector<1x10xi32>
    %162 = arith.select %159, %161, %85 : vector<1x10xi1>, vector<1x10xi32>
    %163 = vector.broadcast %c1_i32 : i32 to vector<1x10xi32>
    %164 = arith.cmpi eq, %13, %163 : vector<1x10xi32>
    %165 = vector.shape_cast %151 : vector<1x1xf32> to vector<1x1xf32>
    %166 = vector.broadcast %165 : vector<1x1xf32> to vector<1x10xf32>
    %167 = arith.select %164, %166, %90 : vector<1x10xi1>, vector<1x10xf32>
    %168 = vector.broadcast %157 : vector<1x1xi32> to vector<1x48xi32>
    %169 = arith.cmpi eq, %14, %168 : vector<1x48xi32>
    %170 = arith.extui %169 : vector<1x48xi1> to vector<1x48xi32>
    %171 = arith.sitofp %170 : vector<1x48xi32> to vector<1x48xf32>
    %cst_57 = arith.constant dense<0.000000e+00> : vector<1x32xf32>
    %172 = tpu.matmul %171, %0, %cst_57 {dimension_numbers = #tpu.dot_dimension_numbers<[1], [0], [0], [1], [0, 0, 1, 1], [], []>} : vector<1x48xf32>, vector<48x32xf32>, vector<1x32xf32> -> vector<1x32xf32>
    %c2_i32 = arith.constant 2 : i32
    %cst_58 = arith.constant dense<0.000000e+00> : vector<1x96xf32>
    %173 = tpu.matmul %172, %2, %cst_58 {dimension_numbers = #tpu.dot_dimension_numbers<[1], [0], [0], [1], [0, 0, 1, 1], [], []>} : vector<1x32xf32>, vector<32x96xf32>, vector<1x96xf32> -> vector<1x96xf32>
    %174 = arith.addf %173, %4 : vector<1x96xf32>
    %cst_59 = arith.constant dense<0.000000e+00> : vector<1x96xf32>
    %175 = tpu.matmul %125, %3, %cst_59 {dimension_numbers = #tpu.dot_dimension_numbers<[1], [0], [0], [1], [0, 0, 1, 1], [], []>} : vector<1x32xf32>, vector<32x96xf32>, vector<1x96xf32> -> vector<1x96xf32>
    %176 = arith.addf %175, %5 : vector<1x96xf32>
    %177 = vector.extract_strided_slice %174 {offsets = [0, 0], sizes = [1, 32], strides = [1, 1]} : vector<1x96xf32> to vector<1x32xf32>
    %178 = vector.extract_strided_slice %176 {offsets = [0, 0], sizes = [1, 32], strides = [1, 1]} : vector<1x96xf32> to vector<1x32xf32>
    %179 = arith.addf %177, %178 : vector<1x32xf32>
    %180 = arith.negf %179 : vector<1x32xf32>
    %181 = math.exp %180 : vector<1x32xf32>
    %cst_60 = arith.constant 1.000000e+00 : f32
    %182 = vector.broadcast %cst_60 : f32 to vector<1x32xf32>
    %183 = arith.addf %182, %181 : vector<1x32xf32>
    %184 = arith.divf %182, %183 : vector<1x32xf32>
    %185 = vector.extract_strided_slice %174 {offsets = [0, 32], sizes = [1, 32], strides = [1, 1]} : vector<1x96xf32> to vector<1x32xf32>
    %186 = vector.extract_strided_slice %176 {offsets = [0, 32], sizes = [1, 32], strides = [1, 1]} : vector<1x96xf32> to vector<1x32xf32>
    %187 = arith.addf %185, %186 : vector<1x32xf32>
    %188 = arith.negf %187 : vector<1x32xf32>
    %189 = math.exp %188 : vector<1x32xf32>
    %cst_61 = arith.constant 1.000000e+00 : f32
    %190 = vector.broadcast %cst_61 : f32 to vector<1x32xf32>
    %191 = arith.addf %190, %189 : vector<1x32xf32>
    %192 = arith.divf %190, %191 : vector<1x32xf32>
    %193 = vector.extract_strided_slice %174 {offsets = [0, 64], sizes = [1, 32], strides = [1, 1]} : vector<1x96xf32> to vector<1x32xf32>
    %194 = vector.extract_strided_slice %176 {offsets = [0, 64], sizes = [1, 32], strides = [1, 1]} : vector<1x96xf32> to vector<1x32xf32>
    %195 = arith.mulf %184, %194 : vector<1x32xf32>
    %196 = arith.addf %193, %195 : vector<1x32xf32>
    %197 = math.tanh %196 : vector<1x32xf32>
    %cst_62 = arith.constant 1.000000e+00 : f32
    %198 = vector.broadcast %cst_62 : f32 to vector<1x32xf32>
    %199 = arith.subf %198, %192 : vector<1x32xf32>
    %200 = arith.mulf %199, %197 : vector<1x32xf32>
    %201 = arith.mulf %192, %125 : vector<1x32xf32>
    %202 = arith.addf %200, %201 : vector<1x32xf32>
    %cst_63 = arith.constant dense<0.000000e+00> : vector<1x8xf32>
    %203 = tpu.matmul %202, %1, %cst_63 {dimension_numbers = #tpu.dot_dimension_numbers<[1], [1], [0], [0], [0, 0, 1, 0], [], []>} : vector<1x32xf32>, vector<8x32xf32>, vector<1x8xf32> -> vector<1x8xf32>
    %cst_64 = arith.constant dense<0xFF800000> : vector<1xf32>
    %204 = vector.multi_reduction <maximumf>, %203, %cst_64 [1] : vector<1x8xf32> to vector<1xf32>
    %205 = vector.shape_cast %204 : vector<1xf32> to vector<1x1xf32>
    %206 = vector.broadcast %205 : vector<1x1xf32> to vector<1x8xf32>
    %207 = arith.subf %203, %206 : vector<1x8xf32>
    %208 = math.exp %207 : vector<1x8xf32>
    %cst_65 = arith.constant dense<0.000000e+00> : vector<1xf32>
    %209 = vector.multi_reduction <add>, %208, %cst_65 [1] : vector<1x8xf32> to vector<1xf32>
    %210 = vector.shape_cast %209 : vector<1xf32> to vector<1x1xf32>
    %211 = vector.broadcast %210 : vector<1x1xf32> to vector<1x8xf32>
    %212 = arith.divf %208, %211 : vector<1x8xf32>
    %cst_66 = arith.constant dense<0.000000e+00> : vector<1x32xf32>
    %213 = tpu.matmul %212, %1, %cst_66 {dimension_numbers = #tpu.dot_dimension_numbers<[1], [0], [0], [1], [0, 0, 1, 1], [], []>} : vector<1x8xf32>, vector<8x32xf32>, vector<1x32xf32> -> vector<1x32xf32>
    %cst_67 = arith.constant dense<0.000000e+00> : vector<1x32xf32>
    %214 = tpu.matmul %202, %7, %cst_67 {dimension_numbers = #tpu.dot_dimension_numbers<[1], [0], [0], [1], [0, 0, 1, 1], [], []>} : vector<1x32xf32>, vector<32x32xf32>, vector<1x32xf32> -> vector<1x32xf32>
    %cst_68 = arith.constant dense<0.000000e+00> : vector<1x32xf32>
    %215 = tpu.matmul %213, %9, %cst_68 {dimension_numbers = #tpu.dot_dimension_numbers<[1], [0], [0], [1], [0, 0, 1, 1], [], []>} : vector<1x32xf32>, vector<32x32xf32>, vector<1x32xf32> -> vector<1x32xf32>
    %216 = arith.addf %214, %215 : vector<1x32xf32>
    %217 = arith.addf %216, %10 : vector<1x32xf32>
    %218 = math.tanh %217 : vector<1x32xf32>
    %cst_69 = arith.constant dense<0.000000e+00> : vector<1x48xf32>
    %219 = tpu.matmul %218, %11, %cst_69 {dimension_numbers = #tpu.dot_dimension_numbers<[1], [0], [0], [1], [0, 0, 1, 1], [], []>} : vector<1x32xf32>, vector<32x48xf32>, vector<1x48xf32> -> vector<1x48xf32>
    %220 = arith.addf %219, %12 : vector<1x48xf32>
    %cst_70 = arith.constant dense<0xFF800000> : vector<1xf32>
    %221 = vector.multi_reduction <maximumf>, %220, %cst_70 [1] : vector<1x48xf32> to vector<1xf32>
    %222 = vector.shape_cast %221 : vector<1xf32> to vector<1x1xf32>
    %223 = vector.broadcast %222 : vector<1x1xf32> to vector<1x48xf32>
    %224 = arith.subf %220, %223 : vector<1x48xf32>
    %225 = math.exp %224 : vector<1x48xf32>
    %cst_71 = arith.constant dense<0.000000e+00> : vector<1xf32>
    %226 = vector.multi_reduction <add>, %225, %cst_71 [1] : vector<1x48xf32> to vector<1xf32>
    %227 = vector.shape_cast %226 : vector<1xf32> to vector<1x1xf32>
    %228 = tpu.reciprocal %227 {approx = true} : vector<1x1xf32> -> vector<1x1xf32>
    %229 = vector.broadcast %222 : vector<1x1xf32> to vector<1x48xf32>
    %230 = arith.cmpf oge, %220, %229 : vector<1x48xf32>
    %c48_i32_72 = arith.constant 48 : i32
    %231 = vector.broadcast %c48_i32_72 : i32 to vector<1x48xi32>
    %232 = arith.select %230, %14, %231 : vector<1x48xi1>, vector<1x48xi32>
    %cst_73 = arith.constant dense<2147483647> : vector<1xi32>
    %233 = vector.multi_reduction <minsi>, %232, %cst_73 [1] : vector<1x48xi32> to vector<1xi32>
    %234 = vector.shape_cast %233 : vector<1xi32> to vector<1x1xi32>
    %235 = vector.broadcast %c2_i32 : i32 to vector<1x10xi32>
    %236 = arith.cmpi eq, %13, %235 : vector<1x10xi32>
    %237 = vector.shape_cast %234 : vector<1x1xi32> to vector<1x1xi32>
    %238 = vector.broadcast %237 : vector<1x1xi32> to vector<1x10xi32>
    %239 = arith.select %236, %238, %162 : vector<1x10xi1>, vector<1x10xi32>
    %240 = vector.broadcast %c2_i32 : i32 to vector<1x10xi32>
    %241 = arith.cmpi eq, %13, %240 : vector<1x10xi32>
    %242 = vector.shape_cast %228 : vector<1x1xf32> to vector<1x1xf32>
    %243 = vector.broadcast %242 : vector<1x1xf32> to vector<1x10xf32>
    %244 = arith.select %241, %243, %167 : vector<1x10xi1>, vector<1x10xf32>
    %245 = vector.broadcast %234 : vector<1x1xi32> to vector<1x48xi32>
    %246 = arith.cmpi eq, %14, %245 : vector<1x48xi32>
    %247 = arith.extui %246 : vector<1x48xi1> to vector<1x48xi32>
    %248 = arith.sitofp %247 : vector<1x48xi32> to vector<1x48xf32>
    %cst_74 = arith.constant dense<0.000000e+00> : vector<1x32xf32>
    %249 = tpu.matmul %248, %0, %cst_74 {dimension_numbers = #tpu.dot_dimension_numbers<[1], [0], [0], [1], [0, 0, 1, 1], [], []>} : vector<1x48xf32>, vector<48x32xf32>, vector<1x32xf32> -> vector<1x32xf32>
    %c3_i32 = arith.constant 3 : i32
    %cst_75 = arith.constant dense<0.000000e+00> : vector<1x96xf32>
    %250 = tpu.matmul %249, %2, %cst_75 {dimension_numbers = #tpu.dot_dimension_numbers<[1], [0], [0], [1], [0, 0, 1, 1], [], []>} : vector<1x32xf32>, vector<32x96xf32>, vector<1x96xf32> -> vector<1x96xf32>
    %251 = arith.addf %250, %4 : vector<1x96xf32>
    %cst_76 = arith.constant dense<0.000000e+00> : vector<1x96xf32>
    %252 = tpu.matmul %202, %3, %cst_76 {dimension_numbers = #tpu.dot_dimension_numbers<[1], [0], [0], [1], [0, 0, 1, 1], [], []>} : vector<1x32xf32>, vector<32x96xf32>, vector<1x96xf32> -> vector<1x96xf32>
    %253 = arith.addf %252, %5 : vector<1x96xf32>
    %254 = vector.extract_strided_slice %251 {offsets = [0, 0], sizes = [1, 32], strides = [1, 1]} : vector<1x96xf32> to vector<1x32xf32>
    %255 = vector.extract_strided_slice %253 {offsets = [0, 0], sizes = [1, 32], strides = [1, 1]} : vector<1x96xf32> to vector<1x32xf32>
    %256 = arith.addf %254, %255 : vector<1x32xf32>
    %257 = arith.negf %256 : vector<1x32xf32>
    %258 = math.exp %257 : vector<1x32xf32>
    %cst_77 = arith.constant 1.000000e+00 : f32
    %259 = vector.broadcast %cst_77 : f32 to vector<1x32xf32>
    %260 = arith.addf %259, %258 : vector<1x32xf32>
    %261 = arith.divf %259, %260 : vector<1x32xf32>
    %262 = vector.extract_strided_slice %251 {offsets = [0, 32], sizes = [1, 32], strides = [1, 1]} : vector<1x96xf32> to vector<1x32xf32>
    %263 = vector.extract_strided_slice %253 {offsets = [0, 32], sizes = [1, 32], strides = [1, 1]} : vector<1x96xf32> to vector<1x32xf32>
    %264 = arith.addf %262, %263 : vector<1x32xf32>
    %265 = arith.negf %264 : vector<1x32xf32>
    %266 = math.exp %265 : vector<1x32xf32>
    %cst_78 = arith.constant 1.000000e+00 : f32
    %267 = vector.broadcast %cst_78 : f32 to vector<1x32xf32>
    %268 = arith.addf %267, %266 : vector<1x32xf32>
    %269 = arith.divf %267, %268 : vector<1x32xf32>
    %270 = vector.extract_strided_slice %251 {offsets = [0, 64], sizes = [1, 32], strides = [1, 1]} : vector<1x96xf32> to vector<1x32xf32>
    %271 = vector.extract_strided_slice %253 {offsets = [0, 64], sizes = [1, 32], strides = [1, 1]} : vector<1x96xf32> to vector<1x32xf32>
    %272 = arith.mulf %261, %271 : vector<1x32xf32>
    %273 = arith.addf %270, %272 : vector<1x32xf32>
    %274 = math.tanh %273 : vector<1x32xf32>
    %cst_79 = arith.constant 1.000000e+00 : f32
    %275 = vector.broadcast %cst_79 : f32 to vector<1x32xf32>
    %276 = arith.subf %275, %269 : vector<1x32xf32>
    %277 = arith.mulf %276, %274 : vector<1x32xf32>
    %278 = arith.mulf %269, %202 : vector<1x32xf32>
    %279 = arith.addf %277, %278 : vector<1x32xf32>
    %cst_80 = arith.constant dense<0.000000e+00> : vector<1x8xf32>
    %280 = tpu.matmul %279, %1, %cst_80 {dimension_numbers = #tpu.dot_dimension_numbers<[1], [1], [0], [0], [0, 0, 1, 0], [], []>} : vector<1x32xf32>, vector<8x32xf32>, vector<1x8xf32> -> vector<1x8xf32>
    %cst_81 = arith.constant dense<0xFF800000> : vector<1xf32>
    %281 = vector.multi_reduction <maximumf>, %280, %cst_81 [1] : vector<1x8xf32> to vector<1xf32>
    %282 = vector.shape_cast %281 : vector<1xf32> to vector<1x1xf32>
    %283 = vector.broadcast %282 : vector<1x1xf32> to vector<1x8xf32>
    %284 = arith.subf %280, %283 : vector<1x8xf32>
    %285 = math.exp %284 : vector<1x8xf32>
    %cst_82 = arith.constant dense<0.000000e+00> : vector<1xf32>
    %286 = vector.multi_reduction <add>, %285, %cst_82 [1] : vector<1x8xf32> to vector<1xf32>
    %287 = vector.shape_cast %286 : vector<1xf32> to vector<1x1xf32>
    %288 = vector.broadcast %287 : vector<1x1xf32> to vector<1x8xf32>
    %289 = arith.divf %285, %288 : vector<1x8xf32>
    %cst_83 = arith.constant dense<0.000000e+00> : vector<1x32xf32>
    %290 = tpu.matmul %289, %1, %cst_83 {dimension_numbers = #tpu.dot_dimension_numbers<[1], [0], [0], [1], [0, 0, 1, 1], [], []>} : vector<1x8xf32>, vector<8x32xf32>, vector<1x32xf32> -> vector<1x32xf32>
    %cst_84 = arith.constant dense<0.000000e+00> : vector<1x32xf32>
    %291 = tpu.matmul %279, %7, %cst_84 {dimension_numbers = #tpu.dot_dimension_numbers<[1], [0], [0], [1], [0, 0, 1, 1], [], []>} : vector<1x32xf32>, vector<32x32xf32>, vector<1x32xf32> -> vector<1x32xf32>
    %cst_85 = arith.constant dense<0.000000e+00> : vector<1x32xf32>
    %292 = tpu.matmul %290, %9, %cst_85 {dimension_numbers = #tpu.dot_dimension_numbers<[1], [0], [0], [1], [0, 0, 1, 1], [], []>} : vector<1x32xf32>, vector<32x32xf32>, vector<1x32xf32> -> vector<1x32xf32>
    %293 = arith.addf %291, %292 : vector<1x32xf32>
    %294 = arith.addf %293, %10 : vector<1x32xf32>
    %295 = math.tanh %294 : vector<1x32xf32>
    %cst_86 = arith.constant dense<0.000000e+00> : vector<1x48xf32>
    %296 = tpu.matmul %295, %11, %cst_86 {dimension_numbers = #tpu.dot_dimension_numbers<[1], [0], [0], [1], [0, 0, 1, 1], [], []>} : vector<1x32xf32>, vector<32x48xf32>, vector<1x48xf32> -> vector<1x48xf32>
    %297 = arith.addf %296, %12 : vector<1x48xf32>
    %cst_87 = arith.constant dense<0xFF800000> : vector<1xf32>
    %298 = vector.multi_reduction <maximumf>, %297, %cst_87 [1] : vector<1x48xf32> to vector<1xf32>
    %299 = vector.shape_cast %298 : vector<1xf32> to vector<1x1xf32>
    %300 = vector.broadcast %299 : vector<1x1xf32> to vector<1x48xf32>
    %301 = arith.subf %297, %300 : vector<1x48xf32>
    %302 = math.exp %301 : vector<1x48xf32>
    %cst_88 = arith.constant dense<0.000000e+00> : vector<1xf32>
    %303 = vector.multi_reduction <add>, %302, %cst_88 [1] : vector<1x48xf32> to vector<1xf32>
    %304 = vector.shape_cast %303 : vector<1xf32> to vector<1x1xf32>
    %305 = tpu.reciprocal %304 {approx = true} : vector<1x1xf32> -> vector<1x1xf32>
    %306 = vector.broadcast %299 : vector<1x1xf32> to vector<1x48xf32>
    %307 = arith.cmpf oge, %297, %306 : vector<1x48xf32>
    %c48_i32_89 = arith.constant 48 : i32
    %308 = vector.broadcast %c48_i32_89 : i32 to vector<1x48xi32>
    %309 = arith.select %307, %14, %308 : vector<1x48xi1>, vector<1x48xi32>
    %cst_90 = arith.constant dense<2147483647> : vector<1xi32>
    %310 = vector.multi_reduction <minsi>, %309, %cst_90 [1] : vector<1x48xi32> to vector<1xi32>
    %311 = vector.shape_cast %310 : vector<1xi32> to vector<1x1xi32>
    %312 = vector.broadcast %c3_i32 : i32 to vector<1x10xi32>
    %313 = arith.cmpi eq, %13, %312 : vector<1x10xi32>
    %314 = vector.shape_cast %311 : vector<1x1xi32> to vector<1x1xi32>
    %315 = vector.broadcast %314 : vector<1x1xi32> to vector<1x10xi32>
    %316 = arith.select %313, %315, %239 : vector<1x10xi1>, vector<1x10xi32>
    %317 = vector.broadcast %c3_i32 : i32 to vector<1x10xi32>
    %318 = arith.cmpi eq, %13, %317 : vector<1x10xi32>
    %319 = vector.shape_cast %305 : vector<1x1xf32> to vector<1x1xf32>
    %320 = vector.broadcast %319 : vector<1x1xf32> to vector<1x10xf32>
    %321 = arith.select %318, %320, %244 : vector<1x10xi1>, vector<1x10xf32>
    %322 = vector.broadcast %311 : vector<1x1xi32> to vector<1x48xi32>
    %323 = arith.cmpi eq, %14, %322 : vector<1x48xi32>
    %324 = arith.extui %323 : vector<1x48xi1> to vector<1x48xi32>
    %325 = arith.sitofp %324 : vector<1x48xi32> to vector<1x48xf32>
    %cst_91 = arith.constant dense<0.000000e+00> : vector<1x32xf32>
    %326 = tpu.matmul %325, %0, %cst_91 {dimension_numbers = #tpu.dot_dimension_numbers<[1], [0], [0], [1], [0, 0, 1, 1], [], []>} : vector<1x48xf32>, vector<48x32xf32>, vector<1x32xf32> -> vector<1x32xf32>
    %c4_i32 = arith.constant 4 : i32
    %cst_92 = arith.constant dense<0.000000e+00> : vector<1x96xf32>
    %327 = tpu.matmul %326, %2, %cst_92 {dimension_numbers = #tpu.dot_dimension_numbers<[1], [0], [0], [1], [0, 0, 1, 1], [], []>} : vector<1x32xf32>, vector<32x96xf32>, vector<1x96xf32> -> vector<1x96xf32>
    %328 = arith.addf %327, %4 : vector<1x96xf32>
    %cst_93 = arith.constant dense<0.000000e+00> : vector<1x96xf32>
    %329 = tpu.matmul %279, %3, %cst_93 {dimension_numbers = #tpu.dot_dimension_numbers<[1], [0], [0], [1], [0, 0, 1, 1], [], []>} : vector<1x32xf32>, vector<32x96xf32>, vector<1x96xf32> -> vector<1x96xf32>
    %330 = arith.addf %329, %5 : vector<1x96xf32>
    %331 = vector.extract_strided_slice %328 {offsets = [0, 0], sizes = [1, 32], strides = [1, 1]} : vector<1x96xf32> to vector<1x32xf32>
    %332 = vector.extract_strided_slice %330 {offsets = [0, 0], sizes = [1, 32], strides = [1, 1]} : vector<1x96xf32> to vector<1x32xf32>
    %333 = arith.addf %331, %332 : vector<1x32xf32>
    %334 = arith.negf %333 : vector<1x32xf32>
    %335 = math.exp %334 : vector<1x32xf32>
    %cst_94 = arith.constant 1.000000e+00 : f32
    %336 = vector.broadcast %cst_94 : f32 to vector<1x32xf32>
    %337 = arith.addf %336, %335 : vector<1x32xf32>
    %338 = arith.divf %336, %337 : vector<1x32xf32>
    %339 = vector.extract_strided_slice %328 {offsets = [0, 32], sizes = [1, 32], strides = [1, 1]} : vector<1x96xf32> to vector<1x32xf32>
    %340 = vector.extract_strided_slice %330 {offsets = [0, 32], sizes = [1, 32], strides = [1, 1]} : vector<1x96xf32> to vector<1x32xf32>
    %341 = arith.addf %339, %340 : vector<1x32xf32>
    %342 = arith.negf %341 : vector<1x32xf32>
    %343 = math.exp %342 : vector<1x32xf32>
    %cst_95 = arith.constant 1.000000e+00 : f32
    %344 = vector.broadcast %cst_95 : f32 to vector<1x32xf32>
    %345 = arith.addf %344, %343 : vector<1x32xf32>
    %346 = arith.divf %344, %345 : vector<1x32xf32>
    %347 = vector.extract_strided_slice %328 {offsets = [0, 64], sizes = [1, 32], strides = [1, 1]} : vector<1x96xf32> to vector<1x32xf32>
    %348 = vector.extract_strided_slice %330 {offsets = [0, 64], sizes = [1, 32], strides = [1, 1]} : vector<1x96xf32> to vector<1x32xf32>
    %349 = arith.mulf %338, %348 : vector<1x32xf32>
    %350 = arith.addf %347, %349 : vector<1x32xf32>
    %351 = math.tanh %350 : vector<1x32xf32>
    %cst_96 = arith.constant 1.000000e+00 : f32
    %352 = vector.broadcast %cst_96 : f32 to vector<1x32xf32>
    %353 = arith.subf %352, %346 : vector<1x32xf32>
    %354 = arith.mulf %353, %351 : vector<1x32xf32>
    %355 = arith.mulf %346, %279 : vector<1x32xf32>
    %356 = arith.addf %354, %355 : vector<1x32xf32>
    %cst_97 = arith.constant dense<0.000000e+00> : vector<1x8xf32>
    %357 = tpu.matmul %356, %1, %cst_97 {dimension_numbers = #tpu.dot_dimension_numbers<[1], [1], [0], [0], [0, 0, 1, 0], [], []>} : vector<1x32xf32>, vector<8x32xf32>, vector<1x8xf32> -> vector<1x8xf32>
    %cst_98 = arith.constant dense<0xFF800000> : vector<1xf32>
    %358 = vector.multi_reduction <maximumf>, %357, %cst_98 [1] : vector<1x8xf32> to vector<1xf32>
    %359 = vector.shape_cast %358 : vector<1xf32> to vector<1x1xf32>
    %360 = vector.broadcast %359 : vector<1x1xf32> to vector<1x8xf32>
    %361 = arith.subf %357, %360 : vector<1x8xf32>
    %362 = math.exp %361 : vector<1x8xf32>
    %cst_99 = arith.constant dense<0.000000e+00> : vector<1xf32>
    %363 = vector.multi_reduction <add>, %362, %cst_99 [1] : vector<1x8xf32> to vector<1xf32>
    %364 = vector.shape_cast %363 : vector<1xf32> to vector<1x1xf32>
    %365 = vector.broadcast %364 : vector<1x1xf32> to vector<1x8xf32>
    %366 = arith.divf %362, %365 : vector<1x8xf32>
    %cst_100 = arith.constant dense<0.000000e+00> : vector<1x32xf32>
    %367 = tpu.matmul %366, %1, %cst_100 {dimension_numbers = #tpu.dot_dimension_numbers<[1], [0], [0], [1], [0, 0, 1, 1], [], []>} : vector<1x8xf32>, vector<8x32xf32>, vector<1x32xf32> -> vector<1x32xf32>
    %cst_101 = arith.constant dense<0.000000e+00> : vector<1x32xf32>
    %368 = tpu.matmul %356, %7, %cst_101 {dimension_numbers = #tpu.dot_dimension_numbers<[1], [0], [0], [1], [0, 0, 1, 1], [], []>} : vector<1x32xf32>, vector<32x32xf32>, vector<1x32xf32> -> vector<1x32xf32>
    %cst_102 = arith.constant dense<0.000000e+00> : vector<1x32xf32>
    %369 = tpu.matmul %367, %9, %cst_102 {dimension_numbers = #tpu.dot_dimension_numbers<[1], [0], [0], [1], [0, 0, 1, 1], [], []>} : vector<1x32xf32>, vector<32x32xf32>, vector<1x32xf32> -> vector<1x32xf32>
    %370 = arith.addf %368, %369 : vector<1x32xf32>
    %371 = arith.addf %370, %10 : vector<1x32xf32>
    %372 = math.tanh %371 : vector<1x32xf32>
    %cst_103 = arith.constant dense<0.000000e+00> : vector<1x48xf32>
    %373 = tpu.matmul %372, %11, %cst_103 {dimension_numbers = #tpu.dot_dimension_numbers<[1], [0], [0], [1], [0, 0, 1, 1], [], []>} : vector<1x32xf32>, vector<32x48xf32>, vector<1x48xf32> -> vector<1x48xf32>
    %374 = arith.addf %373, %12 : vector<1x48xf32>
    %cst_104 = arith.constant dense<0xFF800000> : vector<1xf32>
    %375 = vector.multi_reduction <maximumf>, %374, %cst_104 [1] : vector<1x48xf32> to vector<1xf32>
    %376 = vector.shape_cast %375 : vector<1xf32> to vector<1x1xf32>
    %377 = vector.broadcast %376 : vector<1x1xf32> to vector<1x48xf32>
    %378 = arith.subf %374, %377 : vector<1x48xf32>
    %379 = math.exp %378 : vector<1x48xf32>
    %cst_105 = arith.constant dense<0.000000e+00> : vector<1xf32>
    %380 = vector.multi_reduction <add>, %379, %cst_105 [1] : vector<1x48xf32> to vector<1xf32>
    %381 = vector.shape_cast %380 : vector<1xf32> to vector<1x1xf32>
    %382 = tpu.reciprocal %381 {approx = true} : vector<1x1xf32> -> vector<1x1xf32>
    %383 = vector.broadcast %376 : vector<1x1xf32> to vector<1x48xf32>
    %384 = arith.cmpf oge, %374, %383 : vector<1x48xf32>
    %c48_i32_106 = arith.constant 48 : i32
    %385 = vector.broadcast %c48_i32_106 : i32 to vector<1x48xi32>
    %386 = arith.select %384, %14, %385 : vector<1x48xi1>, vector<1x48xi32>
    %cst_107 = arith.constant dense<2147483647> : vector<1xi32>
    %387 = vector.multi_reduction <minsi>, %386, %cst_107 [1] : vector<1x48xi32> to vector<1xi32>
    %388 = vector.shape_cast %387 : vector<1xi32> to vector<1x1xi32>
    %389 = vector.broadcast %c4_i32 : i32 to vector<1x10xi32>
    %390 = arith.cmpi eq, %13, %389 : vector<1x10xi32>
    %391 = vector.shape_cast %388 : vector<1x1xi32> to vector<1x1xi32>
    %392 = vector.broadcast %391 : vector<1x1xi32> to vector<1x10xi32>
    %393 = arith.select %390, %392, %316 : vector<1x10xi1>, vector<1x10xi32>
    %394 = vector.broadcast %c4_i32 : i32 to vector<1x10xi32>
    %395 = arith.cmpi eq, %13, %394 : vector<1x10xi32>
    %396 = vector.shape_cast %382 : vector<1x1xf32> to vector<1x1xf32>
    %397 = vector.broadcast %396 : vector<1x1xf32> to vector<1x10xf32>
    %398 = arith.select %395, %397, %321 : vector<1x10xi1>, vector<1x10xf32>
    %399 = vector.broadcast %388 : vector<1x1xi32> to vector<1x48xi32>
    %400 = arith.cmpi eq, %14, %399 : vector<1x48xi32>
    %401 = arith.extui %400 : vector<1x48xi1> to vector<1x48xi32>
    %402 = arith.sitofp %401 : vector<1x48xi32> to vector<1x48xf32>
    %cst_108 = arith.constant dense<0.000000e+00> : vector<1x32xf32>
    %403 = tpu.matmul %402, %0, %cst_108 {dimension_numbers = #tpu.dot_dimension_numbers<[1], [0], [0], [1], [0, 0, 1, 1], [], []>} : vector<1x48xf32>, vector<48x32xf32>, vector<1x32xf32> -> vector<1x32xf32>
    %c5_i32 = arith.constant 5 : i32
    %cst_109 = arith.constant dense<0.000000e+00> : vector<1x96xf32>
    %404 = tpu.matmul %403, %2, %cst_109 {dimension_numbers = #tpu.dot_dimension_numbers<[1], [0], [0], [1], [0, 0, 1, 1], [], []>} : vector<1x32xf32>, vector<32x96xf32>, vector<1x96xf32> -> vector<1x96xf32>
    %405 = arith.addf %404, %4 : vector<1x96xf32>
    %cst_110 = arith.constant dense<0.000000e+00> : vector<1x96xf32>
    %406 = tpu.matmul %356, %3, %cst_110 {dimension_numbers = #tpu.dot_dimension_numbers<[1], [0], [0], [1], [0, 0, 1, 1], [], []>} : vector<1x32xf32>, vector<32x96xf32>, vector<1x96xf32> -> vector<1x96xf32>
    %407 = arith.addf %406, %5 : vector<1x96xf32>
    %408 = vector.extract_strided_slice %405 {offsets = [0, 0], sizes = [1, 32], strides = [1, 1]} : vector<1x96xf32> to vector<1x32xf32>
    %409 = vector.extract_strided_slice %407 {offsets = [0, 0], sizes = [1, 32], strides = [1, 1]} : vector<1x96xf32> to vector<1x32xf32>
    %410 = arith.addf %408, %409 : vector<1x32xf32>
    %411 = arith.negf %410 : vector<1x32xf32>
    %412 = math.exp %411 : vector<1x32xf32>
    %cst_111 = arith.constant 1.000000e+00 : f32
    %413 = vector.broadcast %cst_111 : f32 to vector<1x32xf32>
    %414 = arith.addf %413, %412 : vector<1x32xf32>
    %415 = arith.divf %413, %414 : vector<1x32xf32>
    %416 = vector.extract_strided_slice %405 {offsets = [0, 32], sizes = [1, 32], strides = [1, 1]} : vector<1x96xf32> to vector<1x32xf32>
    %417 = vector.extract_strided_slice %407 {offsets = [0, 32], sizes = [1, 32], strides = [1, 1]} : vector<1x96xf32> to vector<1x32xf32>
    %418 = arith.addf %416, %417 : vector<1x32xf32>
    %419 = arith.negf %418 : vector<1x32xf32>
    %420 = math.exp %419 : vector<1x32xf32>
    %cst_112 = arith.constant 1.000000e+00 : f32
    %421 = vector.broadcast %cst_112 : f32 to vector<1x32xf32>
    %422 = arith.addf %421, %420 : vector<1x32xf32>
    %423 = arith.divf %421, %422 : vector<1x32xf32>
    %424 = vector.extract_strided_slice %405 {offsets = [0, 64], sizes = [1, 32], strides = [1, 1]} : vector<1x96xf32> to vector<1x32xf32>
    %425 = vector.extract_strided_slice %407 {offsets = [0, 64], sizes = [1, 32], strides = [1, 1]} : vector<1x96xf32> to vector<1x32xf32>
    %426 = arith.mulf %415, %425 : vector<1x32xf32>
    %427 = arith.addf %424, %426 : vector<1x32xf32>
    %428 = math.tanh %427 : vector<1x32xf32>
    %cst_113 = arith.constant 1.000000e+00 : f32
    %429 = vector.broadcast %cst_113 : f32 to vector<1x32xf32>
    %430 = arith.subf %429, %423 : vector<1x32xf32>
    %431 = arith.mulf %430, %428 : vector<1x32xf32>
    %432 = arith.mulf %423, %356 : vector<1x32xf32>
    %433 = arith.addf %431, %432 : vector<1x32xf32>
    %cst_114 = arith.constant dense<0.000000e+00> : vector<1x8xf32>
    %434 = tpu.matmul %433, %1, %cst_114 {dimension_numbers = #tpu.dot_dimension_numbers<[1], [1], [0], [0], [0, 0, 1, 0], [], []>} : vector<1x32xf32>, vector<8x32xf32>, vector<1x8xf32> -> vector<1x8xf32>
    %cst_115 = arith.constant dense<0xFF800000> : vector<1xf32>
    %435 = vector.multi_reduction <maximumf>, %434, %cst_115 [1] : vector<1x8xf32> to vector<1xf32>
    %436 = vector.shape_cast %435 : vector<1xf32> to vector<1x1xf32>
    %437 = vector.broadcast %436 : vector<1x1xf32> to vector<1x8xf32>
    %438 = arith.subf %434, %437 : vector<1x8xf32>
    %439 = math.exp %438 : vector<1x8xf32>
    %cst_116 = arith.constant dense<0.000000e+00> : vector<1xf32>
    %440 = vector.multi_reduction <add>, %439, %cst_116 [1] : vector<1x8xf32> to vector<1xf32>
    %441 = vector.shape_cast %440 : vector<1xf32> to vector<1x1xf32>
    %442 = vector.broadcast %441 : vector<1x1xf32> to vector<1x8xf32>
    %443 = arith.divf %439, %442 : vector<1x8xf32>
    %cst_117 = arith.constant dense<0.000000e+00> : vector<1x32xf32>
    %444 = tpu.matmul %443, %1, %cst_117 {dimension_numbers = #tpu.dot_dimension_numbers<[1], [0], [0], [1], [0, 0, 1, 1], [], []>} : vector<1x8xf32>, vector<8x32xf32>, vector<1x32xf32> -> vector<1x32xf32>
    %cst_118 = arith.constant dense<0.000000e+00> : vector<1x32xf32>
    %445 = tpu.matmul %433, %7, %cst_118 {dimension_numbers = #tpu.dot_dimension_numbers<[1], [0], [0], [1], [0, 0, 1, 1], [], []>} : vector<1x32xf32>, vector<32x32xf32>, vector<1x32xf32> -> vector<1x32xf32>
    %cst_119 = arith.constant dense<0.000000e+00> : vector<1x32xf32>
    %446 = tpu.matmul %444, %9, %cst_119 {dimension_numbers = #tpu.dot_dimension_numbers<[1], [0], [0], [1], [0, 0, 1, 1], [], []>} : vector<1x32xf32>, vector<32x32xf32>, vector<1x32xf32> -> vector<1x32xf32>
    %447 = arith.addf %445, %446 : vector<1x32xf32>
    %448 = arith.addf %447, %10 : vector<1x32xf32>
    %449 = math.tanh %448 : vector<1x32xf32>
    %cst_120 = arith.constant dense<0.000000e+00> : vector<1x48xf32>
    %450 = tpu.matmul %449, %11, %cst_120 {dimension_numbers = #tpu.dot_dimension_numbers<[1], [0], [0], [1], [0, 0, 1, 1], [], []>} : vector<1x32xf32>, vector<32x48xf32>, vector<1x48xf32> -> vector<1x48xf32>
    %451 = arith.addf %450, %12 : vector<1x48xf32>
    %cst_121 = arith.constant dense<0xFF800000> : vector<1xf32>
    %452 = vector.multi_reduction <maximumf>, %451, %cst_121 [1] : vector<1x48xf32> to vector<1xf32>
    %453 = vector.shape_cast %452 : vector<1xf32> to vector<1x1xf32>
    %454 = vector.broadcast %453 : vector<1x1xf32> to vector<1x48xf32>
    %455 = arith.subf %451, %454 : vector<1x48xf32>
    %456 = math.exp %455 : vector<1x48xf32>
    %cst_122 = arith.constant dense<0.000000e+00> : vector<1xf32>
    %457 = vector.multi_reduction <add>, %456, %cst_122 [1] : vector<1x48xf32> to vector<1xf32>
    %458 = vector.shape_cast %457 : vector<1xf32> to vector<1x1xf32>
    %459 = tpu.reciprocal %458 {approx = true} : vector<1x1xf32> -> vector<1x1xf32>
    %460 = vector.broadcast %453 : vector<1x1xf32> to vector<1x48xf32>
    %461 = arith.cmpf oge, %451, %460 : vector<1x48xf32>
    %c48_i32_123 = arith.constant 48 : i32
    %462 = vector.broadcast %c48_i32_123 : i32 to vector<1x48xi32>
    %463 = arith.select %461, %14, %462 : vector<1x48xi1>, vector<1x48xi32>
    %cst_124 = arith.constant dense<2147483647> : vector<1xi32>
    %464 = vector.multi_reduction <minsi>, %463, %cst_124 [1] : vector<1x48xi32> to vector<1xi32>
    %465 = vector.shape_cast %464 : vector<1xi32> to vector<1x1xi32>
    %466 = vector.broadcast %c5_i32 : i32 to vector<1x10xi32>
    %467 = arith.cmpi eq, %13, %466 : vector<1x10xi32>
    %468 = vector.shape_cast %465 : vector<1x1xi32> to vector<1x1xi32>
    %469 = vector.broadcast %468 : vector<1x1xi32> to vector<1x10xi32>
    %470 = arith.select %467, %469, %393 : vector<1x10xi1>, vector<1x10xi32>
    %471 = vector.broadcast %c5_i32 : i32 to vector<1x10xi32>
    %472 = arith.cmpi eq, %13, %471 : vector<1x10xi32>
    %473 = vector.shape_cast %459 : vector<1x1xf32> to vector<1x1xf32>
    %474 = vector.broadcast %473 : vector<1x1xf32> to vector<1x10xf32>
    %475 = arith.select %472, %474, %398 : vector<1x10xi1>, vector<1x10xf32>
    %476 = vector.broadcast %465 : vector<1x1xi32> to vector<1x48xi32>
    %477 = arith.cmpi eq, %14, %476 : vector<1x48xi32>
    %478 = arith.extui %477 : vector<1x48xi1> to vector<1x48xi32>
    %479 = arith.sitofp %478 : vector<1x48xi32> to vector<1x48xf32>
    %cst_125 = arith.constant dense<0.000000e+00> : vector<1x32xf32>
    %480 = tpu.matmul %479, %0, %cst_125 {dimension_numbers = #tpu.dot_dimension_numbers<[1], [0], [0], [1], [0, 0, 1, 1], [], []>} : vector<1x48xf32>, vector<48x32xf32>, vector<1x32xf32> -> vector<1x32xf32>
    %c6_i32 = arith.constant 6 : i32
    %cst_126 = arith.constant dense<0.000000e+00> : vector<1x96xf32>
    %481 = tpu.matmul %480, %2, %cst_126 {dimension_numbers = #tpu.dot_dimension_numbers<[1], [0], [0], [1], [0, 0, 1, 1], [], []>} : vector<1x32xf32>, vector<32x96xf32>, vector<1x96xf32> -> vector<1x96xf32>
    %482 = arith.addf %481, %4 : vector<1x96xf32>
    %cst_127 = arith.constant dense<0.000000e+00> : vector<1x96xf32>
    %483 = tpu.matmul %433, %3, %cst_127 {dimension_numbers = #tpu.dot_dimension_numbers<[1], [0], [0], [1], [0, 0, 1, 1], [], []>} : vector<1x32xf32>, vector<32x96xf32>, vector<1x96xf32> -> vector<1x96xf32>
    %484 = arith.addf %483, %5 : vector<1x96xf32>
    %485 = vector.extract_strided_slice %482 {offsets = [0, 0], sizes = [1, 32], strides = [1, 1]} : vector<1x96xf32> to vector<1x32xf32>
    %486 = vector.extract_strided_slice %484 {offsets = [0, 0], sizes = [1, 32], strides = [1, 1]} : vector<1x96xf32> to vector<1x32xf32>
    %487 = arith.addf %485, %486 : vector<1x32xf32>
    %488 = arith.negf %487 : vector<1x32xf32>
    %489 = math.exp %488 : vector<1x32xf32>
    %cst_128 = arith.constant 1.000000e+00 : f32
    %490 = vector.broadcast %cst_128 : f32 to vector<1x32xf32>
    %491 = arith.addf %490, %489 : vector<1x32xf32>
    %492 = arith.divf %490, %491 : vector<1x32xf32>
    %493 = vector.extract_strided_slice %482 {offsets = [0, 32], sizes = [1, 32], strides = [1, 1]} : vector<1x96xf32> to vector<1x32xf32>
    %494 = vector.extract_strided_slice %484 {offsets = [0, 32], sizes = [1, 32], strides = [1, 1]} : vector<1x96xf32> to vector<1x32xf32>
    %495 = arith.addf %493, %494 : vector<1x32xf32>
    %496 = arith.negf %495 : vector<1x32xf32>
    %497 = math.exp %496 : vector<1x32xf32>
    %cst_129 = arith.constant 1.000000e+00 : f32
    %498 = vector.broadcast %cst_129 : f32 to vector<1x32xf32>
    %499 = arith.addf %498, %497 : vector<1x32xf32>
    %500 = arith.divf %498, %499 : vector<1x32xf32>
    %501 = vector.extract_strided_slice %482 {offsets = [0, 64], sizes = [1, 32], strides = [1, 1]} : vector<1x96xf32> to vector<1x32xf32>
    %502 = vector.extract_strided_slice %484 {offsets = [0, 64], sizes = [1, 32], strides = [1, 1]} : vector<1x96xf32> to vector<1x32xf32>
    %503 = arith.mulf %492, %502 : vector<1x32xf32>
    %504 = arith.addf %501, %503 : vector<1x32xf32>
    %505 = math.tanh %504 : vector<1x32xf32>
    %cst_130 = arith.constant 1.000000e+00 : f32
    %506 = vector.broadcast %cst_130 : f32 to vector<1x32xf32>
    %507 = arith.subf %506, %500 : vector<1x32xf32>
    %508 = arith.mulf %507, %505 : vector<1x32xf32>
    %509 = arith.mulf %500, %433 : vector<1x32xf32>
    %510 = arith.addf %508, %509 : vector<1x32xf32>
    %cst_131 = arith.constant dense<0.000000e+00> : vector<1x8xf32>
    %511 = tpu.matmul %510, %1, %cst_131 {dimension_numbers = #tpu.dot_dimension_numbers<[1], [1], [0], [0], [0, 0, 1, 0], [], []>} : vector<1x32xf32>, vector<8x32xf32>, vector<1x8xf32> -> vector<1x8xf32>
    %cst_132 = arith.constant dense<0xFF800000> : vector<1xf32>
    %512 = vector.multi_reduction <maximumf>, %511, %cst_132 [1] : vector<1x8xf32> to vector<1xf32>
    %513 = vector.shape_cast %512 : vector<1xf32> to vector<1x1xf32>
    %514 = vector.broadcast %513 : vector<1x1xf32> to vector<1x8xf32>
    %515 = arith.subf %511, %514 : vector<1x8xf32>
    %516 = math.exp %515 : vector<1x8xf32>
    %cst_133 = arith.constant dense<0.000000e+00> : vector<1xf32>
    %517 = vector.multi_reduction <add>, %516, %cst_133 [1] : vector<1x8xf32> to vector<1xf32>
    %518 = vector.shape_cast %517 : vector<1xf32> to vector<1x1xf32>
    %519 = vector.broadcast %518 : vector<1x1xf32> to vector<1x8xf32>
    %520 = arith.divf %516, %519 : vector<1x8xf32>
    %cst_134 = arith.constant dense<0.000000e+00> : vector<1x32xf32>
    %521 = tpu.matmul %520, %1, %cst_134 {dimension_numbers = #tpu.dot_dimension_numbers<[1], [0], [0], [1], [0, 0, 1, 1], [], []>} : vector<1x8xf32>, vector<8x32xf32>, vector<1x32xf32> -> vector<1x32xf32>
    %cst_135 = arith.constant dense<0.000000e+00> : vector<1x32xf32>
    %522 = tpu.matmul %510, %7, %cst_135 {dimension_numbers = #tpu.dot_dimension_numbers<[1], [0], [0], [1], [0, 0, 1, 1], [], []>} : vector<1x32xf32>, vector<32x32xf32>, vector<1x32xf32> -> vector<1x32xf32>
    %cst_136 = arith.constant dense<0.000000e+00> : vector<1x32xf32>
    %523 = tpu.matmul %521, %9, %cst_136 {dimension_numbers = #tpu.dot_dimension_numbers<[1], [0], [0], [1], [0, 0, 1, 1], [], []>} : vector<1x32xf32>, vector<32x32xf32>, vector<1x32xf32> -> vector<1x32xf32>
    %524 = arith.addf %522, %523 : vector<1x32xf32>
    %525 = arith.addf %524, %10 : vector<1x32xf32>
    %526 = math.tanh %525 : vector<1x32xf32>
    %cst_137 = arith.constant dense<0.000000e+00> : vector<1x48xf32>
    %527 = tpu.matmul %526, %11, %cst_137 {dimension_numbers = #tpu.dot_dimension_numbers<[1], [0], [0], [1], [0, 0, 1, 1], [], []>} : vector<1x32xf32>, vector<32x48xf32>, vector<1x48xf32> -> vector<1x48xf32>
    %528 = arith.addf %527, %12 : vector<1x48xf32>
    %cst_138 = arith.constant dense<0xFF800000> : vector<1xf32>
    %529 = vector.multi_reduction <maximumf>, %528, %cst_138 [1] : vector<1x48xf32> to vector<1xf32>
    %530 = vector.shape_cast %529 : vector<1xf32> to vector<1x1xf32>
    %531 = vector.broadcast %530 : vector<1x1xf32> to vector<1x48xf32>
    %532 = arith.subf %528, %531 : vector<1x48xf32>
    %533 = math.exp %532 : vector<1x48xf32>
    %cst_139 = arith.constant dense<0.000000e+00> : vector<1xf32>
    %534 = vector.multi_reduction <add>, %533, %cst_139 [1] : vector<1x48xf32> to vector<1xf32>
    %535 = vector.shape_cast %534 : vector<1xf32> to vector<1x1xf32>
    %536 = tpu.reciprocal %535 {approx = true} : vector<1x1xf32> -> vector<1x1xf32>
    %537 = vector.broadcast %530 : vector<1x1xf32> to vector<1x48xf32>
    %538 = arith.cmpf oge, %528, %537 : vector<1x48xf32>
    %c48_i32_140 = arith.constant 48 : i32
    %539 = vector.broadcast %c48_i32_140 : i32 to vector<1x48xi32>
    %540 = arith.select %538, %14, %539 : vector<1x48xi1>, vector<1x48xi32>
    %cst_141 = arith.constant dense<2147483647> : vector<1xi32>
    %541 = vector.multi_reduction <minsi>, %540, %cst_141 [1] : vector<1x48xi32> to vector<1xi32>
    %542 = vector.shape_cast %541 : vector<1xi32> to vector<1x1xi32>
    %543 = vector.broadcast %c6_i32 : i32 to vector<1x10xi32>
    %544 = arith.cmpi eq, %13, %543 : vector<1x10xi32>
    %545 = vector.shape_cast %542 : vector<1x1xi32> to vector<1x1xi32>
    %546 = vector.broadcast %545 : vector<1x1xi32> to vector<1x10xi32>
    %547 = arith.select %544, %546, %470 : vector<1x10xi1>, vector<1x10xi32>
    %548 = vector.broadcast %c6_i32 : i32 to vector<1x10xi32>
    %549 = arith.cmpi eq, %13, %548 : vector<1x10xi32>
    %550 = vector.shape_cast %536 : vector<1x1xf32> to vector<1x1xf32>
    %551 = vector.broadcast %550 : vector<1x1xf32> to vector<1x10xf32>
    %552 = arith.select %549, %551, %475 : vector<1x10xi1>, vector<1x10xf32>
    %553 = vector.broadcast %542 : vector<1x1xi32> to vector<1x48xi32>
    %554 = arith.cmpi eq, %14, %553 : vector<1x48xi32>
    %555 = arith.extui %554 : vector<1x48xi1> to vector<1x48xi32>
    %556 = arith.sitofp %555 : vector<1x48xi32> to vector<1x48xf32>
    %cst_142 = arith.constant dense<0.000000e+00> : vector<1x32xf32>
    %557 = tpu.matmul %556, %0, %cst_142 {dimension_numbers = #tpu.dot_dimension_numbers<[1], [0], [0], [1], [0, 0, 1, 1], [], []>} : vector<1x48xf32>, vector<48x32xf32>, vector<1x32xf32> -> vector<1x32xf32>
    %c7_i32 = arith.constant 7 : i32
    %cst_143 = arith.constant dense<0.000000e+00> : vector<1x96xf32>
    %558 = tpu.matmul %557, %2, %cst_143 {dimension_numbers = #tpu.dot_dimension_numbers<[1], [0], [0], [1], [0, 0, 1, 1], [], []>} : vector<1x32xf32>, vector<32x96xf32>, vector<1x96xf32> -> vector<1x96xf32>
    %559 = arith.addf %558, %4 : vector<1x96xf32>
    %cst_144 = arith.constant dense<0.000000e+00> : vector<1x96xf32>
    %560 = tpu.matmul %510, %3, %cst_144 {dimension_numbers = #tpu.dot_dimension_numbers<[1], [0], [0], [1], [0, 0, 1, 1], [], []>} : vector<1x32xf32>, vector<32x96xf32>, vector<1x96xf32> -> vector<1x96xf32>
    %561 = arith.addf %560, %5 : vector<1x96xf32>
    %562 = vector.extract_strided_slice %559 {offsets = [0, 0], sizes = [1, 32], strides = [1, 1]} : vector<1x96xf32> to vector<1x32xf32>
    %563 = vector.extract_strided_slice %561 {offsets = [0, 0], sizes = [1, 32], strides = [1, 1]} : vector<1x96xf32> to vector<1x32xf32>
    %564 = arith.addf %562, %563 : vector<1x32xf32>
    %565 = arith.negf %564 : vector<1x32xf32>
    %566 = math.exp %565 : vector<1x32xf32>
    %cst_145 = arith.constant 1.000000e+00 : f32
    %567 = vector.broadcast %cst_145 : f32 to vector<1x32xf32>
    %568 = arith.addf %567, %566 : vector<1x32xf32>
    %569 = arith.divf %567, %568 : vector<1x32xf32>
    %570 = vector.extract_strided_slice %559 {offsets = [0, 32], sizes = [1, 32], strides = [1, 1]} : vector<1x96xf32> to vector<1x32xf32>
    %571 = vector.extract_strided_slice %561 {offsets = [0, 32], sizes = [1, 32], strides = [1, 1]} : vector<1x96xf32> to vector<1x32xf32>
    %572 = arith.addf %570, %571 : vector<1x32xf32>
    %573 = arith.negf %572 : vector<1x32xf32>
    %574 = math.exp %573 : vector<1x32xf32>
    %cst_146 = arith.constant 1.000000e+00 : f32
    %575 = vector.broadcast %cst_146 : f32 to vector<1x32xf32>
    %576 = arith.addf %575, %574 : vector<1x32xf32>
    %577 = arith.divf %575, %576 : vector<1x32xf32>
    %578 = vector.extract_strided_slice %559 {offsets = [0, 64], sizes = [1, 32], strides = [1, 1]} : vector<1x96xf32> to vector<1x32xf32>
    %579 = vector.extract_strided_slice %561 {offsets = [0, 64], sizes = [1, 32], strides = [1, 1]} : vector<1x96xf32> to vector<1x32xf32>
    %580 = arith.mulf %569, %579 : vector<1x32xf32>
    %581 = arith.addf %578, %580 : vector<1x32xf32>
    %582 = math.tanh %581 : vector<1x32xf32>
    %cst_147 = arith.constant 1.000000e+00 : f32
    %583 = vector.broadcast %cst_147 : f32 to vector<1x32xf32>
    %584 = arith.subf %583, %577 : vector<1x32xf32>
    %585 = arith.mulf %584, %582 : vector<1x32xf32>
    %586 = arith.mulf %577, %510 : vector<1x32xf32>
    %587 = arith.addf %585, %586 : vector<1x32xf32>
    %cst_148 = arith.constant dense<0.000000e+00> : vector<1x8xf32>
    %588 = tpu.matmul %587, %1, %cst_148 {dimension_numbers = #tpu.dot_dimension_numbers<[1], [1], [0], [0], [0, 0, 1, 0], [], []>} : vector<1x32xf32>, vector<8x32xf32>, vector<1x8xf32> -> vector<1x8xf32>
    %cst_149 = arith.constant dense<0xFF800000> : vector<1xf32>
    %589 = vector.multi_reduction <maximumf>, %588, %cst_149 [1] : vector<1x8xf32> to vector<1xf32>
    %590 = vector.shape_cast %589 : vector<1xf32> to vector<1x1xf32>
    %591 = vector.broadcast %590 : vector<1x1xf32> to vector<1x8xf32>
    %592 = arith.subf %588, %591 : vector<1x8xf32>
    %593 = math.exp %592 : vector<1x8xf32>
    %cst_150 = arith.constant dense<0.000000e+00> : vector<1xf32>
    %594 = vector.multi_reduction <add>, %593, %cst_150 [1] : vector<1x8xf32> to vector<1xf32>
    %595 = vector.shape_cast %594 : vector<1xf32> to vector<1x1xf32>
    %596 = vector.broadcast %595 : vector<1x1xf32> to vector<1x8xf32>
    %597 = arith.divf %593, %596 : vector<1x8xf32>
    %cst_151 = arith.constant dense<0.000000e+00> : vector<1x32xf32>
    %598 = tpu.matmul %597, %1, %cst_151 {dimension_numbers = #tpu.dot_dimension_numbers<[1], [0], [0], [1], [0, 0, 1, 1], [], []>} : vector<1x8xf32>, vector<8x32xf32>, vector<1x32xf32> -> vector<1x32xf32>
    %cst_152 = arith.constant dense<0.000000e+00> : vector<1x32xf32>
    %599 = tpu.matmul %587, %7, %cst_152 {dimension_numbers = #tpu.dot_dimension_numbers<[1], [0], [0], [1], [0, 0, 1, 1], [], []>} : vector<1x32xf32>, vector<32x32xf32>, vector<1x32xf32> -> vector<1x32xf32>
    %cst_153 = arith.constant dense<0.000000e+00> : vector<1x32xf32>
    %600 = tpu.matmul %598, %9, %cst_153 {dimension_numbers = #tpu.dot_dimension_numbers<[1], [0], [0], [1], [0, 0, 1, 1], [], []>} : vector<1x32xf32>, vector<32x32xf32>, vector<1x32xf32> -> vector<1x32xf32>
    %601 = arith.addf %599, %600 : vector<1x32xf32>
    %602 = arith.addf %601, %10 : vector<1x32xf32>
    %603 = math.tanh %602 : vector<1x32xf32>
    %cst_154 = arith.constant dense<0.000000e+00> : vector<1x48xf32>
    %604 = tpu.matmul %603, %11, %cst_154 {dimension_numbers = #tpu.dot_dimension_numbers<[1], [0], [0], [1], [0, 0, 1, 1], [], []>} : vector<1x32xf32>, vector<32x48xf32>, vector<1x48xf32> -> vector<1x48xf32>
    %605 = arith.addf %604, %12 : vector<1x48xf32>
    %cst_155 = arith.constant dense<0xFF800000> : vector<1xf32>
    %606 = vector.multi_reduction <maximumf>, %605, %cst_155 [1] : vector<1x48xf32> to vector<1xf32>
    %607 = vector.shape_cast %606 : vector<1xf32> to vector<1x1xf32>
    %608 = vector.broadcast %607 : vector<1x1xf32> to vector<1x48xf32>
    %609 = arith.subf %605, %608 : vector<1x48xf32>
    %610 = math.exp %609 : vector<1x48xf32>
    %cst_156 = arith.constant dense<0.000000e+00> : vector<1xf32>
    %611 = vector.multi_reduction <add>, %610, %cst_156 [1] : vector<1x48xf32> to vector<1xf32>
    %612 = vector.shape_cast %611 : vector<1xf32> to vector<1x1xf32>
    %613 = tpu.reciprocal %612 {approx = true} : vector<1x1xf32> -> vector<1x1xf32>
    %614 = vector.broadcast %607 : vector<1x1xf32> to vector<1x48xf32>
    %615 = arith.cmpf oge, %605, %614 : vector<1x48xf32>
    %c48_i32_157 = arith.constant 48 : i32
    %616 = vector.broadcast %c48_i32_157 : i32 to vector<1x48xi32>
    %617 = arith.select %615, %14, %616 : vector<1x48xi1>, vector<1x48xi32>
    %cst_158 = arith.constant dense<2147483647> : vector<1xi32>
    %618 = vector.multi_reduction <minsi>, %617, %cst_158 [1] : vector<1x48xi32> to vector<1xi32>
    %619 = vector.shape_cast %618 : vector<1xi32> to vector<1x1xi32>
    %620 = vector.broadcast %c7_i32 : i32 to vector<1x10xi32>
    %621 = arith.cmpi eq, %13, %620 : vector<1x10xi32>
    %622 = vector.shape_cast %619 : vector<1x1xi32> to vector<1x1xi32>
    %623 = vector.broadcast %622 : vector<1x1xi32> to vector<1x10xi32>
    %624 = arith.select %621, %623, %547 : vector<1x10xi1>, vector<1x10xi32>
    %625 = vector.broadcast %c7_i32 : i32 to vector<1x10xi32>
    %626 = arith.cmpi eq, %13, %625 : vector<1x10xi32>
    %627 = vector.shape_cast %613 : vector<1x1xf32> to vector<1x1xf32>
    %628 = vector.broadcast %627 : vector<1x1xf32> to vector<1x10xf32>
    %629 = arith.select %626, %628, %552 : vector<1x10xi1>, vector<1x10xf32>
    %630 = vector.broadcast %619 : vector<1x1xi32> to vector<1x48xi32>
    %631 = arith.cmpi eq, %14, %630 : vector<1x48xi32>
    %632 = arith.extui %631 : vector<1x48xi1> to vector<1x48xi32>
    %633 = arith.sitofp %632 : vector<1x48xi32> to vector<1x48xf32>
    %cst_159 = arith.constant dense<0.000000e+00> : vector<1x32xf32>
    %634 = tpu.matmul %633, %0, %cst_159 {dimension_numbers = #tpu.dot_dimension_numbers<[1], [0], [0], [1], [0, 0, 1, 1], [], []>} : vector<1x48xf32>, vector<48x32xf32>, vector<1x32xf32> -> vector<1x32xf32>
    %c8_i32 = arith.constant 8 : i32
    %cst_160 = arith.constant dense<0.000000e+00> : vector<1x96xf32>
    %635 = tpu.matmul %634, %2, %cst_160 {dimension_numbers = #tpu.dot_dimension_numbers<[1], [0], [0], [1], [0, 0, 1, 1], [], []>} : vector<1x32xf32>, vector<32x96xf32>, vector<1x96xf32> -> vector<1x96xf32>
    %636 = arith.addf %635, %4 : vector<1x96xf32>
    %cst_161 = arith.constant dense<0.000000e+00> : vector<1x96xf32>
    %637 = tpu.matmul %587, %3, %cst_161 {dimension_numbers = #tpu.dot_dimension_numbers<[1], [0], [0], [1], [0, 0, 1, 1], [], []>} : vector<1x32xf32>, vector<32x96xf32>, vector<1x96xf32> -> vector<1x96xf32>
    %638 = arith.addf %637, %5 : vector<1x96xf32>
    %639 = vector.extract_strided_slice %636 {offsets = [0, 0], sizes = [1, 32], strides = [1, 1]} : vector<1x96xf32> to vector<1x32xf32>
    %640 = vector.extract_strided_slice %638 {offsets = [0, 0], sizes = [1, 32], strides = [1, 1]} : vector<1x96xf32> to vector<1x32xf32>
    %641 = arith.addf %639, %640 : vector<1x32xf32>
    %642 = arith.negf %641 : vector<1x32xf32>
    %643 = math.exp %642 : vector<1x32xf32>
    %cst_162 = arith.constant 1.000000e+00 : f32
    %644 = vector.broadcast %cst_162 : f32 to vector<1x32xf32>
    %645 = arith.addf %644, %643 : vector<1x32xf32>
    %646 = arith.divf %644, %645 : vector<1x32xf32>
    %647 = vector.extract_strided_slice %636 {offsets = [0, 32], sizes = [1, 32], strides = [1, 1]} : vector<1x96xf32> to vector<1x32xf32>
    %648 = vector.extract_strided_slice %638 {offsets = [0, 32], sizes = [1, 32], strides = [1, 1]} : vector<1x96xf32> to vector<1x32xf32>
    %649 = arith.addf %647, %648 : vector<1x32xf32>
    %650 = arith.negf %649 : vector<1x32xf32>
    %651 = math.exp %650 : vector<1x32xf32>
    %cst_163 = arith.constant 1.000000e+00 : f32
    %652 = vector.broadcast %cst_163 : f32 to vector<1x32xf32>
    %653 = arith.addf %652, %651 : vector<1x32xf32>
    %654 = arith.divf %652, %653 : vector<1x32xf32>
    %655 = vector.extract_strided_slice %636 {offsets = [0, 64], sizes = [1, 32], strides = [1, 1]} : vector<1x96xf32> to vector<1x32xf32>
    %656 = vector.extract_strided_slice %638 {offsets = [0, 64], sizes = [1, 32], strides = [1, 1]} : vector<1x96xf32> to vector<1x32xf32>
    %657 = arith.mulf %646, %656 : vector<1x32xf32>
    %658 = arith.addf %655, %657 : vector<1x32xf32>
    %659 = math.tanh %658 : vector<1x32xf32>
    %cst_164 = arith.constant 1.000000e+00 : f32
    %660 = vector.broadcast %cst_164 : f32 to vector<1x32xf32>
    %661 = arith.subf %660, %654 : vector<1x32xf32>
    %662 = arith.mulf %661, %659 : vector<1x32xf32>
    %663 = arith.mulf %654, %587 : vector<1x32xf32>
    %664 = arith.addf %662, %663 : vector<1x32xf32>
    %cst_165 = arith.constant dense<0.000000e+00> : vector<1x8xf32>
    %665 = tpu.matmul %664, %1, %cst_165 {dimension_numbers = #tpu.dot_dimension_numbers<[1], [1], [0], [0], [0, 0, 1, 0], [], []>} : vector<1x32xf32>, vector<8x32xf32>, vector<1x8xf32> -> vector<1x8xf32>
    %cst_166 = arith.constant dense<0xFF800000> : vector<1xf32>
    %666 = vector.multi_reduction <maximumf>, %665, %cst_166 [1] : vector<1x8xf32> to vector<1xf32>
    %667 = vector.shape_cast %666 : vector<1xf32> to vector<1x1xf32>
    %668 = vector.broadcast %667 : vector<1x1xf32> to vector<1x8xf32>
    %669 = arith.subf %665, %668 : vector<1x8xf32>
    %670 = math.exp %669 : vector<1x8xf32>
    %cst_167 = arith.constant dense<0.000000e+00> : vector<1xf32>
    %671 = vector.multi_reduction <add>, %670, %cst_167 [1] : vector<1x8xf32> to vector<1xf32>
    %672 = vector.shape_cast %671 : vector<1xf32> to vector<1x1xf32>
    %673 = vector.broadcast %672 : vector<1x1xf32> to vector<1x8xf32>
    %674 = arith.divf %670, %673 : vector<1x8xf32>
    %cst_168 = arith.constant dense<0.000000e+00> : vector<1x32xf32>
    %675 = tpu.matmul %674, %1, %cst_168 {dimension_numbers = #tpu.dot_dimension_numbers<[1], [0], [0], [1], [0, 0, 1, 1], [], []>} : vector<1x8xf32>, vector<8x32xf32>, vector<1x32xf32> -> vector<1x32xf32>
    %cst_169 = arith.constant dense<0.000000e+00> : vector<1x32xf32>
    %676 = tpu.matmul %664, %7, %cst_169 {dimension_numbers = #tpu.dot_dimension_numbers<[1], [0], [0], [1], [0, 0, 1, 1], [], []>} : vector<1x32xf32>, vector<32x32xf32>, vector<1x32xf32> -> vector<1x32xf32>
    %cst_170 = arith.constant dense<0.000000e+00> : vector<1x32xf32>
    %677 = tpu.matmul %675, %9, %cst_170 {dimension_numbers = #tpu.dot_dimension_numbers<[1], [0], [0], [1], [0, 0, 1, 1], [], []>} : vector<1x32xf32>, vector<32x32xf32>, vector<1x32xf32> -> vector<1x32xf32>
    %678 = arith.addf %676, %677 : vector<1x32xf32>
    %679 = arith.addf %678, %10 : vector<1x32xf32>
    %680 = math.tanh %679 : vector<1x32xf32>
    %cst_171 = arith.constant dense<0.000000e+00> : vector<1x48xf32>
    %681 = tpu.matmul %680, %11, %cst_171 {dimension_numbers = #tpu.dot_dimension_numbers<[1], [0], [0], [1], [0, 0, 1, 1], [], []>} : vector<1x32xf32>, vector<32x48xf32>, vector<1x48xf32> -> vector<1x48xf32>
    %682 = arith.addf %681, %12 : vector<1x48xf32>
    %cst_172 = arith.constant dense<0xFF800000> : vector<1xf32>
    %683 = vector.multi_reduction <maximumf>, %682, %cst_172 [1] : vector<1x48xf32> to vector<1xf32>
    %684 = vector.shape_cast %683 : vector<1xf32> to vector<1x1xf32>
    %685 = vector.broadcast %684 : vector<1x1xf32> to vector<1x48xf32>
    %686 = arith.subf %682, %685 : vector<1x48xf32>
    %687 = math.exp %686 : vector<1x48xf32>
    %cst_173 = arith.constant dense<0.000000e+00> : vector<1xf32>
    %688 = vector.multi_reduction <add>, %687, %cst_173 [1] : vector<1x48xf32> to vector<1xf32>
    %689 = vector.shape_cast %688 : vector<1xf32> to vector<1x1xf32>
    %690 = tpu.reciprocal %689 {approx = true} : vector<1x1xf32> -> vector<1x1xf32>
    %691 = vector.broadcast %684 : vector<1x1xf32> to vector<1x48xf32>
    %692 = arith.cmpf oge, %682, %691 : vector<1x48xf32>
    %c48_i32_174 = arith.constant 48 : i32
    %693 = vector.broadcast %c48_i32_174 : i32 to vector<1x48xi32>
    %694 = arith.select %692, %14, %693 : vector<1x48xi1>, vector<1x48xi32>
    %cst_175 = arith.constant dense<2147483647> : vector<1xi32>
    %695 = vector.multi_reduction <minsi>, %694, %cst_175 [1] : vector<1x48xi32> to vector<1xi32>
    %696 = vector.shape_cast %695 : vector<1xi32> to vector<1x1xi32>
    %697 = vector.broadcast %c8_i32 : i32 to vector<1x10xi32>
    %698 = arith.cmpi eq, %13, %697 : vector<1x10xi32>
    %699 = vector.shape_cast %696 : vector<1x1xi32> to vector<1x1xi32>
    %700 = vector.broadcast %699 : vector<1x1xi32> to vector<1x10xi32>
    %701 = arith.select %698, %700, %624 : vector<1x10xi1>, vector<1x10xi32>
    %702 = vector.broadcast %c8_i32 : i32 to vector<1x10xi32>
    %703 = arith.cmpi eq, %13, %702 : vector<1x10xi32>
    %704 = vector.shape_cast %690 : vector<1x1xf32> to vector<1x1xf32>
    %705 = vector.broadcast %704 : vector<1x1xf32> to vector<1x10xf32>
    %706 = arith.select %703, %705, %629 : vector<1x10xi1>, vector<1x10xf32>
    %707 = vector.broadcast %696 : vector<1x1xi32> to vector<1x48xi32>
    %708 = arith.cmpi eq, %14, %707 : vector<1x48xi32>
    %709 = arith.extui %708 : vector<1x48xi1> to vector<1x48xi32>
    %710 = arith.sitofp %709 : vector<1x48xi32> to vector<1x48xf32>
    %cst_176 = arith.constant dense<0.000000e+00> : vector<1x32xf32>
    %711 = tpu.matmul %710, %0, %cst_176 {dimension_numbers = #tpu.dot_dimension_numbers<[1], [0], [0], [1], [0, 0, 1, 1], [], []>} : vector<1x48xf32>, vector<48x32xf32>, vector<1x32xf32> -> vector<1x32xf32>
    %c9_i32 = arith.constant 9 : i32
    %cst_177 = arith.constant dense<0.000000e+00> : vector<1x96xf32>
    %712 = tpu.matmul %711, %2, %cst_177 {dimension_numbers = #tpu.dot_dimension_numbers<[1], [0], [0], [1], [0, 0, 1, 1], [], []>} : vector<1x32xf32>, vector<32x96xf32>, vector<1x96xf32> -> vector<1x96xf32>
    %713 = arith.addf %712, %4 : vector<1x96xf32>
    %cst_178 = arith.constant dense<0.000000e+00> : vector<1x96xf32>
    %714 = tpu.matmul %664, %3, %cst_178 {dimension_numbers = #tpu.dot_dimension_numbers<[1], [0], [0], [1], [0, 0, 1, 1], [], []>} : vector<1x32xf32>, vector<32x96xf32>, vector<1x96xf32> -> vector<1x96xf32>
    %715 = arith.addf %714, %5 : vector<1x96xf32>
    %716 = vector.extract_strided_slice %713 {offsets = [0, 0], sizes = [1, 32], strides = [1, 1]} : vector<1x96xf32> to vector<1x32xf32>
    %717 = vector.extract_strided_slice %715 {offsets = [0, 0], sizes = [1, 32], strides = [1, 1]} : vector<1x96xf32> to vector<1x32xf32>
    %718 = arith.addf %716, %717 : vector<1x32xf32>
    %719 = arith.negf %718 : vector<1x32xf32>
    %720 = math.exp %719 : vector<1x32xf32>
    %cst_179 = arith.constant 1.000000e+00 : f32
    %721 = vector.broadcast %cst_179 : f32 to vector<1x32xf32>
    %722 = arith.addf %721, %720 : vector<1x32xf32>
    %723 = arith.divf %721, %722 : vector<1x32xf32>
    %724 = vector.extract_strided_slice %713 {offsets = [0, 32], sizes = [1, 32], strides = [1, 1]} : vector<1x96xf32> to vector<1x32xf32>
    %725 = vector.extract_strided_slice %715 {offsets = [0, 32], sizes = [1, 32], strides = [1, 1]} : vector<1x96xf32> to vector<1x32xf32>
    %726 = arith.addf %724, %725 : vector<1x32xf32>
    %727 = arith.negf %726 : vector<1x32xf32>
    %728 = math.exp %727 : vector<1x32xf32>
    %cst_180 = arith.constant 1.000000e+00 : f32
    %729 = vector.broadcast %cst_180 : f32 to vector<1x32xf32>
    %730 = arith.addf %729, %728 : vector<1x32xf32>
    %731 = arith.divf %729, %730 : vector<1x32xf32>
    %732 = vector.extract_strided_slice %713 {offsets = [0, 64], sizes = [1, 32], strides = [1, 1]} : vector<1x96xf32> to vector<1x32xf32>
    %733 = vector.extract_strided_slice %715 {offsets = [0, 64], sizes = [1, 32], strides = [1, 1]} : vector<1x96xf32> to vector<1x32xf32>
    %734 = arith.mulf %723, %733 : vector<1x32xf32>
    %735 = arith.addf %732, %734 : vector<1x32xf32>
    %736 = math.tanh %735 : vector<1x32xf32>
    %cst_181 = arith.constant 1.000000e+00 : f32
    %737 = vector.broadcast %cst_181 : f32 to vector<1x32xf32>
    %738 = arith.subf %737, %731 : vector<1x32xf32>
    %739 = arith.mulf %738, %736 : vector<1x32xf32>
    %740 = arith.mulf %731, %664 : vector<1x32xf32>
    %741 = arith.addf %739, %740 : vector<1x32xf32>
    %cst_182 = arith.constant dense<0.000000e+00> : vector<1x8xf32>
    %742 = tpu.matmul %741, %1, %cst_182 {dimension_numbers = #tpu.dot_dimension_numbers<[1], [1], [0], [0], [0, 0, 1, 0], [], []>} : vector<1x32xf32>, vector<8x32xf32>, vector<1x8xf32> -> vector<1x8xf32>
    %cst_183 = arith.constant dense<0xFF800000> : vector<1xf32>
    %743 = vector.multi_reduction <maximumf>, %742, %cst_183 [1] : vector<1x8xf32> to vector<1xf32>
    %744 = vector.shape_cast %743 : vector<1xf32> to vector<1x1xf32>
    %745 = vector.broadcast %744 : vector<1x1xf32> to vector<1x8xf32>
    %746 = arith.subf %742, %745 : vector<1x8xf32>
    %747 = math.exp %746 : vector<1x8xf32>
    %cst_184 = arith.constant dense<0.000000e+00> : vector<1xf32>
    %748 = vector.multi_reduction <add>, %747, %cst_184 [1] : vector<1x8xf32> to vector<1xf32>
    %749 = vector.shape_cast %748 : vector<1xf32> to vector<1x1xf32>
    %750 = vector.broadcast %749 : vector<1x1xf32> to vector<1x8xf32>
    %751 = arith.divf %747, %750 : vector<1x8xf32>
    %cst_185 = arith.constant dense<0.000000e+00> : vector<1x32xf32>
    %752 = tpu.matmul %751, %1, %cst_185 {dimension_numbers = #tpu.dot_dimension_numbers<[1], [0], [0], [1], [0, 0, 1, 1], [], []>} : vector<1x8xf32>, vector<8x32xf32>, vector<1x32xf32> -> vector<1x32xf32>
    %cst_186 = arith.constant dense<0.000000e+00> : vector<1x32xf32>
    %753 = tpu.matmul %741, %7, %cst_186 {dimension_numbers = #tpu.dot_dimension_numbers<[1], [0], [0], [1], [0, 0, 1, 1], [], []>} : vector<1x32xf32>, vector<32x32xf32>, vector<1x32xf32> -> vector<1x32xf32>
    %cst_187 = arith.constant dense<0.000000e+00> : vector<1x32xf32>
    %754 = tpu.matmul %752, %9, %cst_187 {dimension_numbers = #tpu.dot_dimension_numbers<[1], [0], [0], [1], [0, 0, 1, 1], [], []>} : vector<1x32xf32>, vector<32x32xf32>, vector<1x32xf32> -> vector<1x32xf32>
    %755 = arith.addf %753, %754 : vector<1x32xf32>
    %756 = arith.addf %755, %10 : vector<1x32xf32>
    %757 = math.tanh %756 : vector<1x32xf32>
    %cst_188 = arith.constant dense<0.000000e+00> : vector<1x48xf32>
    %758 = tpu.matmul %757, %11, %cst_188 {dimension_numbers = #tpu.dot_dimension_numbers<[1], [0], [0], [1], [0, 0, 1, 1], [], []>} : vector<1x32xf32>, vector<32x48xf32>, vector<1x48xf32> -> vector<1x48xf32>
    %759 = arith.addf %758, %12 : vector<1x48xf32>
    %cst_189 = arith.constant dense<0xFF800000> : vector<1xf32>
    %760 = vector.multi_reduction <maximumf>, %759, %cst_189 [1] : vector<1x48xf32> to vector<1xf32>
    %761 = vector.shape_cast %760 : vector<1xf32> to vector<1x1xf32>
    %762 = vector.broadcast %761 : vector<1x1xf32> to vector<1x48xf32>
    %763 = arith.subf %759, %762 : vector<1x48xf32>
    %764 = math.exp %763 : vector<1x48xf32>
    %cst_190 = arith.constant dense<0.000000e+00> : vector<1xf32>
    %765 = vector.multi_reduction <add>, %764, %cst_190 [1] : vector<1x48xf32> to vector<1xf32>
    %766 = vector.shape_cast %765 : vector<1xf32> to vector<1x1xf32>
    %767 = tpu.reciprocal %766 {approx = true} : vector<1x1xf32> -> vector<1x1xf32>
    %768 = vector.broadcast %761 : vector<1x1xf32> to vector<1x48xf32>
    %769 = arith.cmpf oge, %759, %768 : vector<1x48xf32>
    %c48_i32_191 = arith.constant 48 : i32
    %770 = vector.broadcast %c48_i32_191 : i32 to vector<1x48xi32>
    %771 = arith.select %769, %14, %770 : vector<1x48xi1>, vector<1x48xi32>
    %cst_192 = arith.constant dense<2147483647> : vector<1xi32>
    %772 = vector.multi_reduction <minsi>, %771, %cst_192 [1] : vector<1x48xi32> to vector<1xi32>
    %773 = vector.shape_cast %772 : vector<1xi32> to vector<1x1xi32>
    %774 = vector.broadcast %c9_i32 : i32 to vector<1x10xi32>
    %775 = arith.cmpi eq, %13, %774 : vector<1x10xi32>
    %776 = vector.shape_cast %773 : vector<1x1xi32> to vector<1x1xi32>
    %777 = vector.broadcast %776 : vector<1x1xi32> to vector<1x10xi32>
    %778 = arith.select %775, %777, %701 : vector<1x10xi1>, vector<1x10xi32>
    %779 = vector.broadcast %c9_i32 : i32 to vector<1x10xi32>
    %780 = arith.cmpi eq, %13, %779 : vector<1x10xi32>
    %781 = vector.shape_cast %767 : vector<1x1xf32> to vector<1x1xf32>
    %782 = vector.broadcast %781 : vector<1x1xf32> to vector<1x10xf32>
    %783 = arith.select %780, %782, %706 : vector<1x10xi1>, vector<1x10xf32>
    %784 = vector.broadcast %773 : vector<1x1xi32> to vector<1x48xi32>
    %785 = arith.cmpi eq, %14, %784 : vector<1x48xi32>
    %786 = arith.extui %785 : vector<1x48xi1> to vector<1x48xi32>
    %787 = arith.sitofp %786 : vector<1x48xi32> to vector<1x48xf32>
    %cst_193 = arith.constant dense<0.000000e+00> : vector<1x32xf32>
    %788 = tpu.matmul %787, %0, %cst_193 {dimension_numbers = #tpu.dot_dimension_numbers<[1], [0], [0], [1], [0, 0, 1, 1], [], []>} : vector<1x48xf32>, vector<48x32xf32>, vector<1x32xf32> -> vector<1x32xf32>
    %c10_i32 = arith.constant 10 : i32
    %c0_194 = arith.constant 0 : index
    %c0_195 = arith.constant 0 : index
    %789 = vector.load %arg11[%c0_194, %c0_195] : memref<1x10xi32, #tpu.memory_space<vmem>>, vector<1x10xi32>
    tpu.vector_store %arg11[%c0_194, %c0_195], %778 {strides = array<i32>} : memref<1x10xi32, #tpu.memory_space<vmem>>, vector<1x10xi32>,
    %c0_196 = arith.constant 0 : index
    %c0_197 = arith.constant 0 : index
    %790 = vector.load %arg12[%c0_196, %c0_197] : memref<1x10xf32, #tpu.memory_space<vmem>>, vector<1x10xf32>
    tpu.vector_store %arg12[%c0_196, %c0_197], %783 {strides = array<i32>} : memref<1x10xf32, #tpu.memory_space<vmem>>, vector<1x10xf32>,
    return
  }
}

</mosaic_0001>

<bundles_post_ra>
// kernel: greedy_decode.2
= control target key start
LH: loop header
LB: loop body
LE: loop exit
PB: predicated region body
PF: predicated region fallthrough
CT: control target
= control target key end

     0   :  { %v3755_v0 = vmov 0.0|0.0   ;;  %vm3756_vm0 = vmmov 0   ;;  %v3757_v8 = vmov 0.0   ;;  %vm56_vm1 = vcmask 261120   ;;  %s3758_s27 = smov 64   ;;  %s3759_s12 = smov 96   ;;  %s4394_s1 = inlined_call_operand.vmem [shape: f32[32,96], index: 1, kind: input, shape index: {}]   ;;  %s4395_s2 = inlined_call_operand.vmem [shape: f32[32,96], index: 2, kind: input, shape index: {}]   ;;  %s4396_s5 = inlined_call_operand.vmem [shape: f32[32,96], index: 5, kind: input, shape index: {}]   ;;  %s4397_s6 = inlined_call_operand.vmem [shape: f32[32,96], index: 6, kind: input, shape index: {}]   ;;  %s4398_s0 = inlined_call_operand.vmem [shape: f32[8,32], index: 0, kind: input, shape index: {}]   ;;  %s4399_s4 = inlined_call_operand.vmem [shape: f32[1,96], index: 4, kind: input, shape index: {}]   ;;  %s4400_s8 = inlined_call_operand.vmem [shape: f32[1,96], index: 8, kind: input, shape index: {}]   ;;  %s4401_s3 = inlined_call_operand.vmem [shape: f32[1,96], index: 3, kind: input, shape index: {}]   ;;  %s4402_s7 = inlined_call_operand.vmem [shape: f32[1,96], index: 7, kind: input, shape index: {}]   ;;  %s4403_s9 = inlined_call_operand.vmem [shape: f32[8,32], index: 9, kind: output, shape index: {0}]   ;;  %s4404_s10 = inlined_call_operand.vmem [shape: f32[1,32], index: 10, kind: output, shape index: {1}]  }
   0x1   :  { %3458 = vmatprep.subr.bf16.mxu0 %v3755_v0  ;;  %3464 = vmatprep.subr.bf16.mxu1 %v3755_v0  ;;  %v34_v1 = vld [vmem:[%s4394_s1] sm:$0xff]  ;;  %v35_v2 = vld [vmem:[%s4394_s1 + $0x8] sm:$0xff]  ;;  %v36_v6 = vld [vmem:[%s4394_s1 + $0x10] sm:$0xff]  ;;  %vm402_vm2 = vcmask 253952  }
   0x2   :  { %v38_v3 = vld [vmem:[%s4395_s2] sm:$0xff]  ;;  %v3826_v4 = vpack.c.bf16 %v35_v2, %v34_v1  ;;  %v39_v5 = vld [vmem:[%s4395_s2 + $0x8] sm:$0xff]  ;;  %v37_v7 = vld [vmem:[%s4394_s1 + $0x18] sm:$0xff]  ;;  %3125 = vmatprep.mubr.msk.f32.mxu1 %vm3756_vm0, %v3757_v8  ;;  %3114 = vmatprep.mubr.msk.f32.mxu0 %vm3756_vm0, %v3757_v8 }
   0x3   :  { %v3841_v9 = vpack.c.bf16 %v39_v5, %v38_v3  ;;  %v40_v10 = vld [vmem:[%s4395_s2 + $0x10] sm:$0xff]  ;;  %v41_v11 = vld [vmem:[%s4395_s2 + $0x18] sm:$0xff]  ;;  %v3850_v12 = vpack.c.bf16 %v37_v7, %v36_v6  ;;  %v44_v14 = vld [vmem:[%s4396_s5] sm:$0xff] }
   0x4   :  { %3460 = vmatpush3.bf16.msra.mxu0 %v3826_v4  ;;  %v3854_v13 = vpack.c.bf16 %v41_v11, %v40_v10  ;;  %v45_v15 = vld [vmem:[%s4396_s5 + $0x8] sm:$0xff]  ;;  %v48_v16 = vld [vmem:[%s4397_s6] sm:$0xff]  ;;  %v46_v21 = vld [vmem:[%s4396_s5 + $0x10] sm:$0xff] }
   0x5   :  { %3466 = vmatpush3.bf16.msra.mxu1 %v3841_v9  ;;  %3461 = vmatprep.subr.bf16.mxu0 %v3755_v0  ;;  %v49_v17 = vld [vmem:[%s4397_s6 + $0x8] sm:$0xff]  ;;  %v54_v18 = vld [vmem:[%s4398_s0] sm:$0x1]  ;;  %v3873_v19 = vpack.c.bf16 %v45_v15, %v44_v14  ;;  %v47_v22 = vld [vmem:[%s4396_s5 + $0x18] sm:$0xff] }
   0x6   :  { %3467 = vmatprep.subr.bf16.mxu1 %v3755_v0  ;;  %v3877_v20 = vpack.c.bf16 %v49_v17, %v48_v16  ;;  %v50_v23 = vld [vmem:[%s4397_s6 + $0x10] sm:$0xff]  ;;  %v51_v24 = vld [vmem:[%s4397_s6 + $0x18] sm:$0xff]  ;;  %v3895_v25 = vpack.c.bf16 %v47_v22, %v46_v21  ;;  %v55_v27 = vld [vmem:[%s4398_s0 + $0x7] sm:$0x1] }
   0x7   :  { %v3899_v26 = vpack.c.bf16 %v51_v24, %v50_v23  ;;  %v3930_v28 = vld [vmem:[%s4399_s4] sm:$0x1]  ;;  %v409_v1 = vld [vmem:[%s4398_s0 + $0x1] sm:$0x1]  ;;  %v410_v3 = vld [vmem:[%s4398_s0 + $0x6] sm:$0x1] }
   0x8   :  { %3463 = vmatpush3.bf16.msra.mxu0 %v3850_v12  ;;  %v3937_v34 = vld [vmem:[%s4400_s8] sm:$0x1] }
   0x9   :  { %3469 = vmatpush3.bf16.msra.mxu1 %v3854_v13  ;;  %3470 = vmatprep.subr.bf16.mxu0 %v3755_v0  ;;  %v3944_v40 = vld [vmem:[%s4401_s3] sm:$0x1] }
   0xa   :  { %3476 = vmatprep.subr.bf16.mxu1 %v3755_v0  ;;  %v3950_v43 = vld [vmem:[%s4402_s7] sm:$0x1] }
   0xb   :  { %3115 = vmatmul.mubr.msk.f32.vlgmr.msra.gmra.mrb[0].mxu0 %vm56_vm1, %v54_v18 }
   0xc   :  { %3126 = vmatmul.mubr.f32.vlgmr.msra.gmra.mrb[0].mxu1 %v3757_v8  ;;  %3472 = vmatpush3.bf16.msra.mxu0 %v3873_v19 }
   0xd   :  { %3478 = vmatpush3.bf16.msra.mxu1 %v3877_v20  ;;  %3473 = vmatprep.subr.bf16.mxu0 %v3755_v0 }
   0xe   :  { %3479 = vmatprep.subr.bf16.mxu1 %v3755_v0  ;;  %3136 = vmatprep.mubr.msk.f32.mxu0 %vm3756_vm0, %v3757_v8 }
   0xf   :  { %3147 = vmatprep.mubr.msk.f32.mxu1 %vm3756_vm0, %v3757_v8 }
  0x10   :  { %3475 = vmatpush3.bf16.msra.mxu0 %v3895_v25 }
  0x11   :  { %3481 = vmatpush3.bf16.msra.mxu1 %v3899_v26  ;;  %3482 = vmatprep.subr.bf16.mxu0 %v3755_v0 }
  0x12   :  { %3488 = vmatprep.subr.bf16.mxu1 %v3755_v0 }
  0x13   :  { %3137 = vmatmul.mubr.msk.f32.vlgmr.msra.gmra.mrb[2].mxu0 %vm56_vm1, %v55_v27 }
  0x14   :  { %3148 = vmatmul.mubr.f32.vlgmr.msra.gmra.mrb[2].mxu1 %v3757_v8  ;;  %3484 = vmatpush3.bf16.msra.mxu0 %v3826_v4 }
  0x15   :  { %3490 = vmatpush3.bf16.msra.mxu1 %v3841_v9  ;;  %3485 = vmatprep.subr.bf16.mxu0 %v3755_v0 }
  0x16   :  { %3491 = vmatprep.subr.bf16.mxu1 %v3755_v0  ;;  %3158 = vmatprep.mubr.msk.f32.mxu0 %vm3756_vm0, %v3757_v8 }
  0x17   :  { %3169 = vmatprep.mubr.msk.f32.mxu1 %vm3756_vm0, %v3757_v8 }
  0x18   :  { %3487 = vmatpush3.bf16.msra.mxu0 %v3850_v12 }
  0x19   :  { %3493 = vmatpush3.bf16.msra.mxu1 %v3854_v13  ;;  %3494 = vmatprep.subr.bf16.mxu0 %v3755_v0 }
  0x1a   :  { %3500 = vmatprep.subr.bf16.mxu1 %v3755_v0 }
  0x1b   :  { %3159 = vmatmul.mubr.msk.f32.vlgmr.msra.gmra.mrb[4].mxu0 %vm56_vm1, %v409_v1 }
  0x1c   :  { %3496 = vmatpush3.bf16.msra.mxu0 %v3873_v19  ;;  %3180 = vmatprep.mubr.msk.f32.mxu0 %vm3756_vm0, %v3757_v8 }
  0x1d   :  { %3497 = vmatprep.subr.bf16.mxu0 %v3755_v0 }
  0x20   :  { %3499 = vmatpush3.bf16.msra.mxu0 %v3895_v25 }
  0x21   :  { %3506 = vmatprep.subr.bf16.mxu0 %v3755_v0 }
  0x23   :  { %3181 = vmatmul.mubr.msk.f32.vlgmr.msra.gmra.mrb[6].mxu0 %vm56_vm1, %v410_v3 }
  0x24   :  { %3508 = vmatpush3.bf16.msra.mxu0 %v3826_v4  ;;  %3202 = vmatprep.mubr.msk.f32.mxu0 %vm3756_vm0, %v3757_v8 }
  0x25   :  { %3509 = vmatprep.subr.bf16.mxu0 %v3755_v0 }
  0x28   :  { %3511 = vmatpush3.bf16.msra.mxu0 %v3850_v12 }
  0x29   :  { %3518 = vmatprep.subr.bf16.mxu0 %v3755_v0 }
  0xde   :  { %v126_v29 = vpop.f32.mrb[0].mxu0 }
  0xdf   :  { %v199_v30 = vpop.f32.mrb[0].mxu1  ;;  %v3116_v31 = vpop.f32.mrb[1].mxu0  ;;  %v127_v41 = vadd.f32 %v126_v29, %v3944_v40 }
  0xe0   :  { %v200_v32 = vadd.f32 %v199_v30, %v3930_v28  ;;  %v3127_v33 = vpop.f32.mrb[1].mxu1 }
  0xe2   :  { %211 = vrot.lane.b32.xlu0 %v200_v32, %s3758_s27  ;;  %v203_v42 = vadd.f32 %v200_v32, %v127_v41 }
  0xe4   :  { %v2901_v44 = vmul.f32 -1.442695, %v203_v42 }
  0xe6   :  { %v298_v35 = vpop.f32.mrb[2].mxu0  ;;  %3655 = vpow2.f32 %v2901_v44 }
  0xe7   :  { %v368_v36 = vpop.f32.mrb[2].mxu1  ;;  %v3138_v37 = vpop.f32.mrb[3].mxu0  ;;  %v299_v45 = vadd.f32 %v298_v35, %v3950_v43 }
  0xe8   :  { %v369_v38 = vadd.f32 %v368_v36, %v3937_v34  ;;  %v3149_v39 = vpop.f32.mrb[3].mxu1 }
  0xea   :  { %380 = vrot.lane.b32.xlu0 %v369_v38, %s3758_s27  ;;  %v372_v46 = vadd.f32 %v369_v38, %v299_v45 }
  0xec   :  { %v2903_v47 = vmul.f32 -1.442695, %v372_v46 }
  0xee   :  { %3657 = vpow2.f32 %v2903_v47  ;;  %v480_v22 = vpop.f32.mrb[4].mxu0 }
  0xef   :  { %v3160_v23 = vpop.f32.mrb[5].mxu0  ;;  %v481_v36 = vadd.f32 %v480_v22, %v3944_v40 }
  0xf0   :  { %v3656_v48 = vpop.eup %3655 }
  0xf1   :  { %v207_v49 = vadd.f32 1.0, %v3656_v48 }
  0xf3   :  { %3659 = vrcp.f32 %v207_v49 }
  0xf6   :  { %v651_v24 = vpop.f32.mrb[6].mxu0 }
  0xf7   :  { %v3182_v27 = vpop.f32.mrb[7].mxu0  ;;  %v652_v39 = vadd.f32 %v651_v24, %v3950_v43 }
  0xf8   :  { %v3658_v50 = vpop.eup %3657 }
  0xf9   :  { %v376_v51 = vadd.f32 1.0, %v3658_v50 }
  0xfb   :  { %3661 = vrcp.f32 %v376_v51 }
  0xfd   :  { %v3660_v52 = vpop.eup %3659 }
  0xfe   :  { %v221_v2 = vsub.f32 1.0, %v3660_v52  ;;  %v227_v6 = vmul.f32 0.0, %v3660_v52 }
 0x105   :  { %v3662_v55 = vpop.eup %3661 }
 0x106   :  { %v390_v11 = vsub.f32 1.0, %v3662_v55  ;;  %v396_v15 = vmul.f32 0.0, %v3662_v55 }
 0x154   :  { %v212_v53 = vpop.permute.xlu0 %211 }
 0x155   :  { %v214_v54 = vmul.f32 %v3660_v52, %v212_v53 }
 0x157   :  { %216 = vrot.lane.b32.xlu1 %v214_v54, %s3758_s27 }
 0x15c   :  { %v381_v56 = vpop.permute.xlu0 %380 }
 0x15d   :  { %v383_v57 = vmul.f32 %v3662_v55, %v381_v56 }
 0x15f   :  { %385 = vrot.lane.b32.xlu1 %v383_v57, %s3758_s27 }
 0x1c9   :  { %v217_v58 = vpop.permute.xlu1 %216 }
 0x1ca   :  { %v219_v59 = vadd.f32 %v217_v58, %v127_v41 }
 0x1cc   :  { %3663 = vtanh.f32 %v219_v59 }
 0x1d1   :  { %v386_v60 = vpop.permute.xlu1 %385 }
 0x1d2   :  { %v388_v61 = vadd.f32 %v386_v60, %v299_v45  ;;  %v763_v60 = vld [vmem:[%s4398_s0 + $0x2] sm:$0x1] }
 0x1d3   :  { %3203 = vmatmul.mubr.msk.f32.vlgmr.msra.gmra.mrb[8].mxu0 %vm56_vm1, %v763_v60 }
 0x1d4   :  { %3665 = vtanh.f32 %v388_v61  ;;  %3520 = vmatpush3.bf16.msra.mxu0 %v3873_v19  ;;  %3224 = vmatprep.mubr.msk.f32.mxu0 %vm3756_vm0, %v3757_v8 }
 0x1d5   :  { %3521 = vmatprep.subr.bf16.mxu0 %v3755_v0 }
 0x1d6   :  { %v3664_v62 = vpop.eup %3663 }
 0x1d7   :  { %223 = vrot.lane.b32.xlu0 %v3664_v62, %s3759_s12  ;;  %v764_v62 = vld [vmem:[%s4398_s0 + $0x5] sm:$0x1] }
 0x1d8   :  { %3523 = vmatpush3.bf16.msra.mxu0 %v3895_v25 }
 0x1d9   :  { %3530 = vmatprep.subr.bf16.mxu0 %v3755_v0 }
 0x1db   :  { %3225 = vmatmul.mubr.msk.f32.vlgmr.msra.gmra.mrb[10].mxu0 %vm56_vm1, %v764_v62 }
 0x1dc   :  { %3532 = vmatpush3.bf16.msra.mxu0 %v3826_v4  ;;  %3246 = vmatprep.mubr.msk.f32.mxu0 %vm3756_vm0, %v3757_v8 }
 0x1dd   :  { %3533 = vmatprep.subr.bf16.mxu0 %v3755_v0 }
 0x1de   :  { %v3666_v63 = vpop.eup %3665 }
 0x1df   :  { %392 = vrot.lane.b32.xlu1 %v3666_v63, %s3759_s12 }
 0x1e0   :  { %3535 = vmatpush3.bf16.msra.mxu0 %v3850_v12 }
 0x1e1   :  { %3542 = vmatprep.subr.bf16.mxu0 %v3755_v0 }
 0x249   :  { %v224_v5 = vpop.permute.xlu0 %223 }
 0x24a   :  { %v226_v7 = vmul.f32 %v224_v5, %v221_v2 }
 0x24c   :  { %v3975_v10 = vadd.f32 %v227_v6, %v226_v7 }
 0x24e   :  { %399 = vrot.lane.b32.xlu0 %v3975_v10, %s3759_s12 }
 0x251   :  { %v393_v14 = vpop.permute.xlu1 %392 }
 0x252   :  { %v395_v16 = vmul.f32 %v393_v14, %v390_v11 }
 0x254   :  { %v3981_v17 = vadd.f32 %v396_v15, %v395_v16 }
 0x256   :  { %405 = vrot.lane.b32.xlu1 %v3981_v17, %s3759_s12 }
 0x2a6   :  { %v834_v16 = vpop.f32.mrb[8].mxu0 }
 0x2c0   :  { %v400_v18 = vpop.permute.xlu0 %399 }
 0x2c1   :  { %403 = vst.msk [vmem:[%s4403_s9] sm:$0x1] %vm402_vm2, %v400_v18  ;;  %3170 = vmatmul.mubr.msk.f32.vlgmr.msra.gmra.mrb[4].mxu1 %vm56_vm1, %v400_v18 }
 0x2c2   :  { %3502 = vmatpush3.bf16.msra.mxu1 %v3877_v20  ;;  %3191 = vmatprep.mubr.msk.f32.mxu1 %vm3756_vm0, %v3757_v8 }
 0x2c3   :  { %3503 = vmatprep.subr.bf16.mxu1 %v3755_v0 }
 0x2c6   :  { %3505 = vmatpush3.bf16.msra.mxu1 %v3899_v26 }
 0x2c7   :  { %3512 = vmatprep.subr.bf16.mxu1 %v3755_v0 }
 0x2c8   :  { %v406_v21 = vpop.permute.xlu1 %405 }
 0x2c9   :  { %408 = vst.msk [vmem:[#allocation2 + $0x7] sm:$0x1] %vm402_vm2, %v406_v21  ;;  %3192 = vmatmul.mubr.msk.f32.vlgmr.msra.gmra.mrb[6].mxu1 %vm56_vm1, %v406_v21 }
 0x2ca   :  { %3514 = vmatpush3.bf16.msra.mxu1 %v3841_v9  ;;  %3213 = vmatprep.mubr.msk.f32.mxu1 %vm3756_vm0, %v3757_v8 }
 0x2cb   :  { %3515 = vmatprep.subr.bf16.mxu1 %v3755_v0 }
 0x2ce   :  { %3517 = vmatpush3.bf16.msra.mxu1 %v3854_v13 }
 0x2cf   :  { %3524 = vmatprep.subr.bf16.mxu1 %v3755_v0 }
 0x394   :  { %v552_v29 = vpop.f32.mrb[4].mxu1 }
 0x395   :  { %v553_v30 = vadd.f32 %v552_v29, %v3930_v28  ;;  %v3171_v31 = vpop.f32.mrb[5].mxu1 }
 0x396   :  { %v835_v31 = vadd.f32 %v834_v16, %v3944_v40 }
 0x397   :  { %564 = vrot.lane.b32.xlu0 %v553_v30, %s3758_s27  ;;  %v556_v37 = vadd.f32 %v553_v30, %v481_v36 }
 0x399   :  { %v2906_v38 = vmul.f32 -1.442695, %v556_v37 }
 0x39b   :  { %3667 = vpow2.f32 %v2906_v38 }
 0x39c   :  { %v723_v32 = vpop.f32.mrb[6].mxu1 }
 0x39d   :  { %v724_v33 = vadd.f32 %v723_v32, %v3937_v34  ;;  %v3193_v35 = vpop.f32.mrb[7].mxu1 }
 0x39f   :  { %735 = vrot.lane.b32.xlu1 %v724_v33, %s3758_s27  ;;  %v727_v41 = vadd.f32 %v724_v33, %v652_v39 }
 0x3a1   :  { %v2909_v42 = vmul.f32 -1.442695, %v727_v41 }
 0x3a3   :  { %3669 = vpow2.f32 %v2909_v42 }
 0x3a5   :  { %v3668_v44 = vpop.eup %3667 }
 0x3a6   :  { %v560_v45 = vadd.f32 1.0, %v3668_v44 }
 0x3a8   :  { %3671 = vrcp.f32 %v560_v45 }
 0x3ad   :  { %v3670_v46 = vpop.eup %3669 }
 0x3ae   :  { %v731_v47 = vadd.f32 1.0, %v3670_v46 }
 0x3b0   :  { %3673 = vrcp.f32 %v731_v47 }
 0x3b2   :  { %v3672_v48 = vpop.eup %3671 }
 0x3b3   :  { %v574_v61 = vsub.f32 1.0, %v3672_v48  ;;  %v580_v1 = vmul.f32 %v3672_v48, %v3975_v10 }
 0x3ba   :  { %v3674_v51 = vpop.eup %3673 }
 0x3bb   :  { %v745_v5 = vsub.f32 1.0, %v3674_v51  ;;  %v751_v7 = vmul.f32 %v3674_v51, %v3981_v17  ;;  %v3204_v17 = vpop.f32.mrb[9].mxu0 }
 0x3bc   :  { %v1005_v18 = vpop.f32.mrb[10].mxu0 }
 0x3bd   :  { %v3226_v21 = vpop.f32.mrb[11].mxu0  ;;  %v1006_v35 = vadd.f32 %v1005_v18, %v3950_v43 }
 0x409   :  { %v565_v49 = vpop.permute.xlu0 %564 }
 0x40a   :  { %v567_v50 = vmul.f32 %v3672_v48, %v565_v49 }
 0x40c   :  { %569 = vrot.lane.b32.xlu0 %v567_v50, %s3758_s27 }
 0x411   :  { %v736_v52 = vpop.permute.xlu1 %735 }
 0x412   :  { %v738_v53 = vmul.f32 %v3674_v51, %v736_v52 }
 0x414   :  { %740 = vrot.lane.b32.xlu1 %v738_v53, %s3758_s27 }
 0x47e   :  { %v570_v54 = vpop.permute.xlu0 %569 }
 0x47f   :  { %v572_v55 = vadd.f32 %v570_v54, %v481_v36 }
 0x481   :  { %3675 = vtanh.f32 %v572_v55 }
 0x486   :  { %v741_v56 = vpop.permute.xlu1 %740 }
 0x487   :  { %v743_v57 = vadd.f32 %v741_v56, %v652_v39  ;;  %v1117_v56 = vld [vmem:[%s4398_s0 + $0x3] sm:$0x1] }
 0x488   :  { %3247 = vmatmul.mubr.msk.f32.vlgmr.msra.gmra.mrb[12].mxu0 %vm56_vm1, %v1117_v56 }
 0x489   :  { %3677 = vtanh.f32 %v743_v57  ;;  %3544 = vmatpush3.bf16.msra.mxu0 %v3873_v19  ;;  %3268 = vmatprep.mubr.msk.f32.mxu0 %vm3756_vm0, %v3757_v8 }
 0x48a   :  { %3545 = vmatprep.subr.bf16.mxu0 %v3755_v0 }
 0x48b   :  { %v3676_v58 = vpop.eup %3675 }
 0x48c   :  { %576 = vrot.lane.b32.xlu0 %v3676_v58, %s3759_s12  ;;  %v1118_v58 = vld [vmem:[%s4398_s0 + $0x4] sm:$0x1] }
 0x48d   :  { %3547 = vmatpush3.bf16.msra.mxu0 %v3895_v25 }
 0x48e   :  { %3554 = vmatprep.subr.bf16.mxu0 %v3755_v0 }
 0x490   :  { %3269 = vmatmul.mubr.msk.f32.vlgmr.msra.gmra.mrb[14].mxu0 %vm56_vm1, %v1118_v58 }
 0x491   :  { %3556 = vmatpush3.bf16.msra.mxu0 %v3826_v4  ;;  %3290 = vmatprep.mubr.msk.f32.mxu0 %vm3756_vm0, %v3757_v8 }
 0x492   :  { %3557 = vmatprep.subr.bf16.mxu0 %v3755_v0 }
 0x493   :  { %v3678_v59 = vpop.eup %3677 }
 0x494   :  { %747 = vrot.lane.b32.xlu1 %v3678_v59, %s3759_s12 }
 0x495   :  { %3559 = vmatpush3.bf16.msra.mxu0 %v3850_v12 }
 0x496   :  { %3566 = vmatprep.subr.bf16.mxu0 %v3755_v0 }
 0x4fe   :  { %v577_v63 = vpop.permute.xlu0 %576 }
 0x4ff   :  { %v579_v2 = vmul.f32 %v577_v63, %v574_v61 }
 0x501   :  { %v4033_v3 = vadd.f32 %v580_v1, %v579_v2 }
 0x503   :  { %754 = vrot.lane.b32.xlu0 %v4033_v3, %s3759_s12 }
 0x506   :  { %v748_v6 = vpop.permute.xlu1 %747 }
 0x507   :  { %v750_v10 = vmul.f32 %v748_v6, %v745_v5 }
 0x509   :  { %v4040_v11 = vadd.f32 %v751_v7, %v750_v10 }
 0x50b   :  { %759 = vrot.lane.b32.xlu1 %v4040_v11, %s3759_s12 }
 0x55b   :  { %v1188_v10 = vpop.f32.mrb[12].mxu0 }
 0x575   :  { %v755_v14 = vpop.permute.xlu0 %754 }
 0x576   :  { %757 = vst.msk [vmem:[%s4403_s9 + $0x1] sm:$0x1] %vm402_vm2, %v755_v14  ;;  %3214 = vmatmul.mubr.msk.f32.vlgmr.msra.gmra.mrb[8].mxu1 %vm56_vm1, %v755_v14 }
 0x577   :  { %3526 = vmatpush3.bf16.msra.mxu1 %v3877_v20  ;;  %3235 = vmatprep.mubr.msk.f32.mxu1 %vm3756_vm0, %v3757_v8 }
 0x578   :  { %3527 = vmatprep.subr.bf16.mxu1 %v3755_v0 }
 0x57b   :  { %3529 = vmatpush3.bf16.msra.mxu1 %v3899_v26 }
 0x57c   :  { %3536 = vmatprep.subr.bf16.mxu1 %v3755_v0 }
 0x57d   :  { %v760_v15 = vpop.permute.xlu1 %759 }
 0x57e   :  { %762 = vst.msk [vmem:[#allocation2 + $0x6] sm:$0x1] %vm402_vm2, %v760_v15  ;;  %3236 = vmatmul.mubr.msk.f32.vlgmr.msra.gmra.mrb[10].mxu1 %vm56_vm1, %v760_v15 }
 0x57f   :  { %3538 = vmatpush3.bf16.msra.mxu1 %v3841_v9  ;;  %3257 = vmatprep.mubr.msk.f32.mxu1 %vm3756_vm0, %v3757_v8 }
 0x580   :  { %3539 = vmatprep.subr.bf16.mxu1 %v3755_v0 }
 0x583   :  { %3541 = vmatpush3.bf16.msra.mxu1 %v3854_v13 }
 0x584   :  { %3548 = vmatprep.subr.bf16.mxu1 %v3755_v0 }
 0x649   :  { %v906_v22 = vpop.f32.mrb[8].mxu1 }
 0x64a   :  { %v907_v23 = vadd.f32 %v906_v22, %v3930_v28  ;;  %v3215_v24 = vpop.f32.mrb[9].mxu1 }
 0x64b   :  { %v1189_v24 = vadd.f32 %v1188_v10, %v3944_v40 }
 0x64c   :  { %918 = vrot.lane.b32.xlu0 %v907_v23, %s3758_s27  ;;  %v910_v32 = vadd.f32 %v907_v23, %v835_v31 }
 0x64e   :  { %v2912_v33 = vmul.f32 -1.442695, %v910_v32 }
 0x650   :  { %3679 = vpow2.f32 %v2912_v33 }
 0x651   :  { %v1077_v27 = vpop.f32.mrb[10].mxu1 }
 0x652   :  { %v1078_v29 = vadd.f32 %v1077_v27, %v3937_v34  ;;  %v3237_v30 = vpop.f32.mrb[11].mxu1 }
 0x654   :  { %1089 = vrot.lane.b32.xlu1 %v1078_v29, %s3758_s27  ;;  %v1081_v36 = vadd.f32 %v1078_v29, %v1006_v35 }
 0x656   :  { %v2915_v37 = vmul.f32 -1.442695, %v1081_v36 }
 0x658   :  { %3681 = vpow2.f32 %v2915_v37 }
 0x65a   :  { %v3680_v38 = vpop.eup %3679 }
 0x65b   :  { %v914_v39 = vadd.f32 1.0, %v3680_v38 }
 0x65d   :  { %3683 = vrcp.f32 %v914_v39 }
 0x662   :  { %v3682_v41 = vpop.eup %3681 }
 0x663   :  { %v1085_v42 = vadd.f32 1.0, %v3682_v41 }
 0x665   :  { %3685 = vrcp.f32 %v1085_v42 }
 0x667   :  { %v3684_v44 = vpop.eup %3683 }
 0x668   :  { %v928_v57 = vsub.f32 1.0, %v3684_v44  ;;  %v934_v60 = vmul.f32 %v3684_v44, %v4033_v3 }
 0x66f   :  { %v3686_v47 = vpop.eup %3685 }
 0x670   :  { %v1099_v63 = vsub.f32 1.0, %v3686_v47  ;;  %v1105_v2 = vmul.f32 %v3686_v47, %v4040_v11  ;;  %v3248_v11 = vpop.f32.mrb[13].mxu0 }
 0x671   :  { %v1359_v14 = vpop.f32.mrb[14].mxu0 }
 0x672   :  { %v3270_v15 = vpop.f32.mrb[15].mxu0  ;;  %v1360_v30 = vadd.f32 %v1359_v14, %v3950_v43 }
 0x6be   :  { %v919_v45 = vpop.permute.xlu0 %918 }
 0x6bf   :  { %v921_v46 = vmul.f32 %v3684_v44, %v919_v45 }
 0x6c1   :  { %923 = vrot.lane.b32.xlu0 %v921_v46, %s3758_s27 }
 0x6c6   :  { %v1090_v48 = vpop.permute.xlu1 %1089 }
 0x6c7   :  { %v1092_v49 = vmul.f32 %v3686_v47, %v1090_v48 }
 0x6c9   :  { %1094 = vrot.lane.b32.xlu1 %v1092_v49, %s3758_s27 }
 0x733   :  { %v924_v50 = vpop.permute.xlu0 %923 }
 0x734   :  { %v926_v51 = vadd.f32 %v924_v50, %v835_v31 }
 0x736   :  { %3687 = vtanh.f32 %v926_v51 }
 0x73b   :  { %v1095_v52 = vpop.permute.xlu1 %1094 }
 0x73c   :  { %v1097_v53 = vadd.f32 %v1095_v52, %v1006_v35  ;;  %v1471_v52 = vld [vmem:[%s4398_s0 + $0x4] sm:$0x1] }
 0x73d   :  { %3291 = vmatmul.mubr.msk.f32.vlgmr.msra.gmra.mrb[16].mxu0 %vm56_vm1, %v1471_v52 }
 0x73e   :  { %3689 = vtanh.f32 %v1097_v53  ;;  %3568 = vmatpush3.bf16.msra.mxu0 %v3873_v19  ;;  %3312 = vmatprep.mubr.msk.f32.mxu0 %vm3756_vm0, %v3757_v8 }
 0x73f   :  { %3569 = vmatprep.subr.bf16.mxu0 %v3755_v0 }
 0x740   :  { %v3688_v54 = vpop.eup %3687 }
 0x741   :  { %930 = vrot.lane.b32.xlu0 %v3688_v54, %s3759_s12  ;;  %v1472_v54 = vld [vmem:[%s4398_s0 + $0x3] sm:$0x1] }
 0x742   :  { %3571 = vmatpush3.bf16.msra.mxu0 %v3895_v25 }
 0x743   :  { %3578 = vmatprep.subr.bf16.mxu0 %v3755_v0 }
 0x745   :  { %3313 = vmatmul.mubr.msk.f32.vlgmr.msra.gmra.mrb[18].mxu0 %vm56_vm1, %v1472_v54 }
 0x746   :  { %3580 = vmatpush3.bf16.msra.mxu0 %v3826_v4  ;;  %3334 = vmatprep.mubr.msk.f32.mxu0 %vm3756_vm0, %v3757_v8 }
 0x747   :  { %3581 = vmatprep.subr.bf16.mxu0 %v3755_v0 }
 0x748   :  { %v3690_v55 = vpop.eup %3689 }
 0x749   :  { %1101 = vrot.lane.b32.xlu1 %v3690_v55, %s3759_s12 }
 0x74a   :  { %3583 = vmatpush3.bf16.msra.mxu0 %v3850_v12 }
 0x74b   :  { %3590 = vmatprep.subr.bf16.mxu0 %v3755_v0 }
 0x7b3   :  { %v931_v59 = vpop.permute.xlu0 %930 }
 0x7b4   :  { %v933_v61 = vmul.f32 %v931_v59, %v928_v57 }
 0x7b6   :  { %v4092_v62 = vadd.f32 %v934_v60, %v933_v61 }
 0x7b8   :  { %1108 = vrot.lane.b32.xlu0 %v4092_v62, %s3759_s12 }
 0x7bb   :  { %v1102_v1 = vpop.permute.xlu1 %1101 }
 0x7bc   :  { %v1104_v3 = vmul.f32 %v1102_v1, %v1099_v63 }
 0x7be   :  { %v4099_v5 = vadd.f32 %v1105_v2, %v1104_v3 }
 0x7c0   :  { %1113 = vrot.lane.b32.xlu1 %v4099_v5, %s3759_s12 }
 0x810   :  { %v1542_v3 = vpop.f32.mrb[16].mxu0 }
 0x82a   :  { %v1109_v6 = vpop.permute.xlu0 %1108 }
 0x82b   :  { %1111 = vst.msk [vmem:[%s4403_s9 + $0x2] sm:$0x1] %vm402_vm2, %v1109_v6  ;;  %3258 = vmatmul.mubr.msk.f32.vlgmr.msra.gmra.mrb[12].mxu1 %vm56_vm1, %v1109_v6 }
 0x82c   :  { %3550 = vmatpush3.bf16.msra.mxu1 %v3877_v20  ;;  %3279 = vmatprep.mubr.msk.f32.mxu1 %vm3756_vm0, %v3757_v8 }
 0x82d   :  { %3551 = vmatprep.subr.bf16.mxu1 %v3755_v0 }
 0x830   :  { %3553 = vmatpush3.bf16.msra.mxu1 %v3899_v26 }
 0x831   :  { %3560 = vmatprep.subr.bf16.mxu1 %v3755_v0 }
 0x832   :  { %v1114_v7 = vpop.permute.xlu1 %1113 }
 0x833   :  { %1116 = vst.msk [vmem:[#allocation2 + $0x5] sm:$0x1] %vm402_vm2, %v1114_v7  ;;  %3280 = vmatmul.mubr.msk.f32.vlgmr.msra.gmra.mrb[14].mxu1 %vm56_vm1, %v1114_v7 }
 0x834   :  { %3562 = vmatpush3.bf16.msra.mxu1 %v3841_v9  ;;  %3301 = vmatprep.mubr.msk.f32.mxu1 %vm3756_vm0, %v3757_v8 }
 0x835   :  { %3563 = vmatprep.subr.bf16.mxu1 %v3755_v0 }
 0x838   :  { %3565 = vmatpush3.bf16.msra.mxu1 %v3854_v13 }
 0x839   :  { %3572 = vmatprep.subr.bf16.mxu1 %v3755_v0 }
 0x8fe   :  { %v1260_v16 = vpop.f32.mrb[12].mxu1 }
 0x8ff   :  { %v1261_v17 = vadd.f32 %v1260_v16, %v3930_v28  ;;  %v3259_v18 = vpop.f32.mrb[13].mxu1 }
 0x900   :  { %v1543_v18 = vadd.f32 %v1542_v3, %v3944_v40 }
 0x901   :  { %1272 = vrot.lane.b32.xlu0 %v1261_v17, %s3758_s27  ;;  %v1264_v27 = vadd.f32 %v1261_v17, %v1189_v24 }
 0x903   :  { %v2918_v29 = vmul.f32 -1.442695, %v1264_v27 }
 0x905   :  { %3691 = vpow2.f32 %v2918_v29 }
 0x906   :  { %v1431_v21 = vpop.f32.mrb[14].mxu1 }
 0x907   :  { %v1432_v22 = vadd.f32 %v1431_v21, %v3937_v34  ;;  %v3281_v23 = vpop.f32.mrb[15].mxu1 }
 0x909   :  { %1443 = vrot.lane.b32.xlu1 %v1432_v22, %s3758_s27  ;;  %v1435_v31 = vadd.f32 %v1432_v22, %v1360_v30 }
 0x90b   :  { %v2921_v32 = vmul.f32 -1.442695, %v1435_v31 }
 0x90d   :  { %3693 = vpow2.f32 %v2921_v32 }
 0x90f   :  { %v3692_v33 = vpop.eup %3691 }
 0x910   :  { %v1268_v35 = vadd.f32 1.0, %v3692_v33 }
 0x912   :  { %3695 = vrcp.f32 %v1268_v35 }
 0x917   :  { %v3694_v36 = vpop.eup %3693 }
 0x918   :  { %v1439_v37 = vadd.f32 1.0, %v3694_v36 }
 0x91a   :  { %3697 = vrcp.f32 %v1439_v37 }
 0x91c   :  { %v3696_v38 = vpop.eup %3695 }
 0x91d   :  { %v1282_v53 = vsub.f32 1.0, %v3696_v38  ;;  %v1288_v56 = vmul.f32 %v3696_v38, %v4092_v62 }
 0x924   :  { %v3698_v42 = vpop.eup %3697 }
 0x925   :  { %v1453_v59 = vsub.f32 1.0, %v3698_v42  ;;  %v1459_v61 = vmul.f32 %v3698_v42, %v4099_v5  ;;  %v3292_v5 = vpop.f32.mrb[17].mxu0 }
 0x926   :  { %v1713_v6 = vpop.f32.mrb[18].mxu0 }
 0x927   :  { %v3314_v7 = vpop.f32.mrb[19].mxu0  ;;  %v1714_v23 = vadd.f32 %v1713_v6, %v3950_v43 }
 0x973   :  { %v1273_v39 = vpop.permute.xlu0 %1272 }
 0x974   :  { %v1275_v41 = vmul.f32 %v3696_v38, %v1273_v39 }
 0x976   :  { %1277 = vrot.lane.b32.xlu0 %v1275_v41, %s3758_s27 }
 0x97b   :  { %v1444_v44 = vpop.permute.xlu1 %1443 }
 0x97c   :  { %v1446_v45 = vmul.f32 %v3698_v42, %v1444_v44 }
 0x97e   :  { %1448 = vrot.lane.b32.xlu1 %v1446_v45, %s3758_s27 }
 0x9e8   :  { %v1278_v46 = vpop.permute.xlu0 %1277 }
 0x9e9   :  { %v1280_v47 = vadd.f32 %v1278_v46, %v1189_v24 }
 0x9eb   :  { %3699 = vtanh.f32 %v1280_v47 }
 0x9f0   :  { %v1449_v48 = vpop.permute.xlu1 %1448 }
 0x9f1   :  { %v1451_v49 = vadd.f32 %v1449_v48, %v1360_v30  ;;  %v1825_v48 = vld [vmem:[%s4398_s0 + $0x5] sm:$0x1] }
 0x9f2   :  { %3335 = vmatmul.mubr.msk.f32.vlgmr.msra.gmra.mrb[20].mxu0 %vm56_vm1, %v1825_v48 }
 0x9f3   :  { %3701 = vtanh.f32 %v1451_v49  ;;  %3592 = vmatpush3.bf16.msra.mxu0 %v3873_v19  ;;  %3356 = vmatprep.mubr.msk.f32.mxu0 %vm3756_vm0, %v3757_v8 }
 0x9f4   :  { %3593 = vmatprep.subr.bf16.mxu0 %v3755_v0 }
 0x9f5   :  { %v3700_v50 = vpop.eup %3699 }
 0x9f6   :  { %1284 = vrot.lane.b32.xlu0 %v3700_v50, %s3759_s12  ;;  %v1826_v50 = vld [vmem:[%s4398_s0 + $0x2] sm:$0x1] }
 0x9f7   :  { %3595 = vmatpush3.bf16.msra.mxu0 %v3895_v25 }
 0x9f8   :  { %3602 = vmatprep.subr.bf16.mxu0 %v3755_v0 }
 0x9fa   :  { %3357 = vmatmul.mubr.msk.f32.vlgmr.msra.gmra.mrb[22].mxu0 %vm56_vm1, %v1826_v50 }
 0x9fb   :  { %3604 = vmatpush3.bf16.msra.mxu0 %v3826_v4  ;;  %3378 = vmatprep.mubr.msk.f32.mxu0 %vm3756_vm0, %v3757_v8 }
 0x9fc   :  { %3605 = vmatprep.subr.bf16.mxu0 %v3755_v0 }
 0x9fd   :  { %v3702_v51 = vpop.eup %3701 }
 0x9fe   :  { %1455 = vrot.lane.b32.xlu1 %v3702_v51, %s3759_s12 }
 0x9ff   :  { %3607 = vmatpush3.bf16.msra.mxu0 %v3850_v12 }
 0xa00   :  { %3614 = vmatprep.subr.bf16.mxu0 %v3755_v0 }
 0xa68   :  { %v1285_v55 = vpop.permute.xlu0 %1284 }
 0xa69   :  { %v1287_v57 = vmul.f32 %v1285_v55, %v1282_v53 }
 0xa6b   :  { %v4151_v58 = vadd.f32 %v1288_v56, %v1287_v57 }
 0xa6d   :  { %1462 = vrot.lane.b32.xlu0 %v4151_v58, %s3759_s12 }
 0xa70   :  { %v1456_v60 = vpop.permute.xlu1 %1455 }
 0xa71   :  { %v1458_v62 = vmul.f32 %v1456_v60, %v1453_v59 }
 0xa73   :  { %v4158_v63 = vadd.f32 %v1459_v61, %v1458_v62 }
 0xa75   :  { %1467 = vrot.lane.b32.xlu1 %v4158_v63, %s3759_s12 }
 0xac5   :  { %v1896_v62 = vpop.f32.mrb[20].mxu0 }
 0xadf   :  { %v1463_v1 = vpop.permute.xlu0 %1462 }
 0xae0   :  { %1465 = vst.msk [vmem:[%s4403_s9 + $0x3] sm:$0x1] %vm402_vm2, %v1463_v1  ;;  %3302 = vmatmul.mubr.msk.f32.vlgmr.msra.gmra.mrb[16].mxu1 %vm56_vm1, %v1463_v1 }
 0xae1   :  { %3574 = vmatpush3.bf16.msra.mxu1 %v3877_v20  ;;  %3323 = vmatprep.mubr.msk.f32.mxu1 %vm3756_vm0, %v3757_v8 }
 0xae2   :  { %3575 = vmatprep.subr.bf16.mxu1 %v3755_v0 }
 0xae5   :  { %3577 = vmatpush3.bf16.msra.mxu1 %v3899_v26 }
 0xae6   :  { %3584 = vmatprep.subr.bf16.mxu1 %v3755_v0 }
 0xae7   :  { %v1468_v2 = vpop.permute.xlu1 %1467 }
 0xae8   :  { %1470 = vst.msk [vmem:[#allocation2 + $0x4] sm:$0x1] %vm402_vm2, %v1468_v2  ;;  %3324 = vmatmul.mubr.msk.f32.vlgmr.msra.gmra.mrb[18].mxu1 %vm56_vm1, %v1468_v2 }
 0xae9   :  { %3586 = vmatpush3.bf16.msra.mxu1 %v3841_v9  ;;  %3345 = vmatprep.mubr.msk.f32.mxu1 %vm3756_vm0, %v3757_v8 }
 0xaea   :  { %3587 = vmatprep.subr.bf16.mxu1 %v3755_v0 }
 0xaed   :  { %3589 = vmatpush3.bf16.msra.mxu1 %v3854_v13 }
 0xaee   :  { %3596 = vmatprep.subr.bf16.mxu1 %v3755_v0 }
 0xbb3   :  { %v1614_v10 = vpop.f32.mrb[16].mxu1 }
 0xbb4   :  { %v1615_v11 = vadd.f32 %v1614_v10, %v3930_v28  ;;  %v3303_v14 = vpop.f32.mrb[17].mxu1 }
 0xbb5   :  { %v1897_v14 = vadd.f32 %v1896_v62, %v3944_v40  ;;  %v4316_v62 = vld [vmem:[%s4401_s3] sm:$0x1] }
 0xbb6   :  { %1626 = vrot.lane.b32.xlu0 %v1615_v11, %s3758_s27  ;;  %v1618_v21 = vadd.f32 %v1615_v11, %v1543_v18 }
 0xbb8   :  { %v2924_v22 = vmul.f32 -1.442695, %v1618_v21 }
 0xbba   :  { %3703 = vpow2.f32 %v2924_v22 }
 0xbbb   :  { %v1785_v15 = vpop.f32.mrb[18].mxu1 }
 0xbbc   :  { %v1786_v16 = vadd.f32 %v1785_v15, %v3937_v34  ;;  %v3325_v17 = vpop.f32.mrb[19].mxu1 }
 0xbbe   :  { %1797 = vrot.lane.b32.xlu1 %v1786_v16, %s3758_s27  ;;  %v1789_v24 = vadd.f32 %v1786_v16, %v1714_v23 }
 0xbc0   :  { %v2927_v27 = vmul.f32 -1.442695, %v1789_v24 }
 0xbc2   :  { %3705 = vpow2.f32 %v2927_v27 }
 0xbc4   :  { %v3704_v29 = vpop.eup %3703 }
 0xbc5   :  { %v1622_v30 = vadd.f32 1.0, %v3704_v29 }
 0xbc7   :  { %3707 = vrcp.f32 %v1622_v30 }
 0xbcc   :  { %v3706_v31 = vpop.eup %3705 }
 0xbcd   :  { %v1793_v32 = vadd.f32 1.0, %v3706_v31 }
 0xbcf   :  { %3709 = vrcp.f32 %v1793_v32 }
 0xbd1   :  { %v3708_v33 = vpop.eup %3707 }
 0xbd2   :  { %v1636_v49 = vsub.f32 1.0, %v3708_v33  ;;  %v1642_v52 = vmul.f32 %v3708_v33, %v4151_v58 }
 0xbd9   :  { %v3710_v37 = vpop.eup %3709 }
 0xbda   :  { %v1807_v55 = vsub.f32 1.0, %v3710_v37  ;;  %v1813_v57 = vmul.f32 %v3710_v37, %v4158_v63  ;;  %v3336_v63 = vpop.f32.mrb[21].mxu0 }
 0xbdb   :  { %v2067_v1 = vpop.f32.mrb[22].mxu0 }
 0xbdc   :  { %v3358_v2 = vpop.f32.mrb[23].mxu0  ;;  %v2068_v17 = vadd.f32 %v2067_v1, %v3950_v43 }
 0xc28   :  { %v1627_v35 = vpop.permute.xlu0 %1626 }
 0xc29   :  { %v1629_v36 = vmul.f32 %v3708_v33, %v1627_v35 }
 0xc2b   :  { %1631 = vrot.lane.b32.xlu0 %v1629_v36, %s3758_s27 }
 0xc30   :  { %v1798_v38 = vpop.permute.xlu1 %1797 }
 0xc31   :  { %v1800_v39 = vmul.f32 %v3710_v37, %v1798_v38  ;;  %v2179_v38 = vld [vmem:[%s4398_s0 + $0x6] sm:$0x1] }
 0xc32   :  { %3379 = vmatmul.mubr.msk.f32.vlgmr.msra.gmra.mrb[24].mxu0 %vm56_vm1, %v2179_v38 }
 0xc33   :  { %1802 = vrot.lane.b32.xlu1 %v1800_v39, %s3758_s27  ;;  %3616 = vmatpush3.bf16.msra.mxu0 %v3873_v19 }
 0xc34   :  { %3400 = vmatprep.mubr.msk.f32.mxu0 %vm3756_vm0, %v3757_v8  ;;  %3617 = vmatprep.subr.bf16.mxu0 %v3755_v0 }
 0xc37   :  { %3619 = vmatpush3.bf16.msra.mxu0 %v3895_v25 }
 0xc38   :  { %3626 = vmatprep.subr.bf16.mxu0 %v3755_v0 }
 0xc9d   :  { %v1632_v41 = vpop.permute.xlu0 %1631 }
 0xc9e   :  { %v1634_v42 = vadd.f32 %v1632_v41, %v1543_v18  ;;  %v2180_v41 = vld [vmem:[%s4398_s0 + $0x1] sm:$0x1] }
 0xc9f   :  { %3401 = vmatmul.mubr.msk.f32.vlgmr.msra.gmra.mrb[26].mxu0 %vm56_vm1, %v2180_v41 }
 0xca0   :  { %3711 = vtanh.f32 %v1634_v42  ;;  %3628 = vmatpush3.bf16.msra.mxu0 %v3826_v4  ;;  %3422 = vmatprep.mubr.msk.f32.mxu0 %vm3756_vm0, %v3757_v8 }
 0xca1   :  { %3629 = vmatprep.subr.bf16.mxu0 %v3755_v0 }
 0xca4   :  { %3631 = vmatpush3.bf16.msra.mxu0 %v3850_v12 }
 0xca5   :  { %v1803_v44 = vpop.permute.xlu1 %1802  ;;  %3638 = vmatprep.subr.bf16.mxu0 %v3755_v0 }
 0xca6   :  { %v1805_v45 = vadd.f32 %v1803_v44, %v1714_v23 }
 0xca8   :  { %3713 = vtanh.f32 %v1805_v45 }
 0xcaa   :  { %v3712_v46 = vpop.eup %3711 }
 0xcab   :  { %1638 = vrot.lane.b32.xlu0 %v3712_v46, %s3759_s12 }
 0xcb2   :  { %v3714_v47 = vpop.eup %3713 }
 0xcb3   :  { %1809 = vrot.lane.b32.xlu1 %v3714_v47, %s3759_s12 }
 0xd1d   :  { %v1639_v51 = vpop.permute.xlu0 %1638 }
 0xd1e   :  { %v1641_v53 = vmul.f32 %v1639_v51, %v1636_v49 }
 0xd20   :  { %v4210_v54 = vadd.f32 %v1642_v52, %v1641_v53  ;;  %v2250_v52 = vpop.f32.mrb[24].mxu0 }
 0xd21   :  { %v3380_v53 = vpop.f32.mrb[25].mxu0  ;;  %v2251_v63 = vadd.f32 %v4316_v62, %v2250_v52 }
 0xd22   :  { %1816 = vrot.lane.b32.xlu0 %v4210_v54, %s3759_s12 }
 0xd25   :  { %v1810_v56 = vpop.permute.xlu1 %1809 }
 0xd26   :  { %v1812_v58 = vmul.f32 %v1810_v56, %v1807_v55 }
 0xd28   :  { %v4217_v59 = vadd.f32 %v1813_v57, %v1812_v58  ;;  %v4302_v57 = vld [vmem:[%s4399_s4] sm:$0x1] }
 0xd2a   :  { %1821 = vrot.lane.b32.xlu1 %v4217_v59, %s3759_s12 }
 0xd94   :  { %v1817_v60 = vpop.permute.xlu0 %1816 }
 0xd95   :  { %1819 = vst.msk [vmem:[%s4403_s9 + $0x4] sm:$0x1] %vm402_vm2, %v1817_v60  ;;  %3346 = vmatmul.mubr.msk.f32.vlgmr.msra.gmra.mrb[20].mxu1 %vm56_vm1, %v1817_v60 }
 0xd96   :  { %3598 = vmatpush3.bf16.msra.mxu1 %v3877_v20  ;;  %3367 = vmatprep.mubr.msk.f32.mxu1 %vm3756_vm0, %v3757_v8 }
 0xd97   :  { %3599 = vmatprep.subr.bf16.mxu1 %v3755_v0 }
 0xd9a   :  { %3601 = vmatpush3.bf16.msra.mxu1 %v3899_v26 }
 0xd9b   :  { %3608 = vmatprep.subr.bf16.mxu1 %v3755_v0 }
 0xd9c   :  { %v1822_v61 = vpop.permute.xlu1 %1821 }
 0xd9d   :  { %1824 = vst.msk [vmem:[#allocation2 + $0x3] sm:$0x1] %vm402_vm2, %v1822_v61  ;;  %3368 = vmatmul.mubr.msk.f32.vlgmr.msra.gmra.mrb[22].mxu1 %vm56_vm1, %v1822_v61 }
 0xd9e   :  { %3610 = vmatpush3.bf16.msra.mxu1 %v3841_v9  ;;  %3389 = vmatprep.mubr.msk.f32.mxu1 %vm3756_vm0, %v3757_v8 }
 0xd9f   :  { %3611 = vmatprep.subr.bf16.mxu1 %v3755_v0 }
 0xda2   :  { %3613 = vmatpush3.bf16.msra.mxu1 %v3854_v13 }
 0xda3   :  { %3620 = vmatprep.subr.bf16.mxu1 %v3755_v0 }
 0xe68   :  { %v1968_v3 = vpop.f32.mrb[20].mxu1 }
 0xe69   :  { %v1969_v5 = vadd.f32 %v1968_v3, %v3930_v28  ;;  %v3347_v6 = vpop.f32.mrb[21].mxu1  ;;  %v4322_v3 = vld [vmem:[%s4402_s7] sm:$0x1] }
 0xe6b   :  { %1980 = vrot.lane.b32.xlu0 %v1969_v5, %s3758_s27  ;;  %v1972_v15 = vadd.f32 %v1969_v5, %v1897_v14 }
 0xe6d   :  { %v2930_v16 = vmul.f32 -1.442695, %v1972_v15 }
 0xe6f   :  { %3715 = vpow2.f32 %v2930_v16 }
 0xe70   :  { %v2139_v7 = vpop.f32.mrb[22].mxu1 }
 0xe71   :  { %v2140_v10 = vadd.f32 %v2139_v7, %v3937_v34  ;;  %v3369_v11 = vpop.f32.mrb[23].mxu1 }
 0xe73   :  { %2151 = vrot.lane.b32.xlu1 %v2140_v10, %s3758_s27  ;;  %v2143_v18 = vadd.f32 %v2140_v10, %v2068_v17 }
 0xe75   :  { %v2933_v21 = vmul.f32 -1.442695, %v2143_v18 }
 0xe77   :  { %3717 = vpow2.f32 %v2933_v21 }
 0xe79   :  { %v3716_v28 = vpop.eup %3715 }
 0xe7a   :  { %v1976_v22 = vadd.f32 1.0, %v3716_v28 }
 0xe7c   :  { %3719 = vrcp.f32 %v1976_v22 }
 0xe81   :  { %v3718_v23 = vpop.eup %3717 }
 0xe82   :  { %v2147_v24 = vadd.f32 1.0, %v3718_v23 }
 0xe84   :  { %3721 = vrcp.f32 %v2147_v24 }
 0xe86   :  { %v3720_v34 = vpop.eup %3719 }
 0xe87   :  { %v1990_v39 = vsub.f32 1.0, %v3720_v34  ;;  %v1996_v44 = vmul.f32 %v3720_v34, %v4210_v54  ;;  %v2421_v54 = vpop.f32.mrb[26].mxu0 }
 0xe88   :  { %v3402_v55 = vpop.f32.mrb[27].mxu0  ;;  %v2422_v5 = vadd.f32 %v4322_v3, %v2421_v54 }
 0xe8e   :  { %v3722_v40 = vpop.eup %3721 }
 0xe8f   :  { %v2161_v47 = vsub.f32 1.0, %v3722_v40  ;;  %v2167_v49 = vmul.f32 %v3722_v40, %v4217_v59 }
 0xedd   :  { %v1981_v27 = vpop.permute.xlu0 %1980 }
 0xede   :  { %v1983_v29 = vmul.f32 %v3720_v34, %v1981_v27 }
 0xee0   :  { %1985 = vrot.lane.b32.xlu0 %v1983_v29, %s3758_s27 }
 0xee5   :  { %v2152_v30 = vpop.permute.xlu1 %2151 }
 0xee6   :  { %v2154_v31 = vmul.f32 %v3722_v40, %v2152_v30  ;;  %v2533_v30 = vld [vmem:[%s4398_s0 + $0x7] sm:$0x1] }
 0xee7   :  { %3423 = vmatmul.mubr.msk.f32.vlgmr.msra.gmra.mrb[28].mxu0 %vm56_vm1, %v2533_v30 }
 0xee8   :  { %2156 = vrot.lane.b32.xlu1 %v2154_v31, %s3758_s27  ;;  %3640 = vmatpush3.bf16.msra.mxu0 %v3873_v19 }
 0xee9   :  { %3444 = vmatprep.mubr.msk.f32.mxu0 %vm3756_vm0, %v3757_v8  ;;  %3641 = vmatprep.subr.bf16.mxu0 %v3755_v0 }
 0xeec   :  { %3643 = vmatpush3.bf16.msra.mxu0 %v3895_v25 }
 0xf52   :  { %v1986_v43 = vpop.permute.xlu0 %1985 }
 0xf53   :  { %v1988_v32 = vadd.f32 %v1986_v43, %v1897_v14  ;;  %v2534_v43 = vld [vmem:[%s4398_s0] sm:$0x1] }
 0xf54   :  { %3445 = vmatmul.mubr.msk.f32.vlgmr.msra.gmra.mrb[30].mxu0 %vm56_vm1, %v2534_v43 }
 0xf55   :  { %3723 = vtanh.f32 %v1988_v32 }
 0xf5a   :  { %v2157_v33 = vpop.permute.xlu1 %2156 }
 0xf5b   :  { %v2159_v35 = vadd.f32 %v2157_v33, %v2068_v17 }
 0xf5d   :  { %3725 = vtanh.f32 %v2159_v35 }
 0xf5f   :  { %v3724_v36 = vpop.eup %3723 }
 0xf60   :  { %1992 = vrot.lane.b32.xlu0 %v3724_v36, %s3759_s12 }
 0xf67   :  { %v3726_v37 = vpop.eup %3725 }
 0xf68   :  { %2163 = vrot.lane.b32.xlu1 %v3726_v37, %s3759_s12 }
 0xfd2   :  { %v1993_v42 = vpop.permute.xlu0 %1992 }
 0xfd3   :  { %v1995_v45 = vmul.f32 %v1993_v42, %v1990_v39 }
 0xfd5   :  { %v4269_v46 = vadd.f32 %v1996_v44, %v1995_v45  ;;  %v2604_v44 = vpop.f32.mrb[28].mxu0 }
 0xfd6   :  { %v3424_v45 = vpop.f32.mrb[29].mxu0 }
 0xfd7   :  { %2170 = vrot.lane.b32.xlu0 %v4269_v46, %s3759_s12 }
 0xfda   :  { %v2164_v48 = vpop.permute.xlu1 %2163 }
 0xfdb   :  { %v2166_v50 = vmul.f32 %v2164_v48, %v2161_v47 }
 0xfdd   :  { %v4276_v4 = vadd.f32 %v2167_v49, %v2166_v50 }
 0xfdf   :  { %2175 = vrot.lane.b32.xlu1 %v4276_v4, %s3759_s12 }
0x1049   :  { %v2171_v51 = vpop.permute.xlu0 %2170 }
0x104a   :  { %2173 = vst.msk [vmem:[%s4403_s9 + $0x5] sm:$0x1] %vm402_vm2, %v2171_v51  ;;  %3390 = vmatmul.mubr.msk.f32.vlgmr.msra.gmra.mrb[24].mxu1 %vm56_vm1, %v2171_v51 }
0x104b   :  { %3622 = vmatpush3.bf16.msra.mxu1 %v3877_v20  ;;  %3411 = vmatprep.mubr.msk.f32.mxu1 %vm3756_vm0, %v3757_v8 }
0x104c   :  { %3623 = vmatprep.subr.bf16.mxu1 %v3755_v0 }
0x104f   :  { %3625 = vmatpush3.bf16.msra.mxu1 %v3899_v26 }
0x1050   :  { %3632 = vmatprep.subr.bf16.mxu1 %v3755_v0 }
0x1051   :  { %v2176_v12 = vpop.permute.xlu1 %2175 }
0x1052   :  { %2178 = vst.msk [vmem:[#allocation2 + $0x2] sm:$0x1] %vm402_vm2, %v2176_v12  ;;  %3412 = vmatmul.mubr.msk.f32.vlgmr.msra.gmra.mrb[26].mxu1 %vm56_vm1, %v2176_v12 }
0x1053   :  { %3634 = vmatpush3.bf16.msra.mxu1 %v3841_v9  ;;  %3433 = vmatprep.mubr.msk.f32.mxu1 %vm3756_vm0, %v3757_v8 }
0x1054   :  { %3635 = vmatprep.subr.bf16.mxu1 %v3755_v0 }
0x1057   :  { %3637 = vmatpush3.bf16.msra.mxu1 %v3854_v13  ;;  %v4309_v13 = vld [vmem:[%s4400_s8] sm:$0x1] }
0x1058   :  { %3644 = vmatprep.subr.bf16.mxu1 %v3755_v0 }
0x111d   :  { %v2322_v56 = vpop.f32.mrb[24].mxu1 }
0x111e   :  { %v2323_v9 = vadd.f32 %v4302_v57, %v2322_v56  ;;  %v3391_v58 = vpop.f32.mrb[25].mxu1 }
0x1120   :  { %2334 = vrot.lane.b32.xlu0 %v2323_v9, %s3758_s27  ;;  %v2326_v1 = vadd.f32 %v2323_v9, %v2251_v63 }
0x1122   :  { %v2936_v2 = vmul.f32 -1.442695, %v2326_v1 }
0x1124   :  { %3727 = vpow2.f32 %v2936_v2 }
0x1125   :  { %v2493_v59 = vpop.f32.mrb[26].mxu1 }
0x1126   :  { %v2494_v60 = vadd.f32 %v4309_v13, %v2493_v59  ;;  %v3413_v61 = vpop.f32.mrb[27].mxu1 }
0x1128   :  { %2505 = vrot.lane.b32.xlu1 %v2494_v60, %s3758_s27  ;;  %v2497_v6 = vadd.f32 %v2494_v60, %v2422_v5 }
0x112a   :  { %v2939_v7 = vmul.f32 -1.442695, %v2497_v6 }
0x112c   :  { %3729 = vpow2.f32 %v2939_v7 }
0x112e   :  { %v3728_v10 = vpop.eup %3727 }
0x112f   :  { %v2330_v11 = vadd.f32 1.0, %v3728_v10 }
0x1131   :  { %3731 = vrcp.f32 %v2330_v11 }
0x1136   :  { %v3730_v14 = vpop.eup %3729 }
0x1137   :  { %v2501_v15 = vadd.f32 1.0, %v3730_v14 }
0x1139   :  { %3733 = vrcp.f32 %v2501_v15 }
0x113b   :  { %v3732_v16 = vpop.eup %3731 }
0x113c   :  { %v2344_v31 = vsub.f32 1.0, %v3732_v16  ;;  %v2350_v33 = vmul.f32 %v3732_v16, %v4269_v46  ;;  %v2775_v46 = vpop.f32.mrb[30].mxu0 }
0x113d   :  { %v3446_v47 = vpop.f32.mrb[31].mxu0  ;;  %v2776_v12 = vadd.f32 %v4322_v3, %v2775_v46 }
0x1143   :  { %v3734_v21 = vpop.eup %3733 }
0x1144   :  { %v2515_v19 = vsub.f32 1.0, %v3734_v21  ;;  %v2521_v25 = vmul.f32 %v3734_v21, %v4276_v4 }
0x1192   :  { %v2335_v17 = vpop.permute.xlu0 %2334 }
0x1193   :  { %v2337_v18 = vmul.f32 %v3732_v16, %v2335_v17 }
0x1195   :  { %2339 = vrot.lane.b32.xlu0 %v2337_v18, %s3758_s27 }
0x119a   :  { %v2506_v28 = vpop.permute.xlu1 %2505 }
0x119b   :  { %v2508_v22 = vmul.f32 %v3734_v21, %v2506_v28 }
0x119d   :  { %2510 = vrot.lane.b32.xlu1 %v2508_v22, %s3758_s27 }
0x1207   :  { %v2340_v23 = vpop.permute.xlu0 %2339 }
0x1208   :  { %v2342_v24 = vadd.f32 %v2340_v23, %v2251_v63 }
0x120a   :  { %3735 = vtanh.f32 %v2342_v24 }
0x120f   :  { %v2511_v34 = vpop.permute.xlu1 %2510 }
0x1210   :  { %v2513_v27 = vadd.f32 %v2511_v34, %v2422_v5 }
0x1212   :  { %3737 = vtanh.f32 %v2513_v27 }
0x1214   :  { %v3736_v29 = vpop.eup %3735 }
0x1215   :  { %2346 = vrot.lane.b32.xlu0 %v3736_v29, %s3759_s12 }
0x121c   :  { %v3738_v40 = vpop.eup %3737 }
0x121d   :  { %2517 = vrot.lane.b32.xlu1 %v3738_v40, %s3759_s12 }
0x1287   :  { %v2347_v32 = vpop.permute.xlu0 %2346 }
0x1288   :  { %v2349_v35 = vmul.f32 %v2347_v32, %v2344_v31 }
0x128a   :  { %v4343_v36 = vadd.f32 %v2350_v33, %v2349_v35 }
0x128c   :  { %2524 = vrot.lane.b32.xlu0 %v4343_v36, %s3759_s12 }
0x128f   :  { %v2518_v37 = vpop.permute.xlu1 %2517 }
0x1290   :  { %v2520_v38 = vmul.f32 %v2518_v37, %v2515_v19 }
0x1292   :  { %v4348_v39 = vadd.f32 %v2521_v25, %v2520_v38 }
0x1294   :  { %2529 = vrot.lane.b32.xlu1 %v4348_v39, %s3759_s12 }
0x12fe   :  { %v2525_v41 = vpop.permute.xlu0 %2524 }
0x12ff   :  { %2527 = vst.msk [vmem:[%s4403_s9 + $0x6] sm:$0x1] %vm402_vm2, %v2525_v41  ;;  %3434 = vmatmul.mubr.msk.f32.vlgmr.msra.gmra.mrb[28].mxu1 %vm56_vm1, %v2525_v41 }
0x1300   :  { %3646 = vmatpush3.bf16.msra.mxu1 %v3877_v20  ;;  %3455 = vmatprep.mubr.msk.f32.mxu1 %vm3756_vm0, %v3757_v8 }
0x1301   :  { %3647 = vmatprep.subr.bf16.mxu1 %v3755_v0 }
0x1304   :  { %3649 = vmatpush3.bf16.msra.mxu1 %v3899_v26  ;;  %v2605_v26 = vadd.f32 %v4316_v62, %v2604_v44 }
0x1306   :  { %v2530_v42 = vpop.permute.xlu1 %2529 }
0x1307   :  { %2532 = vst.msk [vmem:[#allocation2 + $0x1] sm:$0x1] %vm402_vm2, %v2530_v42  ;;  %3456 = vmatmul.mubr.msk.f32.vlgmr.msra.gmra.mrb[30].mxu1 %vm56_vm1, %v2530_v42 }
0x13d2   :  { %v2676_v48 = vpop.f32.mrb[28].mxu1 }
0x13d3   :  { %v2677_v49 = vadd.f32 %v4302_v57, %v2676_v48  ;;  %v3435_v20 = vpop.f32.mrb[29].mxu1 }
0x13d5   :  { %2688 = vrot.lane.b32.xlu0 %v2677_v49, %s3758_s27  ;;  %v2680_v4 = vadd.f32 %v2677_v49, %v2605_v26 }
0x13d7   :  { %v2942_v51 = vmul.f32 -1.442695, %v2680_v4 }
0x13d9   :  { %3739 = vpow2.f32 %v2942_v51 }
0x13da   :  { %v2847_v8 = vpop.f32.mrb[30].mxu1 }
0x13db   :  { %v2848_v0 = vadd.f32 %v4309_v13, %v2847_v8  ;;  %v3457_v50 = vpop.f32.mrb[31].mxu1 }
0x13dd   :  { %2859 = vrot.lane.b32.xlu1 %v2848_v0, %s3758_s27  ;;  %v2851_v52 = vadd.f32 %v2848_v0, %v2776_v12 }
0x13df   :  { %v2945_v53 = vmul.f32 -1.442695, %v2851_v52 }
0x13e1   :  { %3741 = vpow2.f32 %v2945_v53 }
0x13e3   :  { %v3740_v54 = vpop.eup %3739 }
0x13e4   :  { %v2684_v55 = vadd.f32 1.0, %v3740_v54 }
0x13e6   :  { %3743 = vrcp.f32 %v2684_v55 }
0x13eb   :  { %v3742_v56 = vpop.eup %3741 }
0x13ec   :  { %v2855_v57 = vadd.f32 1.0, %v3742_v56 }
0x13ee   :  { %3745 = vrcp.f32 %v2855_v57 }
0x13f0   :  { %v3744_v9 = vpop.eup %3743 }
0x13f1   :  { %v2698_v6 = vsub.f32 1.0, %v3744_v9  ;;  %v2704_v10 = vmul.f32 %v3744_v9, %v4343_v36 }
0x13f8   :  { %v3746_v13 = vpop.eup %3745 }
0x13f9   :  { %v2869_v15 = vsub.f32 1.0, %v3746_v13  ;;  %v2875_v17 = vmul.f32 %v3746_v13, %v4348_v39 }
0x1447   :  { %v2689_v58 = vpop.permute.xlu0 %2688 }
0x1448   :  { %v2691_v59 = vmul.f32 %v3744_v9, %v2689_v58 }
0x144a   :  { %2693 = vrot.lane.b32.xlu0 %v2691_v59, %s3758_s27 }
0x144f   :  { %v2860_v60 = vpop.permute.xlu1 %2859 }
0x1450   :  { %v2862_v61 = vmul.f32 %v3746_v13, %v2860_v60 }
0x1452   :  { %2864 = vrot.lane.b32.xlu1 %v2862_v61, %s3758_s27 }
0x14bc   :  { %v2694_v62 = vpop.permute.xlu0 %2693 }
0x14bd   :  { %v2696_v63 = vadd.f32 %v2694_v62, %v2605_v26 }
0x14bf   :  { %3747 = vtanh.f32 %v2696_v63 }
0x14c4   :  { %v2865_v1 = vpop.permute.xlu1 %2864 }
0x14c5   :  { %v2867_v2 = vadd.f32 %v2865_v1, %v2776_v12 }
0x14c7   :  { %3749 = vtanh.f32 %v2867_v2 }
0x14c9   :  { %v3748_v3 = vpop.eup %3747 }
0x14ca   :  { %2700 = vrot.lane.b32.xlu0 %v3748_v3, %s3759_s12 }
0x14d1   :  { %v3750_v5 = vpop.eup %3749 }
0x14d2   :  { %2871 = vrot.lane.b32.xlu1 %v3750_v5, %s3759_s12 }
0x153c   :  { %v2701_v7 = vpop.permute.xlu0 %2700 }
0x153d   :  { %v2703_v11 = vmul.f32 %v2701_v7, %v2698_v6 }
0x153f   :  { %v2705_v14 = vadd.f32 %v2704_v10, %v2703_v11 }
0x1541   :  { %2878 = vrot.lane.b32.xlu0 %v2705_v14, %s3759_s12 }
0x1544   :  { %v2872_v16 = vpop.permute.xlu1 %2871 }
0x1545   :  { %v2874_v18 = vmul.f32 %v2872_v16, %v2869_v15 }
0x1547   :  { %v2876_v21 = vadd.f32 %v2875_v17, %v2874_v18 }
0x1549   :  { %2883 = vrot.lane.b32.xlu1 %v2876_v21, %s3759_s12 }
0x15b3   :  { %v2879_v28 = vpop.permute.xlu0 %2878 }
0x15b4   :  { %2881 = vst.msk [vmem:[%s4403_s9 + $0x7] sm:$0x1] %vm402_vm2, %v2879_v28  ;;  %2891 = vst.msk [vmem:[%s4404_s10] sm:$0x1] %vm402_vm2, %v2879_v28 }
0x15bb   :  { %v2884_v22 = vpop.permute.xlu1 %2883  ;;  %v2887_v23 = vld [vmem:[%s4403_s9] sm:$0xff] }
0x15bc   :  { %2886 = vst.msk [vmem:[#allocation2] sm:$0x1] %vm402_vm2, %v2884_v22 }
0x15c3   :  { %v2888_v24 = vld [vmem:[#allocation2] sm:$0xff] }
0x15c4   :  { %v2889_v34 = vadd.f32 %v2888_v24, %v2887_v23 }
0x15c6   :  { %2890 = vst.msk [vmem:[%s4403_s9] sm:$0xff] %vm56_vm1, %v2889_v34 }

// kernel: greedy_decode.3
= control target key start
LH: loop header
LB: loop body
LE: loop exit
PB: predicated region body
PF: predicated region fallthrough
CT: control target
= control target key end

     0   :  { %18 = vsyncpa [#allocation3], 0  ;;  %v8428_v3 = vmov 0.0|0.0   ;;  %vm8429_vm0 = vmmov 0   ;;  %v8430_v11 = vmov 0.0   ;;  %s9660_s0 = inlined_call_operand.vmem [shape: f32[48,32], index: 0, kind: input, shape index: {}]   ;;  %s9661_s1 = inlined_call_operand.vmem [shape: f32[8,32], index: 1, kind: input, shape index: {}]   ;;  %s9662_s2 = inlined_call_operand.vmem [shape: f32[1,32], index: 2, kind: input, shape index: {}]   ;;  %s9663_s3 = inlined_call_operand.vmem [shape: f32[32,96], index: 3, kind: input, shape index: {}]   ;;  %s9664_s4 = inlined_call_operand.vmem [shape: f32[32,96], index: 4, kind: input, shape index: {}]   ;;  %s9665_s5 = inlined_call_operand.vmem [shape: f32[1,96], index: 5, kind: input, shape index: {}]   ;;  %s9666_s6 = inlined_call_operand.vmem [shape: f32[1,96], index: 6, kind: input, shape index: {}]   ;;  %s9667_s7 = inlined_call_operand.vmem [shape: f32[2,32,32], index: 7, kind: input, shape index: {}]   ;;  %s9668_s8 = inlined_call_operand.vmem [shape: f32[1,32], index: 8, kind: input, shape index: {}]   ;;  %s9669_s9 = inlined_call_operand.vmem [shape: f32[32,48], index: 9, kind: input, shape index: {}]   ;;  %s9670_s10 = inlined_call_operand.vmem [shape: f32[1,48], index: 10, kind: input, shape index: {}]   ;;  %s9671_s11 = inlined_call_operand.hbm [shape: s32[1,10], index: 11, kind: output, shape index: {0}]   ;;  %s9672_s12 = inlined_call_operand.hbm [shape: f32[1,10], index: 12, kind: output, shape index: {1}]  }
   0x1   :  { %v49_v0 = vld [vmem:[%s9663_s3] sm:$0xff]  ;;  %v50_v1 = vld [vmem:[%s9663_s3 + $0x8] sm:$0xff]  ;;  %7821 = vmatprep.subr.bf16.mxu0 %v8428_v3  ;;  %7827 = vmatprep.subr.bf16.mxu1 %v8428_v3  ;;  %v51_v6 = vld [vmem:[%s9663_s3 + $0x10] sm:$0xff] }
   0x2   :  { %v53_v2 = vld [vmem:[%s9664_s4] sm:$0xff]  ;;  %v8512_v4 = vpack.c.bf16 %v50_v1, %v49_v0  ;;  %v54_v5 = vld [vmem:[%s9664_s4 + $0x8] sm:$0xff]  ;;  %v52_v7 = vld [vmem:[%s9663_s3 + $0x18] sm:$0xff]  ;;  %7044 = vmatprep.mubr.msk.f32.mxu0 %vm8429_vm0, %v8430_v11  ;;  %7055 = vmatprep.mubr.msk.f32.mxu1 %vm8429_vm0, %v8430_v11 }
   0x3   :  { %v8523_v8 = vpack.c.bf16 %v54_v5, %v53_v2  ;;  %v55_v9 = vld [vmem:[%s9664_s4 + $0x10] sm:$0xff]  ;;  %v56_v10 = vld [vmem:[%s9664_s4 + $0x18] sm:$0xff]  ;;  %v8536_v12 = vpack.c.bf16 %v52_v7, %v51_v6  ;;  %v8541_v13 = vld [vmem:[%s9660_s0] sm:$0xff] }
   0x4   :  { %7823 = vmatpush3.bf16.msra.mxu0 %v8512_v4  ;;  %v8545_v14 = vpack.c.bf16 %v56_v10, %v55_v9 }
   0x5   :  { %7829 = vmatpush3.bf16.msra.mxu1 %v8523_v8  ;;  %7824 = vmatprep.subr.bf16.mxu0 %v8428_v3 }
   0x6   :  { %19 = vsyncpa [#allocation5], 0  ;;  %7830 = vmatprep.subr.bf16.mxu1 %v8428_v3  ;;  %v78_v15 = vrot.slane %v8541_v13, 1  ;;  %vm79_vm1 = vcmask 261120   ;;  %v76_v16 = vld [vmem:[%s9662_s2] sm:$0x1]  ;;  %v74_v34 = vlaneseq }
   0x7   :  { %v8565_v17 = vld [vmem:[%s9666_s6] sm:$0x1]  ;;  %s8431_s2 = smov 64   ;;  %s8432_s27 = smov 96   ;;  %vm336_vm2 = vcmask 57344   ;;  %v6572_v56 = vld [vmem:[%s9667_s7 + $0x28] sm:$0xff] }
   0x8   :  { %7826 = vmatpush3.bf16.msra.mxu0 %v8536_v12  ;;  %v8572_v23 = vld [vmem:[%s9665_s5] sm:$0x1]  ;;  %v250_v35 = vshrl.u32 %v74_v34, 7  ;;  %s8433_s28 = smov 32   ;;  %v6573_v57 = vld [vmem:[%s9667_s7 + $0x30] sm:$0xff]  ;;  %v6574_v59 = vld [vmem:[%s9667_s7 + $0x38] sm:$0xff] }
   0x9   :  { %7832 = vmatpush3.bf16.msra.mxu1 %v8545_v14  ;;  %7058 = vmatprep.subr.mxu0 %v8430_v11  ;;  %v8580_v36 = vld [vmem:[%s9661_s1] sm:$0xff]  ;;  %v8615_v60 = vpack.c.bf16 %v6574_v59, %v6573_v57  ;;  %v60_v63 = vld [vmem:[%s9667_s7 + $0x8] sm:$0xff]  ;;  %vm348_vm3 = vcmask 64512   ;;  %v61_v5 = vld [vmem:[%s9667_s7 + $0x10] sm:$0xff]  ;;  %vm640_vm4 = vcmask 385024   ;;  %vm674_vm7 = vcmask 392192  }
   0xa   :  { %7063 = vmatprep.subr.mxu1 %v8430_v11  ;;  %v251_v37 = vsub.s32 0, %v250_v35  ;;  %v6571_v55 = vld [vmem:[%s9667_s7 + $0x20] sm:$0xff]  ;;  %v62_v6 = vld [vmem:[%s9667_s7 + $0x18] sm:$0xff]  ;;  %v43_v9 = vld [vmem:[%s9660_s0 + $0x8] sm:$0xff] }
   0xb   :  { %7045 = vmatmul.mubr.msk.f32.vlgmr.msra.gmra.mrb[0].mxu0 %vm79_vm1, %v78_v15  ;;  %v8609_v58 = vpack.c.bf16 %v6572_v56, %v6571_v55  ;;  %v59_v62 = vld [vmem:[%s9667_s7] sm:$0xff]  ;;  %v8636_v7 = vpack.c.bf16 %v62_v6, %v61_v5  ;;  %v8645_v10 = vpack.c.bf16 %v43_v9, %v8541_v13 }
   0xc   :  { %7056 = vmatmul.mubr.msk.f32.vlgmr.msra.gmra.mrb[0].mxu1 %vm79_vm1, %v76_v16  ;;  %7060 = vmatprep.mubr.msk.f32.mxu0 %vm8429_vm0, %v8430_v11  ;;  %v252_v39 = vrot.slane %v76_v16, %v251_v37  ;;  %v8626_v1 = vpack.c.bf16 %v60_v63, %v59_v62 }
   0xd   :  { %7065 = vmatprep.mubr.msk.f32.mxu1 %vm8429_vm0, %v8430_v11  ;;  %7064 = vmatpush3.msra.mxu1 %v8580_v36 }
   0xe   :  { %7839 = vmatprep.subr.bf16.mxu1 %v8428_v3 }
  0x11   :  { %7059 = vmatpush3.xpose.msk.msra.mxu0 %vm79_vm1, %v8580_v36 }
  0x12   :  { %7833 = vmatprep.subr.bf16.mxu0 %v8428_v3 }
  0xde   :  { %v148_v18 = vpop.f32.mrb[0].mxu0 }
  0xdf   :  { %v221_v19 = vpop.f32.mrb[0].mxu1  ;;  %v7046_v20 = vpop.f32.mrb[1].mxu0  ;;  %v149_v24 = vadd.f32 %v148_v18, %v8572_v23 }
  0xe0   :  { %v222_v21 = vadd.f32 %v221_v19, %v8565_v17  ;;  %v7057_v22 = vpop.f32.mrb[1].mxu1  ;;  %v69_v19 = vld [vmem:[%s9669_s9] sm:$0xff]  ;;  %v70_v20 = vld [vmem:[%s9669_s9 + $0x8] sm:$0xff] }
  0xe1   :  { %v8667_v22 = vpack.c.bf16 %v70_v20, %v69_v19 }
  0xe2   :  { %233 = vrot.lane.b32.xlu0 %v222_v21, %s8431_s2  ;;  %v225_v25 = vadd.f32 %v222_v21, %v149_v24  ;;  %v71_v21 = vld [vmem:[%s9669_s9 + $0x10] sm:$0xff] }
  0xe4   :  { %v6577_v26 = vmul.f32 -1.442695, %v225_v25 }
  0xe6   :  { %8210 = vpow2.f32 %v6577_v26  ;;  %v8681_v26 = vld [vmem:[%s9668_s8] sm:$0x1] }
  0xf0   :  { %v8211_v27 = vpop.eup %8210 }
  0xf1   :  { %v229_v28 = vadd.f32 1.0, %v8211_v27 }
  0xf3   :  { %8212 = vrcp.f32 %v229_v28 }
  0xfd   :  { %v8213_v29 = vpop.eup %8212 }
  0xfe   :  { %v243_v41 = vsub.f32 1.0, %v8213_v29 }
 0x154   :  { %v234_v30 = vpop.permute.xlu0 %233 }
 0x155   :  { %v236_v31 = vmul.f32 %v8213_v29, %v234_v30 }
 0x157   :  { %238 = vrot.lane.b32.xlu0 %v236_v31, %s8431_s2 }
 0x1c9   :  { %v239_v32 = vpop.permute.xlu0 %238 }
 0x1ca   :  { %v241_v33 = vadd.f32 %v239_v32, %v149_v24  ;;  %v72_v24 = vld [vmem:[%s9669_s9 + $0x18] sm:$0xff]  ;;  %v8694_v32 = vld [vmem:[%s9670_s10] sm:$0x1] }
 0x1cb   :  { %v8673_v25 = vpack.c.bf16 %v72_v24, %v71_v21 }
 0x1cc   :  { %8214 = vtanh.f32 %v241_v33 }
 0x1d6   :  { %v8215_v38 = vpop.eup %8214 }
 0x1d7   :  { %245 = vrot.lane.b32.xlu1 %v8215_v38, %s8432_s27 }
 0x1db   :  { %253 = vrot.lane.b32.xlu1 %v252_v39, %s8433_s28  ;;  %v8702_v39 = vand.u32 127, %v74_v34  ;;  %v45_v34 = vld [vmem:[%s9660_s0 + $0x18] sm:$0xff] }
 0x1dd   :  { %vm668_vm11 = vcmp.eq.s32.totalorder %v8702_v39, 0  ;;  %vm1321_vm12 = vcmp.eq.s32.totalorder %v8702_v39, 1 }
 0x249   :  { %v246_v40 = vpop.permute.xlu1 %245 }
 0x24a   :  { %v248_v43 = vmul.f32 %v246_v40, %v243_v41 }
 0x24d   :  { %v254_v42 = vpop.permute.xlu1 %253 }
 0x24e   :  { %v256_v44 = vmul.f32 %v8213_v29, %v254_v42 }
 0x250   :  { %v8588_v45 = vadd.f32 %v256_v44, %v248_v43 }
 0x252   :  { %259 = vrot.lane.b32.xlu0 %v8588_v45, %s8432_s27 }
 0x2c4   :  { %v8592_v46 = vpop.permute.xlu0 %259 }
 0x2c5   :  { %7061 = vmatmul.mubr.msk.f32.vlgmr.msra.gmra.mrb[2].mxu0 %vm79_vm1, %v8592_v46 }
 0x2c6   :  { %7076 = vmatprep.mubr.msk.f32.mxu0 %vm8429_vm0, %v8430_v11  ;;  %7835 = vmatpush3.bf16.msra.mxu0 %v8609_v58 }
 0x2c7   :  { %7836 = vmatprep.subr.bf16.mxu0 %v8428_v3 }
 0x2ca   :  { %7838 = vmatpush3.bf16.msra.mxu0 %v8615_v60 }
 0x2cb   :  { %7845 = vmatprep.subr.bf16.mxu0 %v8428_v3 }
 0x398   :  { %v332_v47 = vpop.f32.mrb[2].mxu0 }
 0x399   :  { %v7062_v48 = vpop.f32.mrb[3].mxu0  ;;  %v337_v49 = vsel %vm336_vm2, %v332_v47, -inf }
 0x39a   :  { %338 = vmax.xlane.f32.xlu1 %v337_v49 }
 0x427   :  { %v339_v50 = vpop.xlane.xlu1 %338 }
 0x428   :  { %v340_v51 = vsub.f32 %v332_v47, %v339_v50  ;;  %v44_v47 = vld [vmem:[%s9660_s0 + $0x10] sm:$0xff] }
 0x429   :  { %v8716_v48 = vpack.c.bf16 %v45_v34, %v44_v47 }
 0x42a   :  { %v341_v52 = vmul.f32 1.442695, %v340_v51 }
 0x42c   :  { %8216 = vpow2.f32 %v341_v52 }
 0x436   :  { %v8217_v53 = vpop.eup %8216 }
 0x437   :  { %v343_v54 = vsel %vm336_vm2, %v8217_v53, 0.0 }
 0x438   :  { %344 = vadd.xlane.f32.xlu0 %v343_v54  ;;  %v47_v54 = vld [vmem:[%s9660_s0 + $0x28] sm:$0xff] }
 0x4c5   :  { %v345_v61 = vpop.xlane.xlu0 %344 }
 0x4c6   :  { %8218 = vrcp.f32 %v345_v61 }
 0x4d0   :  { %v8219_v0 = vpop.eup %8218 }
 0x4d1   :  { %v347_v2 = vmul.f32 %v8219_v0, %v8217_v53  ;;  %v46_v53 = vld [vmem:[%s9660_s0 + $0x20] sm:$0xff] }
 0x4d2   :  { %v8726_v55 = vpack.c.bf16 %v47_v54, %v46_v53 }
 0x4d3   :  { %7066 = vmatmul.mubr.msk.f32.vlgmr.msra.gmra.mrb[2].mxu1 %vm348_vm3, %v347_v2 }
 0x4d4   :  { %7841 = vmatpush3.bf16.msra.mxu1 %v8626_v1  ;;  %7087 = vmatprep.mubr.msk.f32.mxu1 %vm8429_vm0, %v8430_v11 }
 0x4d5   :  { %7842 = vmatprep.subr.bf16.mxu1 %v8428_v3 }
 0x4d8   :  { %7844 = vmatpush3.bf16.msra.mxu1 %v8636_v7 }
 0x4d9   :  { %7851 = vmatprep.subr.bf16.mxu1 %v8428_v3 }
 0x4db   :  { %7088 = vmatmul.mubr.msk.f32.vlgmr.msra.gmra.mrb[4].mxu1 %vm79_vm1, %v8592_v46 }
 0x4dc   :  { %7853 = vmatpush3.bf16.msra.mxu1 %v8645_v10  ;;  %7113 = vmatprep.mubr.msk.f32.mxu1 %vm8429_vm0, %v8430_v11 }
 0x4dd   :  { %7854 = vmatprep.subr.bf16.mxu1 %v8428_v3 }
 0x4e0   :  { %7856 = vmatpush3.bf16.msra.mxu1 %v8716_v48 }
 0x4e1   :  { %7857 = vmatprep.subr.bf16.mxu1 %v8428_v3 }
 0x4e4   :  { %7859 = vmatpush3.bf16.msra.mxu1 %v8726_v55 }
 0x4e5   :  { %7866 = vmatprep.subr.bf16.mxu1 %v8428_v3 }
 0x5a6   :  { %v418_v15 = vpop.f32.mrb[2].mxu1 }
 0x5a7   :  { %v7067_v16 = vpop.f32.mrb[3].mxu1  ;;  %7077 = vmatmul.mubr.msk.f32.vlgmr.msra.gmra.mrb[4].mxu0 %vm79_vm1, %v418_v15 }
 0x5a8   :  { %7098 = vmatprep.mubr.msk.f32.mxu0 %vm8429_vm0, %v8430_v11  ;;  %7847 = vmatpush3.bf16.msra.mxu0 %v8667_v22 }
 0x5a9   :  { %7848 = vmatprep.subr.bf16.mxu0 %v8428_v3 }
 0x5ac   :  { %7850 = vmatpush3.bf16.msra.mxu0 %v8673_v25 }
 0x5ad   :  { %7860 = vmatprep.subr.bf16.mxu0 %v8428_v3 }
 0x5ae   :  { %v561_v13 = vpop.f32.mrb[4].mxu1 }
 0x5af   :  { %v7089_v18 = vpop.f32.mrb[5].mxu1 }
 0x67a   :  { %v491_v27 = vpop.f32.mrb[4].mxu0 }
 0x67b   :  { %v562_v28 = vadd.f32 %v561_v13, %v491_v27  ;;  %v7078_v29 = vpop.f32.mrb[5].mxu0 }
 0x67d   :  { %v565_v30 = vadd.f32 %v562_v28, %v8681_v26 }
 0x67f   :  { %8220 = vtanh.f32 %v565_v30 }
 0x689   :  { %v8221_v31 = vpop.eup %8220 }
 0x68a   :  { %7099 = vmatmul.mubr.msk.f32.vlgmr.msra.gmra.mrb[6].mxu0 %vm79_vm1, %v8221_v31 }
 0x68b   :  { %7862 = vmatpush3.bf16.msra.mxu0 %v8512_v4  ;;  %7124 = vmatprep.mubr.msk.f32.mxu0 %vm8429_vm0, %v8430_v11 }
 0x68c   :  { %7863 = vmatprep.subr.bf16.mxu0 %v8428_v3 }
 0x68f   :  { %7865 = vmatpush3.bf16.msra.mxu0 %v8536_v12 }
 0x690   :  { %7138 = vmatprep.subr.mxu0 %v8430_v11 }
 0x75d   :  { %v636_v33 = vpop.f32.mrb[6].mxu0 }
 0x75e   :  { %v8697_v35 = vadd.f32 %v636_v33, %v8694_v32  ;;  %v7100_v37 = vpop.f32.mrb[7].mxu0 }
 0x760   :  { %v641_v38 = vsel %vm640_vm4, %v8697_v35, -inf }
 0x761   :  { %642 = vmax.xlane.f32.xlu0 %v641_v38 }
 0x7ee   :  { %v8704_v40 = vpop.xlane.xlu0 %642 }
 0x7ef   :  { %vm651_vm5 = vcmp.ge.f32.partialorder %v8697_v35, %v8704_v40 }
 0x7f0   :  { %v652_v41 = vsel %vm651_vm5, %v8702_v39, 48  ;;  %vm1973_vm5 = vcmp.eq.s32.totalorder %v8702_v39, 2 }
 0x7f1   :  { %v653_v42 = vsel %vm640_vm4, %v652_v41, 2147483647 }
 0x7f2   :  { %v655_v43 = vshra.s32 %v653_v42, 16  ;;  %v654_v49 = vand.u32 65535, %v653_v42 }
 0x7f4   :  { %v657_v44 = vcvt.s32.f32 %v655_v43  ;;  %v656_v51 = vcvt.s32.f32 %v654_v49 }
 0x7f6   :  { %658 = vmin.xlane.f32.xlu1 %v657_v44 }
 0x883   :  { %v659_v50 = vpop.xlane.xlu1 %658 }
 0x884   :  { %vm660_vm6 = vcmp.eq.f32.partialorder %v657_v44, %v659_v50  ;;  %v665_v56 = vcvt.f32.s32 %v659_v50 }
 0x885   :  { %v661_v52 = vsel %vm660_vm6, %v656_v51, inf }
 0x886   :  { %662 = vmin.xlane.f32.xlu0 %v661_v52  ;;  %v666_v59 = vshll.u32 %v665_v56, 16 }
 0x913   :  { %v663_v57 = vpop.xlane.xlu0 %662 }
 0x914   :  { %v664_v61 = vcvt.f32.s32 %v663_v57 }
 0x916   :  { %v8730_v62 = vadd.s32 %v666_v59, %v664_v61 }
 0x918   :  { %vm671_vm8 = vcmp.eq.s32.totalorder %v8702_v39, %v8730_v62 }
 0x919   :  { %v6584_v63 = vsel %vm671_vm8, 1.0, %v8430_v11 }
 0x91a   :  { %7114 = vmatmul.mubr.msk.f32.vlgmr.msra.gmra.mrb[6].mxu1 %vm674_vm7, %v6584_v63 }
 0x91b   :  { %7868 = vmatpush3.bf16.msra.mxu1 %v8523_v8  ;;  %7135 = vmatprep.mubr.msk.f32.mxu1 %vm8429_vm0, %v8430_v11 }
 0x91c   :  { %7869 = vmatprep.subr.bf16.mxu1 %v8428_v3 }
 0x91f   :  { %7871 = vmatpush3.bf16.msra.mxu1 %v8545_v14 }
 0x920   :  { %7872 = vmatprep.subr.bf16.mxu1 %v8428_v3 }
 0x922   :  { %7136 = vmatmul.mubr.msk.f32.vlgmr.msra.gmra.mrb[8].mxu1 %vm79_vm1, %v8592_v46 }
 0x923   :  { %7874 = vmatpush3.bf16.msra.mxu1 %v8609_v58  ;;  %7156 = vmatprep.mubr.msk.f32.mxu1 %vm8429_vm0, %v8430_v11 }
 0x924   :  { %7875 = vmatprep.subr.bf16.mxu1 %v8428_v3 }
 0x927   :  { %7877 = vmatpush3.bf16.msra.mxu1 %v8615_v60 }
 0x928   :  { %7884 = vmatprep.subr.bf16.mxu1 %v8428_v3 }
 0x9ed   :  { %v744_v0 = vpop.f32.mrb[6].mxu1 }
 0x9ee   :  { %v7115_v2 = vpop.f32.mrb[7].mxu1  ;;  %7125 = vmatmul.mubr.msk.f32.vlgmr.msra.gmra.mrb[8].mxu0 %vm79_vm1, %v744_v0 }
 0x9ef   :  { %7139 = vmatpush3.xpose.msk.msra.mxu0 %vm79_vm1, %v8580_v36  ;;  %7140 = vmatprep.mubr.msk.f32.mxu0 %vm8429_vm0, %v8430_v11 }
 0x9f0   :  { %7143 = vmatprep.subr.mxu0 %v8430_v11 }
 0x9f5   :  { %v887_v46 = vpop.f32.mrb[8].mxu1 }
 0x9f6   :  { %v888_v5 = vadd.f32 %v887_v46, %v8565_v17  ;;  %v7137_v6 = vpop.f32.mrb[9].mxu1 }
 0x9f8   :  { %899 = vrot.lane.b32.xlu1 %v888_v5, %s8431_s2 }
 0xa6a   :  { %v900_v24 = vpop.permute.xlu1 %899 }
 0xac1   :  { %v817_v9 = vpop.f32.mrb[8].mxu0 }
 0xac2   :  { %v818_v15 = vadd.f32 %v817_v9, %v8572_v23  ;;  %v7126_v16 = vpop.f32.mrb[9].mxu0 }
 0xac4   :  { %v891_v13 = vadd.f32 %v888_v5, %v818_v15 }
 0xac6   :  { %v6588_v18 = vmul.f32 -1.442695, %v891_v13 }
 0xac8   :  { %8222 = vpow2.f32 %v6588_v18 }
 0xad2   :  { %v8223_v19 = vpop.eup %8222 }
 0xad3   :  { %v895_v20 = vadd.f32 1.0, %v8223_v19 }
 0xad5   :  { %8224 = vrcp.f32 %v895_v20 }
 0xadf   :  { %v8225_v21 = vpop.eup %8224 }
 0xae0   :  { %v902_v27 = vmul.f32 %v8225_v21, %v900_v24  ;;  %v909_v31 = vsub.f32 1.0, %v8225_v21  ;;  %v915_v37 = vmul.f32 %v8225_v21, %v8588_v45 }
 0xae2   :  { %904 = vrot.lane.b32.xlu0 %v902_v27, %s8431_s2 }
 0xb54   :  { %v905_v28 = vpop.permute.xlu0 %904 }
 0xb55   :  { %v907_v29 = vadd.f32 %v905_v28, %v818_v15 }
 0xb57   :  { %8226 = vtanh.f32 %v907_v29 }
 0xb61   :  { %v8227_v30 = vpop.eup %8226 }
 0xb62   :  { %911 = vrot.lane.b32.xlu1 %v8227_v30, %s8432_s27 }
 0xbd4   :  { %v912_v33 = vpop.permute.xlu1 %911 }
 0xbd5   :  { %v914_v38 = vmul.f32 %v912_v33, %v909_v31 }
 0xbd7   :  { %v8762_v41 = vadd.f32 %v915_v37, %v914_v38 }
 0xbd9   :  { %918 = vrot.lane.b32.xlu1 %v8762_v41, %s8432_s27 }
 0xc4b   :  { %v8766_v42 = vpop.permute.xlu1 %918 }
 0xc4c   :  { %7141 = vmatmul.mubr.msk.f32.vlgmr.msra.gmra.mrb[10].mxu0 %vm79_vm1, %v8766_v42 }
 0xc4d   :  { %7144 = vmatpush3.msra.mxu0 %v8580_v36  ;;  %7145 = vmatprep.mubr.msk.f32.mxu0 %vm8429_vm0, %v8430_v11 }
 0xc4e   :  { %7878 = vmatprep.subr.bf16.mxu0 %v8428_v3 }
 0xd1f   :  { %v988_v43 = vpop.f32.mrb[10].mxu0 }
 0xd20   :  { %v7142_v45 = vpop.f32.mrb[11].mxu0  ;;  %v992_v44 = vsel %vm336_vm2, %v988_v43, -inf }
 0xd21   :  { %993 = vmax.xlane.f32.xlu0 %v992_v44 }
 0xdae   :  { %v994_v47 = vpop.xlane.xlu0 %993 }
 0xdaf   :  { %v995_v34 = vsub.f32 %v988_v43, %v994_v47  ;;  %v669_v43 = vsel %vm668_vm11, %v8730_v62, 0 }
 0xdb1   :  { %v996_v49 = vmul.f32 1.442695, %v995_v34 }
 0xdb3   :  { %8228 = vpow2.f32 %v996_v49 }
 0xdbd   :  { %v8229_v50 = vpop.eup %8228 }
 0xdbe   :  { %v998_v51 = vsel %vm336_vm2, %v8229_v50, 0.0 }
 0xdbf   :  { %999 = vadd.xlane.f32.xlu1 %v998_v51 }
 0xe4c   :  { %v1000_v52 = vpop.xlane.xlu1 %999 }
 0xe4d   :  { %8230 = vrcp.f32 %v1000_v52 }
 0xe57   :  { %v8231_v53 = vpop.eup %8230 }
 0xe58   :  { %v1002_v54 = vmul.f32 %v8231_v53, %v8229_v50 }
 0xe5a   :  { %7146 = vmatmul.mubr.msk.f32.vlgmr.msra.gmra.mrb[12].mxu0 %vm348_vm3, %v1002_v54 }
 0xe5b   :  { %7880 = vmatpush3.bf16.msra.mxu0 %v8626_v1  ;;  %7167 = vmatprep.mubr.msk.f32.mxu0 %vm8429_vm0, %v8430_v11 }
 0xe5c   :  { %7881 = vmatprep.subr.bf16.mxu0 %v8428_v3 }
 0xe5f   :  { %7883 = vmatpush3.bf16.msra.mxu0 %v8636_v7 }
 0xe60   :  { %7890 = vmatprep.subr.bf16.mxu0 %v8428_v3 }
 0xe62   :  { %7168 = vmatmul.mubr.msk.f32.vlgmr.msra.gmra.mrb[14].mxu0 %vm79_vm1, %v8766_v42 }
 0xe63   :  { %7892 = vmatpush3.bf16.msra.mxu0 %v8645_v10  ;;  %7193 = vmatprep.mubr.msk.f32.mxu0 %vm8429_vm0, %v8430_v11 }
 0xe64   :  { %7893 = vmatprep.subr.bf16.mxu0 %v8428_v3 }
 0xe67   :  { %7895 = vmatpush3.bf16.msra.mxu0 %v8716_v48 }
 0xe68   :  { %7896 = vmatprep.subr.bf16.mxu0 %v8428_v3 }
 0xe6b   :  { %7898 = vmatpush3.bf16.msra.mxu0 %v8726_v55 }
 0xe6c   :  { %7905 = vmatprep.subr.bf16.mxu0 %v8428_v3 }
 0xf2d   :  { %v1072_v56 = vpop.f32.mrb[12].mxu0 }
 0xf2e   :  { %v7147_v57 = vpop.f32.mrb[13].mxu0  ;;  %7157 = vmatmul.mubr.msk.f32.vlgmr.msra.gmra.mrb[10].mxu1 %vm79_vm1, %v1072_v56 }
 0xf2f   :  { %7886 = vmatpush3.bf16.msra.mxu1 %v8667_v22  ;;  %7178 = vmatprep.mubr.msk.f32.mxu1 %vm8429_vm0, %v8430_v11 }
 0xf30   :  { %7887 = vmatprep.subr.bf16.mxu1 %v8428_v3 }
 0xf33   :  { %7889 = vmatpush3.bf16.msra.mxu1 %v8673_v25 }
 0xf34   :  { %7899 = vmatprep.subr.bf16.mxu1 %v8428_v3 }
 0xf35   :  { %v1215_v59 = vpop.f32.mrb[14].mxu0 }
 0xf36   :  { %v7169_v61 = vpop.f32.mrb[15].mxu0 }
0x1001   :  { %v1145_v63 = vpop.f32.mrb[10].mxu1 }
0x1002   :  { %v1216_v0 = vadd.f32 %v1215_v59, %v1145_v63  ;;  %v7158_v2 = vpop.f32.mrb[11].mxu1 }
0x1004   :  { %v1219_v46 = vadd.f32 %v1216_v0, %v8681_v26 }
0x1006   :  { %8232 = vtanh.f32 %v1219_v46 }
0x1010   :  { %v8233_v5 = vpop.eup %8232 }
0x1011   :  { %7179 = vmatmul.mubr.msk.f32.vlgmr.msra.gmra.mrb[12].mxu1 %vm79_vm1, %v8233_v5 }
0x1012   :  { %7901 = vmatpush3.bf16.msra.mxu1 %v8512_v4  ;;  %7204 = vmatprep.mubr.msk.f32.mxu1 %vm8429_vm0, %v8430_v11 }
0x1013   :  { %7902 = vmatprep.subr.bf16.mxu1 %v8428_v3 }
0x1016   :  { %7904 = vmatpush3.bf16.msra.mxu1 %v8536_v12 }
0x1017   :  { %7218 = vmatprep.subr.mxu1 %v8430_v11 }
0x10e4   :  { %v1290_v6 = vpop.f32.mrb[12].mxu1 }
0x10e5   :  { %v8809_v9 = vadd.f32 %v1290_v6, %v8694_v32  ;;  %v7180_v15 = vpop.f32.mrb[13].mxu1 }
0x10e7   :  { %v1294_v16 = vsel %vm640_vm4, %v8809_v9, -inf }
0x10e8   :  { %1295 = vmax.xlane.f32.xlu0 %v1294_v16 }
0x1175   :  { %v8813_v13 = vpop.xlane.xlu0 %1295 }
0x1176   :  { %vm1304_vm9 = vcmp.ge.f32.partialorder %v8809_v9, %v8813_v13 }
0x1177   :  { %v1305_v18 = vsel %vm1304_vm9, %v8702_v39, 48 }
0x1178   :  { %v1306_v19 = vsel %vm640_vm4, %v1305_v18, 2147483647 }
0x1179   :  { %v1308_v20 = vshra.s32 %v1306_v19, 16  ;;  %v1307_v24 = vand.u32 65535, %v1306_v19 }
0x117b   :  { %v1310_v21 = vcvt.s32.f32 %v1308_v20  ;;  %v1309_v28 = vcvt.s32.f32 %v1307_v24 }
0x117d   :  { %1311 = vmin.xlane.f32.xlu0 %v1310_v21 }
0x120a   :  { %v1312_v27 = vpop.xlane.xlu0 %1311 }
0x120b   :  { %vm1313_vm10 = vcmp.eq.f32.partialorder %v1310_v21, %v1312_v27  ;;  %v1318_v30 = vcvt.f32.s32 %v1312_v27 }
0x120c   :  { %v1314_v29 = vsel %vm1313_vm10, %v1309_v28, inf  ;;  %vm2625_vm10 = vcmp.eq.s32.totalorder %v8702_v39, 3 }
0x120d   :  { %1315 = vmin.xlane.f32.xlu1 %v1314_v29  ;;  %v1319_v33 = vshll.u32 %v1318_v30, 16 }
0x129a   :  { %v1316_v31 = vpop.xlane.xlu1 %1315 }
0x129b   :  { %v1317_v37 = vcvt.f32.s32 %v1316_v31 }
0x129d   :  { %v1320_v38 = vadd.s32 %v1319_v33, %v1317_v37 }
0x129f   :  { %v8826_v45 = vsel %vm1321_vm12, %v1320_v38, %v669_v43  ;;  %vm1324_vm13 = vcmp.eq.s32.totalorder %v8702_v39, %v1320_v38 }
0x12a0   :  { %v6595_v44 = vsel %vm1324_vm13, 1.0, %v8430_v11 }
0x12a1   :  { %7194 = vmatmul.mubr.msk.f32.vlgmr.msra.gmra.mrb[16].mxu0 %vm674_vm7, %v6595_v44 }
0x12a2   :  { %7907 = vmatpush3.bf16.msra.mxu0 %v8523_v8  ;;  %7215 = vmatprep.mubr.msk.f32.mxu0 %vm8429_vm0, %v8430_v11 }
0x12a3   :  { %7908 = vmatprep.subr.bf16.mxu0 %v8428_v3 }
0x12a6   :  { %7910 = vmatpush3.bf16.msra.mxu0 %v8545_v14 }
0x12a7   :  { %7911 = vmatprep.subr.bf16.mxu0 %v8428_v3 }
0x12a9   :  { %7216 = vmatmul.mubr.msk.f32.vlgmr.msra.gmra.mrb[18].mxu0 %vm79_vm1, %v8766_v42 }
0x12aa   :  { %7913 = vmatpush3.bf16.msra.mxu0 %v8609_v58  ;;  %7236 = vmatprep.mubr.msk.f32.mxu0 %vm8429_vm0, %v8430_v11 }
0x12ab   :  { %7914 = vmatprep.subr.bf16.mxu0 %v8428_v3 }
0x12ae   :  { %7916 = vmatpush3.bf16.msra.mxu0 %v8615_v60 }
0x12af   :  { %7923 = vmatprep.subr.bf16.mxu0 %v8428_v3 }
0x1374   :  { %v1396_v62 = vpop.f32.mrb[16].mxu0 }
0x1375   :  { %v7195_v47 = vpop.f32.mrb[17].mxu0  ;;  %7205 = vmatmul.mubr.msk.f32.vlgmr.msra.gmra.mrb[14].mxu1 %vm79_vm1, %v1396_v62 }
0x1376   :  { %7219 = vmatpush3.xpose.msk.msra.mxu1 %vm79_vm1, %v8580_v36  ;;  %7220 = vmatprep.mubr.msk.f32.mxu1 %vm8429_vm0, %v8430_v11 }
0x1377   :  { %7223 = vmatprep.subr.mxu1 %v8430_v11 }
0x137c   :  { %v1539_v42 = vpop.f32.mrb[18].mxu0 }
0x137d   :  { %v1540_v34 = vadd.f32 %v1539_v42, %v8565_v17  ;;  %v7217_v49 = vpop.f32.mrb[19].mxu0 }
0x137f   :  { %1551 = vrot.lane.b32.xlu0 %v1540_v34, %s8431_s2 }
0x13f1   :  { %v1552_v61 = vpop.permute.xlu0 %1551 }
0x1448   :  { %v1469_v50 = vpop.f32.mrb[14].mxu1 }
0x1449   :  { %v1470_v51 = vadd.f32 %v1469_v50, %v8572_v23  ;;  %v7206_v52 = vpop.f32.mrb[15].mxu1 }
0x144b   :  { %v1543_v53 = vadd.f32 %v1540_v34, %v1470_v51 }
0x144d   :  { %v6599_v54 = vmul.f32 -1.442695, %v1543_v53 }
0x144f   :  { %8234 = vpow2.f32 %v6599_v54 }
0x1459   :  { %v8235_v56 = vpop.eup %8234 }
0x145a   :  { %v1547_v57 = vadd.f32 1.0, %v8235_v56 }
0x145c   :  { %8236 = vrcp.f32 %v1547_v57 }
0x1466   :  { %v8237_v59 = vpop.eup %8236 }
0x1467   :  { %v1554_v63 = vmul.f32 %v8237_v59, %v1552_v61  ;;  %v1561_v5 = vsub.f32 1.0, %v8237_v59  ;;  %v1567_v15 = vmul.f32 %v8237_v59, %v8762_v41 }
0x1469   :  { %1556 = vrot.lane.b32.xlu1 %v1554_v63, %s8431_s2 }
0x14db   :  { %v1557_v0 = vpop.permute.xlu1 %1556 }
0x14dc   :  { %v1559_v2 = vadd.f32 %v1557_v0, %v1470_v51 }
0x14de   :  { %8238 = vtanh.f32 %v1559_v2 }
0x14e8   :  { %v8239_v46 = vpop.eup %8238 }
0x14e9   :  { %1563 = vrot.lane.b32.xlu1 %v8239_v46, %s8432_s27 }
0x155b   :  { %v1564_v6 = vpop.permute.xlu1 %1563 }
0x155c   :  { %v1566_v16 = vmul.f32 %v1564_v6, %v1561_v5 }
0x155e   :  { %v8857_v18 = vadd.f32 %v1567_v15, %v1566_v16 }
0x1560   :  { %1570 = vrot.lane.b32.xlu0 %v8857_v18, %s8432_s27 }
0x15d2   :  { %v8861_v19 = vpop.permute.xlu0 %1570 }
0x15d3   :  { %7221 = vmatmul.mubr.msk.f32.vlgmr.msra.gmra.mrb[16].mxu1 %vm79_vm1, %v8861_v19 }
0x15d4   :  { %7224 = vmatpush3.msra.mxu1 %v8580_v36  ;;  %7225 = vmatprep.mubr.msk.f32.mxu1 %vm8429_vm0, %v8430_v11 }
0x15d5   :  { %7917 = vmatprep.subr.bf16.mxu1 %v8428_v3 }
0x16a6   :  { %v1640_v20 = vpop.f32.mrb[16].mxu1 }
0x16a7   :  { %v7222_v41 = vpop.f32.mrb[17].mxu1  ;;  %v1644_v21 = vsel %vm336_vm2, %v1640_v20, -inf }
0x16a8   :  { %1645 = vmax.xlane.f32.xlu1 %v1644_v21 }
0x1735   :  { %v1646_v24 = vpop.xlane.xlu1 %1645 }
0x1736   :  { %v1647_v27 = vsub.f32 %v1640_v20, %v1646_v24 }
0x1738   :  { %v1648_v28 = vmul.f32 1.442695, %v1647_v27 }
0x173a   :  { %8240 = vpow2.f32 %v1648_v28 }
0x1744   :  { %v8241_v29 = vpop.eup %8240 }
0x1745   :  { %v1650_v30 = vsel %vm336_vm2, %v8241_v29, 0.0 }
0x1746   :  { %1651 = vadd.xlane.f32.xlu0 %v1650_v30 }
0x17d3   :  { %v1652_v31 = vpop.xlane.xlu0 %1651 }
0x17d4   :  { %8242 = vrcp.f32 %v1652_v31 }
0x17de   :  { %v8243_v33 = vpop.eup %8242 }
0x17df   :  { %v1654_v37 = vmul.f32 %v8243_v33, %v8241_v29 }
0x17e1   :  { %7226 = vmatmul.mubr.msk.f32.vlgmr.msra.gmra.mrb[18].mxu1 %vm348_vm3, %v1654_v37 }
0x17e2   :  { %7919 = vmatpush3.bf16.msra.mxu1 %v8626_v1  ;;  %7247 = vmatprep.mubr.msk.f32.mxu1 %vm8429_vm0, %v8430_v11 }
0x17e3   :  { %7920 = vmatprep.subr.bf16.mxu1 %v8428_v3 }
0x17e6   :  { %7922 = vmatpush3.bf16.msra.mxu1 %v8636_v7 }
0x17e7   :  { %7929 = vmatprep.subr.bf16.mxu1 %v8428_v3 }
0x17e9   :  { %7248 = vmatmul.mubr.msk.f32.vlgmr.msra.gmra.mrb[20].mxu1 %vm79_vm1, %v8861_v19 }
0x17ea   :  { %7931 = vmatpush3.bf16.msra.mxu1 %v8645_v10  ;;  %7273 = vmatprep.mubr.msk.f32.mxu1 %vm8429_vm0, %v8430_v11 }
0x17eb   :  { %7932 = vmatprep.subr.bf16.mxu1 %v8428_v3 }
0x17ee   :  { %7934 = vmatpush3.bf16.msra.mxu1 %v8716_v48 }
0x17ef   :  { %7935 = vmatprep.subr.bf16.mxu1 %v8428_v3 }
0x17f2   :  { %7937 = vmatpush3.bf16.msra.mxu1 %v8726_v55 }
0x17f3   :  { %7944 = vmatprep.subr.bf16.mxu1 %v8428_v3 }
0x18b4   :  { %v1724_v38 = vpop.f32.mrb[18].mxu1 }
0x18b5   :  { %v7227_v43 = vpop.f32.mrb[19].mxu1  ;;  %7237 = vmatmul.mubr.msk.f32.vlgmr.msra.gmra.mrb[20].mxu0 %vm79_vm1, %v1724_v38 }
0x18b6   :  { %7925 = vmatpush3.bf16.msra.mxu0 %v8667_v22  ;;  %7258 = vmatprep.mubr.msk.f32.mxu0 %vm8429_vm0, %v8430_v11 }
0x18b7   :  { %7926 = vmatprep.subr.bf16.mxu0 %v8428_v3 }
0x18ba   :  { %7928 = vmatpush3.bf16.msra.mxu0 %v8673_v25 }
0x18bb   :  { %7938 = vmatprep.subr.bf16.mxu0 %v8428_v3 }
0x18bc   :  { %v1867_v44 = vpop.f32.mrb[20].mxu1 }
0x18bd   :  { %v7249_v62 = vpop.f32.mrb[21].mxu1 }
0x1988   :  { %v1797_v47 = vpop.f32.mrb[20].mxu0 }
0x1989   :  { %v1868_v42 = vadd.f32 %v1867_v44, %v1797_v47  ;;  %v7238_v34 = vpop.f32.mrb[21].mxu0 }
0x198b   :  { %v1871_v49 = vadd.f32 %v1868_v42, %v8681_v26 }
0x198d   :  { %8244 = vtanh.f32 %v1871_v49 }
0x1997   :  { %v8245_v50 = vpop.eup %8244 }
0x1998   :  { %7259 = vmatmul.mubr.msk.f32.vlgmr.msra.gmra.mrb[22].mxu0 %vm79_vm1, %v8245_v50 }
0x1999   :  { %7940 = vmatpush3.bf16.msra.mxu0 %v8512_v4  ;;  %7284 = vmatprep.mubr.msk.f32.mxu0 %vm8429_vm0, %v8430_v11 }
0x199a   :  { %7941 = vmatprep.subr.bf16.mxu0 %v8428_v3 }
0x199d   :  { %7943 = vmatpush3.bf16.msra.mxu0 %v8536_v12 }
0x199e   :  { %7298 = vmatprep.subr.mxu0 %v8430_v11 }
0x1a6b   :  { %v1942_v51 = vpop.f32.mrb[22].mxu0 }
0x1a6c   :  { %v8904_v52 = vadd.f32 %v1942_v51, %v8694_v32  ;;  %v7260_v53 = vpop.f32.mrb[23].mxu0 }
0x1a6e   :  { %v1946_v54 = vsel %vm640_vm4, %v8904_v52, -inf }
0x1a6f   :  { %1947 = vmax.xlane.f32.xlu0 %v1946_v54 }
0x1afc   :  { %v8908_v56 = vpop.xlane.xlu0 %1947 }
0x1afd   :  { %vm1956_vm14 = vcmp.ge.f32.partialorder %v8904_v52, %v8908_v56 }
0x1afe   :  { %v1957_v57 = vsel %vm1956_vm14, %v8702_v39, 48 }
0x1aff   :  { %v1958_v59 = vsel %vm640_vm4, %v1957_v57, 2147483647 }
0x1b00   :  { %v1960_v61 = vshra.s32 %v1958_v59, 16  ;;  %v1959_v0 = vand.u32 65535, %v1958_v59 }
0x1b02   :  { %v1962_v63 = vcvt.s32.f32 %v1960_v61  ;;  %v1961_v46 = vcvt.s32.f32 %v1959_v0 }
0x1b04   :  { %1963 = vmin.xlane.f32.xlu1 %v1962_v63 }
0x1b91   :  { %v1964_v2 = vpop.xlane.xlu1 %1963 }
0x1b92   :  { %vm1965_vm15 = vcmp.eq.f32.partialorder %v1962_v63, %v1964_v2  ;;  %v1970_v6 = vcvt.f32.s32 %v1964_v2 }
0x1b93   :  { %v1966_v5 = vsel %vm1965_vm15, %v1961_v46, inf }
0x1b94   :  { %1967 = vmin.xlane.f32.xlu0 %v1966_v5  ;;  %v1971_v16 = vshll.u32 %v1970_v6, 16 }
0x1c21   :  { %v1968_v15 = vpop.xlane.xlu0 %1967 }
0x1c22   :  { %v1969_v20 = vcvt.f32.s32 %v1968_v15 }
0x1c24   :  { %v1972_v41 = vadd.s32 %v1971_v16, %v1969_v20 }
0x1c26   :  { %v8918_v21 = vsel %vm1973_vm5, %v1972_v41, %v8826_v45  ;;  %vm1976_vm6 = vcmp.eq.s32.totalorder %v8702_v39, %v1972_v41 }
0x1c27   :  { %v6606_v24 = vsel %vm1976_vm6, 1.0, %v8430_v11  ;;  %vm3277_vm6 = vcmp.eq.s32.totalorder %v8702_v39, 4 }
0x1c28   :  { %7274 = vmatmul.mubr.msk.f32.vlgmr.msra.gmra.mrb[22].mxu1 %vm674_vm7, %v6606_v24 }
0x1c29   :  { %7946 = vmatpush3.bf16.msra.mxu1 %v8523_v8  ;;  %7295 = vmatprep.mubr.msk.f32.mxu1 %vm8429_vm0, %v8430_v11 }
0x1c2a   :  { %7947 = vmatprep.subr.bf16.mxu1 %v8428_v3 }
0x1c2d   :  { %7949 = vmatpush3.bf16.msra.mxu1 %v8545_v14 }
0x1c2e   :  { %7950 = vmatprep.subr.bf16.mxu1 %v8428_v3 }
0x1c30   :  { %7296 = vmatmul.mubr.msk.f32.vlgmr.msra.gmra.mrb[24].mxu1 %vm79_vm1, %v8861_v19 }
0x1c31   :  { %7952 = vmatpush3.bf16.msra.mxu1 %v8609_v58  ;;  %7316 = vmatprep.mubr.msk.f32.mxu1 %vm8429_vm0, %v8430_v11 }
0x1c32   :  { %7953 = vmatprep.subr.bf16.mxu1 %v8428_v3 }
0x1c35   :  { %7955 = vmatpush3.bf16.msra.mxu1 %v8615_v60 }
0x1c36   :  { %7962 = vmatprep.subr.bf16.mxu1 %v8428_v3 }
0x1cfb   :  { %v2048_v45 = vpop.f32.mrb[22].mxu1 }
0x1cfc   :  { %v7275_v27 = vpop.f32.mrb[23].mxu1  ;;  %7285 = vmatmul.mubr.msk.f32.vlgmr.msra.gmra.mrb[24].mxu0 %vm79_vm1, %v2048_v45 }
0x1cfd   :  { %7299 = vmatpush3.xpose.msk.msra.mxu0 %vm79_vm1, %v8580_v36  ;;  %7300 = vmatprep.mubr.msk.f32.mxu0 %vm8429_vm0, %v8430_v11 }
0x1cfe   :  { %7303 = vmatprep.subr.mxu0 %v8430_v11 }
0x1d03   :  { %v2191_v19 = vpop.f32.mrb[24].mxu1 }
0x1d04   :  { %v2192_v28 = vadd.f32 %v2191_v19, %v8565_v17  ;;  %v7297_v29 = vpop.f32.mrb[25].mxu1 }
0x1d06   :  { %2203 = vrot.lane.b32.xlu1 %v2192_v28, %s8431_s2 }
0x1d78   :  { %v2204_v47 = vpop.permute.xlu1 %2203 }
0x1dcf   :  { %v2121_v30 = vpop.f32.mrb[24].mxu0 }
0x1dd0   :  { %v2122_v31 = vadd.f32 %v2121_v30, %v8572_v23  ;;  %v7286_v33 = vpop.f32.mrb[25].mxu0 }
0x1dd2   :  { %v2195_v37 = vadd.f32 %v2192_v28, %v2122_v31 }
0x1dd4   :  { %v6610_v38 = vmul.f32 -1.442695, %v2195_v37 }
0x1dd6   :  { %8246 = vpow2.f32 %v6610_v38 }
0x1de0   :  { %v8247_v43 = vpop.eup %8246 }
0x1de1   :  { %v2199_v44 = vadd.f32 1.0, %v8247_v43 }
0x1de3   :  { %8248 = vrcp.f32 %v2199_v44 }
0x1ded   :  { %v8249_v62 = vpop.eup %8248 }
0x1dee   :  { %v2206_v42 = vmul.f32 %v8249_v62, %v2204_v47  ;;  %v2213_v50 = vsub.f32 1.0, %v8249_v62  ;;  %v2219_v51 = vmul.f32 %v8249_v62, %v8857_v18 }
0x1df0   :  { %2208 = vrot.lane.b32.xlu0 %v2206_v42, %s8431_s2 }
0x1e62   :  { %v2209_v34 = vpop.permute.xlu0 %2208 }
0x1e63   :  { %v2211_v17 = vadd.f32 %v2209_v34, %v2122_v31 }
0x1e65   :  { %8250 = vtanh.f32 %v2211_v17 }
0x1e6f   :  { %v8251_v49 = vpop.eup %8250 }
0x1e70   :  { %2215 = vrot.lane.b32.xlu1 %v8251_v49, %s8432_s27 }
0x1ee2   :  { %v2216_v23 = vpop.permute.xlu1 %2215 }
0x1ee3   :  { %v2218_v53 = vmul.f32 %v2216_v23, %v2213_v50 }
0x1ee5   :  { %v8949_v54 = vadd.f32 %v2219_v51, %v2218_v53 }
0x1ee7   :  { %2222 = vrot.lane.b32.xlu1 %v8949_v54, %s8432_s27 }
0x1f59   :  { %v8953_v57 = vpop.permute.xlu1 %2222 }
0x1f5a   :  { %7301 = vmatmul.mubr.msk.f32.vlgmr.msra.gmra.mrb[26].mxu0 %vm79_vm1, %v8953_v57 }
0x1f5b   :  { %7304 = vmatpush3.msra.mxu0 %v8580_v36  ;;  %7305 = vmatprep.mubr.msk.f32.mxu0 %vm8429_vm0, %v8430_v11 }
0x1f5c   :  { %7956 = vmatprep.subr.bf16.mxu0 %v8428_v3 }
0x202d   :  { %v2292_v59 = vpop.f32.mrb[26].mxu0 }
0x202e   :  { %v7302_v18 = vpop.f32.mrb[27].mxu0  ;;  %v2296_v61 = vsel %vm336_vm2, %v2292_v59, -inf }
0x202f   :  { %2297 = vmax.xlane.f32.xlu0 %v2296_v61  ;;  %v9033_v61 = vld [vmem:[%s9661_s1] sm:$0xff] }
0x20bc   :  { %v2298_v63 = vpop.xlane.xlu0 %2297 }
0x20bd   :  { %v2299_v0 = vsub.f32 %v2292_v59, %v2298_v63  ;;  %v9043_v63 = vld [vmem:[%s9666_s6] sm:$0x1] }
0x20bf   :  { %v2300_v2 = vmul.f32 1.442695, %v2299_v0 }
0x20c1   :  { %8252 = vpow2.f32 %v2300_v2 }
0x20cb   :  { %v8253_v46 = vpop.eup %8252 }
0x20cc   :  { %v2302_v5 = vsel %vm336_vm2, %v8253_v46, 0.0 }
0x20cd   :  { %2303 = vadd.xlane.f32.xlu1 %v2302_v5  ;;  %v9050_v5 = vld [vmem:[%s9665_s5] sm:$0x1] }
0x215a   :  { %v2304_v6 = vpop.xlane.xlu1 %2303 }
0x215b   :  { %8254 = vrcp.f32 %v2304_v6 }
0x2165   :  { %v8255_v36 = vpop.eup %8254 }
0x2166   :  { %v2306_v15 = vmul.f32 %v8255_v36, %v8253_v46 }
0x2168   :  { %7306 = vmatmul.mubr.msk.f32.vlgmr.msra.gmra.mrb[28].mxu0 %vm348_vm3, %v2306_v15 }
0x2169   :  { %7958 = vmatpush3.bf16.msra.mxu0 %v8626_v1  ;;  %7327 = vmatprep.mubr.msk.f32.mxu0 %vm8429_vm0, %v8430_v11 }
0x216a   :  { %7959 = vmatprep.subr.bf16.mxu0 %v8428_v3 }
0x216d   :  { %7961 = vmatpush3.bf16.msra.mxu0 %v8636_v7 }
0x216e   :  { %7968 = vmatprep.subr.bf16.mxu0 %v8428_v3 }
0x2170   :  { %7328 = vmatmul.mubr.msk.f32.vlgmr.msra.gmra.mrb[30].mxu0 %vm79_vm1, %v8953_v57 }
0x2171   :  { %7970 = vmatpush3.bf16.msra.mxu0 %v8645_v10  ;;  %7353 = vmatprep.mubr.msk.f32.mxu0 %vm8429_vm0, %v8430_v11 }
0x2172   :  { %7971 = vmatprep.subr.bf16.mxu0 %v8428_v3 }
0x2175   :  { %7973 = vmatpush3.bf16.msra.mxu0 %v8716_v48 }
0x2176   :  { %7974 = vmatprep.subr.bf16.mxu0 %v8428_v3 }
0x2179   :  { %7976 = vmatpush3.bf16.msra.mxu0 %v8726_v55 }
0x217a   :  { %7983 = vmatprep.subr.bf16.mxu0 %v8428_v3 }
0x223b   :  { %v2376_v16 = vpop.f32.mrb[28].mxu0 }
0x223c   :  { %v7307_v20 = vpop.f32.mrb[29].mxu0  ;;  %7317 = vmatmul.mubr.msk.f32.vlgmr.msra.gmra.mrb[26].mxu1 %vm79_vm1, %v2376_v16 }
0x223d   :  { %7964 = vmatpush3.bf16.msra.mxu1 %v8667_v22  ;;  %7338 = vmatprep.mubr.msk.f32.mxu1 %vm8429_vm0, %v8430_v11 }
0x223e   :  { %7965 = vmatprep.subr.bf16.mxu1 %v8428_v3 }
0x2241   :  { %7967 = vmatpush3.bf16.msra.mxu1 %v8673_v25 }
0x2242   :  { %7977 = vmatprep.subr.bf16.mxu1 %v8428_v3 }
0x2243   :  { %v2519_v41 = vpop.f32.mrb[30].mxu0 }
0x2244   :  { %v7329_v24 = vpop.f32.mrb[31].mxu0 }
0x230f   :  { %v2449_v45 = vpop.f32.mrb[26].mxu1 }
0x2310   :  { %v2520_v27 = vadd.f32 %v2519_v41, %v2449_v45  ;;  %v7318_v19 = vpop.f32.mrb[27].mxu1 }
0x2312   :  { %v2523_v28 = vadd.f32 %v2520_v27, %v8681_v26 }
0x2314   :  { %8256 = vtanh.f32 %v2523_v28 }
0x231e   :  { %v8257_v29 = vpop.eup %8256 }
0x231f   :  { %7339 = vmatmul.mubr.msk.f32.vlgmr.msra.gmra.mrb[28].mxu1 %vm79_vm1, %v8257_v29 }
0x2320   :  { %7979 = vmatpush3.bf16.msra.mxu1 %v8512_v4  ;;  %7364 = vmatprep.mubr.msk.f32.mxu1 %vm8429_vm0, %v8430_v11 }
0x2321   :  { %7980 = vmatprep.subr.bf16.mxu1 %v8428_v3 }
0x2324   :  { %7982 = vmatpush3.bf16.msra.mxu1 %v8536_v12 }
0x2325   :  { %7378 = vmatprep.subr.mxu1 %v8430_v11 }
0x23f2   :  { %v2594_v30 = vpop.f32.mrb[28].mxu1 }
0x23f3   :  { %v8996_v31 = vadd.f32 %v2594_v30, %v8694_v32  ;;  %v7340_v26 = vpop.f32.mrb[29].mxu1 }
0x23f5   :  { %v2598_v33 = vsel %vm640_vm4, %v8996_v31, -inf }
0x23f6   :  { %2599 = vmax.xlane.f32.xlu0 %v2598_v33 }
0x2483   :  { %v9000_v37 = vpop.xlane.xlu0 %2599 }
0x2484   :  { %vm2608_vm8 = vcmp.ge.f32.partialorder %v8996_v31, %v9000_v37 }
0x2485   :  { %v2609_v38 = vsel %vm2608_vm8, %v8702_v39, 48 }
0x2486   :  { %v2610_v43 = vsel %vm640_vm4, %v2609_v38, 2147483647 }
0x2487   :  { %v2612_v44 = vshra.s32 %v2610_v43, 16  ;;  %v2611_v47 = vand.u32 65535, %v2610_v43 }
0x2489   :  { %v2614_v62 = vcvt.s32.f32 %v2612_v44  ;;  %v2613_v42 = vcvt.s32.f32 %v2611_v47 }
0x248b   :  { %2615 = vmin.xlane.f32.xlu0 %v2614_v62 }
0x2518   :  { %v2616_v32 = vpop.xlane.xlu0 %2615 }
0x2519   :  { %vm2617_vm9 = vcmp.eq.f32.partialorder %v2614_v62, %v2616_v32  ;;  %v2622_v17 = vcvt.f32.s32 %v2616_v32 }
0x251a   :  { %v2618_v34 = vsel %vm2617_vm9, %v2613_v42, inf }
0x251b   :  { %2619 = vmin.xlane.f32.xlu1 %v2618_v34  ;;  %v2623_v50 = vshll.u32 %v2622_v17, 16 }
0x25a8   :  { %v2620_v49 = vpop.xlane.xlu1 %2619 }
0x25a9   :  { %v2621_v23 = vcvt.f32.s32 %v2620_v49 }
0x25ab   :  { %v2624_v51 = vadd.s32 %v2623_v50, %v2621_v23 }
0x25ad   :  { %v9010_v53 = vsel %vm2625_vm10, %v2624_v51, %v8918_v21  ;;  %vm2628_vm13 = vcmp.eq.s32.totalorder %v8702_v39, %v2624_v51 }
0x25ae   :  { %v6617_v59 = vsel %vm2628_vm13, 1.0, %v8430_v11 }
0x25af   :  { %7354 = vmatmul.mubr.msk.f32.vlgmr.msra.gmra.mrb[32].mxu0 %vm674_vm7, %v6617_v59 }
0x25b0   :  { %7985 = vmatpush3.bf16.msra.mxu0 %v8523_v8  ;;  %7375 = vmatprep.mubr.msk.f32.mxu0 %vm8429_vm0, %v8430_v11 }
0x25b1   :  { %7986 = vmatprep.subr.bf16.mxu0 %v8428_v3 }
0x25b4   :  { %7988 = vmatpush3.bf16.msra.mxu0 %v8545_v14 }
0x25b5   :  { %7989 = vmatprep.subr.bf16.mxu0 %v8428_v3 }
0x25b7   :  { %7376 = vmatmul.mubr.msk.f32.vlgmr.msra.gmra.mrb[34].mxu0 %vm79_vm1, %v8953_v57 }
0x25b8   :  { %7991 = vmatpush3.bf16.msra.mxu0 %v8609_v58  ;;  %7396 = vmatprep.mubr.msk.f32.mxu0 %vm8429_vm0, %v8430_v11 }
0x25b9   :  { %7992 = vmatprep.subr.bf16.mxu0 %v8428_v3 }
0x25bc   :  { %7994 = vmatpush3.bf16.msra.mxu0 %v8615_v60 }
0x25bd   :  { %8001 = vmatprep.subr.bf16.mxu0 %v8428_v3 }
0x2682   :  { %v2700_v21 = vpop.f32.mrb[32].mxu0 }
0x2683   :  { %v7355_v18 = vpop.f32.mrb[33].mxu0  ;;  %7365 = vmatmul.mubr.msk.f32.vlgmr.msra.gmra.mrb[30].mxu1 %vm79_vm1, %v2700_v21 }
0x2684   :  { %7379 = vmatpush3.xpose.msk.msra.mxu1 %vm79_vm1, %v9033_v61  ;;  %7380 = vmatprep.mubr.msk.f32.mxu1 %vm8429_vm0, %v8430_v11 }
0x2685   :  { %7383 = vmatprep.subr.mxu1 %v8430_v11 }
0x268a   :  { %v2843_v57 = vpop.f32.mrb[34].mxu0 }
0x268b   :  { %v2844_v0 = vadd.f32 %v9043_v63, %v2843_v57  ;;  %v7377_v2 = vpop.f32.mrb[35].mxu0 }
0x268d   :  { %2855 = vrot.lane.b32.xlu0 %v2844_v0, %s8431_s2 }
0x26ff   :  { %v2856_v45 = vpop.permute.xlu0 %2855 }
0x2756   :  { %v2773_v46 = vpop.f32.mrb[30].mxu1 }
0x2757   :  { %v2774_v6 = vadd.f32 %v9050_v5, %v2773_v46  ;;  %v7366_v36 = vpop.f32.mrb[31].mxu1 }
0x2759   :  { %v2847_v15 = vadd.f32 %v2844_v0, %v2774_v6 }
0x275b   :  { %v6621_v16 = vmul.f32 -1.442695, %v2847_v15 }
0x275d   :  { %8258 = vpow2.f32 %v6621_v16 }
0x2767   :  { %v8259_v20 = vpop.eup %8258 }
0x2768   :  { %v2851_v41 = vadd.f32 1.0, %v8259_v20  ;;  %v9110_v20 = vld [vmem:[%s9670_s10] sm:$0x1] }
0x276a   :  { %8260 = vrcp.f32 %v2851_v41 }
0x2774   :  { %v8261_v24 = vpop.eup %8260 }
0x2775   :  { %v2858_v27 = vmul.f32 %v8261_v24, %v2856_v45  ;;  %v2865_v30 = vsub.f32 1.0, %v8261_v24  ;;  %v2871_v33 = vmul.f32 %v8261_v24, %v8949_v54 }
0x2777   :  { %2860 = vrot.lane.b32.xlu1 %v2858_v27, %s8431_s2 }
0x27e9   :  { %v2861_v19 = vpop.permute.xlu1 %2860 }
0x27ea   :  { %v2863_v28 = vadd.f32 %v2861_v19, %v2774_v6  ;;  %v9097_v6 = vld [vmem:[%s9668_s8] sm:$0x1] }
0x27ec   :  { %8262 = vtanh.f32 %v2863_v28 }
0x27f6   :  { %v8263_v29 = vpop.eup %8262 }
0x27f7   :  { %2867 = vrot.lane.b32.xlu1 %v8263_v29, %s8432_s27 }
0x2869   :  { %v2868_v26 = vpop.permute.xlu1 %2867 }
0x286a   :  { %v2870_v38 = vmul.f32 %v2868_v26, %v2865_v30 }
0x286c   :  { %v9056_v43 = vadd.f32 %v2871_v33, %v2870_v38 }
0x286e   :  { %2874 = vrot.lane.b32.xlu0 %v9056_v43, %s8432_s27 }
0x28e0   :  { %v9060_v44 = vpop.permute.xlu0 %2874 }
0x28e1   :  { %7381 = vmatmul.mubr.msk.f32.vlgmr.msra.gmra.mrb[32].mxu1 %vm79_vm1, %v9060_v44 }
0x28e2   :  { %7384 = vmatpush3.msra.mxu1 %v9033_v61  ;;  %7385 = vmatprep.mubr.msk.f32.mxu1 %vm8429_vm0, %v8430_v11 }
0x28e3   :  { %7995 = vmatprep.subr.bf16.mxu1 %v8428_v3 }
0x29b4   :  { %v2944_v62 = vpop.f32.mrb[32].mxu1 }
0x29b5   :  { %v7382_v54 = vpop.f32.mrb[33].mxu1  ;;  %v2948_v47 = vsel %vm336_vm2, %v2944_v62, -inf }
0x29b6   :  { %2949 = vmax.xlane.f32.xlu1 %v2948_v47 }
0x2a43   :  { %v2950_v32 = vpop.xlane.xlu1 %2949 }
0x2a44   :  { %v2951_v42 = vsub.f32 %v2944_v62, %v2950_v32 }
0x2a46   :  { %v2952_v34 = vmul.f32 1.442695, %v2951_v42 }
0x2a48   :  { %8264 = vpow2.f32 %v2952_v34 }
0x2a52   :  { %v8265_v17 = vpop.eup %8264 }
0x2a53   :  { %v2954_v49 = vsel %vm336_vm2, %v8265_v17, 0.0 }
0x2a54   :  { %2955 = vadd.xlane.f32.xlu0 %v2954_v49 }
0x2ae1   :  { %v2956_v50 = vpop.xlane.xlu0 %2955 }
0x2ae2   :  { %8266 = vrcp.f32 %v2956_v50 }
0x2aec   :  { %v8267_v23 = vpop.eup %8266 }
0x2aed   :  { %v2958_v51 = vmul.f32 %v8267_v23, %v8265_v17 }
0x2aef   :  { %7386 = vmatmul.mubr.msk.f32.vlgmr.msra.gmra.mrb[34].mxu1 %vm348_vm3, %v2958_v51 }
0x2af0   :  { %7997 = vmatpush3.bf16.msra.mxu1 %v8626_v1  ;;  %7407 = vmatprep.mubr.msk.f32.mxu1 %vm8429_vm0, %v8430_v11 }
0x2af1   :  { %7998 = vmatprep.subr.bf16.mxu1 %v8428_v3 }
0x2af4   :  { %8000 = vmatpush3.bf16.msra.mxu1 %v8636_v7 }
0x2af5   :  { %8007 = vmatprep.subr.bf16.mxu1 %v8428_v3 }
0x2af7   :  { %7408 = vmatmul.mubr.msk.f32.vlgmr.msra.gmra.mrb[36].mxu1 %vm79_vm1, %v9060_v44 }
0x2af8   :  { %8009 = vmatpush3.bf16.msra.mxu1 %v8645_v10  ;;  %7433 = vmatprep.mubr.msk.f32.mxu1 %vm8429_vm0, %v8430_v11 }
0x2af9   :  { %8010 = vmatprep.subr.bf16.mxu1 %v8428_v3 }
0x2afc   :  { %8012 = vmatpush3.bf16.msra.mxu1 %v8716_v48 }
0x2afd   :  { %8013 = vmatprep.subr.bf16.mxu1 %v8428_v3 }
0x2b00   :  { %8015 = vmatpush3.bf16.msra.mxu1 %v8726_v55 }
0x2b01   :  { %8022 = vmatprep.subr.bf16.mxu1 %v8428_v3 }
0x2bc2   :  { %v3028_v59 = vpop.f32.mrb[34].mxu1 }
0x2bc3   :  { %v7387_v21 = vpop.f32.mrb[35].mxu1  ;;  %7397 = vmatmul.mubr.msk.f32.vlgmr.msra.gmra.mrb[36].mxu0 %vm79_vm1, %v3028_v59 }
0x2bc4   :  { %8003 = vmatpush3.bf16.msra.mxu0 %v8667_v22  ;;  %7418 = vmatprep.mubr.msk.f32.mxu0 %vm8429_vm0, %v8430_v11 }
0x2bc5   :  { %8004 = vmatprep.subr.bf16.mxu0 %v8428_v3 }
0x2bc8   :  { %8006 = vmatpush3.bf16.msra.mxu0 %v8673_v25 }
0x2bc9   :  { %8016 = vmatprep.subr.bf16.mxu0 %v8428_v3 }
0x2bca   :  { %v3171_v18 = vpop.f32.mrb[36].mxu1 }
0x2bcb   :  { %v7409_v57 = vpop.f32.mrb[37].mxu1 }
0x2c96   :  { %v3101_v0 = vpop.f32.mrb[36].mxu0 }
0x2c97   :  { %v3172_v2 = vadd.f32 %v3171_v18, %v3101_v0  ;;  %v7398_v46 = vpop.f32.mrb[37].mxu0 }
0x2c99   :  { %v3175_v36 = vadd.f32 %v9097_v6, %v3172_v2 }
0x2c9b   :  { %8268 = vtanh.f32 %v3175_v36 }
0x2ca5   :  { %v8269_v15 = vpop.eup %8268 }
0x2ca6   :  { %7419 = vmatmul.mubr.msk.f32.vlgmr.msra.gmra.mrb[38].mxu0 %vm79_vm1, %v8269_v15 }
0x2ca7   :  { %8018 = vmatpush3.bf16.msra.mxu0 %v8512_v4  ;;  %7444 = vmatprep.mubr.msk.f32.mxu0 %vm8429_vm0, %v8430_v11 }
0x2ca8   :  { %8019 = vmatprep.subr.bf16.mxu0 %v8428_v3 }
0x2cab   :  { %8021 = vmatpush3.bf16.msra.mxu0 %v8536_v12 }
0x2cac   :  { %7458 = vmatprep.subr.mxu0 %v8430_v11 }
0x2d79   :  { %v3246_v16 = vpop.f32.mrb[38].mxu0 }
0x2d7a   :  { %v9113_v41 = vadd.f32 %v9110_v20, %v3246_v16  ;;  %v7420_v24 = vpop.f32.mrb[39].mxu0 }
0x2d7c   :  { %v3250_v45 = vsel %vm640_vm4, %v9113_v41, -inf }
0x2d7d   :  { %3251 = vmax.xlane.f32.xlu0 %v3250_v45 }
0x2e0a   :  { %v9117_v27 = vpop.xlane.xlu0 %3251 }
0x2e0b   :  { %vm3260_vm14 = vcmp.ge.f32.partialorder %v9113_v41, %v9117_v27 }
0x2e0c   :  { %v3261_v19 = vsel %vm3260_vm14, %v8702_v39, 48  ;;  %vm3929_vm14 = vcmp.eq.s32.totalorder %v8702_v39, 5 }
0x2e0d   :  { %v3262_v28 = vsel %vm640_vm4, %v3261_v19, 2147483647 }
0x2e0e   :  { %v3264_v29 = vshra.s32 %v3262_v28, 16  ;;  %v3263_v26 = vand.u32 65535, %v3262_v28 }
0x2e10   :  { %v3266_v30 = vcvt.s32.f32 %v3264_v29  ;;  %v3265_v38 = vcvt.s32.f32 %v3263_v26 }
0x2e12   :  { %3267 = vmin.xlane.f32.xlu1 %v3266_v30 }
0x2e9f   :  { %v3268_v33 = vpop.xlane.xlu1 %3267 }
0x2ea0   :  { %vm3269_vm15 = vcmp.eq.f32.partialorder %v3266_v30, %v3268_v33  ;;  %v3274_v54 = vcvt.f32.s32 %v3268_v33 }
0x2ea1   :  { %v3270_v62 = vsel %vm3269_vm15, %v3265_v38, inf }
0x2ea2   :  { %3271 = vmin.xlane.f32.xlu0 %v3270_v62  ;;  %v3275_v32 = vshll.u32 %v3274_v54, 16 }
0x2f2f   :  { %v3272_v47 = vpop.xlane.xlu0 %3271 }
0x2f30   :  { %v3273_v42 = vcvt.f32.s32 %v3272_v47 }
0x2f32   :  { %v3276_v34 = vadd.s32 %v3275_v32, %v3273_v42 }
0x2f34   :  { %v9127_v17 = vsel %vm3277_vm6, %v3276_v34, %v9010_v53  ;;  %vm3280_vm8 = vcmp.eq.s32.totalorder %v8702_v39, %v3276_v34 }
0x2f35   :  { %v6628_v49 = vsel %vm3280_vm8, 1.0, %v8430_v11 }
0x2f36   :  { %7434 = vmatmul.mubr.msk.f32.vlgmr.msra.gmra.mrb[38].mxu1 %vm674_vm7, %v6628_v49 }
0x2f37   :  { %8024 = vmatpush3.bf16.msra.mxu1 %v8523_v8  ;;  %7455 = vmatprep.mubr.msk.f32.mxu1 %vm8429_vm0, %v8430_v11 }
0x2f38   :  { %8025 = vmatprep.subr.bf16.mxu1 %v8428_v3 }
0x2f3b   :  { %8027 = vmatpush3.bf16.msra.mxu1 %v8545_v14 }
0x2f3c   :  { %8028 = vmatprep.subr.bf16.mxu1 %v8428_v3 }
0x2f3e   :  { %7456 = vmatmul.mubr.msk.f32.vlgmr.msra.gmra.mrb[40].mxu1 %vm79_vm1, %v9060_v44 }
0x2f3f   :  { %8030 = vmatpush3.bf16.msra.mxu1 %v8609_v58  ;;  %7476 = vmatprep.mubr.msk.f32.mxu1 %vm8429_vm0, %v8430_v11 }
0x2f40   :  { %8031 = vmatprep.subr.bf16.mxu1 %v8428_v3 }
0x2f43   :  { %8033 = vmatpush3.bf16.msra.mxu1 %v8615_v60 }
0x2f44   :  { %8040 = vmatprep.subr.bf16.mxu1 %v8428_v3 }
0x3009   :  { %v3352_v53 = vpop.f32.mrb[38].mxu1 }
0x300a   :  { %v7435_v50 = vpop.f32.mrb[39].mxu1  ;;  %7445 = vmatmul.mubr.msk.f32.vlgmr.msra.gmra.mrb[40].mxu0 %vm79_vm1, %v3352_v53 }
0x300b   :  { %7459 = vmatpush3.xpose.msk.msra.mxu0 %vm79_vm1, %v9033_v61  ;;  %7460 = vmatprep.mubr.msk.f32.mxu0 %vm8429_vm0, %v8430_v11 }
0x300c   :  { %7463 = vmatprep.subr.mxu0 %v8430_v11 }
0x3011   :  { %v3495_v44 = vpop.f32.mrb[40].mxu1 }
0x3012   :  { %v3496_v23 = vadd.f32 %v9043_v63, %v3495_v44  ;;  %v7457_v51 = vpop.f32.mrb[41].mxu1 }
0x3014   :  { %3507 = vrot.lane.b32.xlu1 %v3496_v23, %s8431_s2 }
0x3086   :  { %v3508_v15 = vpop.permute.xlu1 %3507 }
0x30dd   :  { %v3425_v59 = vpop.f32.mrb[40].mxu0 }
0x30de   :  { %v3426_v21 = vadd.f32 %v9050_v5, %v3425_v59  ;;  %v7446_v18 = vpop.f32.mrb[41].mxu0 }
0x30e0   :  { %v3499_v57 = vadd.f32 %v3496_v23, %v3426_v21 }
0x30e2   :  { %v6632_v0 = vmul.f32 -1.442695, %v3499_v57 }
0x30e4   :  { %8270 = vpow2.f32 %v6632_v0 }
0x30ee   :  { %v8271_v2 = vpop.eup %8270 }
0x30ef   :  { %v3503_v46 = vadd.f32 1.0, %v8271_v2 }
0x30f1   :  { %8272 = vrcp.f32 %v3503_v46 }
0x30fb   :  { %v8273_v36 = vpop.eup %8272 }
0x30fc   :  { %v3510_v16 = vmul.f32 %v8273_v36, %v3508_v15  ;;  %v3517_v28 = vsub.f32 1.0, %v8273_v36  ;;  %v3523_v30 = vmul.f32 %v8273_v36, %v9056_v43 }
0x30fe   :  { %3512 = vrot.lane.b32.xlu0 %v3510_v16, %s8431_s2 }
0x3170   :  { %v3513_v24 = vpop.permute.xlu0 %3512 }
0x3171   :  { %v3515_v45 = vadd.f32 %v3513_v24, %v3426_v21 }
0x3173   :  { %8274 = vtanh.f32 %v3515_v45 }
0x317d   :  { %v8275_v19 = vpop.eup %8274 }
0x317e   :  { %3519 = vrot.lane.b32.xlu1 %v8275_v19, %s8432_s27 }
0x31f0   :  { %v3520_v29 = vpop.permute.xlu1 %3519 }
0x31f1   :  { %v3522_v26 = vmul.f32 %v3520_v29, %v3517_v28 }
0x31f3   :  { %v9158_v33 = vadd.f32 %v3523_v30, %v3522_v26 }
0x31f5   :  { %3526 = vrot.lane.b32.xlu1 %v9158_v33, %s8432_s27 }
0x3267   :  { %v9162_v38 = vpop.permute.xlu1 %3526 }
0x3268   :  { %7461 = vmatmul.mubr.msk.f32.vlgmr.msra.gmra.mrb[42].mxu0 %vm79_vm1, %v9162_v38 }
0x3269   :  { %7464 = vmatpush3.msra.mxu0 %v9033_v61  ;;  %7465 = vmatprep.mubr.msk.f32.mxu0 %vm8429_vm0, %v8430_v11 }
0x326a   :  { %8034 = vmatprep.subr.bf16.mxu0 %v8428_v3 }
0x333b   :  { %v3596_v62 = vpop.f32.mrb[42].mxu0 }
0x333c   :  { %v7462_v43 = vpop.f32.mrb[43].mxu0  ;;  %v3600_v54 = vsel %vm336_vm2, %v3596_v62, -inf }
0x333d   :  { %3601 = vmax.xlane.f32.xlu0 %v3600_v54 }
0x33ca   :  { %v3602_v47 = vpop.xlane.xlu0 %3601 }
0x33cb   :  { %v3603_v32 = vsub.f32 %v3596_v62, %v3602_v47 }
0x33cd   :  { %v3604_v42 = vmul.f32 1.442695, %v3603_v32 }
0x33cf   :  { %8276 = vpow2.f32 %v3604_v42 }
0x33d9   :  { %v8277_v34 = vpop.eup %8276 }
0x33da   :  { %v3606_v49 = vsel %vm336_vm2, %v8277_v34, 0.0 }
0x33db   :  { %3607 = vadd.xlane.f32.xlu1 %v3606_v49 }
0x3468   :  { %v3608_v53 = vpop.xlane.xlu1 %3607 }
0x3469   :  { %8278 = vrcp.f32 %v3608_v53 }
0x3473   :  { %v8279_v50 = vpop.eup %8278 }
0x3474   :  { %v3610_v44 = vmul.f32 %v8279_v50, %v8277_v34 }
0x3476   :  { %7466 = vmatmul.mubr.msk.f32.vlgmr.msra.gmra.mrb[44].mxu0 %vm348_vm3, %v3610_v44 }
0x3477   :  { %8036 = vmatpush3.bf16.msra.mxu0 %v8626_v1  ;;  %7487 = vmatprep.mubr.msk.f32.mxu0 %vm8429_vm0, %v8430_v11 }
0x3478   :  { %8037 = vmatprep.subr.bf16.mxu0 %v8428_v3 }
0x347b   :  { %8039 = vmatpush3.bf16.msra.mxu0 %v8636_v7 }
0x347c   :  { %8046 = vmatprep.subr.bf16.mxu0 %v8428_v3 }
0x347e   :  { %7488 = vmatmul.mubr.msk.f32.vlgmr.msra.gmra.mrb[46].mxu0 %vm79_vm1, %v9162_v38 }
0x347f   :  { %8048 = vmatpush3.bf16.msra.mxu0 %v8645_v10  ;;  %7513 = vmatprep.mubr.msk.f32.mxu0 %vm8429_vm0, %v8430_v11 }
0x3480   :  { %8049 = vmatprep.subr.bf16.mxu0 %v8428_v3 }
0x3483   :  { %8051 = vmatpush3.bf16.msra.mxu0 %v8716_v48 }
0x3484   :  { %8052 = vmatprep.subr.bf16.mxu0 %v8428_v3 }
0x3487   :  { %8054 = vmatpush3.bf16.msra.mxu0 %v8726_v55 }
0x3488   :  { %8061 = vmatprep.subr.bf16.mxu0 %v8428_v3 }
0x3549   :  { %v3680_v23 = vpop.f32.mrb[44].mxu0 }
0x354a   :  { %v7467_v51 = vpop.f32.mrb[45].mxu0  ;;  %7477 = vmatmul.mubr.msk.f32.vlgmr.msra.gmra.mrb[42].mxu1 %vm79_vm1, %v3680_v23 }
0x354b   :  { %8042 = vmatpush3.bf16.msra.mxu1 %v8667_v22  ;;  %7498 = vmatprep.mubr.msk.f32.mxu1 %vm8429_vm0, %v8430_v11 }
0x354c   :  { %8043 = vmatprep.subr.bf16.mxu1 %v8428_v3 }
0x354f   :  { %8045 = vmatpush3.bf16.msra.mxu1 %v8673_v25 }
0x3550   :  { %8055 = vmatprep.subr.bf16.mxu1 %v8428_v3 }
0x3551   :  { %v3823_v59 = vpop.f32.mrb[46].mxu0 }
0x3552   :  { %v7489_v21 = vpop.f32.mrb[47].mxu0 }
0x361d   :  { %v3753_v18 = vpop.f32.mrb[42].mxu1 }
0x361e   :  { %v3824_v57 = vadd.f32 %v3823_v59, %v3753_v18  ;;  %v7478_v0 = vpop.f32.mrb[43].mxu1 }
0x3620   :  { %v3827_v2 = vadd.f32 %v9097_v6, %v3824_v57 }
0x3622   :  { %8280 = vtanh.f32 %v3827_v2 }
0x362c   :  { %v8281_v46 = vpop.eup %8280 }
0x362d   :  { %7499 = vmatmul.mubr.msk.f32.vlgmr.msra.gmra.mrb[44].mxu1 %vm79_vm1, %v8281_v46 }
0x362e   :  { %8057 = vmatpush3.bf16.msra.mxu1 %v8512_v4  ;;  %7524 = vmatprep.mubr.msk.f32.mxu1 %vm8429_vm0, %v8430_v11 }
0x362f   :  { %8058 = vmatprep.subr.bf16.mxu1 %v8428_v3 }
0x3632   :  { %8060 = vmatpush3.bf16.msra.mxu1 %v8536_v12 }
0x3633   :  { %7538 = vmatprep.subr.mxu1 %v8430_v11 }
0x3700   :  { %v3898_v36 = vpop.f32.mrb[44].mxu1 }
0x3701   :  { %v9205_v15 = vadd.f32 %v9110_v20, %v3898_v36  ;;  %v7500_v16 = vpop.f32.mrb[45].mxu1 }
0x3703   :  { %v3902_v24 = vsel %vm640_vm4, %v9205_v15, -inf }
0x3704   :  { %3903 = vmax.xlane.f32.xlu0 %v3902_v24 }
0x3791   :  { %v9209_v45 = vpop.xlane.xlu0 %3903 }
0x3792   :  { %vm3912_vm9 = vcmp.ge.f32.partialorder %v9205_v15, %v9209_v45 }
0x3793   :  { %v3913_v19 = vsel %vm3912_vm9, %v8702_v39, 48 }
0x3794   :  { %v3914_v28 = vsel %vm640_vm4, %v3913_v19, 2147483647 }
0x3795   :  { %v3916_v29 = vshra.s32 %v3914_v28, 16  ;;  %v3915_v26 = vand.u32 65535, %v3914_v28 }
0x3797   :  { %v3918_v30 = vcvt.s32.f32 %v3916_v29  ;;  %v3917_v43 = vcvt.s32.f32 %v3915_v26 }
0x3799   :  { %3919 = vmin.xlane.f32.xlu0 %v3918_v30 }
0x3826   :  { %v3920_v62 = vpop.xlane.xlu0 %3919 }
0x3827   :  { %vm3921_vm13 = vcmp.eq.f32.partialorder %v3918_v30, %v3920_v62  ;;  %v3926_v47 = vcvt.f32.s32 %v3920_v62 }
0x3828   :  { %v3922_v54 = vsel %vm3921_vm13, %v3917_v43, inf  ;;  %vm4581_vm13 = vcmp.eq.s32.totalorder %v8702_v39, 6 }
0x3829   :  { %3923 = vmin.xlane.f32.xlu1 %v3922_v54  ;;  %v3927_v42 = vshll.u32 %v3926_v47, 16 }
0x38b6   :  { %v3924_v32 = vpop.xlane.xlu1 %3923 }
0x38b7   :  { %v3925_v34 = vcvt.f32.s32 %v3924_v32 }
0x38b9   :  { %v3928_v49 = vadd.s32 %v3927_v42, %v3925_v34 }
0x38bb   :  { %v9219_v53 = vsel %vm3929_vm14, %v3928_v49, %v9127_v17  ;;  %vm3932_vm15 = vcmp.eq.s32.totalorder %v8702_v39, %v3928_v49 }
0x38bc   :  { %v6639_v50 = vsel %vm3932_vm15, 1.0, %v8430_v11 }
0x38bd   :  { %7514 = vmatmul.mubr.msk.f32.vlgmr.msra.gmra.mrb[48].mxu0 %vm674_vm7, %v6639_v50 }
0x38be   :  { %8063 = vmatpush3.bf16.msra.mxu0 %v8523_v8  ;;  %7535 = vmatprep.mubr.msk.f32.mxu0 %vm8429_vm0, %v8430_v11 }
0x38bf   :  { %8064 = vmatprep.subr.bf16.mxu0 %v8428_v3 }
0x38c2   :  { %8066 = vmatpush3.bf16.msra.mxu0 %v8545_v14 }
0x38c3   :  { %8067 = vmatprep.subr.bf16.mxu0 %v8428_v3 }
0x38c5   :  { %7536 = vmatmul.mubr.msk.f32.vlgmr.msra.gmra.mrb[50].mxu0 %vm79_vm1, %v9162_v38 }
0x38c6   :  { %8069 = vmatpush3.bf16.msra.mxu0 %v8609_v58  ;;  %7556 = vmatprep.mubr.msk.f32.mxu0 %vm8429_vm0, %v8430_v11 }
0x38c7   :  { %8070 = vmatprep.subr.bf16.mxu0 %v8428_v3 }
0x38ca   :  { %8072 = vmatpush3.bf16.msra.mxu0 %v8615_v60 }
0x38cb   :  { %8079 = vmatprep.subr.bf16.mxu0 %v8428_v3 }
0x3990   :  { %v4004_v17 = vpop.f32.mrb[48].mxu0 }
0x3991   :  { %v7515_v44 = vpop.f32.mrb[49].mxu0  ;;  %7525 = vmatmul.mubr.msk.f32.vlgmr.msra.gmra.mrb[46].mxu1 %vm79_vm1, %v4004_v17 }
0x3992   :  { %7539 = vmatpush3.xpose.msk.msra.mxu1 %vm79_vm1, %v9033_v61  ;;  %7540 = vmatprep.mubr.msk.f32.mxu1 %vm8429_vm0, %v8430_v11 }
0x3993   :  { %7543 = vmatprep.subr.mxu1 %v8430_v11 }
0x3998   :  { %v4147_v38 = vpop.f32.mrb[50].mxu0 }
0x3999   :  { %v4148_v23 = vadd.f32 %v9043_v63, %v4147_v38  ;;  %v7537_v51 = vpop.f32.mrb[51].mxu0 }
0x399b   :  { %4159 = vrot.lane.b32.xlu0 %v4148_v23, %s8431_s2 }
0x3a0d   :  { %v4160_v16 = vpop.permute.xlu0 %4159 }
0x3a64   :  { %v4077_v59 = vpop.f32.mrb[46].mxu1 }
0x3a65   :  { %v4078_v21 = vadd.f32 %v9050_v5, %v4077_v59  ;;  %v7526_v18 = vpop.f32.mrb[47].mxu1 }
0x3a67   :  { %v4151_v57 = vadd.f32 %v4148_v23, %v4078_v21 }
0x3a69   :  { %v6643_v0 = vmul.f32 -1.442695, %v4151_v57 }
0x3a6b   :  { %8282 = vpow2.f32 %v6643_v0 }
0x3a75   :  { %v8283_v2 = vpop.eup %8282 }
0x3a76   :  { %v4155_v46 = vadd.f32 1.0, %v8283_v2 }
0x3a78   :  { %8284 = vrcp.f32 %v4155_v46 }
0x3a82   :  { %v8285_v36 = vpop.eup %8284 }
0x3a83   :  { %v4162_v24 = vmul.f32 %v8285_v36, %v4160_v16  ;;  %v4169_v30 = vsub.f32 1.0, %v8285_v36  ;;  %v4175_v62 = vmul.f32 %v8285_v36, %v9158_v33 }
0x3a85   :  { %4164 = vrot.lane.b32.xlu1 %v4162_v24, %s8431_s2 }
0x3af7   :  { %v4165_v19 = vpop.permute.xlu1 %4164 }
0x3af8   :  { %v4167_v28 = vadd.f32 %v4165_v19, %v4078_v21 }
0x3afa   :  { %8286 = vtanh.f32 %v4167_v28 }
0x3b04   :  { %v8287_v29 = vpop.eup %8286 }
0x3b05   :  { %4171 = vrot.lane.b32.xlu1 %v8287_v29, %s8432_s27 }
0x3b77   :  { %v4172_v26 = vpop.permute.xlu1 %4171 }
0x3b78   :  { %v4174_v43 = vmul.f32 %v4172_v26, %v4169_v30 }
0x3b7a   :  { %v9250_v54 = vadd.f32 %v4175_v62, %v4174_v43 }
0x3b7c   :  { %4178 = vrot.lane.b32.xlu0 %v9250_v54, %s8432_s27 }
0x3bee   :  { %v9254_v47 = vpop.permute.xlu0 %4178 }
0x3bef   :  { %7541 = vmatmul.mubr.msk.f32.vlgmr.msra.gmra.mrb[48].mxu1 %vm79_vm1, %v9254_v47 }
0x3bf0   :  { %7544 = vmatpush3.msra.mxu1 %v9033_v61  ;;  %7545 = vmatprep.mubr.msk.f32.mxu1 %vm8429_vm0, %v8430_v11 }
0x3bf1   :  { %8073 = vmatprep.subr.bf16.mxu1 %v8428_v3 }
0x3cc2   :  { %v4248_v32 = vpop.f32.mrb[48].mxu1 }
0x3cc3   :  { %v7542_v33 = vpop.f32.mrb[49].mxu1  ;;  %v4252_v42 = vsel %vm336_vm2, %v4248_v32, -inf }
0x3cc4   :  { %4253 = vmax.xlane.f32.xlu1 %v4252_v42 }
0x3d51   :  { %v4254_v34 = vpop.xlane.xlu1 %4253 }
0x3d52   :  { %v4255_v49 = vsub.f32 %v4248_v32, %v4254_v34 }
0x3d54   :  { %v4256_v50 = vmul.f32 1.442695, %v4255_v49 }
0x3d56   :  { %8288 = vpow2.f32 %v4256_v50 }
0x3d60   :  { %v8289_v17 = vpop.eup %8288 }
0x3d61   :  { %v4258_v44 = vsel %vm336_vm2, %v8289_v17, 0.0 }
0x3d62   :  { %4259 = vadd.xlane.f32.xlu0 %v4258_v44 }
0x3def   :  { %v4260_v38 = vpop.xlane.xlu0 %4259 }
0x3df0   :  { %8290 = vrcp.f32 %v4260_v38 }
0x3dfa   :  { %v8291_v23 = vpop.eup %8290 }
0x3dfb   :  { %v4262_v51 = vmul.f32 %v8291_v23, %v8289_v17 }
0x3dfd   :  { %7546 = vmatmul.mubr.msk.f32.vlgmr.msra.gmra.mrb[50].mxu1 %vm348_vm3, %v4262_v51 }
0x3dfe   :  { %8075 = vmatpush3.bf16.msra.mxu1 %v8626_v1  ;;  %7567 = vmatprep.mubr.msk.f32.mxu1 %vm8429_vm0, %v8430_v11 }
0x3dff   :  { %8076 = vmatprep.subr.bf16.mxu1 %v8428_v3 }
0x3e02   :  { %8078 = vmatpush3.bf16.msra.mxu1 %v8636_v7 }
0x3e03   :  { %8085 = vmatprep.subr.bf16.mxu1 %v8428_v3 }
0x3e05   :  { %7568 = vmatmul.mubr.msk.f32.vlgmr.msra.gmra.mrb[52].mxu1 %vm79_vm1, %v9254_v47 }
0x3e06   :  { %8087 = vmatpush3.bf16.msra.mxu1 %v8645_v10  ;;  %7593 = vmatprep.mubr.msk.f32.mxu1 %vm8429_vm0, %v8430_v11 }
0x3e07   :  { %8088 = vmatprep.subr.bf16.mxu1 %v8428_v3 }
0x3e0a   :  { %8090 = vmatpush3.bf16.msra.mxu1 %v8716_v48 }
0x3e0b   :  { %8091 = vmatprep.subr.bf16.mxu1 %v8428_v3 }
0x3e0e   :  { %8093 = vmatpush3.bf16.msra.mxu1 %v8726_v55 }
0x3e0f   :  { %8100 = vmatprep.subr.bf16.mxu1 %v8428_v3 }
0x3ed0   :  { %v4332_v59 = vpop.f32.mrb[50].mxu1 }
0x3ed1   :  { %v7547_v21 = vpop.f32.mrb[51].mxu1  ;;  %7557 = vmatmul.mubr.msk.f32.vlgmr.msra.gmra.mrb[52].mxu0 %vm79_vm1, %v4332_v59 }
0x3ed2   :  { %8081 = vmatpush3.bf16.msra.mxu0 %v8667_v22  ;;  %7578 = vmatprep.mubr.msk.f32.mxu0 %vm8429_vm0, %v8430_v11 }
0x3ed3   :  { %8082 = vmatprep.subr.bf16.mxu0 %v8428_v3 }
0x3ed6   :  { %8084 = vmatpush3.bf16.msra.mxu0 %v8673_v25 }
0x3ed7   :  { %8094 = vmatprep.subr.bf16.mxu0 %v8428_v3 }
0x3ed8   :  { %v4475_v18 = vpop.f32.mrb[52].mxu1 }
0x3ed9   :  { %v7569_v57 = vpop.f32.mrb[53].mxu1 }
0x3fa4   :  { %v4405_v0 = vpop.f32.mrb[52].mxu0 }
0x3fa5   :  { %v4476_v2 = vadd.f32 %v4475_v18, %v4405_v0  ;;  %v7558_v46 = vpop.f32.mrb[53].mxu0 }
0x3fa7   :  { %v4479_v36 = vadd.f32 %v9097_v6, %v4476_v2 }
0x3fa9   :  { %8292 = vtanh.f32 %v4479_v36 }
0x3fb3   :  { %v8293_v16 = vpop.eup %8292 }
0x3fb4   :  { %7579 = vmatmul.mubr.msk.f32.vlgmr.msra.gmra.mrb[54].mxu0 %vm79_vm1, %v8293_v16 }
0x3fb5   :  { %8096 = vmatpush3.bf16.msra.mxu0 %v8512_v4  ;;  %7604 = vmatprep.mubr.msk.f32.mxu0 %vm8429_vm0, %v8430_v11 }
0x3fb6   :  { %8097 = vmatprep.subr.bf16.mxu0 %v8428_v3 }
0x3fb9   :  { %8099 = vmatpush3.bf16.msra.mxu0 %v8536_v12 }
0x3fba   :  { %7618 = vmatprep.subr.mxu0 %v8430_v11 }
0x4087   :  { %v4550_v24 = vpop.f32.mrb[54].mxu0 }
0x4088   :  { %v9297_v19 = vadd.f32 %v9110_v20, %v4550_v24  ;;  %v7580_v28 = vpop.f32.mrb[55].mxu0 }
0x408a   :  { %v4554_v29 = vsel %vm640_vm4, %v9297_v19, -inf }
0x408b   :  { %4555 = vmax.xlane.f32.xlu0 %v4554_v29 }
0x4118   :  { %v9301_v30 = vpop.xlane.xlu0 %4555 }
0x4119   :  { %vm4564_vm8 = vcmp.ge.f32.partialorder %v9297_v19, %v9301_v30 }
0x411a   :  { %v4565_v26 = vsel %vm4564_vm8, %v8702_v39, 48 }
0x411b   :  { %v4566_v62 = vsel %vm640_vm4, %v4565_v26, 2147483647 }
0x411c   :  { %v4568_v43 = vshra.s32 %v4566_v62, 16  ;;  %v4567_v33 = vand.u32 65535, %v4566_v62 }
0x411e   :  { %v4570_v32 = vcvt.s32.f32 %v4568_v43  ;;  %v4569_v34 = vcvt.s32.f32 %v4567_v33 }
0x4120   :  { %4571 = vmin.xlane.f32.xlu1 %v4570_v32 }
0x41ad   :  { %v4572_v42 = vpop.xlane.xlu1 %4571 }
0x41ae   :  { %vm4573_vm9 = vcmp.eq.f32.partialorder %v4570_v32, %v4572_v42  ;;  %v4578_v50 = vcvt.f32.s32 %v4572_v42 }
0x41af   :  { %v4574_v49 = vsel %vm4573_vm9, %v4569_v34, inf }
0x41b0   :  { %4575 = vmin.xlane.f32.xlu0 %v4574_v49  ;;  %v4579_v44 = vshll.u32 %v4578_v50, 16 }
0x423d   :  { %v4576_v17 = vpop.xlane.xlu0 %4575 }
0x423e   :  { %v4577_v38 = vcvt.f32.s32 %v4576_v17 }
0x4240   :  { %v4580_v23 = vadd.s32 %v4579_v44, %v4577_v38 }
0x4242   :  { %v9311_v51 = vsel %vm4581_vm13, %v4580_v23, %v9219_v53  ;;  %vm4584_vm15 = vcmp.eq.s32.totalorder %v8702_v39, %v4580_v23 }
0x4243   :  { %v6650_v59 = vsel %vm4584_vm15, 1.0, %v8430_v11  ;;  %vm9673_vm15 = vcmp.eq.s32.totalorder %v8702_v39, 7 }
0x4244   :  { %7594 = vmatmul.mubr.msk.f32.vlgmr.msra.gmra.mrb[54].mxu1 %vm674_vm7, %v6650_v59 }
0x4245   :  { %8102 = vmatpush3.bf16.msra.mxu1 %v8523_v8  ;;  %7615 = vmatprep.mubr.msk.f32.mxu1 %vm8429_vm0, %v8430_v11 }
0x4246   :  { %8103 = vmatprep.subr.bf16.mxu1 %v8428_v3 }
0x4249   :  { %8105 = vmatpush3.bf16.msra.mxu1 %v8545_v14 }
0x424a   :  { %8106 = vmatprep.subr.bf16.mxu1 %v8428_v3 }
0x424c   :  { %7616 = vmatmul.mubr.msk.f32.vlgmr.msra.gmra.mrb[56].mxu1 %vm79_vm1, %v9254_v47 }
0x424d   :  { %8108 = vmatpush3.bf16.msra.mxu1 %v8609_v58  ;;  %7636 = vmatprep.mubr.msk.f32.mxu1 %vm8429_vm0, %v8430_v11 }
0x424e   :  { %8109 = vmatprep.subr.bf16.mxu1 %v8428_v3 }
0x4251   :  { %8111 = vmatpush3.bf16.msra.mxu1 %v8615_v60 }
0x4252   :  { %8118 = vmatprep.subr.bf16.mxu1 %v8428_v3 }
0x4317   :  { %v4656_v53 = vpop.f32.mrb[54].mxu1 }
0x4318   :  { %v7595_v21 = vpop.f32.mrb[55].mxu1  ;;  %7605 = vmatmul.mubr.msk.f32.vlgmr.msra.gmra.mrb[56].mxu0 %vm79_vm1, %v4656_v53 }
0x4319   :  { %7619 = vmatpush3.xpose.msk.msra.mxu0 %vm79_vm1, %v9033_v61  ;;  %7620 = vmatprep.mubr.msk.f32.mxu0 %vm8429_vm0, %v8430_v11 }
0x431a   :  { %7623 = vmatprep.subr.mxu0 %v8430_v11 }
0x431f   :  { %v4799_v47 = vpop.f32.mrb[56].mxu1 }
0x4320   :  { %v4800_v18 = vadd.f32 %v9043_v63, %v4799_v47  ;;  %v7617_v57 = vpop.f32.mrb[57].mxu1 }
0x4322   :  { %4811 = vrot.lane.b32.xlu1 %v4800_v18, %s8431_s2 }
0x4394   :  { %v4812_v26 = vpop.permute.xlu1 %4811 }
0x43eb   :  { %v4729_v0 = vpop.f32.mrb[56].mxu0 }
0x43ec   :  { %v4730_v2 = vadd.f32 %v9050_v5, %v4729_v0  ;;  %v7606_v46 = vpop.f32.mrb[57].mxu0 }
0x43ee   :  { %v4803_v36 = vadd.f32 %v4800_v18, %v4730_v2 }
0x43f0   :  { %v6654_v16 = vmul.f32 -1.442695, %v4803_v36 }
0x43f2   :  { %8294 = vpow2.f32 %v6654_v16 }
0x43fc   :  { %v8295_v24 = vpop.eup %8294 }
0x43fd   :  { %v4807_v28 = vadd.f32 1.0, %v8295_v24 }
0x43ff   :  { %8296 = vrcp.f32 %v4807_v28 }
0x4409   :  { %v8297_v29 = vpop.eup %8296 }
0x440a   :  { %v4814_v62 = vmul.f32 %v8297_v29, %v4812_v26  ;;  %v4821_v33 = vsub.f32 1.0, %v8297_v29  ;;  %v4827_v42 = vmul.f32 %v8297_v29, %v9250_v54 }
0x440c   :  { %4816 = vrot.lane.b32.xlu0 %v4814_v62, %s8431_s2 }
0x447e   :  { %v4817_v43 = vpop.permute.xlu0 %4816 }
0x447f   :  { %v4819_v63 = vadd.f32 %v4817_v43, %v4730_v2 }
0x4481   :  { %8298 = vtanh.f32 %v4819_v63 }
0x448b   :  { %v8299_v32 = vpop.eup %8298 }
0x448c   :  { %4823 = vrot.lane.b32.xlu1 %v8299_v32, %s8432_s27 }
0x44fe   :  { %v4824_v5 = vpop.permute.xlu1 %4823 }
0x44ff   :  { %v4826_v34 = vmul.f32 %v4824_v5, %v4821_v33 }
0x4501   :  { %v9342_v49 = vadd.f32 %v4827_v42, %v4826_v34 }
0x4503   :  { %4830 = vrot.lane.b32.xlu1 %v9342_v49, %s8432_s27 }
0x4575   :  { %v9346_v50 = vpop.permute.xlu1 %4830 }
0x4576   :  { %7621 = vmatmul.mubr.msk.f32.vlgmr.msra.gmra.mrb[58].mxu0 %vm79_vm1, %v9346_v50 }
0x4577   :  { %7624 = vmatpush3.msra.mxu0 %v9033_v61  ;;  %7625 = vmatprep.mubr.msk.f32.mxu0 %vm8429_vm0, %v8430_v11 }
0x4578   :  { %8112 = vmatprep.subr.bf16.mxu0 %v8428_v3 }
0x4649   :  { %v4900_v17 = vpop.f32.mrb[58].mxu0 }
0x464a   :  { %v7622_v54 = vpop.f32.mrb[59].mxu0  ;;  %v4904_v44 = vsel %vm336_vm2, %v4900_v17, -inf }
0x464b   :  { %4905 = vmax.xlane.f32.xlu0 %v4904_v44 }
0x46d8   :  { %v4906_v38 = vpop.xlane.xlu0 %4905 }
0x46d9   :  { %v4907_v23 = vsub.f32 %v4900_v17, %v4906_v38 }
0x46db   :  { %v4908_v59 = vmul.f32 1.442695, %v4907_v23 }
0x46dd   :  { %8300 = vpow2.f32 %v4908_v59 }
0x46e7   :  { %v8301_v53 = vpop.eup %8300 }
0x46e8   :  { %v4910_v21 = vsel %vm336_vm2, %v8301_v53, 0.0 }
0x46e9   :  { %4911 = vadd.xlane.f32.xlu1 %v4910_v21 }
0x4776   :  { %v4912_v47 = vpop.xlane.xlu1 %4911 }
0x4777   :  { %8302 = vrcp.f32 %v4912_v47 }
0x4781   :  { %v8303_v61 = vpop.eup %8302 }
0x4782   :  { %v4914_v18 = vmul.f32 %v8303_v61, %v8301_v53 }
0x4784   :  { %7626 = vmatmul.mubr.msk.f32.vlgmr.msra.gmra.mrb[60].mxu0 %vm348_vm3, %v4914_v18  ;;  %v9426_v18 = vld [vmem:[%s9661_s1] sm:$0xff] }
0x4785   :  { %8114 = vmatpush3.bf16.msra.mxu0 %v8626_v1  ;;  %7647 = vmatprep.mubr.msk.f32.mxu0 %vm8429_vm0, %v8430_v11 }
0x4786   :  { %8115 = vmatprep.subr.bf16.mxu0 %v8428_v3 }
0x4789   :  { %8117 = vmatpush3.bf16.msra.mxu0 %v8636_v7 }
0x478a   :  { %8124 = vmatprep.subr.bf16.mxu0 %v8428_v3 }
0x478c   :  { %7648 = vmatmul.mubr.msk.f32.vlgmr.msra.gmra.mrb[62].mxu0 %vm79_vm1, %v9346_v50 }
0x478d   :  { %8126 = vmatpush3.bf16.msra.mxu0 %v8645_v10  ;;  %7673 = vmatprep.mubr.msk.f32.mxu0 %vm8429_vm0, %v8430_v11 }
0x478e   :  { %8127 = vmatprep.subr.bf16.mxu0 %v8428_v3 }
0x4791   :  { %8129 = vmatpush3.bf16.msra.mxu0 %v8716_v48 }
0x4792   :  { %8130 = vmatprep.subr.bf16.mxu0 %v8428_v3 }
0x4795   :  { %8132 = vmatpush3.bf16.msra.mxu0 %v8726_v55 }
0x4796   :  { %8139 = vmatprep.subr.bf16.mxu0 %v8428_v3 }
0x4857   :  { %v4984_v57 = vpop.f32.mrb[60].mxu0 }
0x4858   :  { %v7627_v0 = vpop.f32.mrb[61].mxu0  ;;  %7637 = vmatmul.mubr.msk.f32.vlgmr.msra.gmra.mrb[58].mxu1 %vm79_vm1, %v4984_v57  ;;  %v9436_v57 = vld [vmem:[%s9666_s6] sm:$0x1] }
0x4859   :  { %8120 = vmatpush3.bf16.msra.mxu1 %v8667_v22  ;;  %7658 = vmatprep.mubr.msk.f32.mxu1 %vm8429_vm0, %v8430_v11 }
0x485a   :  { %8121 = vmatprep.subr.bf16.mxu1 %v8428_v3 }
0x485d   :  { %8123 = vmatpush3.bf16.msra.mxu1 %v8673_v25 }
0x485e   :  { %8133 = vmatprep.subr.bf16.mxu1 %v8428_v3 }
0x485f   :  { %v5127_v2 = vpop.f32.mrb[62].mxu0 }
0x4860   :  { %v7649_v46 = vpop.f32.mrb[63].mxu0 }
0x492b   :  { %v5057_v36 = vpop.f32.mrb[58].mxu1 }
0x492c   :  { %v5128_v16 = vadd.f32 %v5127_v2, %v5057_v36  ;;  %v7638_v24 = vpop.f32.mrb[59].mxu1  ;;  %v9443_v36 = vld [vmem:[%s9665_s5] sm:$0x1] }
0x492e   :  { %v5131_v28 = vadd.f32 %v9097_v6, %v5128_v16 }
0x4930   :  { %8304 = vtanh.f32 %v5131_v28 }
0x493a   :  { %v8305_v29 = vpop.eup %8304 }
0x493b   :  { %7659 = vmatmul.mubr.msk.f32.vlgmr.msra.gmra.mrb[60].mxu1 %vm79_vm1, %v8305_v29 }
0x493c   :  { %8135 = vmatpush3.bf16.msra.mxu1 %v8512_v4  ;;  %7684 = vmatprep.mubr.msk.f32.mxu1 %vm8429_vm0, %v8430_v11 }
0x493d   :  { %8136 = vmatprep.subr.bf16.mxu1 %v8428_v3 }
0x4940   :  { %8138 = vmatpush3.bf16.msra.mxu1 %v8536_v12 }
0x4941   :  { %7698 = vmatprep.subr.mxu1 %v8430_v11 }
0x4a0e   :  { %v5202_v26 = vpop.f32.mrb[60].mxu1 }
0x4a0f   :  { %v9389_v62 = vadd.f32 %v9110_v20, %v5202_v26  ;;  %v7660_v6 = vpop.f32.mrb[61].mxu1 }
0x4a11   :  { %v5206_v43 = vsel %vm640_vm4, %v9389_v62, -inf }
0x4a12   :  { %5207 = vmax.xlane.f32.xlu0 %v5206_v43 }
0x4a9f   :  { %v9393_v63 = vpop.xlane.xlu0 %5207 }
0x4aa0   :  { %vm5216_vm8 = vcmp.ge.f32.partialorder %v9389_v62, %v9393_v63 }
0x4aa1   :  { %v5217_v32 = vsel %vm5216_vm8, %v8702_v39, 48 }
0x4aa2   :  { %v5218_v33 = vsel %vm640_vm4, %v5217_v32, 2147483647 }
0x4aa3   :  { %v5220_v5 = vshra.s32 %v5218_v33, 16  ;;  %v5219_v34 = vand.u32 65535, %v5218_v33 }
0x4aa5   :  { %v5222_v42 = vcvt.s32.f32 %v5220_v5  ;;  %v5221_v17 = vcvt.s32.f32 %v5219_v34 }
0x4aa7   :  { %5223 = vmin.xlane.f32.xlu0 %v5222_v42 }
0x4b34   :  { %v5224_v20 = vpop.xlane.xlu0 %5223 }
0x4b35   :  { %vm5225_vm9 = vcmp.eq.f32.partialorder %v5222_v42, %v5224_v20  ;;  %v5230_v44 = vcvt.f32.s32 %v5224_v20 }
0x4b36   :  { %v5226_v54 = vsel %vm5225_vm9, %v5221_v17, inf }
0x4b37   :  { %5227 = vmin.xlane.f32.xlu1 %v5226_v54  ;;  %v5231_v23 = vshll.u32 %v5230_v44, 16 }
0x4bc4   :  { %v5228_v38 = vpop.xlane.xlu1 %5227 }
0x4bc5   :  { %v5229_v59 = vcvt.f32.s32 %v5228_v38 }
0x4bc7   :  { %v5232_v53 = vadd.s32 %v5231_v23, %v5229_v59 }
0x4bc9   :  { %vm5236_vm8 = vcmp.eq.s32.totalorder %v8702_v39, %v5232_v53  ;;  %v9404_v21 = vsel %vm9673_vm15, %v5232_v53, %v9311_v51  ;;  %vm5885_vm15 = vcmp.eq.s32.totalorder %v8702_v39, 8 }
0x4bca   :  { %v6661_v47 = vsel %vm5236_vm8, 1.0, %v8430_v11 }
0x4bcb   :  { %7674 = vmatmul.mubr.msk.f32.vlgmr.msra.gmra.mrb[64].mxu0 %vm674_vm7, %v6661_v47 }
0x4bcc   :  { %8141 = vmatpush3.bf16.msra.mxu0 %v8523_v8  ;;  %7695 = vmatprep.mubr.msk.f32.mxu0 %vm8429_vm0, %v8430_v11 }
0x4bcd   :  { %8142 = vmatprep.subr.bf16.mxu0 %v8428_v3 }
0x4bd0   :  { %8144 = vmatpush3.bf16.msra.mxu0 %v8545_v14 }
0x4bd1   :  { %8145 = vmatprep.subr.bf16.mxu0 %v8428_v3 }
0x4bd3   :  { %7696 = vmatmul.mubr.msk.f32.vlgmr.msra.gmra.mrb[66].mxu0 %vm79_vm1, %v9346_v50 }
0x4bd4   :  { %8147 = vmatpush3.bf16.msra.mxu0 %v8609_v58  ;;  %7716 = vmatprep.mubr.msk.f32.mxu0 %vm8429_vm0, %v8430_v11 }
0x4bd5   :  { %8148 = vmatprep.subr.bf16.mxu0 %v8428_v3 }
0x4bd8   :  { %8150 = vmatpush3.bf16.msra.mxu0 %v8615_v60 }
0x4bd9   :  { %8157 = vmatprep.subr.bf16.mxu0 %v8428_v3 }
0x4c9e   :  { %v5308_v51 = vpop.f32.mrb[64].mxu0 }
0x4c9f   :  { %v7675_v61 = vpop.f32.mrb[65].mxu0  ;;  %7685 = vmatmul.mubr.msk.f32.vlgmr.msra.gmra.mrb[62].mxu1 %vm79_vm1, %v5308_v51 }
0x4ca0   :  { %7699 = vmatpush3.xpose.msk.msra.mxu1 %vm79_vm1, %v9426_v18  ;;  %7700 = vmatprep.mubr.msk.f32.mxu1 %vm8429_vm0, %v8430_v11 }
0x4ca1   :  { %7703 = vmatprep.subr.mxu1 %v8430_v11 }
0x4ca6   :  { %v5451_v50 = vpop.f32.mrb[66].mxu0 }
0x4ca7   :  { %v5452_v0 = vadd.f32 %v9436_v57, %v5451_v50  ;;  %v7697_v2 = vpop.f32.mrb[67].mxu0 }
0x4ca9   :  { %5463 = vrot.lane.b32.xlu0 %v5452_v0, %s8431_s2 }
0x4d1b   :  { %v5464_v32 = vpop.permute.xlu0 %5463 }
0x4d72   :  { %v5381_v46 = vpop.f32.mrb[62].mxu1 }
0x4d73   :  { %v5382_v16 = vadd.f32 %v9443_v36, %v5381_v46  ;;  %v7686_v24 = vpop.f32.mrb[63].mxu1 }
0x4d75   :  { %v5455_v28 = vadd.f32 %v5452_v0, %v5382_v16 }
0x4d77   :  { %v6665_v29 = vmul.f32 -1.442695, %v5455_v28 }
0x4d79   :  { %8306 = vpow2.f32 %v6665_v29 }
0x4d83   :  { %v8307_v26 = vpop.eup %8306 }
0x4d84   :  { %v5459_v6 = vadd.f32 1.0, %v8307_v26 }
0x4d86   :  { %8308 = vrcp.f32 %v5459_v6  ;;  %v9490_v6 = vld [vmem:[%s9668_s8] sm:$0x1] }
0x4d90   :  { %v8309_v43 = vpop.eup %8308 }
0x4d91   :  { %v5466_v33 = vmul.f32 %v8309_v43, %v5464_v32  ;;  %v5473_v20 = vsub.f32 1.0, %v8309_v43  ;;  %v5479_v54 = vmul.f32 %v8309_v43, %v9342_v49 }
0x4d93   :  { %5468 = vrot.lane.b32.xlu1 %v5466_v33, %s8431_s2 }
0x4e05   :  { %v5469_v5 = vpop.permute.xlu1 %5468 }
0x4e06   :  { %v5471_v42 = vadd.f32 %v5469_v5, %v5382_v16  ;;  %v9503_v5 = vld [vmem:[%s9670_s10] sm:$0x1]  ;;  %s8434_s10 = smov [#allocation4]  }
0x4e08   :  { %8310 = vtanh.f32 %v5471_v42 }
0x4e12   :  { %v8311_v34 = vpop.eup %8310 }
0x4e13   :  { %5475 = vrot.lane.b32.xlu1 %v8311_v34, %s8432_s27 }
0x4e85   :  { %v5476_v17 = vpop.permute.xlu1 %5475 }
0x4e86   :  { %v5478_v44 = vmul.f32 %v5476_v17, %v5473_v20 }
0x4e88   :  { %v9449_v38 = vadd.f32 %v5479_v54, %v5478_v44 }
0x4e8a   :  { %5482 = vrot.lane.b32.xlu0 %v9449_v38, %s8432_s27 }
0x4efc   :  { %v9453_v23 = vpop.permute.xlu0 %5482 }
0x4efd   :  { %7701 = vmatmul.mubr.msk.f32.vlgmr.msra.gmra.mrb[64].mxu1 %vm79_vm1, %v9453_v23 }
0x4efe   :  { %7704 = vmatpush3.msra.mxu1 %v9426_v18  ;;  %7705 = vmatprep.mubr.msk.f32.mxu1 %vm8429_vm0, %v8430_v11 }
0x4eff   :  { %8151 = vmatprep.subr.bf16.mxu1 %v8428_v3 }
0x4fd0   :  { %v5552_v59 = vpop.f32.mrb[64].mxu1 }
0x4fd1   :  { %v7702_v49 = vpop.f32.mrb[65].mxu1  ;;  %v5556_v53 = vsel %vm336_vm2, %v5552_v59, -inf }
0x4fd2   :  { %5557 = vmax.xlane.f32.xlu1 %v5556_v53 }
0x505f   :  { %v5558_v47 = vpop.xlane.xlu1 %5557 }
0x5060   :  { %v5559_v51 = vsub.f32 %v5552_v59, %v5558_v47 }
0x5062   :  { %v5560_v61 = vmul.f32 1.442695, %v5559_v51 }
0x5064   :  { %8312 = vpow2.f32 %v5560_v61 }
0x506e   :  { %v8313_v50 = vpop.eup %8312 }
0x506f   :  { %v5562_v0 = vsel %vm336_vm2, %v8313_v50, 0.0 }
0x5070   :  { %5563 = vadd.xlane.f32.xlu0 %v5562_v0 }
0x50fd   :  { %v5564_v2 = vpop.xlane.xlu0 %5563 }
0x50fe   :  { %8314 = vrcp.f32 %v5564_v2 }
0x5108   :  { %v8315_v46 = vpop.eup %8314 }
0x5109   :  { %v5566_v16 = vmul.f32 %v8315_v46, %v8313_v50 }
0x510b   :  { %7706 = vmatmul.mubr.msk.f32.vlgmr.msra.gmra.mrb[66].mxu1 %vm348_vm3, %v5566_v16 }
0x510c   :  { %8153 = vmatpush3.bf16.msra.mxu1 %v8626_v1  ;;  %7727 = vmatprep.mubr.msk.f32.mxu1 %vm8429_vm0, %v8430_v11 }
0x510d   :  { %8154 = vmatprep.subr.bf16.mxu1 %v8428_v3 }
0x5110   :  { %8156 = vmatpush3.bf16.msra.mxu1 %v8636_v7 }
0x5111   :  { %8163 = vmatprep.subr.bf16.mxu1 %v8428_v3 }
0x5113   :  { %7728 = vmatmul.mubr.msk.f32.vlgmr.msra.gmra.mrb[68].mxu1 %vm79_vm1, %v9453_v23 }
0x5114   :  { %8165 = vmatpush3.bf16.msra.mxu1 %v8645_v10  ;;  %7753 = vmatprep.mubr.msk.f32.mxu1 %vm8429_vm0, %v8430_v11 }
0x5115   :  { %8166 = vmatprep.subr.bf16.mxu1 %v8428_v3 }
0x5118   :  { %8168 = vmatpush3.bf16.msra.mxu1 %v8716_v48 }
0x5119   :  { %8169 = vmatprep.subr.bf16.mxu1 %v8428_v3 }
0x511c   :  { %8171 = vmatpush3.bf16.msra.mxu1 %v8726_v55 }
0x511d   :  { %8178 = vmatprep.subr.bf16.mxu1 %v8428_v3 }
0x51de   :  { %v5636_v24 = vpop.f32.mrb[66].mxu1 }
0x51df   :  { %v7707_v28 = vpop.f32.mrb[67].mxu1  ;;  %7717 = vmatmul.mubr.msk.f32.vlgmr.msra.gmra.mrb[68].mxu0 %vm79_vm1, %v5636_v24 }
0x51e0   :  { %8159 = vmatpush3.bf16.msra.mxu0 %v8667_v22  ;;  %7738 = vmatprep.mubr.msk.f32.mxu0 %vm8429_vm0, %v8430_v11 }
0x51e1   :  { %8160 = vmatprep.subr.bf16.mxu0 %v8428_v3 }
0x51e4   :  { %8162 = vmatpush3.bf16.msra.mxu0 %v8673_v25 }
0x51e5   :  { %8172 = vmatprep.subr.bf16.mxu0 %v8428_v3 }
0x51e6   :  { %v5779_v10 = vpop.f32.mrb[68].mxu1 }
0x51e7   :  { %v7729_v48 = vpop.f32.mrb[69].mxu1 }
0x52b2   :  { %v5709_v55 = vpop.f32.mrb[68].mxu0 }
0x52b3   :  { %v5780_v29 = vadd.f32 %v5779_v10, %v5709_v55  ;;  %v7718_v26 = vpop.f32.mrb[69].mxu0 }
0x52b5   :  { %v5783_v43 = vadd.f32 %v9490_v6, %v5780_v29 }
0x52b7   :  { %8316 = vtanh.f32 %v5783_v43 }
0x52c1   :  { %v8317_v32 = vpop.eup %8316 }
0x52c2   :  { %7739 = vmatmul.mubr.msk.f32.vlgmr.msra.gmra.mrb[70].mxu0 %vm79_vm1, %v8317_v32 }
0x52c3   :  { %8174 = vmatpush3.bf16.msra.mxu0 %v8512_v4  ;;  %7764 = vmatprep.mubr.msk.f32.mxu0 %vm8429_vm0, %v8430_v11 }
0x52c4   :  { %8175 = vmatprep.subr.bf16.mxu0 %v8428_v3 }
0x52c7   :  { %8177 = vmatpush3.bf16.msra.mxu0 %v8536_v12 }
0x52c8   :  { %7778 = vmatprep.subr.mxu0 %v8430_v11 }
0x5395   :  { %v5854_v33 = vpop.f32.mrb[70].mxu0 }
0x5396   :  { %v9506_v42 = vadd.f32 %v9503_v5, %v5854_v33  ;;  %v7740_v34 = vpop.f32.mrb[71].mxu0 }
0x5398   :  { %v5858_v4 = vsel %vm640_vm4, %v9506_v42, -inf }
0x5399   :  { %5859 = vmax.xlane.f32.xlu0 %v5858_v4 }
0x5426   :  { %v9510_v20 = vpop.xlane.xlu0 %5859 }
0x5427   :  { %vm5868_vm9 = vcmp.ge.f32.partialorder %v9506_v42, %v9510_v20 }
0x5428   :  { %v5869_v12 = vsel %vm5868_vm9, %v8702_v39, 48 }
0x5429   :  { %v5870_v17 = vsel %vm640_vm4, %v5869_v12, 2147483647 }
0x542a   :  { %v5872_v54 = vshra.s32 %v5870_v17, 16  ;;  %v5871_v59 = vand.u32 65535, %v5870_v17 }
0x542c   :  { %v5874_v44 = vcvt.s32.f32 %v5872_v54  ;;  %v5873_v53 = vcvt.s32.f32 %v5871_v59 }
0x542e   :  { %5875 = vmin.xlane.f32.xlu1 %v5874_v44 }
0x54bb   :  { %v5876_v49 = vpop.xlane.xlu1 %5875 }
0x54bc   :  { %vm5877_vm8 = vcmp.eq.f32.partialorder %v5874_v44, %v5876_v49  ;;  %v5882_v51 = vcvt.f32.s32 %v5876_v49 }
0x54bd   :  { %v5878_v47 = vsel %vm5877_vm8, %v5873_v53, inf }
0x54be   :  { %5879 = vmin.xlane.f32.xlu0 %v5878_v47  ;;  %v5883_v50 = vshll.u32 %v5882_v51, 16 }
0x554b   :  { %v5880_v61 = vpop.xlane.xlu0 %5879 }
0x554c   :  { %v5881_v0 = vcvt.f32.s32 %v5880_v61 }
0x554e   :  { %v5884_v2 = vadd.s32 %v5883_v50, %v5881_v0  ;;  %v1949_v50 = vsub.f32 %v8904_v52, %v8908_v56 }
0x5550   :  { %vm5888_vm9 = vcmp.eq.s32.totalorder %v8702_v39, %v5884_v2  ;;  %v9521_v46 = vsel %vm5885_vm15, %v5884_v2, %v9404_v21  ;;  %v1950_v0 = vmul.f32 1.442695, %v1949_v50  ;;  %v3253_v2 = vsub.f32 %v9113_v41, %v9117_v27 }
0x5551   :  { %v6672_v16 = vsel %vm5888_vm9, 1.0, %v8430_v11 }
0x5552   :  { %7754 = vmatmul.mubr.msk.f32.vlgmr.msra.gmra.mrb[70].mxu1 %vm674_vm7, %v6672_v16  ;;  %v3254_v16 = vmul.f32 1.442695, %v3253_v2 }
0x5553   :  { %8180 = vmatpush3.bf16.msra.mxu1 %v8523_v8  ;;  %7775 = vmatprep.mubr.msk.f32.mxu1 %vm8429_vm0, %v8430_v11 }
0x5554   :  { %8181 = vmatprep.subr.bf16.mxu1 %v8428_v3 }
0x5557   :  { %8183 = vmatpush3.bf16.msra.mxu1 %v8545_v14 }
0x5558   :  { %8184 = vmatprep.subr.bf16.mxu1 %v8428_v3 }
0x555a   :  { %7776 = vmatmul.mubr.msk.f32.vlgmr.msra.gmra.mrb[72].mxu1 %vm79_vm1, %v9453_v23 }
0x555b   :  { %8186 = vmatpush3.bf16.msra.mxu1 %v8609_v58  ;;  %7796 = vmatprep.mubr.msk.f32.mxu1 %vm8429_vm0, %v8430_v11 }
0x555c   :  { %8187 = vmatprep.subr.bf16.mxu1 %v8428_v3 }
0x555f   :  { %8189 = vmatpush3.bf16.msra.mxu1 %v8615_v60 }
0x5560   :  { %8196 = vmatprep.subr.bf16.mxu1 %v8428_v3 }
0x5625   :  { %v5960_v8 = vpop.f32.mrb[70].mxu1 }
0x5626   :  { %v7755_v21 = vpop.f32.mrb[71].mxu1  ;;  %7765 = vmatmul.mubr.msk.f32.vlgmr.msra.gmra.mrb[72].mxu0 %vm79_vm1, %v5960_v8  ;;  %v4557_v8 = vsub.f32 %v9297_v19, %v9301_v30 }
0x5627   :  { %7779 = vmatpush3.xpose.msk.msra.mxu0 %vm79_vm1, %v9426_v18  ;;  %7780 = vmatprep.mubr.msk.f32.mxu0 %vm8429_vm0, %v8430_v11 }
0x5628   :  { %7783 = vmatprep.subr.mxu0 %v8430_v11 }
0x562d   :  { %v6103_v14 = vpop.f32.mrb[72].mxu1 }
0x562e   :  { %v6104_v58 = vadd.f32 %v9436_v57, %v6103_v14  ;;  %v7777_v23 = vpop.f32.mrb[73].mxu1 }
0x5630   :  { %6115 = vrot.lane.b32.xlu1 %v6104_v58, %s8431_s2 }
0x56a2   :  { %v6116_v43 = vpop.permute.xlu1 %6115 }
0x56f9   :  { %v6033_v60 = vpop.f32.mrb[72].mxu0 }
0x56fa   :  { %v6034_v24 = vadd.f32 %v9443_v36, %v6033_v60  ;;  %v7766_v28 = vpop.f32.mrb[73].mxu0 }
0x56fc   :  { %v6107_v10 = vadd.f32 %v6104_v58, %v6034_v24 }
0x56fe   :  { %v6676_v48 = vmul.f32 -1.442695, %v6107_v10 }
0x5700   :  { %8318 = vpow2.f32 %v6676_v48 }
0x570a   :  { %v8319_v55 = vpop.eup %8318 }
0x570b   :  { %v6111_v29 = vadd.f32 1.0, %v8319_v55 }
0x570d   :  { %8320 = vrcp.f32 %v6111_v29 }
0x5717   :  { %v8321_v26 = vpop.eup %8320 }
0x5718   :  { %v6118_v32 = vmul.f32 %v8321_v26, %v6116_v43  ;;  %v6125_v4 = vsub.f32 1.0, %v8321_v26  ;;  %v6131_v12 = vmul.f32 %v8321_v26, %v9449_v38  ;;  %v644_v38 = vsub.f32 %v8697_v35, %v8704_v40 }
0x5719   :  { %v4558_v35 = vmul.f32 1.442695, %v4557_v8  ;;  %v5861_v40 = vsub.f32 %v9506_v42, %v9510_v20 }
0x571a   :  { %6120 = vrot.lane.b32.xlu0 %v6118_v32, %s8431_s2  ;;  %v645_v61 = vmul.f32 1.442695, %v644_v38  ;;  %s6559_s2 = sshll.u32 %s8434_s10, 4  ;;  %s6560_s2 = int_to_ptr.vmem [resolvable:$true] %s6559_s2 }
0x571b   :  { %v5862_v14 = vmul.f32 1.442695, %v5861_v40  ;;  %s8384_s20 = scalar_lea.vmem %s6560_s2, 32  ;;  %p8385_p1 = scmp.lt.s32.totalorder %s6560_s2, %s6560_s2 }
0x578c   :  { %v6121_v33 = vpop.permute.xlu0 %6120 }
0x578d   :  { %v6123_v57 = vadd.f32 %v6121_v33, %v6034_v24 }
0x578f   :  { %8322 = vtanh.f32 %v6123_v57 }
0x5799   :  { %v8323_v34 = vpop.eup %8322 }
0x579a   :  { %6127 = vrot.lane.b32.xlu1 %v8323_v34, %s8432_s27 }
0x580c   :  { %v6128_v36 = vpop.permute.xlu1 %6127 }
0x580d   :  { %v6130_v17 = vmul.f32 %v6128_v36, %v6125_v4  ;;  %v2601_v4 = vsub.f32 %v8996_v31, %v9000_v37  ;;  %v3905_v36 = vsub.f32 %v9205_v15, %v9209_v45 }
0x580f   :  { %v6132_v54 = vadd.f32 %v6131_v12, %v6130_v17  ;;  %v5209_v17 = vsub.f32 %v9389_v62, %v9393_v63 }
0x5811   :  { %6134 = vrot.lane.b32.xlu1 %v6132_v54, %s8432_s27  ;;  %s8380_s27 = scalar_lea.vmem %s6560_s2, 16 }
0x5812   :  { %p8381_p0 = scmp.ne.s32.totalorder %s6560_s2, %s8380_s27  ;;  %p8386_p2 = scmp.lt.s32.totalorder %s8384_s20, %s8380_s27 }
0x5814   :  { %p8387_p3 = por %p8386_p2, %p8385_p1 }
0x5816   :  { %p8388_p4 = pnand %p8387_p3, %p8381_p0 }
0x5883   :  { %v6135_v44 = vpop.permute.xlu1 %6134 }
0x5884   :  { %7781 = vmatmul.mubr.msk.f32.vlgmr.msra.gmra.mrb[74].mxu0 %vm79_vm1, %v6135_v44 }
0x5885   :  { %7784 = vmatpush3.msra.mxu0 %v9426_v18  ;;  %7785 = vmatprep.mubr.msk.f32.mxu0 %vm8429_vm0, %v8430_v11 }
0x5886   :  { %8190 = vmatprep.subr.bf16.mxu0 %v8428_v3 }
0x5957   :  { %v6204_v59 = vpop.f32.mrb[74].mxu0 }
0x5958   :  { %v7782_v49 = vpop.f32.mrb[75].mxu0  ;;  %v6208_v53 = vsel %vm336_vm2, %v6204_v59, -inf }
0x5959   :  { %6209 = vmax.xlane.f32.xlu0 %v6208_v53 }
0x59e6   :  { %v6210_v47 = vpop.xlane.xlu0 %6209 }
0x59e7   :  { %v6211_v51 = vsub.f32 %v6204_v59, %v6210_v47 }
0x59e9   :  { %v6212_v18 = vmul.f32 1.442695, %v6211_v51 }
0x59eb   :  { %8324 = vpow2.f32 %v6212_v18 }
0x59ec   :  { %8326 = vpow2.f32 %v645_v61 }
0x59ed   :  { %8328 = vpow2.f32 %v1950_v0 }
0x59ee   :  { %8330 = vpow2.f32 %v3254_v16 }
0x59ef   :  { %8332 = vpow2.f32 %v4558_v35 }
0x59f0   :  { %8334 = vpow2.f32 %v5862_v14 }
0x59f5   :  { %v8325_v21 = vpop.eup %8324 }
0x59f6   :  { %v6214_v52 = vsel %vm336_vm2, %v8325_v21, 0.0  ;;  %v8327_v56 = vpop.eup %8326  ;;  %vm9674_vm2 = vcmp.eq.s32.totalorder %v8702_v39, 7 }
0x59f7   :  { %6215 = vadd.xlane.f32.xlu1 %v6214_v52  ;;  %v647_v58 = vsel %vm640_vm4, %v8327_v56, 0.0  ;;  %v8329_v41 = vpop.eup %8328 }
0x59f8   :  { %v1952_v27 = vsel %vm640_vm4, %v8329_v41, 0.0  ;;  %v8331_v19 = vpop.eup %8330 }
0x59f9   :  { %v3256_v30 = vsel %vm640_vm4, %v8331_v19, 0.0  ;;  %v8333_v23 = vpop.eup %8332 }
0x59fa   :  { %v4560_v42 = vsel %vm640_vm4, %v8333_v23, 0.0  ;;  %v8335_v20 = vpop.eup %8334 }
0x59fb   :  { %648 = vadd.xlane.f32.xlu1 %v647_v58  ;;  %v5864_v60 = vsel %vm640_vm4, %v8335_v20, 0.0 }
0x59ff   :  { %1953 = vadd.xlane.f32.xlu1 %v1952_v27 }
0x5a03   :  { %3257 = vadd.xlane.f32.xlu1 %v3256_v30 }
0x5a07   :  { %4561 = vadd.xlane.f32.xlu1 %v4560_v42 }
0x5a0b   :  { %5865 = vadd.xlane.f32.xlu1 %v5864_v60 }
0x5a84   :  { %v6216_v24 = vpop.xlane.xlu1 %6215 }
0x5a85   :  { %8336 = vrcp.f32 %v6216_v24 }
0x5a88   :  { %v649_v50 = vpop.xlane.xlu1 %648 }
0x5a8c   :  { %v1954_v0 = vpop.xlane.xlu1 %1953 }
0x5a8f   :  { %v8337_v28 = vpop.eup %8336 }
0x5a90   :  { %v6218_v10 = vmul.f32 %v8337_v28, %v8325_v21  ;;  %v3258_v35 = vpop.xlane.xlu1 %3257 }
0x5a92   :  { %7786 = vmatmul.mubr.msk.f32.vlgmr.msra.gmra.mrb[76].mxu0 %vm348_vm3, %v6218_v10  ;;  %vm6537_vm3 = vcmp.eq.s32.totalorder %v8702_v39, 9 }
0x5a93   :  { %8192 = vmatpush3.bf16.msra.mxu0 %v8626_v1  ;;  %7807 = vmatprep.mubr.msk.f32.mxu0 %vm8429_vm0, %v8430_v11 }
0x5a94   :  { %8193 = vmatprep.subr.bf16.mxu0 %v8428_v3  ;;  %v4562_v52 = vpop.xlane.xlu1 %4561 }
0x5a97   :  { %8195 = vmatpush3.bf16.msra.mxu0 %v8636_v7 }
0x5a98   :  { %v5866_v30 = vpop.xlane.xlu1 %5865 }
0x5a9a   :  { %7808 = vmatmul.mubr.msk.f32.vlgmr.msra.gmra.mrb[78].mxu0 %vm79_vm1, %v6135_v44  ;;  %v5210_v44 = vmul.f32 1.442695, %v5209_v17 }
0x5b65   :  { %v6288_v48 = vpop.f32.mrb[76].mxu0 }
0x5b66   :  { %v7787_v55 = vpop.f32.mrb[77].mxu0  ;;  %7797 = vmatmul.mubr.msk.f32.vlgmr.msra.gmra.mrb[74].mxu1 %vm79_vm1, %v6288_v48 }
0x5b67   :  { %8198 = vmatpush3.bf16.msra.mxu1 %v8667_v22  ;;  %7818 = vmatprep.mubr.msk.f32.mxu1 %vm8429_vm0, %v8430_v11 }
0x5b68   :  { %8199 = vmatprep.subr.bf16.mxu1 %v8428_v3  ;;  %v1297_v3 = vsub.f32 %v8809_v9, %v8813_v13 }
0x5b6b   :  { %8201 = vmatpush3.bf16.msra.mxu1 %v8673_v25  ;;  %v1298_v25 = vmul.f32 1.442695, %v1297_v3 }
0x5b6d   :  { %v6431_v1 = vpop.f32.mrb[78].mxu0 }
0x5b6e   :  { %v7809_v29 = vpop.f32.mrb[79].mxu0 }
0x5c39   :  { %v6361_v26 = vpop.f32.mrb[74].mxu1 }
0x5c3a   :  { %v6432_v43 = vadd.f32 %v6431_v1, %v6361_v26  ;;  %v7798_v7 = vpop.f32.mrb[75].mxu1 }
0x5c3c   :  { %v6435_v32 = vadd.f32 %v9490_v6, %v6432_v43  ;;  %v2602_v6 = vmul.f32 1.442695, %v2601_v4 }
0x5c3e   :  { %8338 = vtanh.f32 %v6435_v32 }
0x5c3f   :  { %8340 = vpow2.f32 %v1298_v25 }
0x5c40   :  { %8342 = vpow2.f32 %v2602_v6 }
0x5c48   :  { %v8339_v33 = vpop.eup %8338 }
0x5c49   :  { %7819 = vmatmul.mubr.msk.f32.vlgmr.msra.gmra.mrb[76].mxu1 %vm79_vm1, %v8339_v33  ;;  %v8341_v59 = vpop.eup %8340 }
0x5c4a   :  { %v1300_v45 = vsel %vm640_vm4, %v8341_v59, 0.0  ;;  %v8343_v49 = vpop.eup %8342 }
0x5c4b   :  { %v2604_v62 = vsel %vm640_vm4, %v8343_v49, 0.0 }
0x5d1c   :  { %v6506_v57 = vpop.f32.mrb[76].mxu1 }
0x5d1d   :  { %v6507_v22 = vadd.f32 %v9503_v5, %v6506_v57  ;;  %v7820_v34 = vpop.f32.mrb[77].mxu1  ;;  %v3906_v5 = vmul.f32 1.442695, %v3905_v36 }
0x5d1f   :  { %v6510_v11 = vsel %vm640_vm4, %v6507_v22, -inf  ;;  %8344 = vpow2.f32 %v3906_v5 }
0x5d20   :  { %6511 = vmax.xlane.f32.xlu0 %v6510_v11  ;;  %8346 = vpow2.f32 %v5210_v44 }
0x5d29   :  { %v8345_v63 = vpop.eup %8344 }
0x5d2a   :  { %v3908_v53 = vsel %vm640_vm4, %v8345_v63, 0.0  ;;  %v8347_v38 = vpop.eup %8346 }
0x5d2b   :  { %v5212_v47 = vsel %vm640_vm4, %v8347_v38, 0.0 }
0x5dad   :  { %v6512_v12 = vpop.xlane.xlu0 %6511 }
0x5dae   :  { %vm6520_vm0 = vcmp.ge.f32.partialorder %v6507_v22, %v6512_v12  ;;  %v6513_v31 = vsub.f32 %v6507_v22, %v6512_v12 }
0x5daf   :  { %v6521_v54 = vsel %vm6520_vm0, %v8702_v39, 48 }
0x5db0   :  { %v6522_v9 = vsel %vm640_vm4, %v6521_v54, 2147483647  ;;  %v6514_v15 = vmul.f32 1.442695, %v6513_v31 }
0x5db1   :  { %v6524_v13 = vshra.s32 %v6522_v9, 16  ;;  %v6523_v18 = vand.u32 65535, %v6522_v9 }
0x5db2   :  { %8348 = vpow2.f32 %v6514_v15 }
0x5db3   :  { %v6526_v37 = vcvt.s32.f32 %v6524_v13  ;;  %v6525_v16 = vcvt.s32.f32 %v6523_v18  ;;  %8350 = vrcp.f32 %v649_v50 }
0x5db5   :  { %6527 = vmin.xlane.f32.xlu0 %v6526_v37 }
0x5db9   :  { %1301 = vadd.xlane.f32.xlu0 %v1300_v45 }
0x5dbc   :  { %v8349_v51 = vpop.eup %8348 }
0x5dbd   :  { %2605 = vadd.xlane.f32.xlu0 %v2604_v62  ;;  %v6516_v61 = vsel %vm640_vm4, %v8349_v51, 0.0  ;;  %v8351_v56 = vpop.eup %8350  ;;  %vm6540_vm4 = vcmask 73728  }
0x5dbe   :  { %v670_v41 = vsel %vm668_vm11, %v8351_v56, 0.0 }
0x5dc1   :  { %3909 = vadd.xlane.f32.xlu0 %v3908_v53 }
0x5dc5   :  { %5213 = vadd.xlane.f32.xlu0 %v5212_v47 }
0x5dc9   :  { %6517 = vadd.xlane.f32.xlu0 %v6516_v61 }
0x5e42   :  { %v9606_v2 = vpop.xlane.xlu0 %6527 }
0x5e43   :  { %vm6529_vm1 = vcmp.eq.f32.partialorder %v6526_v37, %v9606_v2 }
0x5e44   :  { %v6530_v8 = vsel %vm6529_vm1, %v6525_v16, inf }
0x5e45   :  { %6531 = vmin.xlane.f32.xlu1 %v6530_v8 }
0x5e46   :  { %v1302_v21 = vpop.xlane.xlu0 %1301 }
0x5e47   :  { %8352 = vrcp.f32 %v1302_v21 }
0x5e48   :  { %8354 = vrcp.f32 %v1954_v0 }
0x5e4a   :  { %v2606_v40 = vpop.xlane.xlu0 %2605 }
0x5e4b   :  { %8356 = vrcp.f32 %v2606_v40 }
0x5e4c   :  { %8358 = vrcp.f32 %v3258_v35 }
0x5e4e   :  { %v3910_v14 = vpop.xlane.xlu0 %3909 }
0x5e4f   :  { %8360 = vrcp.f32 %v3910_v14 }
0x5e50   :  { %8362 = vrcp.f32 %v4562_v52 }
0x5e51   :  { %v8353_v58 = vpop.eup %8352 }
0x5e52   :  { %v5214_v27 = vpop.xlane.xlu0 %5213  ;;  %v1323_v19 = vsel %vm1321_vm12, %v8353_v58, %v670_v41  ;;  %v8355_v23 = vpop.eup %8354 }
0x5e53   :  { %8364 = vrcp.f32 %v5214_v27  ;;  %v1975_v20 = vsel %vm1973_vm5, %v8355_v23, %v1323_v19 }
0x5e54   :  { %8366 = vrcp.f32 %v5866_v30 }
0x5e55   :  { %v8357_v42 = vpop.eup %8356 }
0x5e56   :  { %v6518_v60 = vpop.xlane.xlu0 %6517  ;;  %v2627_v24 = vsel %vm2625_vm10, %v8357_v42, %v1975_v20  ;;  %v8359_v28 = vpop.eup %8358 }
0x5e57   :  { %8368 = vrcp.f32 %v6518_v60  ;;  %v3279_v48 = vsel %vm3277_vm6, %v8359_v28, %v2627_v24 }
0x5e59   :  { %v8361_v10 = vpop.eup %8360 }
0x5e5a   :  { %v3931_v55 = vsel %vm3929_vm14, %v8361_v10, %v3279_v48  ;;  %v8363_v1 = vpop.eup %8362 }
0x5e5b   :  { %v4583_v26 = vsel %vm4581_vm13, %v8363_v1, %v3931_v55 }
0x5e5d   :  { %v8365_v29 = vpop.eup %8364 }
0x5e5e   :  { %v5235_v43 = vsel %vm9674_vm2, %v8365_v29, %v4583_v26  ;;  %v8367_v7 = vpop.eup %8366 }
0x5e5f   :  { %v5887_v33 = vsel %vm5885_vm15, %v8367_v7, %v5235_v43 }
0x5e61   :  { %v8369_v32 = vpop.eup %8368 }
0x5e62   :  { %v6539_v57 = vsel %vm6537_vm3, %v8369_v32, %v5887_v33 }
0x5e63   :  { %6542 = vst.msk [vmem:[#allocation4] sm:$0x1] %vm6540_vm4, %v6539_v57 }
0x5e64   :  { %8391 = shalt.err (!%p8388_p4)
}
0x5e65   :  { %s8392_s23 = scalar_lea.hbm %s9672_s12, 16 }
0x5e66   :  { %p8393_p5 = scmp.ne.s32.totalorder %s9672_s12, %s8392_s23  ;;  %p8396_p6 = scmp.lt.u32.totalorder %s8392_s23, %s9672_s12 }
0x5e68   :  { %p8398_p7 = pnand %p8396_p6, %p8393_p5 }
0x5e6a   :  { %8401 = shalt.err (!%p8398_p7)
}
0x5e6b   :  { %6562 = dma.vmem_to_hbm [thread:$0]  %s6560_s2, 16, %s9672_s12, [#allocation5]   ;;  %v6534_v22 = vcvt.f32.s32 %v9606_v2 }
0x5e6c   :  { %s8435_s29 = smov [#allocation2]  }
0x5e6d   :  { %v6535_v11 = vshll.u32 %v6534_v22, 16  ;;  %s6549_s30 = sshll.u32 %s8435_s29, 4  ;;  %s6550_s30 = int_to_ptr.vmem [resolvable:$true] %s6549_s30 }
0x5e6e   :  { %s8402_s13 = scalar_lea.vmem %s6550_s30, 16  ;;  %s8406_s14 = scalar_lea.vmem %s6550_s30, 32 }
0x5e6f   :  { %p8403_p8 = scmp.ne.s32.totalorder %s6550_s30, %s8402_s13  ;;  %p8407_p9 = scmp.lt.s32.totalorder %s6550_s30, %s6550_s30 }
0x5e70   :  { %p8408_p10 = scmp.lt.s32.totalorder %s8406_s14, %s8402_s13 }
0x5e72   :  { %p8409_p11 = por %p8408_p10, %p8407_p9 }
0x5e74   :  { %p8410_p12 = pnand %p8409_p11, %p8403_p8 }
0x5ed2   :  { %v6532_v34 = vpop.xlane.xlu1 %6531 }
0x5ed3   :  { %v6533_v3 = vcvt.f32.s32 %v6532_v34 }
0x5ed5   :  { %v6536_v25 = vadd.s32 %v6535_v11, %v6533_v3 }
0x5ed7   :  { %v6538_v4 = vsel %vm6537_vm3, %v6536_v25, %v9521_v46 }
0x5ed8   :  { %6541 = vst.msk [vmem:[#allocation2] sm:$0x1] %vm6540_vm4, %v6538_v4 }
0x5ed9   :  { %8413 = shalt.err (!%p8410_p12)
}
0x5eda   :  { %s8414_s16 = scalar_lea.hbm %s9671_s11, 16 }
0x5edb   :  { %p8415_p13 = scmp.ne.s32.totalorder %s9671_s11, %s8414_s16  ;;  %p8418_p0 = scmp.lt.u32.totalorder %s8414_s16, %s9671_s11 }
0x5edd   :  { %p8420_p1 = pnand %p8418_p0, %p8415_p13 }
0x5edf   :  { %8423 = shalt.err (!%p8420_p1)
}
0x5ee0   :  { %6552 = dma.vmem_to_hbm [thread:$0]  %s6550_s30, 16, %s9671_s11, [#allocation3]  }
0x5ee1   :  { %8424 = dma.done.wait [#allocation3], 16  }
0x5ee2   :  { %8425 = vsyncadd [#allocation3], 4294967280 }
0x5ee3   :  { %8426 = dma.done.wait [#allocation5], 16  }
0x5ee4   :  { %8427 = vsyncadd [#allocation5], 4294967280 }
0x5ee5   :  { %6569 = vsyncpa [#allocation3], 1 }
0x5ee6   :  { %6570 = vsyncpa [#allocation5], 1 }

</bundles_post_ra>
